<compile_context>
chip_gen: v6e
topology: v6e:2x2x1
jax: 0.10.0
libtpu: 0.0.40
codegen_flags: <defaults>
</compile_context>

<pallas_src>
import functools

import jax
import jax.numpy as jnp
from jax.experimental import pallas as pl
from jax.experimental.pallas import tpu as pltpu


def _round_up(x, m):
    return ((x + m - 1) // m) * m


def _default_bf16_epilogue():
    """bf16 elementwise epilogue on chips with a bf16 VPU/EUP (v6e, v7x)."""
    try:
        kind = jax.devices()[0].device_kind.lower()
    except Exception:
        return True
    # v5e and older have no bf16 VPU/EUP; bf16 elementwise would be emulated
    # through converts there, so keep the epilogue in f32.
    return not any(t in kind for t in ("v2", "v3", "v4", "v5"))


# ---------------------------------------------------------------------------
# Pallas kernel: router + top-k gating + fused expert FFNs.
# ---------------------------------------------------------------------------
def moe_kernel(x_ref, wr_ref, br_ref, w1s_ref, b1s_ref, w2s_ref, b2s_ref,
               out_ref, *, num_experts, top_k, hidden_dim, bf16_epilogue):
    E = num_experts
    H = hidden_dim

    xb = x_ref[...]                                                 # (Tt, D) bf16

    # ---- router (Conv1D == x @ Wr + br). f32 accumulation so near-tied
    #      logits do not flip the top-k picks (tiny matmul, N = E). ----
    logits = jnp.dot(xb.astype(jnp.float32), wr_ref[...],
                     preferred_element_type=jnp.float32)
    logits = logits + br_ref[...]                                   # (Tt, E)
    # Unnormalized softmax: the per-row softmax denominator cancels in the
    # top-k renormalization below, so the divide is skipped.
    rw = jnp.exp(logits - jnp.max(logits, axis=-1, keepdims=True))  # (Tt, E)

    # ---- top-k gating on the (Tt, E) slab (E static & tiny) ----
    # rank_e = #{j : rw_j > rw_e} + #{j < e : rw_j == rw_e}  (torch.topk tie rule)
    lane_e = jax.lax.broadcasted_iota(jnp.int32, rw.shape, 1)
    rank = jnp.zeros_like(rw)
    for j in range(E):                                              # E tiny & static
        rw_j = rw[:, j:j + 1]                                       # (Tt, 1) lane-broadcast
        rank = rank + (rw_j > rw).astype(jnp.float32)
        rank = rank + jnp.logical_and(rw_j == rw, lane_e > j).astype(jnp.float32)
    gates = jnp.where(rank < float(top_k), rw, 0.0)                 # (Tt, E)
    denom = jnp.sum(gates, axis=-1, keepdims=True)                  # > 0 (rw = exp > 0)
    scale = gates * pl.reciprocal(denom, approx=True)               # (Tt, E) f32

    # ---- fused up-projection for ALL experts: one lane-dense bf16 MXU matmul
    h = jnp.dot(xb, w1s_ref[...], preferred_element_type=jnp.float32)   # (Tt, E*H) f32
    if bf16_epilogue:
        # v6e / v7x: bf16 VPU+EUP -> 2x packed elementwise, half the ld/st bytes.
        hb = jax.nn.gelu((h + b1s_ref[...]).astype(jnp.bfloat16))       # (Tt, E*H) bf16
    else:
        # v5e: no bf16 VPU/EUP -> keep the elementwise epilogue in f32.
        hb = jax.nn.gelu(h + b1s_ref[...]).astype(jnp.bfloat16)         # (Tt, E*H) bf16

    # ---- per-expert down-projection; gate the (Tt, D) partial outputs.
    # Unselected experts have gate 0 and contribute exactly nothing, so this
    # reproduces the masked top-k sum of the reference.
    y = jnp.zeros(out_ref.shape, jnp.float32)                       # (Tt, D)
    for e in range(E):                                              # E static
        he = hb[:, e * H:(e + 1) * H]                               # lane-aligned slice
        ye = jnp.dot(he, w2s_ref[e * H:(e + 1) * H, :],
                     preferred_element_type=jnp.float32)            # (Tt, D)
        y = y + scale[:, e:e + 1] * (ye + b2s_ref[e:e + 1, :])
    out_ref[...] = y.astype(out_ref.dtype)


# ---------------------------------------------------------------------------
# One-time weight preparation (parameter-load time, NOT per call).
# ---------------------------------------------------------------------------
def prepare_moe_params(params):
    wr, br, w1, b1, w2, b2 = params
    E, D, H = w1.shape
    wrf = wr.astype(jnp.float32)                                    # (D, E)
    br2 = br.reshape(1, E).astype(jnp.float32)                      # (1, E)
    w1s = jnp.transpose(w1, (1, 0, 2)).reshape(D, E * H).astype(jnp.bfloat16)
    b1s = b1.reshape(1, E * H).astype(jnp.float32)
    w2s = w2.reshape(E * H, D).astype(jnp.bfloat16)
    b2s = b2.reshape(E, D).astype(jnp.float32)
    return (wrf, br2, w1s, b1s, w2s, b2s)


# ---------------------------------------------------------------------------
# Wrapper: token tiling + VMEM budgeting + pallas_call.
# ---------------------------------------------------------------------------
def mixture_of_experts(x, prepared, *, num_experts=4, top_k=2, tile_t=512,
                       bf16_epilogue=None):
    wrf, br2, w1s, b1s, w2s, b2s = prepared
    B, S, D = x.shape
    E = num_experts
    H = w1s.shape[-1] // E
    T = B * S

    if bf16_epilogue is None:
        bf16_epilogue = _default_bf16_epilogue()

    out_itemsize = jnp.dtype(x.dtype).itemsize

    # Derived VMEM footprint (resident weights assumed double-buffered,
    # double-buffered streamed x/out tiles, the big (tt, E*H) intermediates,
    # plus fixed headroom for spills / internal scratch).
    def _vmem_bytes(tt):
        w_bytes = 2 * (wrf.size * 4 + br2.size * 4 + w1s.size * 2
                       + b1s.size * 4 + w2s.size * 2 + b2s.size * 4)
        io_bytes = 2 * (tt * D * 2 + tt * D * out_itemsize)
        tmp_bytes = tt * E * H * (4 + 2 + 4) + tt * max(D, 128) * 4 * 8
        return w_bytes + io_bytes + tmp_bytes + (8 << 20)

    # Token tiling (16-row granularity keeps bf16 sublane packing clean).
    tile_t = _round_up(min(tile_t, _round_up(T, 16)), 16)
    # Cap the tile so the footprint stays well inside v7x's 64 MiB VMEM.
    while tile_t > 16 and _vmem_bytes(tile_t) > (44 << 20):
        tile_t = _round_up(tile_t // 2, 16)
    # Keep >= 2 token tiles when possible so the "parallel" grid axis can be
    # split across both TensorCores on v7x (v5e/v6e unaffected).
    if T > 16 and _round_up(T, tile_t) // tile_t < 2:
        tile_t = _round_up(-(-T // 2), 16)

    T_pad = _round_up(T, tile_t)
    x2 = x.reshape(T, D).astype(jnp.bfloat16)          # streamed operand in bf16
    if T_pad != T:
        x2 = jnp.pad(x2, ((0, T_pad - T), (0, 0)))
    grid = (T_pad // tile_t,)

    kernel = functools.partial(moe_kernel, num_experts=E, top_k=top_k,
                               hidden_dim=H, bf16_epilogue=bf16_epilogue)

    # TODO(synk): if a profile shows exposed DMA on the streamed x tile, add
    #   pipeline_mode=pl.Buffered(3) on its BlockSpec (VMEM headroom exists).
    out2 = pl.pallas_call(
        kernel,
        out_shape=jax.ShapeDtypeStruct((T_pad, D), x.dtype),
        grid_spec=pltpu.PrefetchScalarGridSpec(
            num_scalar_prefetch=0,
            grid=grid,
            in_specs=[
                pl.BlockSpec((tile_t, D), lambda i: (i, 0)),      # x   (streamed, bf16)
                pl.BlockSpec((D, E), lambda i: (0, 0)),           # Wr  (resident)
                pl.BlockSpec((1, E), lambda i: (0, 0)),           # br
                pl.BlockSpec((D, E * H), lambda i: (0, 0)),       # stacked W1 (bf16)
                pl.BlockSpec((1, E * H), lambda i: (0, 0)),       # stacked b1
                pl.BlockSpec((E * H, D), lambda i: (0, 0)),       # stacked W2 (bf16)
                pl.BlockSpec((E, D), lambda i: (0, 0)),           # stacked b2
            ],
            out_specs=pl.BlockSpec((tile_t, D), lambda i: (i, 0)),
        ),
        compiler_params=pltpu.CompilerParams(
            dimension_semantics=("parallel",),   # megacore-shard token tiles (v7x)
            vmem_limit_bytes=int(_vmem_bytes(tile_t)),
        ),
    )(x2, wrf, br2, w1s, b1s, w2s, b2s)

    final_output = out2[:T].reshape(B, S, D)
    aux_loss = jnp.float32(0.0)
    return final_output, aux_loss


# ---------------------------------------------------------------------------
# Pure-JAX reference (mirrors the PyTorch forward) for a sanity check.
# ---------------------------------------------------------------------------
def moe_reference(x, params, *, num_experts=4, top_k=2):
    wr, br, w1, b1, w2, b2 = params
    xf = x.astype(jnp.float32)
    P = jax.lax.Precision.HIGHEST
    logits = jnp.einsum("bsd,de->bse", xf, wr, precision=P) + br
    rw = jax.nn.softmax(logits, axis=-1)
    vals, idx = jax.lax.top_k(rw, top_k)
    vals = vals / jnp.sum(vals, axis=-1, keepdims=True)

    expert_outs = []
    for e in range(num_experts):
        h = jax.nn.gelu(jnp.einsum("bsd,dh->bsh", xf, w1[e], precision=P) + b1[e])
        expert_outs.append(jnp.einsum("bsh,hd->bsd", h, w2[e], precision=P) + b2[e])

    final = jnp.zeros_like(xf)
    for k in range(top_k):
        for e in range(num_experts):
            mask = (idx[..., k] == e)[..., None].astype(jnp.float32)
            final = final + mask * vals[..., k:k + 1] * expert_outs[e]
    return final, jnp.float32(0.0)


# ---------------------------------------------------------------------------
if __name__ == "__main__":
    # T = B*S = 380 -> tile_t = 192 -> 2 token tiles, padded to 384
    # (exercises the pipelined token tiling, the >=2-tile megacore split, and
    #  the padding path).
    B, S, D, H = 2, 190, 128, 256
    NUM_EXPERTS, TOP_K = 4, 2

    key = jax.random.PRNGKey(0)
    kx, kr, k1, k2, kb1, kb2, kbr = jax.random.split(key, 7)

    # Activations in bf16 (what the kernel streams); weights in f32.
    x = jax.random.normal(kx, (B, S, D), dtype=jnp.float32).astype(jnp.bfloat16)
    wr = 0.02 * jax.random.normal(kr, (D, NUM_EXPERTS), dtype=jnp.float32)
    br = 0.02 * jax.random.normal(kbr, (NUM_EXPERTS,), dtype=jnp.float32)
    w1 = 0.02 * jax.random.normal(k1, (NUM_EXPERTS, D, H), dtype=jnp.float32)
    b1 = 0.02 * jax.random.normal(kb1, (NUM_EXPERTS, H), dtype=jnp.float32)
    w2 = 0.02 * jax.random.normal(k2, (NUM_EXPERTS, H, D), dtype=jnp.float32)
    b2 = 0.02 * jax.random.normal(kb2, (NUM_EXPERTS, D), dtype=jnp.float32)
    params = (wr, br, w1, b1, w2, b2)

    # One-time weight stacking / casting (parameter-load time, not per call).
    prepared = prepare_moe_params(params)

    moe = jax.jit(functools.partial(mixture_of_experts,
                                    num_experts=NUM_EXPERTS, top_k=TOP_K))
    out, aux = moe(x, prepared)
    out = jax.block_until_ready(out)

    ref_out, _ = moe_reference(x, params, num_experts=NUM_EXPERTS, top_k=TOP_K)
    assert out.shape == (B, S, D)
    outf = out.astype(jnp.float32)
    err = float(jnp.max(jnp.abs(outf - ref_out)))
    # bf16 MXU operands, bf16 activation streaming/output, optional bf16
    # epilogue and the EUP approximate reciprocal set the tolerance.
    assert jnp.allclose(outf, ref_out, atol=5e-3, rtol=5e-2), f"max abs err {err}"
    assert float(aux) == 0.0

    print("KERNEL_OK")
</pallas_src>

<mosaic_0001>
module attributes {stable_mosaic.version = 11 : i64} {
  func.func @moe_kernel(%arg0: i32, %arg1: memref<192x128xbf16, #tpu.memory_space<vmem>>, %arg2: memref<128x4xf32, #tpu.memory_space<vmem>>, %arg3: memref<1x4xf32, #tpu.memory_space<vmem>>, %arg4: memref<128x1024xbf16, #tpu.memory_space<vmem>>, %arg5: memref<1x1024xf32, #tpu.memory_space<vmem>>, %arg6: memref<1024x128xbf16, #tpu.memory_space<vmem>>, %arg7: memref<4x128xf32, #tpu.memory_space<vmem>>, %arg8: memref<192x128xbf16, #tpu.memory_space<vmem>>) attributes {dimension_semantics = [#tpu.dimension_semantics<parallel>], iteration_bounds = array<i64: 2>, scalar_prefetch = 0 : i64, scratch_operands = 0 : i64, tpu.core_type = #tpu.core_type<tc>, window_params = [{transform_indices = @transform_0, window_bounds = array<i64: 192, 128>}, {pipeline_mode = #tpu.pipeline_mode<synchronous>, transform_indices = @transform_1, window_bounds = array<i64: 128, 4>}, {pipeline_mode = #tpu.pipeline_mode<synchronous>, transform_indices = @transform_2, window_bounds = array<i64: 1, 4>}, {pipeline_mode = #tpu.pipeline_mode<synchronous>, transform_indices = @transform_3, window_bounds = array<i64: 128, 1024>}, {pipeline_mode = #tpu.pipeline_mode<synchronous>, transform_indices = @transform_4, window_bounds = array<i64: 1, 1024>}, {pipeline_mode = #tpu.pipeline_mode<synchronous>, transform_indices = @transform_5, window_bounds = array<i64: 1024, 128>}, {pipeline_mode = #tpu.pipeline_mode<synchronous>, transform_indices = @transform_6, window_bounds = array<i64: 4, 128>}, {transform_indices = @transform_7, window_bounds = array<i64: 192, 128>}]} {
    %c0 = arith.constant 0 : index
    %c0_0 = arith.constant 0 : index
    %0 = vector.load %arg1[%c0, %c0_0] : memref<192x128xbf16, #tpu.memory_space<vmem>>, vector<192x128xbf16>
    %1 = arith.extf %0 : vector<192x128xbf16> to vector<192x128xf32>
    %c0_1 = arith.constant 0 : index
    %c0_2 = arith.constant 0 : index
    %2 = vector.load %arg2[%c0_1, %c0_2] : memref<128x4xf32, #tpu.memory_space<vmem>>, vector<128x4xf32>
    %cst = arith.constant dense<0.000000e+00> : vector<192x4xf32>
    %3 = tpu.matmul %1, %2, %cst {dimension_numbers = #tpu.dot_dimension_numbers<[1], [0], [0], [1], [0, 0, 1, 1], [], []>} : vector<192x128xf32>, vector<128x4xf32>, vector<192x4xf32> -> vector<192x4xf32>
    %c0_3 = arith.constant 0 : index
    %c0_4 = arith.constant 0 : index
    %4 = vector.load %arg3[%c0_3, %c0_4] : memref<1x4xf32, #tpu.memory_space<vmem>>, vector<1x4xf32>
    %5 = vector.broadcast %4 : vector<1x4xf32> to vector<192x4xf32>
    %6 = arith.addf %3, %5 : vector<192x4xf32>
    %cst_5 = arith.constant dense<0xFF800000> : vector<192xf32>
    %7 = vector.multi_reduction <maximumf>, %6, %cst_5 [1] : vector<192x4xf32> to vector<192xf32>
    %8 = vector.shape_cast %7 : vector<192xf32> to vector<192x1xf32>
    %9 = vector.broadcast %8 : vector<192x1xf32> to vector<192x4xf32>
    %10 = arith.subf %6, %9 : vector<192x4xf32>
    %11 = math.exp %10 : vector<192x4xf32>
    %12 = tpu.iota {dimensions = array<i32: 1>} : vector<192x4xi32>
    %cst_6 = arith.constant 0.000000e+00 : f32
    %13 = vector.broadcast %cst_6 : f32 to vector<192x4xf32>
    %14 = vector.extract_strided_slice %11 {offsets = [0, 0], sizes = [192, 1], strides = [1, 1]} : vector<192x4xf32> to vector<192x1xf32>
    %15 = vector.broadcast %14 : vector<192x1xf32> to vector<192x4xf32>
    %16 = arith.cmpf ogt, %15, %11 : vector<192x4xf32>
    %17 = arith.extui %16 : vector<192x4xi1> to vector<192x4xi32>
    %18 = arith.sitofp %17 : vector<192x4xi32> to vector<192x4xf32>
    %19 = arith.addf %13, %18 : vector<192x4xf32>
    %20 = vector.broadcast %14 : vector<192x1xf32> to vector<192x4xf32>
    %21 = arith.cmpf oeq, %20, %11 : vector<192x4xf32>
    %c0_i32 = arith.constant 0 : i32
    %22 = vector.broadcast %c0_i32 : i32 to vector<192x4xi32>
    %23 = arith.cmpi sgt, %12, %22 : vector<192x4xi32>
    %24 = arith.andi %21, %23 : vector<192x4xi1>
    %25 = arith.extui %24 : vector<192x4xi1> to vector<192x4xi32>
    %26 = arith.sitofp %25 : vector<192x4xi32> to vector<192x4xf32>
    %27 = arith.addf %19, %26 : vector<192x4xf32>
    %28 = vector.extract_strided_slice %11 {offsets = [0, 1], sizes = [192, 1], strides = [1, 1]} : vector<192x4xf32> to vector<192x1xf32>
    %29 = vector.broadcast %28 : vector<192x1xf32> to vector<192x4xf32>
    %30 = arith.cmpf ogt, %29, %11 : vector<192x4xf32>
    %31 = arith.extui %30 : vector<192x4xi1> to vector<192x4xi32>
    %32 = arith.sitofp %31 : vector<192x4xi32> to vector<192x4xf32>
    %33 = arith.addf %27, %32 : vector<192x4xf32>
    %34 = vector.broadcast %28 : vector<192x1xf32> to vector<192x4xf32>
    %35 = arith.cmpf oeq, %34, %11 : vector<192x4xf32>
    %c1_i32 = arith.constant 1 : i32
    %36 = vector.broadcast %c1_i32 : i32 to vector<192x4xi32>
    %37 = arith.cmpi sgt, %12, %36 : vector<192x4xi32>
    %38 = arith.andi %35, %37 : vector<192x4xi1>
    %39 = arith.extui %38 : vector<192x4xi1> to vector<192x4xi32>
    %40 = arith.sitofp %39 : vector<192x4xi32> to vector<192x4xf32>
    %41 = arith.addf %33, %40 : vector<192x4xf32>
    %42 = vector.extract_strided_slice %11 {offsets = [0, 2], sizes = [192, 1], strides = [1, 1]} : vector<192x4xf32> to vector<192x1xf32>
    %43 = vector.broadcast %42 : vector<192x1xf32> to vector<192x4xf32>
    %44 = arith.cmpf ogt, %43, %11 : vector<192x4xf32>
    %45 = arith.extui %44 : vector<192x4xi1> to vector<192x4xi32>
    %46 = arith.sitofp %45 : vector<192x4xi32> to vector<192x4xf32>
    %47 = arith.addf %41, %46 : vector<192x4xf32>
    %48 = vector.broadcast %42 : vector<192x1xf32> to vector<192x4xf32>
    %49 = arith.cmpf oeq, %48, %11 : vector<192x4xf32>
    %c2_i32 = arith.constant 2 : i32
    %50 = vector.broadcast %c2_i32 : i32 to vector<192x4xi32>
    %51 = arith.cmpi sgt, %12, %50 : vector<192x4xi32>
    %52 = arith.andi %49, %51 : vector<192x4xi1>
    %53 = arith.extui %52 : vector<192x4xi1> to vector<192x4xi32>
    %54 = arith.sitofp %53 : vector<192x4xi32> to vector<192x4xf32>
    %55 = arith.addf %47, %54 : vector<192x4xf32>
    %56 = vector.extract_strided_slice %11 {offsets = [0, 3], sizes = [192, 1], strides = [1, 1]} : vector<192x4xf32> to vector<192x1xf32>
    %57 = vector.broadcast %56 : vector<192x1xf32> to vector<192x4xf32>
    %58 = arith.cmpf ogt, %57, %11 : vector<192x4xf32>
    %59 = arith.extui %58 : vector<192x4xi1> to vector<192x4xi32>
    %60 = arith.sitofp %59 : vector<192x4xi32> to vector<192x4xf32>
    %61 = arith.addf %55, %60 : vector<192x4xf32>
    %62 = vector.broadcast %56 : vector<192x1xf32> to vector<192x4xf32>
    %63 = arith.cmpf oeq, %62, %11 : vector<192x4xf32>
    %c3_i32 = arith.constant 3 : i32
    %64 = vector.broadcast %c3_i32 : i32 to vector<192x4xi32>
    %65 = arith.cmpi sgt, %12, %64 : vector<192x4xi32>
    %66 = arith.andi %63, %65 : vector<192x4xi1>
    %67 = arith.extui %66 : vector<192x4xi1> to vector<192x4xi32>
    %68 = arith.sitofp %67 : vector<192x4xi32> to vector<192x4xf32>
    %69 = arith.addf %61, %68 : vector<192x4xf32>
    %cst_7 = arith.constant 2.000000e+00 : f32
    %70 = vector.broadcast %cst_7 : f32 to vector<192x4xf32>
    %71 = arith.cmpf olt, %69, %70 : vector<192x4xf32>
    %cst_8 = arith.constant 0.000000e+00 : f32
    %72 = vector.broadcast %cst_8 : f32 to vector<192x4xf32>
    %73 = arith.select %71, %11, %72 : vector<192x4xi1>, vector<192x4xf32>
    %cst_9 = arith.constant dense<0.000000e+00> : vector<192xf32>
    %74 = vector.multi_reduction <add>, %73, %cst_9 [1] : vector<192x4xf32> to vector<192xf32>
    %75 = vector.shape_cast %74 : vector<192xf32> to vector<192x1xf32>
    %76 = tpu.reciprocal %75 {approx = true} : vector<192x1xf32> -> vector<192x1xf32>
    %77 = vector.broadcast %76 : vector<192x1xf32> to vector<192x4xf32>
    %78 = arith.mulf %73, %77 : vector<192x4xf32>
    %c0_10 = arith.constant 0 : index
    %c0_11 = arith.constant 0 : index
    %79 = vector.load %arg4[%c0_10, %c0_11] : memref<128x1024xbf16, #tpu.memory_space<vmem>>, vector<128x1024xbf16>
    %cst_12 = arith.constant dense<0.000000e+00> : vector<192x1024xf32>
    %80 = tpu.matmul %0, %79, %cst_12 {dimension_numbers = #tpu.dot_dimension_numbers<[1], [0], [0], [1], [0, 0, 1, 1], [], []>} : vector<192x128xbf16>, vector<128x1024xbf16>, vector<192x1024xf32> -> vector<192x1024xf32>
    %c0_13 = arith.constant 0 : index
    %c0_14 = arith.constant 0 : index
    %81 = vector.load %arg5[%c0_13, %c0_14] : memref<1x1024xf32, #tpu.memory_space<vmem>>, vector<1x1024xf32>
    %82 = vector.broadcast %81 : vector<1x1024xf32> to vector<192x1024xf32>
    %83 = arith.addf %80, %82 : vector<192x1024xf32>
    %84 = arith.truncf %83 : vector<192x1024xf32> to vector<192x1024xbf16>
    %85 = arith.mulf %84, %84 : vector<192x1024xbf16>
    %86 = arith.mulf %84, %85 : vector<192x1024xbf16>
    %cst_15 = arith.constant 4.467770e-02 : bf16
    %87 = vector.broadcast %cst_15 : bf16 to vector<192x1024xbf16>
    %88 = arith.mulf %87, %86 : vector<192x1024xbf16>
    %89 = arith.addf %84, %88 : vector<192x1024xbf16>
    %cst_16 = arith.constant 7.968750e-01 : bf16
    %90 = vector.broadcast %cst_16 : bf16 to vector<192x1024xbf16>
    %91 = arith.mulf %90, %89 : vector<192x1024xbf16>
    %92 = math.tanh %91 : vector<192x1024xbf16>
    %cst_17 = arith.constant 1.000000e+00 : bf16
    %93 = vector.broadcast %cst_17 : bf16 to vector<192x1024xbf16>
    %94 = arith.addf %93, %92 : vector<192x1024xbf16>
    %cst_18 = arith.constant 5.000000e-01 : bf16
    %95 = vector.broadcast %cst_18 : bf16 to vector<192x1024xbf16>
    %96 = arith.mulf %95, %94 : vector<192x1024xbf16>
    %97 = arith.mulf %84, %96 : vector<192x1024xbf16>
    %cst_19 = arith.constant 0.000000e+00 : f32
    %98 = vector.broadcast %cst_19 : f32 to vector<192x128xf32>
    %99 = vector.extract_strided_slice %97 {offsets = [0, 0], sizes = [192, 256], strides = [1, 1]} : vector<192x1024xbf16> to vector<192x256xbf16>
    %c0_20 = arith.constant 0 : index
    %c0_21 = arith.constant 0 : index
    %100 = vector.load %arg6[%c0_20, %c0_21] : memref<1024x128xbf16, #tpu.memory_space<vmem>>, vector<256x128xbf16>
    %cst_22 = arith.constant dense<0.000000e+00> : vector<192x128xf32>
    %101 = tpu.matmul %99, %100, %cst_22 {dimension_numbers = #tpu.dot_dimension_numbers<[1], [0], [0], [1], [0, 0, 1, 1], [], []>} : vector<192x256xbf16>, vector<256x128xbf16>, vector<192x128xf32> -> vector<192x128xf32>
    %102 = vector.extract_strided_slice %78 {offsets = [0, 0], sizes = [192, 1], strides = [1, 1]} : vector<192x4xf32> to vector<192x1xf32>
    %c0_23 = arith.constant 0 : index
    %c0_24 = arith.constant 0 : index
    %103 = vector.load %arg7[%c0_23, %c0_24] : memref<4x128xf32, #tpu.memory_space<vmem>>, vector<1x128xf32>
    %104 = vector.broadcast %103 : vector<1x128xf32> to vector<192x128xf32>
    %105 = arith.addf %101, %104 : vector<192x128xf32>
    %106 = vector.broadcast %102 : vector<192x1xf32> to vector<192x128xf32>
    %107 = arith.mulf %106, %105 : vector<192x128xf32>
    %108 = arith.addf %98, %107 : vector<192x128xf32>
    %109 = vector.extract_strided_slice %97 {offsets = [0, 256], sizes = [192, 256], strides = [1, 1]} : vector<192x1024xbf16> to vector<192x256xbf16>
    %c256 = arith.constant 256 : index
    %c0_25 = arith.constant 0 : index
    %110 = vector.load %arg6[%c256, %c0_25] : memref<1024x128xbf16, #tpu.memory_space<vmem>>, vector<256x128xbf16>
    %cst_26 = arith.constant dense<0.000000e+00> : vector<192x128xf32>
    %111 = tpu.matmul %109, %110, %cst_26 {dimension_numbers = #tpu.dot_dimension_numbers<[1], [0], [0], [1], [0, 0, 1, 1], [], []>} : vector<192x256xbf16>, vector<256x128xbf16>, vector<192x128xf32> -> vector<192x128xf32>
    %112 = vector.extract_strided_slice %78 {offsets = [0, 1], sizes = [192, 1], strides = [1, 1]} : vector<192x4xf32> to vector<192x1xf32>
    %c1 = arith.constant 1 : index
    %c0_27 = arith.constant 0 : index
    %113 = vector.load %arg7[%c1, %c0_27] : memref<4x128xf32, #tpu.memory_space<vmem>>, vector<1x128xf32>
    %114 = vector.broadcast %113 : vector<1x128xf32> to vector<192x128xf32>
    %115 = arith.addf %111, %114 : vector<192x128xf32>
    %116 = vector.broadcast %112 : vector<192x1xf32> to vector<192x128xf32>
    %117 = arith.mulf %116, %115 : vector<192x128xf32>
    %118 = arith.addf %108, %117 : vector<192x128xf32>
    %119 = vector.extract_strided_slice %97 {offsets = [0, 512], sizes = [192, 256], strides = [1, 1]} : vector<192x1024xbf16> to vector<192x256xbf16>
    %c512 = arith.constant 512 : index
    %c0_28 = arith.constant 0 : index
    %120 = vector.load %arg6[%c512, %c0_28] : memref<1024x128xbf16, #tpu.memory_space<vmem>>, vector<256x128xbf16>
    %cst_29 = arith.constant dense<0.000000e+00> : vector<192x128xf32>
    %121 = tpu.matmul %119, %120, %cst_29 {dimension_numbers = #tpu.dot_dimension_numbers<[1], [0], [0], [1], [0, 0, 1, 1], [], []>} : vector<192x256xbf16>, vector<256x128xbf16>, vector<192x128xf32> -> vector<192x128xf32>
    %122 = vector.extract_strided_slice %78 {offsets = [0, 2], sizes = [192, 1], strides = [1, 1]} : vector<192x4xf32> to vector<192x1xf32>
    %c2 = arith.constant 2 : index
    %c0_30 = arith.constant 0 : index
    %123 = vector.load %arg7[%c2, %c0_30] : memref<4x128xf32, #tpu.memory_space<vmem>>, vector<1x128xf32>
    %124 = vector.broadcast %123 : vector<1x128xf32> to vector<192x128xf32>
    %125 = arith.addf %121, %124 : vector<192x128xf32>
    %126 = vector.broadcast %122 : vector<192x1xf32> to vector<192x128xf32>
    %127 = arith.mulf %126, %125 : vector<192x128xf32>
    %128 = arith.addf %118, %127 : vector<192x128xf32>
    %129 = vector.extract_strided_slice %97 {offsets = [0, 768], sizes = [192, 256], strides = [1, 1]} : vector<192x1024xbf16> to vector<192x256xbf16>
    %c768 = arith.constant 768 : index
    %c0_31 = arith.constant 0 : index
    %130 = vector.load %arg6[%c768, %c0_31] : memref<1024x128xbf16, #tpu.memory_space<vmem>>, vector<256x128xbf16>
    %cst_32 = arith.constant dense<0.000000e+00> : vector<192x128xf32>
    %131 = tpu.matmul %129, %130, %cst_32 {dimension_numbers = #tpu.dot_dimension_numbers<[1], [0], [0], [1], [0, 0, 1, 1], [], []>} : vector<192x256xbf16>, vector<256x128xbf16>, vector<192x128xf32> -> vector<192x128xf32>
    %132 = vector.extract_strided_slice %78 {offsets = [0, 3], sizes = [192, 1], strides = [1, 1]} : vector<192x4xf32> to vector<192x1xf32>
    %c3 = arith.constant 3 : index
    %c0_33 = arith.constant 0 : index
    %133 = vector.load %arg7[%c3, %c0_33] : memref<4x128xf32, #tpu.memory_space<vmem>>, vector<1x128xf32>
    %134 = vector.broadcast %133 : vector<1x128xf32> to vector<192x128xf32>
    %135 = arith.addf %131, %134 : vector<192x128xf32>
    %136 = vector.broadcast %132 : vector<192x1xf32> to vector<192x128xf32>
    %137 = arith.mulf %136, %135 : vector<192x128xf32>
    %138 = arith.addf %128, %137 : vector<192x128xf32>
    %139 = arith.truncf %138 : vector<192x128xf32> to vector<192x128xbf16>
    %c0_34 = arith.constant 0 : index
    %c0_35 = arith.constant 0 : index
    %140 = vector.load %arg8[%c0_34, %c0_35] : memref<192x128xbf16, #tpu.memory_space<vmem>>, vector<192x128xbf16>
    tpu.vector_store %arg8[%c0_34, %c0_35], %139 {strides = array<i32>} : memref<192x128xbf16, #tpu.memory_space<vmem>>, vector<192x128xbf16>,
    return
  }
  func.func @transform_0(%arg0: i32) -> (i32, i32) {
    %c0_i32 = arith.constant 0 : i32
    %c0_i32_0 = arith.constant 0 : i32
    return %arg0, %c0_i32 : i32, i32
  }
  func.func @transform_1(%arg0: i32) -> (i32, i32) {
    %c0_i32 = arith.constant 0 : i32
    %c0_i32_0 = arith.constant 0 : i32
    %c0_i32_1 = arith.constant 0 : i32
    return %c0_i32, %c0_i32_0 : i32, i32
  }
  func.func @transform_2(%arg0: i32) -> (i32, i32) {
    %c0_i32 = arith.constant 0 : i32
    %c0_i32_0 = arith.constant 0 : i32
    %c0_i32_1 = arith.constant 0 : i32
    return %c0_i32, %c0_i32_0 : i32, i32
  }
  func.func @transform_3(%arg0: i32) -> (i32, i32) {
    %c0_i32 = arith.constant 0 : i32
    %c0_i32_0 = arith.constant 0 : i32
    %c0_i32_1 = arith.constant 0 : i32
    return %c0_i32, %c0_i32_0 : i32, i32
  }
  func.func @transform_4(%arg0: i32) -> (i32, i32) {
    %c0_i32 = arith.constant 0 : i32
    %c0_i32_0 = arith.constant 0 : i32
    %c0_i32_1 = arith.constant 0 : i32
    return %c0_i32, %c0_i32_0 : i32, i32
  }
  func.func @transform_5(%arg0: i32) -> (i32, i32) {
    %c0_i32 = arith.constant 0 : i32
    %c0_i32_0 = arith.constant 0 : i32
    %c0_i32_1 = arith.constant 0 : i32
    return %c0_i32, %c0_i32_0 : i32, i32
  }
  func.func @transform_6(%arg0: i32) -> (i32, i32) {
    %c0_i32 = arith.constant 0 : i32
    %c0_i32_0 = arith.constant 0 : i32
    %c0_i32_1 = arith.constant 0 : i32
    return %c0_i32, %c0_i32_0 : i32, i32
  }
  func.func @transform_7(%arg0: i32) -> (i32, i32) {
    %c0_i32 = arith.constant 0 : i32
    %c0_i32_0 = arith.constant 0 : i32
    return %arg0, %c0_i32 : i32, i32
  }
}

</mosaic_0001>

<bundles_post_ra>
// kernel: mixture_of_experts.1
= control target key start
LH: loop header
LB: loop body
LE: loop exit
PB: predicated region body
PF: predicated region fallthrough
CT: control target
= control target key end

     0   :  { %s7620_s24 = smov 0   ;;  %s13449_s0 = inlined_call_operand.vmem [shape: bf16[384,128], index: 0, kind: input, shape index: {}]   ;;  %s13450_s1 = inlined_call_operand.vmem [shape: f32[128,4], index: 1, kind: input, shape index: {}]   ;;  %s13451_s2 = inlined_call_operand.vmem [shape: f32[1,4], index: 2, kind: input, shape index: {}]   ;;  %s13452_s3 = inlined_call_operand.vmem [shape: bf16[128,1024], index: 3, kind: input, shape index: {}]   ;;  %s13453_s4 = inlined_call_operand.vmem [shape: f32[1,1024], index: 4, kind: input, shape index: {}]   ;;  %s13454_s5 = inlined_call_operand.vmem [shape: bf16[1024,128], index: 5, kind: input, shape index: {}]   ;;  %s13455_s6 = inlined_call_operand.vmem [shape: f32[4,128], index: 6, kind: input, shape index: {}]   ;;  %s13456_s7 = inlined_call_operand.vmem [shape: bf16[384,128], index: 7, kind: output, shape index: {}]  }
   0x1 LB: > { %s6028_s25 = sadd.s32 4294967295, %s7573_s24   ;;  %p6032_p0 = scmp.ge.s32.totalorder %s7573_s24, 1  ;;  %s7573_s24 = sphi %s7620_s24, %s17_s24  }
   0x2   : > { %p238_p1 = scmp.lt.s32.totalorder %s7573_s24, 3 }
   0x4   : > { %p239_p2 = pnand %p6032_p0, %p238_p1 }
   0x6   : > { %242 = sbr.rel (%p239_p2) target bundleno = 1307 (0x51b), region = 48 }
   0xb   : > { %v350_v0 = vld [vmem:[%s13450_s1 + $0x78] sm:$0xff]  ;;  %v349_v1 = vld [vmem:[%s13450_s1 + $0x70] sm:$0xff]  ;;  %s270_s30 = smul.u32 24, %s6028_s25  ;;  %v348_v2 = vld [vmem:[%s13450_s1 + $0x68] sm:$0xff]  ;;  %vm13569_vm0 = vcmask 31744  }
   0xc   : > { %6885 = vmatprep.subr.mxu0 %v350_v0  ;;  %v347_v3 = vld [vmem:[%s13450_s1 + $0x60] sm:$0xff]  ;;  %v346_v4 = vld [vmem:[%s13450_s1 + $0x58] sm:$0xff]  ;;  %v345_v5 = vld [vmem:[%s13450_s1 + $0x50] sm:$0xff] }
   0xd   : > { %6886 = vmatpush3.msra.mxu0 %v350_v0  ;;  %p271_p3 = scmp.lt.s32.totalorder %s270_s30, 47  ;;  %v344_v8 = vld [vmem:[%s13450_s1 + $0x48] sm:$0xff]  ;;  %v343_v9 = vld [vmem:[%s13450_s1 + $0x40] sm:$0xff]  ;;  %v342_v10 = vld [vmem:[%s13450_s1 + $0x38] sm:$0xff] }
   0xe   : > { %6887 = vmatprep.subr.mxu0 %v349_v1  ;;  %v341_v11 = vld [vmem:[%s13450_s1 + $0x30] sm:$0xff]  ;;  %v340_v12 = vld [vmem:[%s13450_s1 + $0x28] sm:$0xff]  ;;  %v339_v13 = vld [vmem:[%s13450_s1 + $0x20] sm:$0xff] }
   0xf   : > { %6888 = vmatpush3.msra.mxu0 %v349_v1  ;;  %s14545_s30 = smov (!%p271_p3, %s270_s30), 47  ;;  %v338_v14 = vld [vmem:[%s13450_s1 + $0x18] sm:$0xff]  ;;  %v337_v15 = vld [vmem:[%s13450_s1 + $0x10] sm:$0xff]  ;;  %v336_v16 = vld [vmem:[%s13450_s1 + $0x8] sm:$0xff] }
  0x10   : > { %6889 = vmatprep.subr.mxu0 %v348_v2  ;;  %s6033_s14 = sshll.u32 %s14545_s30, 2  ;;  %v335_v18 = vld [vmem:[%s13450_s1] sm:$0xff] }
  0x11   : > { %6890 = vmatpush3.msra.mxu0 %v348_v2  ;;  %s7651_s17 = scalar_lea.vmem %s13449_s0, %s6033_s14  ;;  %v7749_v52 = vld [vmem:[%s13451_s2] ss:$0 sm:$0xff]  ;;  %s13062_s21 = scalar_lea.vmem %s13456_s7, %s6033_s14 }
  0x12   : > { %6891 = vmatprep.subr.mxu0 %v347_v3  ;;  %v7657_v6 = vld [vmem:[%s7651_s17] sm:$0xff]   ;;  %v7688_v17 = vld [vmem:[%s7651_s17 + $0x8] sm:$0xff]   ;;  %v7695_v20 = vld [vmem:[%s7651_s17 + $0x10] sm:$0xff]  }
  0x13   : > { %6892 = vmatpush3.msra.mxu0 %v347_v3  ;;  %v311_v7 = vunpack.c.l.bf16 %v7657_v6  ;;  %v312_v19 = vunpack.c.h.bf16 %v7657_v6  ;;  %v313_v21 = vunpack.c.l.bf16 %v7688_v17  ;;  %v314_v22 = vunpack.c.h.bf16 %v7688_v17  ;;  %v7700_v23 = vld [vmem:[%s7651_s17 + $0x18] sm:$0xff]   ;;  %v7705_v26 = vld [vmem:[%s7651_s17 + $0x20] sm:$0xff]   ;;  %v7710_v29 = vld [vmem:[%s7651_s17 + $0x28] sm:$0xff]  }
  0x14   : > { %6893 = vmatprep.subr.mxu0 %v346_v4  ;;  %v315_v24 = vunpack.c.l.bf16 %v7695_v20  ;;  %v316_v25 = vunpack.c.h.bf16 %v7695_v20  ;;  %v317_v27 = vunpack.c.l.bf16 %v7700_v23  ;;  %v318_v28 = vunpack.c.h.bf16 %v7700_v23  ;;  %v7715_v32 = vld [vmem:[%s7651_s17 + $0x30] sm:$0xff]   ;;  %v7720_v35 = vld [vmem:[%s7651_s17 + $0x38] sm:$0xff]   ;;  %v7726_v39 = vld [vmem:[%s7651_s17 + $0x40] sm:$0xff]  }
  0x15   : > { %6894 = vmatpush3.msra.mxu0 %v346_v4  ;;  %6917 = vmatprep.mubr.f32.mxu0 %v311_v7  ;;  %v319_v30 = vunpack.c.l.bf16 %v7705_v26  ;;  %v320_v31 = vunpack.c.h.bf16 %v7705_v26  ;;  %v321_v33 = vunpack.c.l.bf16 %v7710_v29  ;;  %v322_v34 = vunpack.c.h.bf16 %v7710_v29  ;;  %v7731_v42 = vld [vmem:[%s7651_s17 + $0x48] sm:$0xff]   ;;  %v7736_v45 = vld [vmem:[%s7651_s17 + $0x50] sm:$0xff]   ;;  %v7741_v48 = vld [vmem:[%s7651_s17 + $0x58] sm:$0xff]  }
  0x16   : > { %6895 = vmatprep.subr.mxu0 %v345_v5  ;;  %v323_v36 = vunpack.c.l.bf16 %v7715_v32  ;;  %v324_v37 = vunpack.c.h.bf16 %v7715_v32  ;;  %v325_v38 = vunpack.c.l.bf16 %v7720_v35  ;;  %v326_v40 = vunpack.c.h.bf16 %v7720_v35 }
  0x17   : > { %6896 = vmatpush3.msra.mxu0 %v345_v5  ;;  %v327_v41 = vunpack.c.l.bf16 %v7726_v39  ;;  %v328_v43 = vunpack.c.h.bf16 %v7726_v39  ;;  %v329_v44 = vunpack.c.l.bf16 %v7731_v42  ;;  %v330_v46 = vunpack.c.h.bf16 %v7731_v42 }
  0x18   : > { %6897 = vmatprep.subr.mxu0 %v344_v8  ;;  %v331_v47 = vunpack.c.l.bf16 %v7736_v45  ;;  %v332_v49 = vunpack.c.h.bf16 %v7736_v45  ;;  %v333_v50 = vunpack.c.l.bf16 %v7741_v48  ;;  %v334_v51 = vunpack.c.h.bf16 %v7741_v48 }
  0x19   : > { %6898 = vmatpush3.msra.mxu0 %v344_v8 }
  0x1a   : > { %6899 = vmatprep.subr.mxu0 %v343_v9 }
  0x1b   : > { %6900 = vmatpush3.msra.mxu0 %v343_v9 }
  0x1c   : > { %6901 = vmatprep.subr.mxu0 %v342_v10 }
  0x1d   : > { %6902 = vmatpush3.msra.mxu0 %v342_v10 }
  0x1e   : > { %6903 = vmatprep.subr.mxu0 %v341_v11 }
  0x1f   : > { %6904 = vmatpush3.msra.mxu0 %v341_v11 }
  0x20   : > { %6905 = vmatprep.subr.mxu0 %v340_v12 }
  0x21   : > { %6906 = vmatpush3.msra.mxu0 %v340_v12 }
  0x22   : > { %6907 = vmatprep.subr.mxu0 %v339_v13 }
  0x23   : > { %6908 = vmatpush3.msra.mxu0 %v339_v13 }
  0x24   : > { %6909 = vmatprep.subr.mxu0 %v338_v14 }
  0x25   : > { %6910 = vmatpush3.msra.mxu0 %v338_v14 }
  0x26   : > { %6911 = vmatprep.subr.mxu0 %v337_v15 }
  0x27   : > { %6912 = vmatpush3.msra.mxu0 %v337_v15 }
  0x28   : > { %6913 = vmatprep.subr.mxu0 %v336_v16 }
  0x29   : > { %6914 = vmatpush3.msra.mxu0 %v336_v16 }
  0x2a   : > { %6915 = vmatprep.subr.mxu0 %v335_v18 }
  0x2b   : > { %6916 = vmatpush3.msra.mxu0 %v335_v18 }
  0x2c   : > { %6918 = vmatmul.mubr.f32.vlgmr.msra.gmra.mxu0 %v312_v19 }
  0x2d   : > { %6920 = vmatprep.mubr.f32.mxu0 %v313_v21 }
  0x30   : > { %6921 = vmatmul.mubr.f32.gmra.mxu0 %v314_v22 }
  0x31   : > { %6923 = vmatprep.mubr.f32.mxu0 %v315_v24 }
  0x34   : > { %6924 = vmatmul.mubr.f32.gmra.mxu0 %v316_v25 }
  0x35   : > { %6926 = vmatprep.mubr.f32.mxu0 %v317_v27 }
  0x38   : > { %6927 = vmatmul.mubr.f32.gmra.mxu0 %v318_v28 }
  0x39   : > { %6929 = vmatprep.mubr.f32.mxu0 %v319_v30 }
  0x3c   : > { %6930 = vmatmul.mubr.f32.gmra.mxu0 %v320_v31 }
  0x3d   : > { %6932 = vmatprep.mubr.f32.mxu0 %v321_v33 }
  0x40   : > { %6933 = vmatmul.mubr.f32.gmra.mxu0 %v322_v34 }
  0x41   : > { %6935 = vmatprep.mubr.f32.mxu0 %v323_v36 }
  0x44   : > { %6936 = vmatmul.mubr.f32.gmra.mxu0 %v324_v37 }
  0x45   : > { %6938 = vmatprep.mubr.f32.mxu0 %v325_v38 }
  0x48   : > { %6939 = vmatmul.mubr.f32.gmra.mxu0 %v326_v40 }
  0x49   : > { %6941 = vmatprep.mubr.f32.mxu0 %v327_v41 }
  0x4c   : > { %6942 = vmatmul.mubr.f32.gmra.mxu0 %v328_v43 }
  0x4d   : > { %6944 = vmatprep.mubr.f32.mxu0 %v329_v44 }
  0x50   : > { %6945 = vmatmul.mubr.f32.gmra.mxu0 %v330_v46 }
  0x51   : > { %6947 = vmatprep.mubr.f32.mxu0 %v331_v47  ;;  %v13459_v47 = vmov 1  }
  0x52   : > { %6983 = vset.pattern.permute.xlu0 %v13459_v47 }
  0x54   : > { %6948 = vmatmul.mubr.f32.gmra.mxu0 %v332_v49 }
  0x55   : > { %6950 = vmatprep.mubr.f32.mxu0 %v333_v50 }
  0x58   : > { %6951 = vmatmul.mubr.f32.gmra.mxu0 %v334_v51 }
  0xec   : > { %v6919_v53 = vpop.f32.mrf.mxu0 }
  0xed   : > { %v7752_v54 = vadd.f32 %v6919_v53, %v7749_v52  ;;  %v13464_v53 = vmov 0  }
  0xee   : > { %v424_v55 = vpop.f32.mrf.mxu0  ;;  %6982 = vset.pattern.permute.xlu1 %v13464_v53  ;;  %2664 = vmatprep.mubr.bf16.mxu1 %v13464_v53 }
  0xef   : > { %v7755_v56 = vadd.f32 %v7749_v52, %v424_v55  ;;  %v547_v57 = vsel %vm13569_vm0, %v7752_v54, -inf  ;;  %2817 = vmatprep.mubr.bf16.mxu0 %v13464_v53 }
  0xf0   : > { %548 = vmax.xlane.f32.xlu0 %v547_v57  ;;  %v6922_v58 = vpop.f32.mrf.mxu0 }
  0xf1   : > { %v7760_v59 = vadd.f32 %v6922_v58, %v7749_v52  ;;  %v544_v63 = vsel %vm13569_vm0, %v7755_v56, -inf }
  0xf2   : > { %v434_v60 = vpop.f32.mrf.mxu0 }
  0xf3   : > { %v7763_v61 = vadd.f32 %v7749_v52, %v434_v60  ;;  %v553_v62 = vsel %vm13569_vm0, %v7760_v59, -inf }
  0xf4   : > { %554 = vmax.xlane.f32.xlu1 %v553_v62  ;;  %v6925_v0 = vpop.f32.mrf.mxu0  ;;  %545 = vmax.xlane.f32.xlu0 %v544_v63 }
  0xf5   : > { %v7770_v1 = vadd.f32 %v6925_v0, %v7749_v52  ;;  %v550_v2 = vsel %vm13569_vm0, %v7763_v61, -inf }
  0xf6   : > { %v444_v3 = vpop.f32.mrf.mxu0 }
  0xf7   : > { %v7775_v4 = vadd.f32 %v7749_v52, %v444_v3  ;;  %v559_v9 = vsel %vm13569_vm0, %v7770_v1, -inf }
  0xf8   : > { %v6928_v5 = vpop.f32.mrf.mxu0  ;;  %551 = vmax.xlane.f32.xlu1 %v550_v2 }
  0xf9   : > { %v7778_v7 = vadd.f32 %v6928_v5, %v7749_v52  ;;  %v556_v8 = vsel %vm13569_vm0, %v7775_v4, -inf }
  0xfa   : > { %v454_v10 = vpop.f32.mrf.mxu0  ;;  %557 = vmax.xlane.f32.xlu0 %v556_v8 }
  0xfb   : > { %v7785_v11 = vadd.f32 %v7749_v52, %v454_v10  ;;  %v565_v15 = vsel %vm13569_vm0, %v7778_v7, -inf }
  0xfc   : > { %v6931_v12 = vpop.f32.mrf.mxu0  ;;  %560 = vmax.xlane.f32.xlu1 %v559_v9 }
  0xfd   : > { %v7788_v13 = vadd.f32 %v6931_v12, %v7749_v52  ;;  %v562_v14 = vsel %vm13569_vm0, %v7785_v11, -inf }
  0xfe   : > { %v464_v16 = vpop.f32.mrf.mxu0  ;;  %563 = vmax.xlane.f32.xlu0 %v562_v14  ;;  %v2190_v14 = vld [vmem:[%s13452_s3 + $0x1c0] sm:$0xff] }
  0xff   : > { %v7795_v18 = vadd.f32 %v7749_v52, %v464_v16  ;;  %v571_v24 = vsel %vm13569_vm0, %v7788_v13, -inf  ;;  %v2191_v16 = vld [vmem:[%s13452_s3 + $0x1c8] sm:$0xff] }
 0x100   : > { %v6934_v19 = vpop.f32.mrf.mxu0  ;;  %566 = vmax.xlane.f32.xlu1 %v565_v15  ;;  %v2194_v15 = vld [vmem:[%s13452_s3 + $0x1e0] sm:$0xff] }
 0x101   : > { %v7798_v21 = vadd.f32 %v6934_v19, %v7749_v52  ;;  %v568_v22 = vsel %vm13569_vm0, %v7795_v18, -inf }
 0x102   : > { %v474_v25 = vpop.f32.mrf.mxu0  ;;  %569 = vmax.xlane.f32.xlu0 %v568_v22 }
 0x103   : > { %v7805_v27 = vadd.f32 %v7749_v52, %v474_v25  ;;  %v577_v33 = vsel %vm13569_vm0, %v7798_v21, -inf  ;;  %v2195_v25 = vld [vmem:[%s13452_s3 + $0x1e8] sm:$0xff] }
 0x104   : > { %v6937_v28 = vpop.f32.mrf.mxu0  ;;  %572 = vmax.xlane.f32.xlu1 %v571_v24  ;;  %v6297_v24 = vcombine.high %v2190_v14, %v2194_v15 }
 0x105   : > { %v7808_v30 = vadd.f32 %v6937_v28, %v7749_v52  ;;  %v574_v31 = vsel %vm13569_vm0, %v7805_v27, -inf }
 0x106   : > { %v484_v34 = vpop.f32.mrf.mxu0  ;;  %575 = vmax.xlane.f32.xlu0 %v574_v31  ;;  %2632 = vmatprep.subr.bf16.mxu1 %v6297_v24  ;;  %v2170_v24 = vld [vmem:[%s13452_s3 + $0x120] sm:$0xff] }
 0x107   : > { %v7815_v36 = vadd.f32 %v7749_v52, %v484_v34  ;;  %v583_v41 = vsel %vm13569_vm0, %v7808_v30, -inf  ;;  %v6299_v34 = vcombine.high %v2191_v16, %v2195_v25 }
 0x108   : > { %v6940_v37 = vpop.f32.mrf.mxu0  ;;  %578 = vmax.xlane.f32.xlu1 %v577_v33  ;;  %v6298_v33 = vcombine.low %v2191_v16, %v2195_v25  ;;  %v2167_v25 = vld [vmem:[%s13452_s3 + $0x108] sm:$0xff] }
 0x109   : > { %v7818_v38 = vadd.f32 %v6940_v37, %v7749_v52  ;;  %v580_v40 = vsel %vm13569_vm0, %v7815_v36, -inf  ;;  %2785 = vmatprep.subr.bf16.mxu0 %v6299_v34 }
 0x10a   : > { %v494_v43 = vpop.f32.mrf.mxu0  ;;  %581 = vmax.xlane.f32.xlu0 %v580_v40  ;;  %v6296_v40 = vcombine.low %v2190_v14, %v2194_v15  ;;  %2786 = vmatpush1.bf16.msra.mxu0 %v6298_v33  ;;  %v2179_v14 = vld [vmem:[%s13452_s3 + $0x168] sm:$0xff] }
 0x10b   : > { %v7825_v44 = vadd.f32 %v7749_v52, %v494_v43  ;;  %v589_v51 = vsel %vm13569_vm0, %v7818_v38, -inf  ;;  %v2182_v43 = vld [vmem:[%s13452_s3 + $0x180] sm:$0xff]  ;;  %v2171_v33 = vld [vmem:[%s13452_s3 + $0x128] sm:$0xff] }
 0x10c   : > { %v6943_v46 = vpop.f32.mrf.mxu0  ;;  %584 = vmax.xlane.f32.xlu1 %v583_v41  ;;  %2633 = vmatpush1.bf16.msra.mxu1 %v6296_v40  ;;  %v6274_v34 = vcombine.low %v2167_v25, %v2171_v33 }
 0x10d   : > { %v7829_v49 = vadd.f32 %v6943_v46, %v7749_v52  ;;  %v586_v50 = vsel %vm13569_vm0, %v7825_v44, -inf  ;;  %v2186_v46 = vld [vmem:[%s13452_s3 + $0x1a0] sm:$0xff] }
 0x10e   : > { %v504_v55 = vpop.f32.mrf.mxu0  ;;  %587 = vmax.xlane.f32.xlu0 %v586_v50  ;;  %v2183_v50 = vld [vmem:[%s13452_s3 + $0x188] sm:$0xff] }
 0x10f   : > { %v7839_v57 = vadd.f32 %v7749_v52, %v504_v55  ;;  %v595_v63 = vsel %vm13569_vm0, %v7829_v49, -inf  ;;  %v2187_v55 = vld [vmem:[%s13452_s3 + $0x1a8] sm:$0xff] }
 0x110   : > { %v6946_v58 = vpop.f32.mrf.mxu0  ;;  %590 = vmax.xlane.f32.xlu1 %v589_v51 }
 0x111   : > { %v7842_v60 = vadd.f32 %v6946_v58, %v7749_v52  ;;  %v592_v62 = vsel %vm13569_vm0, %v7839_v57, -inf }
 0x112   : > { %v514_v0 = vpop.f32.mrf.mxu0  ;;  %593 = vmax.xlane.f32.xlu0 %v592_v62  ;;  %v6290_v62 = vcombine.low %v2183_v50, %v2187_v55 }
 0x113   : > { %v7849_v2 = vadd.f32 %v7749_v52, %v514_v0  ;;  %v601_v9 = vsel %vm13569_vm0, %v7842_v60, -inf  ;;  %v6288_v0 = vcombine.low %v2182_v43, %v2186_v46 }
 0x114   : > { %v6949_v3 = vpop.f32.mrf.mxu0  ;;  %596 = vmax.xlane.f32.xlu1 %v595_v63  ;;  %v6291_v63 = vcombine.high %v2183_v50, %v2187_v55  ;;  %v2159_v50 = vld [vmem:[%s13452_s3 + $0xc8] sm:$0xff] }
 0x115   : > { %v7852_v5 = vadd.f32 %v6949_v3, %v7749_v52  ;;  %v598_v8 = vsel %vm13569_vm0, %v7849_v2, -inf  ;;  %v2174_v3 = vld [vmem:[%s13452_s3 + $0x140] sm:$0xff] }
 0x116   : > { %v524_v10 = vpop.f32.mrf.mxu0  ;;  %599 = vmax.xlane.f32.xlu0 %v598_v8  ;;  %2787 = vmatprep.subr.bf16.mxu0 %v6291_v63  ;;  %v2178_v8 = vld [vmem:[%s13452_s3 + $0x160] sm:$0xff] }
 0x117   : > { %v7859_v12 = vadd.f32 %v7749_v52, %v524_v10  ;;  %v607_v22 = vsel %vm13569_vm0, %v7852_v5, -inf  ;;  %v6281_v10 = vcombine.high %v2174_v3, %v2178_v8  ;;  %2788 = vmatpush1.bf16.msra.mxu0 %v6290_v62  ;;  %v2150_v63 = vld [vmem:[%s13452_s3 + $0x80] sm:$0xff] }
 0x118   : > { %v6952_v19 = vpop.f32.mrf.mxu0  ;;  %602 = vmax.xlane.f32.xlu1 %v601_v9  ;;  %v2175_v9 = vld [vmem:[%s13452_s3 + $0x148] sm:$0xff] }
 0x119   : > { %v7876_v28 = vadd.f32 %v6952_v19, %v7749_v52  ;;  %v604_v31 = vsel %vm13569_vm0, %v7859_v12, -inf  ;;  %v6282_v15 = vcombine.low %v2175_v9, %v2179_v14  ;;  %v6283_v16 = vcombine.high %v2175_v9, %v2179_v14  ;;  %v2155_v9 = vld [vmem:[%s13452_s3 + $0xa8] sm:$0xff] }
 0x11a   : > { %v534_v37 = vpop.f32.mrf.mxu0  ;;  %605 = vmax.xlane.f32.xlu0 %v604_v31  ;;  %v6280_v19 = vcombine.low %v2174_v3, %v2178_v8  ;;  %v2151_v3 = vld [vmem:[%s13452_s3 + $0x88] sm:$0xff] }
 0x11b   : > { %v7881_v41 = vadd.f32 %v7749_v52, %v534_v37  ;;  %v613_v51 = vsel %vm13569_vm0, %v7876_v28, -inf  ;;  %v6289_v52 = vcombine.high %v2182_v43, %v2186_v46  ;;  %2789 = vmatprep.subr.bf16.mxu0 %v6283_v16  ;;  %v6275_v37 = vcombine.high %v2167_v25, %v2171_v33  ;;  %v2158_v43 = vld [vmem:[%s13452_s3 + $0xc0] sm:$0xff]  ;;  %v2147_v25 = vld [vmem:[%s13452_s3 + $0x68] sm:$0xff] }
 0x11c   : > { %608 = vmax.xlane.f32.xlu1 %v607_v22  ;;  %v2166_v22 = vld [vmem:[%s13452_s3 + $0x100] sm:$0xff]  ;;  %2790 = vmatpush1.bf16.msra.mxu0 %v6282_v15  ;;  %v6259_v14 = vcombine.high %v2151_v3, %v2155_v9 }
 0x11d   : > { %v610_v58 = vsel %vm13569_vm0, %v7881_v41, -inf  ;;  %2634 = vmatprep.subr.bf16.mxu1 %v6289_v52  ;;  %v6273_v31 = vcombine.high %v2166_v22, %v2170_v24  ;;  %v6272_v40 = vcombine.low %v2166_v22, %v2170_v24  ;;  %2791 = vmatprep.subr.bf16.mxu0 %v6275_v37  ;;  %v2162_v46 = vld [vmem:[%s13452_s3 + $0xe0] sm:$0xff]  ;;  %v2163_v52 = vld [vmem:[%s13452_s3 + $0xe8] sm:$0xff] }
 0x11e   : > { %611 = vmax.xlane.f32.xlu0 %v610_v58  ;;  %2635 = vmatpush1.bf16.msra.mxu1 %v6288_v0  ;;  %v6266_v55 = vcombine.low %v2159_v50, %v2163_v52  ;;  %v6267_v58 = vcombine.high %v2159_v50, %v2163_v52  ;;  %v6264_v62 = vcombine.low %v2158_v43, %v2162_v46  ;;  %v2154_v0 = vld [vmem:[%s13452_s3 + $0xa0] sm:$0xff]  ;;  %v2143_v22 = vld [vmem:[%s13452_s3 + $0x48] sm:$0xff] }
 0x11f   : > { %2636 = vmatprep.subr.bf16.mxu1 %v6281_v10  ;;  %v6257_v8 = vcombine.high %v2150_v63, %v2154_v0  ;;  %v6258_v10 = vcombine.low %v2151_v3, %v2155_v9  ;;  %v6256_v15 = vcombine.low %v2150_v63, %v2154_v0  ;;  %v2142_v16 = vld [vmem:[%s13452_s3 + $0x40] sm:$0xff]  ;;  %v6251_v33 = vcombine.high %v2143_v22, %v2147_v25  ;;  %v2139_v50 = vld [vmem:[%s13452_s3 + $0x28] sm:$0xff]  ;;  %v2193_v63 = vld [vmem:[%s13452_s3 + $0x1d8] sm:$0xff] }
 0x120   : > { %614 = vmax.xlane.f32.xlu1 %v613_v51  ;;  %v6265_v51 = vcombine.high %v2158_v43, %v2162_v46  ;;  %2792 = vmatpush1.bf16.msra.mxu0 %v6274_v34  ;;  %v2134_v37 = vld [vmem:[%s13452_s3] sm:$0xff]  ;;  %v2135_v43 = vld [vmem:[%s13452_s3 + $0x8] sm:$0xff] }
 0x121   : > { %2793 = vmatprep.subr.bf16.mxu0 %v6267_v58  ;;  %v6242_v52 = vcombine.low %v2135_v43, %v2139_v50  ;;  %v2192_v58 = vld [vmem:[%s13452_s3 + $0x1d0] sm:$0xff] }
 0x122   : > { %2637 = vmatpush1.bf16.msra.mxu1 %v6280_v19  ;;  %v2146_v19 = vld [vmem:[%s13452_s3 + $0x60] sm:$0xff] }
 0x123   : > { %2638 = vmatprep.subr.bf16.mxu1 %v6273_v31  ;;  %v6249_v24 = vcombine.high %v2142_v16, %v2146_v19  ;;  %v6250_v31 = vcombine.low %v2143_v22, %v2147_v25  ;;  %v6248_v34 = vcombine.low %v2142_v16, %v2146_v19  ;;  %v2184_v16 = vld [vmem:[%s13452_s3 + $0x190] sm:$0xff]  ;;  %v2185_v22 = vld [vmem:[%s13452_s3 + $0x198] sm:$0xff] }
 0x124   : > { %2794 = vmatpush1.bf16.msra.mxu0 %v6266_v55  ;;  %v6243_v55 = vcombine.high %v2135_v43, %v2139_v50  ;;  %v2188_v19 = vld [vmem:[%s13452_s3 + $0x1b0] sm:$0xff]  ;;  %v2177_v50 = vld [vmem:[%s13452_s3 + $0x158] sm:$0xff] }
 0x125   : > { %2795 = vmatprep.subr.bf16.mxu0 %v6259_v14  ;;  %v6293_v25 = vcombine.high %v2184_v16, %v2188_v19  ;;  %v2176_v43 = vld [vmem:[%s13452_s3 + $0x150] sm:$0xff] }
 0x126   : > { %2639 = vmatpush1.bf16.msra.mxu1 %v6272_v40  ;;  %v2138_v40 = vld [vmem:[%s13452_s3 + $0x20] sm:$0xff] }
 0x127   : > { %2640 = vmatprep.subr.bf16.mxu1 %v6265_v51  ;;  %v6241_v46 = vcombine.high %v2134_v37, %v2138_v40  ;;  %v6240_v51 = vcombine.low %v2134_v37, %v2138_v40 }
 0x128   : > { %2796 = vmatpush1.bf16.msra.mxu0 %v6258_v10 }
 0x129   : > { %2797 = vmatprep.subr.bf16.mxu0 %v6251_v33 }
 0x12a   : > { %2641 = vmatpush1.bf16.msra.mxu1 %v6264_v62  ;;  %v2196_v62 = vld [vmem:[%s13452_s3 + $0x1f0] sm:$0xff] }
 0x12b   : > { %2642 = vmatprep.subr.bf16.mxu1 %v6257_v8  ;;  %v6300_v0 = vcombine.low %v2192_v58, %v2196_v62  ;;  %v6301_v3 = vcombine.high %v2192_v58, %v2196_v62  ;;  %v2197_v8 = vld [vmem:[%s13452_s3 + $0x1f8] sm:$0xff] }
 0x12c   : > { %2798 = vmatpush1.bf16.msra.mxu0 %v6250_v31  ;;  %v6302_v10 = vcombine.low %v2193_v63, %v2197_v8  ;;  %v6303_v14 = vcombine.high %v2193_v63, %v2197_v8  ;;  %v2189_v31 = vld [vmem:[%s13452_s3 + $0x1b8] sm:$0xff] }
 0x12d   : > { %2799 = vmatprep.subr.bf16.mxu0 %v6243_v55  ;;  %v6295_v37 = vcombine.high %v2185_v22, %v2189_v31  ;;  %v2181_v58 = vld [vmem:[%s13452_s3 + $0x178] sm:$0xff] }
 0x12e   : > { %2643 = vmatpush1.bf16.msra.mxu1 %v6256_v15  ;;  %v6286_v62 = vcombine.low %v2177_v50, %v2181_v58  ;;  %v6287_v63 = vcombine.high %v2177_v50, %v2181_v58 }
 0x12f   : > { %2644 = vmatprep.subr.bf16.mxu1 %v6249_v24 }
 0x130   : > { %2800 = vmatpush1.bf16.msra.mxu0 %v6242_v52 }
 0x131   : > { %3091 = vmatprep.subr.bf16.mxu0 %v6303_v14 }
 0x132   : > { %2645 = vmatpush1.bf16.msra.mxu1 %v6248_v34  ;;  %v6294_v34 = vcombine.low %v2185_v22, %v2189_v31  ;;  %v2160_v22 = vld [vmem:[%s13452_s3 + $0xd0] sm:$0xff]  ;;  %v2165_v31 = vld [vmem:[%s13452_s3 + $0xf8] sm:$0xff] }
 0x133   : > { %2646 = vmatprep.subr.bf16.mxu1 %v6241_v46  ;;  %2818 = vmatmul.mubr.bf16.vlgmr.msra.gmra.mxu0 %v7657_v6  ;;  %v2180_v46 = vld [vmem:[%s13452_s3 + $0x170] sm:$0xff] }
 0x134   : > { %2827 = vmatprep.mubr.bf16.mxu0 %v13464_v53  ;;  %3092 = vmatpush1.bf16.msra.mxu0 %v6302_v10  ;;  %v6284_v52 = vcombine.low %v2176_v43, %v2180_v46  ;;  %v6285_v55 = vcombine.high %v2176_v43, %v2180_v46 }
 0x135   : > { %3093 = vmatprep.subr.bf16.mxu0 %v6295_v37 }
 0x136   : > { %2647 = vmatpush1.bf16.msra.mxu1 %v6240_v51 }
 0x137   : > { %2938 = vmatprep.subr.bf16.mxu1 %v6301_v3  ;;  %v2169_v3 = vld [vmem:[%s13452_s3 + $0x118] sm:$0xff] }
 0x138   : > { %3094 = vmatpush1.bf16.msra.mxu0 %v6294_v34 }
 0x139   : > { %2665 = vmatmul.mubr.bf16.vlgmr.msra.gmra.mxu1 %v7657_v6  ;;  %3095 = vmatprep.subr.bf16.mxu0 %v6287_v63 }
 0x13a   : > { %2674 = vmatprep.mubr.bf16.mxu1 %v13464_v53  ;;  %2939 = vmatpush1.bf16.msra.mxu1 %v6300_v0  ;;  %v2168_v0 = vld [vmem:[%s13452_s3 + $0x110] sm:$0xff] }
 0x13b   : > { %2828 = vmatmul.mubr.bf16.gmra.mxu0 %v7688_v17  ;;  %2940 = vmatprep.subr.bf16.mxu1 %v6293_v25 }
 0x13c   : > { %2837 = vmatprep.mubr.bf16.mxu0 %v13464_v53  ;;  %3096 = vmatpush1.bf16.msra.mxu0 %v6286_v62 }
 0x141   : > { %2675 = vmatmul.mubr.bf16.gmra.mxu1 %v7688_v17 }
 0x142   : > { %2684 = vmatprep.mubr.bf16.mxu1 %v13464_v53 }
 0x143   : > { %2838 = vmatmul.mubr.bf16.gmra.mxu0 %v7695_v20 }
 0x144   : > { %2847 = vmatprep.mubr.bf16.mxu0 %v13464_v53 }
 0x149   : > { %2685 = vmatmul.mubr.bf16.gmra.mxu1 %v7695_v20 }
 0x14a   : > { %2694 = vmatprep.mubr.bf16.mxu1 %v13464_v53 }
 0x14b   : > { %2848 = vmatmul.mubr.bf16.gmra.mxu0 %v7700_v23 }
 0x14c   : > { %2857 = vmatprep.mubr.bf16.mxu0 %v13464_v53 }
 0x151   : > { %2695 = vmatmul.mubr.bf16.gmra.mxu1 %v7700_v23 }
 0x152   : > { %2704 = vmatprep.mubr.bf16.mxu1 %v13464_v53 }
 0x153   : > { %2858 = vmatmul.mubr.bf16.gmra.mxu0 %v7705_v26 }
 0x154   : > { %2867 = vmatprep.mubr.bf16.mxu0 %v13464_v53 }
 0x159   : > { %2705 = vmatmul.mubr.bf16.gmra.mxu1 %v7705_v26 }
 0x15a   : > { %2714 = vmatprep.mubr.bf16.mxu1 %v13464_v53 }
 0x15b   : > { %2868 = vmatmul.mubr.bf16.gmra.mxu0 %v7710_v29 }
 0x15c   : > { %2877 = vmatprep.mubr.bf16.mxu0 %v13464_v53 }
 0x161   : > { %2715 = vmatmul.mubr.bf16.gmra.mxu1 %v7710_v29 }
 0x162   : > { %2724 = vmatprep.mubr.bf16.mxu1 %v13464_v53 }
 0x163   : > { %2878 = vmatmul.mubr.bf16.gmra.mxu0 %v7715_v32 }
 0x164   : > { %2887 = vmatprep.mubr.bf16.mxu0 %v13464_v53 }
 0x169   : > { %2725 = vmatmul.mubr.bf16.gmra.mxu1 %v7715_v32 }
 0x16a   : > { %2734 = vmatprep.mubr.bf16.mxu1 %v13464_v53 }
 0x16b   : > { %2888 = vmatmul.mubr.bf16.gmra.mxu0 %v7720_v35 }
 0x16c   : > { %2897 = vmatprep.mubr.bf16.mxu0 %v13464_v53 }
 0x171   : > { %2735 = vmatmul.mubr.bf16.gmra.mxu1 %v7720_v35 }
 0x172   : > { %2744 = vmatprep.mubr.bf16.mxu1 %v13464_v53 }
 0x173   : > { %2898 = vmatmul.mubr.bf16.gmra.mxu0 %v7726_v39 }
 0x174   : > { %2907 = vmatprep.mubr.bf16.mxu0 %v13464_v53 }
 0x179   : > { %v549_v9 = vpop.xlane.xlu0 %548  ;;  %2745 = vmatmul.mubr.bf16.gmra.mxu1 %v7726_v39 }
 0x17a   : > { %v617_v15 = vsub.f32 %v7752_v54, %v549_v9  ;;  %v6292_v54 = vcombine.low %v2184_v16, %v2188_v19  ;;  %2754 = vmatprep.mubr.bf16.mxu1 %v13464_v53 }
 0x17b   : > { %2908 = vmatmul.mubr.bf16.gmra.mxu0 %v7731_v42 }
 0x17c   : > { %v642_v24 = vmul.f32 1.442695, %v617_v15  ;;  %2941 = vmatpush1.bf16.msra.mxu1 %v6292_v54  ;;  %v2173_v15 = vld [vmem:[%s13452_s3 + $0x138] sm:$0xff]  ;;  %2917 = vmatprep.mubr.bf16.mxu0 %v13464_v53 }
 0x17d   : > { %v546_v33 = vpop.xlane.xlu0 %545  ;;  %v555_v40 = vpop.xlane.xlu1 %554  ;;  %2942 = vmatprep.subr.bf16.mxu1 %v6285_v55  ;;  %v6278_v16 = vcombine.low %v2169_v3, %v2173_v15  ;;  %v6279_v19 = vcombine.high %v2169_v3, %v2173_v15  ;;  %v2161_v54 = vld [vmem:[%s13452_s3 + $0xd8] sm:$0xff] }
 0x17e   : > { %7260 = vpow2.f32 %v642_v24  ;;  %v616_v51 = vsub.f32 %v7755_v56, %v546_v33  ;;  %v2172_v56 = vld [vmem:[%s13452_s3 + $0x130] sm:$0xff]  ;;  %v619_v33 = vsub.f32 %v7760_v59, %v555_v40  ;;  %v6270_v43 = vcombine.low %v2161_v54, %v2165_v31  ;;  %v2153_v59 = vld [vmem:[%s13452_s3 + $0x98] sm:$0xff] }
 0x17f   : > { %v6276_v10 = vcombine.low %v2168_v0, %v2172_v56  ;;  %v6277_v14 = vcombine.high %v2168_v0, %v2172_v56  ;;  %3097 = vmatprep.subr.bf16.mxu0 %v6279_v19  ;;  %v2164_v24 = vld [vmem:[%s13452_s3 + $0xf0] sm:$0xff]  ;;  %v6271_v46 = vcombine.high %v2161_v54, %v2165_v31  ;;  %v2157_v55 = vld [vmem:[%s13452_s3 + $0xb8] sm:$0xff] }
 0x180   : > { %v640_v8 = vmul.f32 1.442695, %v616_v51  ;;  %2943 = vmatpush1.bf16.msra.mxu1 %v6284_v52  ;;  %v6269_v25 = vcombine.high %v2160_v22, %v2164_v24  ;;  %3098 = vmatpush1.bf16.msra.mxu0 %v6278_v16  ;;  %v6268_v37 = vcombine.low %v2160_v22, %v2164_v24  ;;  %v2152_v51 = vld [vmem:[%s13452_s3 + $0x90] sm:$0xff]  ;;  %v646_v58 = vmul.f32 1.442695, %v619_v33  ;;  %v2145_v16 = vld [vmem:[%s13452_s3 + $0x58] sm:$0xff] }
 0x181   : > { %2755 = vmatmul.mubr.bf16.gmra.mxu1 %v7731_v42  ;;  %v8055_v9 = vpop.xlane.xlu1 %551  ;;  %2944 = vmatprep.subr.bf16.mxu1 %v6277_v14  ;;  %v2156_v52 = vld [vmem:[%s13452_s3 + $0xb0] sm:$0xff]  ;;  %v6263_v63 = vcombine.high %v2153_v59, %v2157_v55  ;;  %v6262_v56 = vcombine.low %v2153_v59, %v2157_v55  ;;  %v13461_v14 = vmov 3   ;;  %v2149_v19 = vld [vmem:[%s13452_s3 + $0x78] sm:$0xff] }
 0x182   : > { %2764 = vmatprep.mubr.bf16.mxu1 %v13464_v53  ;;  %7262 = vpow2.f32 %v640_v8  ;;  %v6261_v40 = vcombine.high %v2152_v51, %v2156_v52  ;;  %3099 = vmatprep.subr.bf16.mxu0 %v6271_v46  ;;  %v6260_v0 = vcombine.low %v2152_v51, %v2156_v52  ;;  %v2144_v8 = vld [vmem:[%s13452_s3 + $0x50] sm:$0xff]  ;;  %v6255_v54 = vcombine.high %v2145_v16, %v2149_v19  ;;  %v2137_v33 = vld [vmem:[%s13452_s3 + $0x18] sm:$0xff] }
 0x183   : > { %2918 = vmatmul.mubr.bf16.gmra.mxu0 %v7736_v45  ;;  %v558_v3 = vpop.xlane.xlu0 %557  ;;  %7264 = vpow2.f32 %v646_v58  ;;  %v2140_v31 = vld [vmem:[%s13452_s3 + $0x30] sm:$0xff]  ;;  %v618_v55 = vsub.f32 %v7763_v61, %v8055_v9 }
 0x184   : > { %2945 = vmatpush1.bf16.msra.mxu1 %v6276_v10  ;;  %3100 = vmatpush1.bf16.msra.mxu0 %v6270_v43  ;;  %v2148_v10 = vld [vmem:[%s13452_s3 + $0x70] sm:$0xff]  ;;  %v620_v24 = vsub.f32 %v7775_v4, %v558_v3 }
 0x185   : > { %v561_v34 = vpop.xlane.xlu1 %560  ;;  %2946 = vmatprep.subr.bf16.mxu1 %v6269_v25  ;;  %3101 = vmatprep.subr.bf16.mxu0 %v6263_v63  ;;  %v6253_v15 = vcombine.high %v2144_v8, %v2148_v10  ;;  %v2136_v25 = vld [vmem:[%s13452_s3 + $0x10] sm:$0xff]  ;;  %v6252_v4 = vcombine.low %v2144_v8, %v2148_v10  ;;  %v644_v63 = vmul.f32 1.442695, %v618_v55 }
 0x186   : > { %v621_v62 = vsub.f32 %v7770_v1, %v561_v34  ;;  %v13457_v1 = vmov 2   ;;  %2927 = vmatprep.mubr.bf16.mxu0 %v13464_v53  ;;  %v6254_v34 = vcombine.low %v2145_v16, %v2149_v19  ;;  %v6245_v46 = vcombine.high %v2136_v25, %v2140_v31 }
 0x187   : > { %v648_v52 = vmul.f32 1.442695, %v620_v24  ;;  %v6244_v59 = vcombine.low %v2136_v25, %v2140_v31  ;;  %v564_v9 = vpop.xlane.xlu0 %563 }
 0x188   : > { %2947 = vmatpush1.bf16.msra.mxu1 %v6268_v37  ;;  %v650_v22 = vmul.f32 1.442695, %v621_v62  ;;  %3102 = vmatpush1.bf16.msra.mxu0 %v6262_v56  ;;  %v2141_v37 = vld [vmem:[%s13452_s3 + $0x38] sm:$0xff] }
 0x189   : > { %2765 = vmatmul.mubr.bf16.gmra.mxu1 %v7736_v45  ;;  %2948 = vmatprep.subr.bf16.mxu1 %v6261_v40  ;;  %v6247_v51 = vcombine.high %v2137_v33, %v2141_v37  ;;  %v6246_v40 = vcombine.low %v2137_v33, %v2141_v37  ;;  %v567_v58 = vpop.xlane.xlu1 %566 }
 0x18a   : > { %2774 = vmatprep.mubr.bf16.mxu1 %v13464_v53  ;;  %7266 = vpow2.f32 %v650_v22  ;;  %3103 = vmatprep.subr.bf16.mxu0 %v6255_v54  ;;  %v623_v62 = vsub.f32 %v7778_v7, %v567_v58  ;;  %v622_v7 = vsub.f32 %v7785_v11, %v564_v9 }
 0x18b   : > { %v8076_v50 = vpop.eup %7260  ;;  %2928 = vmatmul.mubr.bf16.gmra.mxu0 %v7741_v48  ;;  %7268 = vpow2.f32 %v648_v52 }
 0x18c   : > { %13647 = vst [vmem:[#allocation2_spill] sm:$0xff] %v8076_v50  ;;  %697 = vperm.xlu1 %6982, %v8076_v50   ;;  %1032 = vperm.xlu0 %6983, %v8076_v50   ;;  %7270 = vpow2.f32 %v644_v63  ;;  %v652_v3 = vmul.f32 1.442695, %v622_v7 }
 0x18d   : > { %2949 = vmatpush1.bf16.msra.mxu1 %v6260_v0  ;;  %3104 = vmatpush1.bf16.msra.mxu0 %v6254_v34  ;;  %v654_v0 = vmul.f32 1.442695, %v623_v62  ;;  %v573_v11 = vpop.xlane.xlu1 %572 }
 0x18e   : > { %2950 = vmatprep.subr.bf16.mxu1 %v6253_v15  ;;  %3105 = vmatprep.subr.bf16.mxu0 %v6247_v51 }
 0x18f   : > { %v8127_v43 = vpop.eup %7262  ;;  %3123 = vmatprep.mubr.bf16.mxu0 %v13464_v53  ;;  %7272 = vpow2.f32 %v654_v0  ;;  %v8313_v0 = vld [vmem:[%s13453_s4] sm:$0xff] }
 0x190   : > { %6984 = vset.pattern.permute.xlu1 %v13457_v1  ;;  %6985 = vset.pattern.permute.xlu0 %v13461_v14  ;;  %v8143_v61 = vpop.eup %7264  ;;  %7274 = vpow2.f32 %v652_v3 }
 0x191   : > { %1345 = vperm.xlu1 %6984, %v8076_v50   ;;  %1658 = vperm.xlu0 %6985, %v8076_v50  }
 0x192   : > { %2775 = vmatmul.mubr.bf16.gmra.mxu1 %v7741_v48  ;;  %3106 = vmatpush1.bf16.msra.mxu0 %v6246_v40 }
 0x193   : > { %2951 = vmatpush1.bf16.msra.mxu1 %v6252_v4  ;;  %2970 = vmatprep.mubr.bf16.mxu1 %v13464_v53 }
 0x194   : > { %2952 = vmatprep.subr.bf16.mxu1 %v6245_v46 }
 0x195   : > { %6987 = vset.pattern.permute.xlu1 %v13459_v47  ;;  %6986 = vset.pattern.permute.xlu0 %v13464_v53 }
 0x196   : > { %1028 = vperm.xlu1 %6987, %v8127_v43   ;;  %692 = vperm.xlu0 %6986, %v8127_v43  }
 0x197   : > { %2953 = vmatpush1.bf16.msra.mxu1 %v6244_v59  ;;  %3124 = vmatmul.mubr.bf16.vlgmr.msra.gmra.mxu0 %v7657_v6  ;;  %v8152_v56 = vpop.eup %7266 }
 0x198   : > { %3133 = vmatprep.mubr.bf16.mxu0 %v13464_v53  ;;  %v8158_v8 = vpop.eup %7268 }
 0x199   : > { %13648 = vst [vmem:[#allocation3_spill] sm:$0xff] %v8158_v8  ;;  %v8171_v10 = vpop.eup %7270 }
 0x19a   : > { %6989 = vset.pattern.permute.xlu1 %v13461_v14  ;;  %6988 = vset.pattern.permute.xlu0 %v13457_v1 }
 0x19b   : > { %1654 = vperm.xlu1 %6989, %v8127_v43   ;;  %1341 = vperm.xlu0 %6988, %v8127_v43  }
 0x19c   : > { %2971 = vmatmul.mubr.bf16.vlgmr.msra.gmra.mxu1 %v7657_v6  ;;  %v625_v6 = vsub.f32 %v7788_v13, %v573_v11  ;;  %v570_v13 = vpop.xlane.xlu0 %569 }
 0x19d   : > { %2980 = vmatprep.mubr.bf16.mxu1 %v13464_v53  ;;  %v624_v16 = vsub.f32 %v7795_v18, %v570_v13  ;;  %v579_v18 = vpop.xlane.xlu1 %578 }
 0x19e   : > { %v658_v15 = vmul.f32 1.442695, %v625_v6  ;;  %v627_v22 = vsub.f32 %v7798_v21, %v579_v18 }
 0x19f   : > { %6990 = vset.pattern.permute.xlu1 %v13464_v53  ;;  %1353 = vperm.xlu0 %6988, %v8143_v61  }
 0x1a0   : > { %707 = vperm.xlu1 %6990, %v8143_v61   ;;  %3134 = vmatmul.mubr.bf16.gmra.mxu0 %v7688_v17  ;;  %7276 = vpow2.f32 %v658_v15  ;;  %v576_v21 = vpop.xlane.xlu0 %575 }
 0x1a1   : > { %3143 = vmatprep.mubr.bf16.mxu0 %v13464_v53 }
 0x1a3   : > { %1361 = vperm.xlu0 %6988, %v8152_v56  }
 0x1a4   : > { %6991 = vset.pattern.permute.xlu1 %v13459_v47  ;;  %2981 = vmatmul.mubr.bf16.gmra.mxu1 %v7688_v17  ;;  %v8176_v17 = vpop.eup %7272 }
 0x1a5   : > { %1040 = vperm.xlu1 %6991, %v8143_v61   ;;  %2990 = vmatprep.mubr.bf16.mxu1 %v13464_v53  ;;  %13649 = vst [vmem:[#allocation4_spill] sm:$0xff] %v8176_v17  ;;  %v8186_v19 = vpop.eup %7274 }
 0x1a6   : > { %13650 = vst [vmem:[#allocation5_spill] sm:$0xff] %v8186_v19 }
 0x1a7   : > { %7001 = vset.pattern.permute.xlu0 %v13459_v47 }
 0x1a8   : > { %1044 = vperm.xlu0 %7001, %v8158_v8   ;;  %3144 = vmatmul.mubr.bf16.gmra.mxu0 %v7695_v20 }
 0x1a9   : > { %6992 = vset.pattern.permute.xlu1 %v13461_v14  ;;  %3153 = vmatprep.mubr.bf16.mxu0 %v13464_v53 }
 0x1aa   : > { %1666 = vperm.xlu1 %6992, %v8143_v61  }
 0x1ac   : > { %7003 = vset.pattern.permute.xlu0 %v13461_v14  ;;  %2991 = vmatmul.mubr.bf16.gmra.mxu1 %v7695_v20  ;;  %v656_v20 = vmul.f32 1.442695, %v624_v16 }
 0x1ad   : > { %1670 = vperm.xlu0 %7003, %v8158_v8   ;;  %3000 = vmatprep.mubr.bf16.mxu1 %v13464_v53  ;;  %v8201_v24 = vpop.eup %7276 }
 0x1ae   : > { %6993 = vset.pattern.permute.xlu1 %v13464_v53  ;;  %7278 = vpow2.f32 %v656_v20  ;;  %13651 = vst [vmem:[#allocation6_spill] sm:$0xff] %v8201_v24 }
 0x1af   : > { %702 = vperm.xlu1 %6993, %v8171_v10  }
 0x1b0   : > { %3154 = vmatmul.mubr.bf16.gmra.mxu0 %v7700_v23 }
 0x1b1   : > { %7006 = vset.pattern.permute.xlu0 %v13457_v1  ;;  %3163 = vmatprep.mubr.bf16.mxu0 %v13464_v53 }
 0x1b2   : > { %1369 = vperm.xlu0 %7006, %v8176_v17  }
 0x1b3   : > { %6994 = vset.pattern.permute.xlu1 %v13459_v47 }
 0x1b4   : > { %1036 = vperm.xlu1 %6994, %v8171_v10   ;;  %3001 = vmatmul.mubr.bf16.gmra.mxu1 %v7700_v23  ;;  %v662_v23 = vmul.f32 1.442695, %v627_v22 }
 0x1b5   : > { %3010 = vmatprep.mubr.bf16.mxu1 %v13464_v53 }
 0x1b6   : > { %7009 = vset.pattern.permute.xlu0 %v13459_v47  ;;  %7280 = vpow2.f32 %v662_v23 }
 0x1b7   : > { %1052 = vperm.xlu0 %7009, %v8186_v19  }
 0x1b8   : > { %6995 = vset.pattern.permute.xlu1 %v13457_v1  ;;  %3164 = vmatmul.mubr.bf16.gmra.mxu0 %v7705_v26 }
 0x1b9   : > { %1349 = vperm.xlu1 %6995, %v8171_v10   ;;  %3173 = vmatprep.mubr.bf16.mxu0 %v13464_v53 }
 0x1bb   : > { %7011 = vset.pattern.permute.xlu0 %v13461_v14  ;;  %v8219_v54 = vpop.eup %7278 }
 0x1bc   : > { %1678 = vperm.xlu0 %7011, %v8186_v19   ;;  %3011 = vmatmul.mubr.bf16.gmra.mxu1 %v7705_v26  ;;  %v626_v26 = vsub.f32 %v7805_v27, %v576_v21  ;;  %13652 = vst [vmem:[#allocation7_spill] sm:$0xff] %v8219_v54  ;;  %v585_v27 = vpop.xlane.xlu1 %584 }
 0x1bd   : > { %6996 = vset.pattern.permute.xlu1 %v13461_v14  ;;  %3020 = vmatprep.mubr.bf16.mxu1 %v13464_v53 }
 0x1be   : > { %1662 = vperm.xlu1 %6996, %v8171_v10   ;;  %v660_v25 = vmul.f32 1.442695, %v626_v26 }
 0x1c0   : > { %7012 = vset.pattern.permute.xlu0 %v13464_v53  ;;  %3174 = vmatmul.mubr.bf16.gmra.mxu0 %v7710_v29  ;;  %7282 = vpow2.f32 %v660_v25 }
 0x1c1   : > { %737 = vperm.xlu0 %7012, %v8201_v24   ;;  %3183 = vmatprep.mubr.bf16.mxu0 %v13464_v53 }
 0x1c2   : > { %6997 = vset.pattern.permute.xlu1 %v13464_v53 }
 0x1c3   : > { %717 = vperm.xlu1 %6997, %v8152_v56   ;;  %v8235_v31 = vpop.eup %7280 }
 0x1c4   : > { %3021 = vmatmul.mubr.bf16.gmra.mxu1 %v7710_v29  ;;  %v629_v29 = vsub.f32 %v7808_v30, %v585_v27  ;;  %13653 = vst [vmem:[#allocation8_spill] sm:$0xff] %v8235_v31 }
 0x1c5   : > { %7014 = vset.pattern.permute.xlu0 %v13457_v1  ;;  %3030 = vmatprep.mubr.bf16.mxu1 %v13464_v53 }
 0x1c6   : > { %1377 = vperm.xlu0 %7014, %v8201_v24   ;;  %v666_v33 = vmul.f32 1.442695, %v629_v29 }
 0x1c7   : > { %6998 = vset.pattern.permute.xlu1 %v13459_v47 }
 0x1c8   : > { %1048 = vperm.xlu1 %6998, %v8152_v56   ;;  %3184 = vmatmul.mubr.bf16.gmra.mxu0 %v7715_v32  ;;  %7284 = vpow2.f32 %v666_v33 }
 0x1c9   : > { %3193 = vmatprep.mubr.bf16.mxu0 %v13464_v53 }
 0x1ca   : > { %7017 = vset.pattern.permute.xlu0 %v13459_v47 }
 0x1cb   : > { %1060 = vperm.xlu0 %7017, %v8219_v54  }
 0x1cc   : > { %6999 = vset.pattern.permute.xlu1 %v13461_v14  ;;  %3031 = vmatmul.mubr.bf16.gmra.mxu1 %v7715_v32  ;;  %v582_v32 = vpop.xlane.xlu0 %581 }
 0x1cd   : > { %1674 = vperm.xlu1 %6999, %v8152_v56   ;;  %3040 = vmatprep.mubr.bf16.mxu1 %v13464_v53  ;;  %v628_v30 = vsub.f32 %v7815_v36, %v582_v32  ;;  %v8250_v4 = vpop.eup %7282  ;;  %v591_v36 = vpop.xlane.xlu1 %590 }
 0x1ce   : > { %13654 = vst [vmem:[#allocation9_spill] sm:$0xff] %v8250_v4  ;;  %v631_v34 = vsub.f32 %v7818_v38, %v591_v36 }
 0x1cf   : > { %7019 = vset.pattern.permute.xlu0 %v13461_v14 }
 0x1d0   : > { %1686 = vperm.xlu0 %7019, %v8219_v54   ;;  %3194 = vmatmul.mubr.bf16.gmra.mxu0 %v7720_v35  ;;  %v670_v46 = vmul.f32 1.442695, %v631_v34 }
 0x1d1   : > { %7000 = vset.pattern.permute.xlu1 %v13464_v53  ;;  %3203 = vmatprep.mubr.bf16.mxu0 %v13464_v53  ;;  %v597_v51 = vpop.xlane.xlu1 %596 }
 0x1d2   : > { %712 = vperm.xlu1 %7000, %v8158_v8   ;;  %v633_v55 = vsub.f32 %v7829_v49, %v597_v51 }
 0x1d4   : > { %7020 = vset.pattern.permute.xlu0 %v13464_v53  ;;  %3041 = vmatmul.mubr.bf16.gmra.mxu1 %v7720_v35  ;;  %v664_v35 = vmul.f32 1.442695, %v628_v30  ;;  %v674_v6 = vmul.f32 1.442695, %v633_v55 }
 0x1d5   : > { %747 = vperm.xlu0 %7020, %v8235_v31   ;;  %3050 = vmatprep.mubr.bf16.mxu1 %v13464_v53  ;;  %v8265_v37 = vpop.eup %7284 }
 0x1d6   : > { %7002 = vset.pattern.permute.xlu1 %v13457_v1  ;;  %7286 = vpow2.f32 %v664_v35  ;;  %13655 = vst [vmem:[#allocation10_spill] sm:$0xff] %v8265_v37 }
 0x1d7   : > { %1357 = vperm.xlu1 %7002, %v8158_v8   ;;  %7288 = vpow2.f32 %v670_v46  ;;  %v7185_v46 = vld [vmem:[%s13454_s5 + $0xf8] sm:$0xff]  }
 0x1d8   : > { %3204 = vmatmul.mubr.bf16.gmra.mxu0 %v7726_v39  ;;  %6621 = vmatprep.subr.bf16.mxu0 %v7185_v46 }
 0x1d9   : > { %7022 = vset.pattern.permute.xlu0 %v13457_v1  ;;  %3213 = vmatprep.mubr.bf16.mxu0 %v13464_v53 }
 0x1da   : > { %1385 = vperm.xlu0 %7022, %v8235_v31  }
 0x1db   : > { %7004 = vset.pattern.permute.xlu1 %v13464_v53 }
 0x1dc   : > { %727 = vperm.xlu1 %7004, %v8176_v17   ;;  %3051 = vmatmul.mubr.bf16.gmra.mxu1 %v7726_v39  ;;  %v588_v39 = vpop.xlane.xlu0 %587 }
 0x1dd   : > { %3060 = vmatprep.mubr.bf16.mxu1 %v13464_v53 }
 0x1de   : > { %7025 = vset.pattern.permute.xlu0 %v13459_v47 }
 0x1df   : > { %1068 = vperm.xlu0 %7025, %v8250_v4  }
 0x1e0   : > { %7005 = vset.pattern.permute.xlu1 %v13459_v47  ;;  %3214 = vmatmul.mubr.bf16.gmra.mxu0 %v7731_v42  ;;  %v8278_v38 = vpop.xlane.xlu0 %593 }
 0x1e1   : > { %1056 = vperm.xlu1 %7005, %v8176_v17   ;;  %3223 = vmatprep.mubr.bf16.mxu0 %v13464_v53 }
 0x1e3   : > { %7027 = vset.pattern.permute.xlu0 %v13461_v14  ;;  %v8285_v52 = vpop.eup %7286 }
 0x1e4   : > { %1694 = vperm.xlu0 %7027, %v8250_v4   ;;  %3061 = vmatmul.mubr.bf16.gmra.mxu1 %v7731_v42  ;;  %v630_v42 = vsub.f32 %v7825_v44, %v588_v39  ;;  %13656 = vst [vmem:[#allocation11_spill] sm:$0xff] %v8285_v52  ;;  %v8292_v40 = vpop.xlane.xlu0 %599  ;;  %v8294_v44 = vpop.xlane.xlu1 %602  ;;  %v7184_v39 = vld [vmem:[%s13454_s5 + $0x78] sm:$0xff]  }
 0x1e5   : > { %7007 = vset.pattern.permute.xlu1 %v13461_v14  ;;  %3070 = vmatprep.mubr.bf16.mxu1 %v13464_v53  ;;  %v8305_v63 = vpop.eup %7288 }
 0x1e6   : > { %1682 = vperm.xlu1 %7007, %v8176_v17   ;;  %v668_v59 = vmul.f32 1.442695, %v630_v42  ;;  %13657 = vst [vmem:[#allocation12_spill] sm:$0xff] %v8305_v63  ;;  %v632_v42 = vsub.f32 %v7839_v57, %v8278_v38  ;;  %6533 = vmatprep.subr.bf16.mxu1 %v7184_v39  ;;  %v634_v57 = vsub.f32 %v7849_v2, %v8292_v40 }
 0x1e8   : > { %7028 = vset.pattern.permute.xlu0 %v13464_v53  ;;  %3224 = vmatmul.mubr.bf16.gmra.mxu0 %v7736_v45  ;;  %7290 = vpow2.f32 %v668_v59  ;;  %v8307_v9 = vpop.xlane.xlu0 %605  ;;  %v672_v39 = vmul.f32 1.442695, %v632_v42  ;;  %v7190_v42 = vld [vmem:[%s13454_s5 + $0x30] sm:$0xff]  }
 0x1e9   : > { %757 = vperm.xlu0 %7028, %v8265_v37   ;;  %3233 = vmatprep.mubr.bf16.mxu0 %v13464_v53  ;;  %7292 = vpow2.f32 %v674_v6  ;;  %v7186_v6 = vld [vmem:[%s13454_s5 + $0x38] sm:$0xff]  }
 0x1ea   : > { %7008 = vset.pattern.permute.xlu1 %v13464_v53  ;;  %6534 = vmatpush3.bf16.msra.mxu1 %v7186_v6  ;;  %v7191_v6 = vld [vmem:[%s13454_s5 + $0xb0] sm:$0xff]   ;;  %7294 = vpow2.f32 %v672_v39 }
 0x1eb   : > { %722 = vperm.xlu1 %7008, %v8186_v19  }
 0x1ec   : > { %3071 = vmatmul.mubr.bf16.gmra.mxu1 %v7736_v45  ;;  %v688_v45 = vlaneseq  ;;  %v8336_v25 = vpop.xlane.xlu0 %611 }
 0x1ed   : > { %7030 = vset.pattern.permute.xlu0 %v13457_v1  ;;  %3080 = vmatprep.mubr.bf16.mxu1 %v13464_v53 }
 0x1ee   : > { %1393 = vperm.xlu0 %7030, %v8265_v37   ;;  %v8303_v58 = vshrl.u32 %v688_v45, 7  ;;  %v8384_v38 = vand.u32 127, %v688_v45  ;;  %v7188_v45 = vld [vmem:[%s13454_s5 + $0x70] sm:$0xff]  }
 0x1ef   : > { %7010 = vset.pattern.permute.xlu1 %v13457_v1  ;;  %6535 = vmatprep.subr.bf16.mxu1 %v7188_v45 }
 0x1f0   : > { %1365 = vperm.xlu1 %7010, %v8186_v19   ;;  %3234 = vmatmul.mubr.bf16.gmra.mxu0 %v7741_v48  ;;  %v2202_v49 = vsub.s32 0, %v8303_v58  ;;  %v2210_v13 = vsub.s32 2, %v8303_v58  ;;  %v2218_v20 = vsub.s32 4, %v8303_v58  ;;  %v2222_v18 = vsub.s32 5, %v8303_v58 }
 0x1f1   : > { %v2226_v22 = vsub.s32 6, %v8303_v58  ;;  %v2230_v23 = vsub.s32 7, %v8303_v58  ;;  %v2214_v46 = vsub.s32 3, %v8303_v58  ;;  %vm930_vm1 = vcmp.gt.s32.totalorder %v8384_v38, 0  ;;  %6536 = vmatpush3.bf16.msra.mxu1 %v7190_v42 }
 0x1f2   : > { %7033 = vset.pattern.permute.xlu0 %v13459_v47  ;;  %v8326_v15 = vrot.slane %v8313_v0, %v2202_v49  ;;  %v8340_v27 = vrot.slane %v8313_v0, %v2218_v20  ;;  %v8343_v29 = vrot.slane %v8313_v0, %v2222_v18  ;;  %v8357_v36 = vrot.slane %v8313_v0, %v2210_v13 }
 0x1f3   : > { %1076 = vperm.xlu0 %7033, %v8285_v52   ;;  %v2819_v7 = vpop.f32.mrf.mxu0  ;;  %v8346_v33 = vrot.slane %v8313_v0, %v2226_v22  ;;  %v8349_v32 = vrot.slane %v8313_v0, %v2230_v23  ;;  %v635_v20 = vsub.f32 %v7842_v60, %v8294_v44  ;;  %v7189_v23 = vld [vmem:[%s13454_s5 + $0xf0] sm:$0xff]   ;;  %vm1243_vm5 = vcmp.gt.s32.totalorder %v8384_v38, 1 }
 0x1f4   : > { %7013 = vset.pattern.permute.xlu1 %v13459_v47  ;;  %3081 = vmatmul.mubr.bf16.gmra.mxu1 %v7741_v48  ;;  %v8315_v48 = vpop.xlane.xlu1 %608  ;;  %13658 = vst [vmem:[#allocation13_spill] sm:$0xff] %v8340_v27  ;;  %13659 = vst [vmem:[#allocation14_spill] sm:$0xff] %v8343_v29  ;;  %v2820_v2 = vadd.f32 %v2819_v7, %v8357_v36  ;;  %v636_v7 = vsub.f32 %v7859_v12, %v8307_v9  ;;  %vm1556_vm6 = vcmp.gt.s32.totalorder %v8384_v38, 2 }
 0x1f5   : > { %1064 = vperm.xlu1 %7013, %v8201_v24   ;;  %v8322_v11 = vpop.f32.mrf.mxu0  ;;  %13660 = vst [vmem:[#allocation15_spill] sm:$0xff] %v8346_v33  ;;  %13661 = vst [vmem:[#allocation16_spill] sm:$0xff] %v8349_v32  ;;  %v8379_v13 = vpop.eup %7290  ;;  %v637_v12 = vsub.f32 %v7852_v5, %v8315_v48 }
 0x1f6   : > { %13662 = vst [vmem:[#allocation17_spill] sm:$0xff] %v8379_v13 }
 0x1f7   : > { %7035 = vset.pattern.permute.xlu0 %v13461_v14  ;;  %v2823_v21 = vpop.f32.mrf.mxu0  ;;  %v682_v39 = vmul.f32 1.442695, %v637_v12 }
 0x1f8   : > { %1702 = vperm.xlu0 %7035, %v8285_v52   ;;  %v8353_v35 = vpop.xlane.xlu1 %614  ;;  %v2824_v40 = vadd.f32 %v2823_v21, %v8357_v36  ;;  %v2206_v21 = vsub.s32 1, %v8303_v58 }
 0x1f9   : > { %7015 = vset.pattern.permute.xlu1 %v13461_v14  ;;  %v2666_v62 = vpop.f32.mrf.mxu1  ;;  %v8351_v30 = vpop.f32.mrf.mxu0 }
 0x1fa   : > { %1690 = vperm.xlu1 %7015, %v8201_v24   ;;  %v2667_v51 = vadd.f32 %v2666_v62, %v8326_v15  ;;  %v8422_v9 = vpack.c.bf16 %v2824_v40, %v2820_v2  ;;  %v680_v2 = vmul.f32 1.442695, %v636_v7  ;;  %v8455_v45 = vrot.slane %v8313_v0, %v2206_v21  ;;  %v8469_v21 = vpop.eup %7292  ;;  %v7197_v40 = vld [vmem:[%s13454_s5 + $0xe0] sm:$0xff]  }
 0x1fb   : > { %v8319_v3 = vpop.f32.mrf.mxu1  ;;  %v8372_v55 = vpop.f32.mrf.mxu0  ;;  %13668 = vst [vmem:[#allocation21_spill] sm:$0xff] %v8469_v21 }
 0x1fc   : > { %7036 = vset.pattern.permute.xlu0 %v13464_v53  ;;  %13664 = vst [vmem:[#allocation19_spill] sm:$0xff] %v8422_v9  ;;  %v3342_v7 = vmul.bf16 %v8422_v9, %v8422_v9 }
 0x1fd   : > { %767 = vperm.xlu0 %7036, %v8305_v63   ;;  %v2670_v16 = vpop.f32.mrf.mxu1  ;;  %v8386_v62 = vpop.f32.mrf.mxu0 }
 0x1fe   : > { %7016 = vset.pattern.permute.xlu1 %v13464_v53  ;;  %v2671_v59 = vadd.f32 %v2670_v16, %v8326_v15  ;;  %v7187_v16 = vld [vmem:[%s13454_s5 + $0xb8] sm:$0xff]   ;;  %v8512_v32 = vmul.bf16 %v3342_v7, %v8422_v9  ;;  %v639_v7 = vsub.f32 %v7876_v28, %v8353_v35 }
 0x1ff   : > { %732 = vperm.xlu1 %7016, %v8219_v54   ;;  %v8334_v26 = vpop.f32.mrf.mxu1  ;;  %6622 = vmatpush3.bf16.msra.mxu0 %v7187_v16  ;;  %v8424_v58 = vpop.f32.mrf.mxu0  ;;  %v7200_v28 = vld [vmem:[%s13454_s5 + $0x58] sm:$0xff]  }
 0x200   : > { %v8405_v60 = vpack.c.bf16 %v2671_v59, %v2667_v51  ;;  %v678_v51 = vmul.f32 1.442695, %v635_v20  ;;  %6623 = vmatprep.subr.bf16.mxu0 %v7189_v23  ;;  %v7193_v20 = vld [vmem:[%s13454_s5 + $0xe8] sm:$0xff]   ;;  %v8458_v23 = vrot.slane %v8313_v0, %v2214_v46  ;;  %v13467_v46 = vmov 0.0  }
 0x201   : > { %7038 = vset.pattern.permute.xlu0 %v13457_v1  ;;  %v8359_v34 = vpop.f32.mrf.mxu1  ;;  %v7194_v0 = vld [vmem:[%s13454_s5 + $0x28] sm:$0xff]  }
 0x202   : > { %1401 = vperm.xlu0 %7038, %v8305_v63   ;;  %13663 = vst [vmem:[#allocation18_spill] sm:$0xff] %v8405_v60  ;;  %v3340_v48 = vmul.bf16 %v8405_v60, %v8405_v60 }
 0x203   : > { %7018 = vset.pattern.permute.xlu1 %v13457_v1  ;;  %v8374_v49 = vpop.f32.mrf.mxu1  ;;  %v676_v1 = vmul.f32 1.442695, %v634_v57  ;;  %v7192_v57 = vld [vmem:[%s13454_s5 + $0x68] sm:$0xff]   ;;  %6624 = vmatpush3.bf16.msra.mxu0 %v7191_v6 }
 0x204   : > { %1373 = vperm.xlu1 %7018, %v8219_v54   ;;  %6537 = vmatprep.subr.bf16.mxu1 %v7192_v57  ;;  %v3436_v12 = vmul.bf16 %v3340_v48, %v8405_v60  ;;  %v2669_v48 = vadd.f32 %v8319_v3, %v8455_v45 }
 0x205   : > { %v8407_v44 = vpop.f32.mrf.mxu1  ;;  %7296 = vpow2.f32 %v676_v1  ;;  %v638_v1 = vsub.f32 %v7881_v41, %v8336_v25  ;;  %6625 = vmatprep.subr.bf16.mxu0 %v7193_v20  ;;  %v7195_v41 = vld [vmem:[%s13454_s5 + $0xa8] sm:$0xff]   ;;  %v7196_v25 = vld [vmem:[%s13454_s5 + $0x60] sm:$0xff]   ;;  %v2822_v20 = vadd.f32 %v8322_v11, %v8458_v23  ;;  %6538 = vmatpush3.bf16.msra.mxu1 %v7194_v0 }
 0x206   : > { %7041 = vset.pattern.permute.xlu0 %v13459_v47  ;;  %7298 = vpow2.f32 %v678_v51  ;;  %6539 = vmatprep.subr.bf16.mxu1 %v7196_v25 }
 0x207   : > { %v698_v18 = vpop.permute.xlu1 %697  ;;  %1084 = vperm.xlu0 %7041, %v8379_v13   ;;  %v8394_v22 = vpop.permute.xlu0 %1032  ;;  %7300 = vpow2.f32 %v680_v2  ;;  %v2673_v2 = vadd.f32 %v8334_v26, %v8455_v45  ;;  %v3532_v26 = vmul.bf16 1027030327, %v3436_v12  ;;  %6626 = vmatpush3.bf16.msra.mxu0 %v7195_v41  ;;  %v7199_v12 = vld [vmem:[%s13454_s5 + $0xa0] sm:$0xff]  }
 0x208   : > { %7021 = vset.pattern.permute.xlu1 %v13459_v47  ;;  %vm907_vm2 = vcmp.eq.f32.partialorder %v698_v18, %v8076_v50  ;;  %v8426_v59 = vpop.f32.mrf.mxu1  ;;  %vm811_vm3 = vcmp.gt.f32.partialorder %v698_v18, %v8076_v50  ;;  %v8464_v47 = vpop.f32.mrf.mxu0  ;;  %vm1124_vm9 = vcmp.gt.f32.partialorder %v8394_v22, %v8076_v50  ;;  %7302 = vpow2.f32 %v682_v39  ;;  %6627 = vmatprep.subr.bf16.mxu0 %v7197_v40  ;;  %v7201_v40 = vld [vmem:[%s13454_s5 + $0xd8] sm:$0xff]  }
 0x209   : > { %1072 = vperm.xlu1 %7021, %v8235_v31   ;;  %vm8449_vm4 = vmand %vm907_vm2, %vm930_vm1  ;;  %v6037_v42 = vsel %vm811_vm3, 1.0, %v13467_v46  ;;  %vm1220_vm10 = vcmp.eq.f32.partialorder %v8394_v22, %v8076_v50  ;;  %v13669_v39 = vmov 2   ;;  %v6085_v35 = vsel %vm1124_vm9, 1.0, %v13467_v46 }
 0x20a   : > { %v6061_v51 = vsel %vm8449_vm4, 1.0, %v13467_v46  ;;  %v8481_v6 = vpop.f32.mrf.mxu1  ;;  %v8550_v25 = vpack.c.bf16 %v2673_v2, %v2669_v48  ;;  %vm8560_vm13 = vmand %vm1220_vm10, %vm1243_vm5  ;;  %v3534_v48 = vmul.bf16 1027030327, %v8512_v32  ;;  %v8574_v22 = vadd.bf16 %v3532_v26, %v8405_v60  ;;  %v8583_v32 = vpop.eup %7294  ;;  %v7203_v26 = vld [vmem:[%s13454_s5 + $0x98] sm:$0xff]  }
 0x20b   : > { %7043 = vset.pattern.permute.xlu0 %v13461_v14  ;;  %v1004_v3 = vadd.f32 %v6061_v51, %v6037_v42  ;;  %v2834_v42 = vadd.f32 %v8424_v58, %v8357_v36  ;;  %13673 = vst [vmem:[#allocation23_spill] sm:$0xff] %v8583_v32  ;;  %6628 = vmatpush3.bf16.msra.mxu0 %v7199_v12 }
 0x20c   : > { %v8434_v16 = vpop.permute.xlu1 %1345  ;;  %1710 = vperm.xlu0 %7043, %v8379_v13   ;;  %v8437_v5 = vpop.permute.xlu0 %1658  ;;  %6629 = vmatprep.subr.bf16.mxu0 %v7201_v40  ;;  %v7206_v40 = vld [vmem:[%s13454_s5 + $0x10] sm:$0xff]  }
 0x20d   : > { %13665 = vst [vmem:[#allocation20_spill] sm:$0xff] %v8437_v5  ;;  %7023 = vset.pattern.permute.xlu1 %v13461_v14  ;;  %v2826_v14 = vadd.f32 %v8351_v30, %v8458_v23  ;;  %v7198_v30 = vld [vmem:[%s13454_s5 + $0x20] sm:$0xff]   ;;  %v8531_v51 = vpop.f32.mrf.mxu1  ;;  %v1196_v29 = vadd.f32 %v6085_v35, %v1004_v3  ;;  %v2677_v3 = vadd.f32 %v8359_v34, %v8326_v15 }
 0x20e   : > { %1698 = vperm.xlu1 %7023, %v8235_v31   ;;  %v2681_v35 = vadd.f32 %v8407_v44, %v8326_v15  ;;  %6540 = vmatpush3.bf16.msra.mxu1 %v7198_v30  ;;  %vm1533_vm15 = vcmp.eq.f32.partialorder %v8434_v16, %v8076_v50  ;;  %v6109_v30 = vsel %vm8560_vm13, 1.0, %v13467_v46  ;;  %vm1437_vm3 = vcmp.gt.f32.partialorder %v8434_v16, %v8076_v50 }
 0x20f   : > { %v8568_v2 = vpack.c.bf16 %v2826_v14, %v2822_v20  ;;  %v7202_v14 = vld [vmem:[%s13454_s5 + $0x18] sm:$0xff]   ;;  %v8585_v20 = vmul.f32 1.442695, %v639_v7  ;;  %v8595_v44 = vpop.f32.mrf.mxu1  ;;  %6541 = vmatprep.subr.bf16.mxu1 %v7200_v28  ;;  %vm8646_vm4 = vmand %vm1533_vm15, %vm1556_vm6  ;;  %6630 = vmatpush3.bf16.msra.mxu0 %v7203_v26  ;;  %v7207_v7 = vld [vmem:[%s13454_s5 + $0x90] sm:$0xff]  }
 0x210   : > { %7044 = vset.pattern.permute.xlu0 %v13464_v53  ;;  %v7208_v26 = vld [vmem:[%s13454_s5 + $0x48] sm:$0xff]  }
 0x211   : > { %v8490_v18 = vpop.permute.xlu1 %1028  ;;  %777 = vperm.xlu0 %7044, %v8469_v21   ;;  %v693_v57 = vpop.permute.xlu0 %692  ;;  %13672 = vst [vmem:[#allocation22_spill] sm:$0xff] %v8568_v2 }
 0x212   : > { %vm810_vm7 = vcmp.gt.f32.partialorder %v693_v57, %v8127_v43  ;;  %vm906_vm8 = vcmp.eq.f32.partialorder %v693_v57, %v8127_v43  ;;  %7024 = vset.pattern.permute.xlu1 %v13464_v53  ;;  %v8514_v57 = vpop.f32.mrf.mxu0  ;;  %v684_v53 = vmul.f32 1.442695, %v638_v1  ;;  %v2830_v1 = vadd.f32 %v8372_v55, %v8357_v36  ;;  %6542 = vmatpush3.bf16.msra.mxu1 %v7202_v14  ;;  %v8675_v14 = vpop.f32.mrf.mxu1 }
 0x213   : > { %v6036_v11 = vsel %vm810_vm7, 1.0, %v13467_v46  ;;  %742 = vperm.xlu1 %7024, %v8250_v4   ;;  %vm931_vm11 = vmand %vm906_vm8, %vm930_vm1  ;;  %vm1123_vm12 = vcmp.gt.f32.partialorder %v8490_v18, %v8127_v43  ;;  %vm1219_vm14 = vcmp.eq.f32.partialorder %v8490_v18, %v8127_v43  ;;  %v7204_v18 = vld [vmem:[%s13454_s5 + $0x50] sm:$0xff]  }
 0x214   : > { %v6060_v0 = vsel %vm931_vm11, 1.0, %v13467_v46  ;;  %7304 = vpow2.f32 %v684_v53  ;;  %v6084_v53 = vsel %vm1123_vm12, 1.0, %v13467_v46  ;;  %v8593_v34 = vpack.c.bf16 %v2834_v42, %v2830_v1  ;;  %vm8608_vm2 = vmand %vm1219_vm14, %vm1243_vm5  ;;  %6543 = vmatprep.subr.bf16.mxu1 %v7204_v18 }
 0x215   : > { %7046 = vset.pattern.permute.xlu0 %v13669_v39  ;;  %v1003_v55 = vadd.f32 %v6060_v0, %v6036_v11  ;;  %v8570_v0 = vpop.f32.mrf.mxu0  ;;  %v13677_v42 = vmov 1   ;;  %v8619_v11 = vadd.f32 %v8374_v49, %v8455_v45  ;;  %v1317_v46 = vadd.f32 %v6109_v30, %v1196_v29 }
 0x216   : > { %v8545_v58 = vpop.permute.xlu1 %1654  ;;  %1409 = vperm.xlu0 %7046, %v8469_v21   ;;  %v8548_v41 = vpop.permute.xlu0 %1341  ;;  %13674 = vst [vmem:[#allocation24_spill] sm:$0xff] %v8593_v34  ;;  %v8633_v49 = vadd.bf16 %v3534_v48, %v8422_v9  ;;  %v3724_v48 = vmul.bf16 1061961548, %v8574_v22  ;;  %v8654_v30 = vpack.c.bf16 %v2681_v35, %v2677_v3  ;;  %v2832_v22 = vadd.f32 %v8386_v62, %v8458_v23 }
 0x217   : > { %7026 = vset.pattern.permute.xlu1 %v13669_v39  ;;  %v1195_v1 = vadd.f32 %v6084_v53, %v1003_v55  ;;  %v7205_v55 = vld [vmem:[%s13454_s5 + $0xd0] sm:$0xff]   ;;  %v8627_v53 = vpop.eup %7296  ;;  %v8637_v33 = vpop.f32.mrf.mxu0  ;;  %v3350_v3 = vmul.bf16 %v8593_v34, %v8593_v34  ;;  %v2683_v35 = vadd.f32 %v8426_v59, %v8455_v45  ;;  %vm1436_vm10 = vcmp.gt.f32.partialorder %v8548_v41, %v8127_v43 }
 0x218   : > { %1381 = vperm.xlu1 %7026, %v8250_v4   ;;  %13678 = vst [vmem:[#allocation25_spill] sm:$0xff] %v8627_v53  ;;  %v8639_v27 = vpop.eup %7298  ;;  %13682 = vst [vmem:[#allocation27_spill] sm:$0xff] %v8654_v30  ;;  %v13683_v4 = vmov 0.0   ;;  %vm1532_vm11 = vcmp.eq.f32.partialorder %v8548_v41, %v8127_v43  ;;  %6631 = vmatprep.subr.bf16.mxu0 %v7205_v55  ;;  %vm1869_vm12 = vcmp.gt.s32.totalorder %v8384_v38, 3  ;;  %7306 = vtanh.bf16 %v3724_v48 }
 0x219   : > { %13679 = vst [vmem:[#allocation26_spill] sm:$0xff] %v8639_v27  ;;  %v6108_v31 = vsel %vm8608_vm2, 1.0, %v13683_v4  ;;  %v8680_v24 = vpop.eup %7300  ;;  %v6133_v62 = vsel %vm1437_vm3, 1.0, %v13683_v4  ;;  %v6157_v16 = vsel %vm8646_vm4, 1.0, %v13683_v4  ;;  %v8705_v18 = vpop.f32.mrf.mxu0  ;;  %v3348_v54 = vmul.bf16 %v8654_v30, %v8654_v30  ;;  %6544 = vmatpush3.bf16.msra.mxu1 %v7206_v40  ;;  %vm8731_vm13 = vmand %vm1532_vm11, %vm1556_vm6  ;;  %6632 = vmatpush3.bf16.msra.mxu0 %v7207_v7  ;;  %v7212_v7 = vld [vmem:[%s13454_s5 + $0x40] sm:$0xff]  }
 0x21a   : > { %7049 = vset.pattern.permute.xlu0 %v13677_v42  ;;  %v8613_v12 = vpop.permute.xlu0 %1353  ;;  %13686 = vst [vmem:[#allocation28_spill] sm:$0xff] %v8680_v24  ;;  %v1316_v21 = vadd.f32 %v6108_v31, %v1195_v1  ;;  %v1509_v19 = vadd.f32 %v6133_v62, %v1317_v46  ;;  %v13687_v24 = vmov 3   ;;  %v7209_v46 = vld [vmem:[%s13454_s5 + $0xc8] sm:$0xff]   ;;  %v2836_v29 = vadd.f32 %v8464_v47, %v8458_v23  ;;  %v8720_v9 = vpop.eup %7302 }
 0x21b   : > { %v708_v28 = vpop.permute.xlu1 %707  ;;  %1092 = vperm.xlu0 %7049, %v8583_v32   ;;  %v7210_v62 = vld [vmem:[%s13454_s5 + $0x8] sm:$0xff]   ;;  %13688 = vst [vmem:[#allocation29_spill] sm:$0xff] %v8720_v9  ;;  %v6132_v48 = vsel %vm1436_vm10, 1.0, %v13683_v4  ;;  %v3446_v47 = vmul.bf16 %v3350_v3, %v8593_v34  ;;  %v8739_v40 = vpop.f32.mrf.mxu1  ;;  %v8753_v3 = vpack.c.bf16 %v2683_v35, %v8619_v11  ;;  %6545 = vmatprep.subr.bf16.mxu1 %v7208_v26 }
 0x21c   : > { %vm813_vm7 = vcmp.gt.f32.partialorder %v708_v28, %v8143_v61  ;;  %vm909_vm8 = vcmp.eq.f32.partialorder %v708_v28, %v8143_v61  ;;  %7029 = vset.pattern.permute.xlu1 %v13677_v42  ;;  %v3726_v28 = vmul.bf16 1061961548, %v8633_v49  ;;  %v1508_v41 = vadd.f32 %v6132_v48, %v1316_v21  ;;  %v8774_v26 = vpop.f32.mrf.mxu0  ;;  %6633 = vmatprep.subr.bf16.mxu0 %v7209_v46 }
 0x21d   : > { %vm8664_vm9 = vmand %vm909_vm8, %vm930_vm1  ;;  %1080 = vperm.xlu1 %7029, %v8265_v37   ;;  %v6039_v31 = vsel %vm813_vm7, 1.0, %v13683_v4  ;;  %13693 = vst [vmem:[#allocation30_spill] sm:$0xff] %v8753_v3  ;;  %v1630_v21 = vadd.f32 %v6157_v16, %v1509_v19  ;;  %vm1750_vm3 = vcmp.gt.f32.partialorder %v8437_v5, %v8076_v50  ;;  %v13695_v11 = vmul.bf16 %v8568_v2, %v8568_v2  ;;  %v7213_v19 = vld [vmem:[%s13454_s5 + $0xc0] sm:$0xff]  }
 0x21e   : > { %v8690_v59 = vpop.permute.xlu0 %1361  ;;  %v6063_v1 = vsel %vm8664_vm9, 1.0, %v13683_v4  ;;  %v13696_v48 = vmov 0   ;;  %7308 = vtanh.bf16 %v3726_v28  ;;  %6546 = vmatpush3.bf16.msra.mxu1 %v7210_v62  ;;  %vm1749_vm4 = vcmp.gt.f32.partialorder %v8545_v58, %v8127_v43  ;;  %v8799_v28 = vpop.f32.mrf.mxu1 }
 0x21f   : > { %7051 = vset.pattern.permute.xlu0 %v13687_v24  ;;  %v1006_v60 = vadd.f32 %v6063_v1, %v6039_v31  ;;  %v13694_v1 = vmul.bf16 %v8550_v25, %v8550_v25  ;;  %v8772_v35 = vmul.bf16 %v13695_v11, %v8568_v2  ;;  %v7214_v11 = vld [vmem:[%s13454_s5] sm:$0xff]   ;;  %v3542_v46 = vmul.bf16 1027030327, %v3446_v47  ;;  %6547 = vmatprep.subr.bf16.mxu1 %v7212_v7  ;;  %v8820_v49 = vpop.f32.mrf.mxu0 }
 0x220   : > { %v1041_v55 = vpop.permute.xlu1 %1040  ;;  %1718 = vperm.xlu0 %7051, %v8583_v32   ;;  %v7211_v32 = vld [vmem:[%s13454_s5 + $0x88] sm:$0xff]   ;;  %7310 = vpow2.f32 %v8585_v20  ;;  %vm1845_vm7 = vcmp.eq.f32.partialorder %v8545_v58, %v8127_v43  ;;  %v3349_v17 = vmul.bf16 %v8753_v3, %v8753_v3  ;;  %vm1535_vm8 = vcmp.eq.f32.partialorder %v8613_v12, %v8143_v61 }
 0x221   : > { %vm1126_vm14 = vcmp.gt.f32.partialorder %v1041_v55, %v8143_v61  ;;  %vm1222_vm15 = vcmp.eq.f32.partialorder %v1041_v55, %v8143_v61  ;;  %7031 = vset.pattern.permute.xlu1 %v13687_v24  ;;  %v8766_v55 = vmul.bf16 %v13694_v1, %v8550_v25  ;;  %v3444_v1 = vmul.bf16 %v3348_v54, %v8654_v30  ;;  %v8786_v2 = vpop.eup %7304  ;;  %vm8837_vm10 = vmand %vm1845_vm7, %vm1869_vm12 }
 0x222   : > { %v6087_v13 = vsel %vm1126_vm14, 1.0, %v13683_v4  ;;  %vm8747_vm2 = vmand %vm1222_vm15, %vm1243_vm5  ;;  %1706 = vperm.xlu1 %7031, %v8265_v37   ;;  %v8781_v37 = vpack.c.bf16 %v2836_v29, %v2832_v22  ;;  %13698 = vst [vmem:[#allocation32_spill] sm:$0xff] %v8786_v2  ;;  %6634 = vmatpush3.bf16.msra.mxu0 %v7211_v32  ;;  %v7215_v29 = vld [vmem:[%s13454_s5 + $0x80] sm:$0xff]   ;;  %v6181_v32 = vsel %vm1750_vm3, 1.0, %v13683_v4  ;;  %v2687_v62 = vadd.f32 %v8481_v6, %v8326_v15 }
 0x223   : > { %v8760_v31 = vpop.permute.xlu0 %1044  ;;  %v1198_v16 = vadd.f32 %v6087_v13, %v1006_v60  ;;  %v6156_v13 = vsel %vm8731_vm13, 1.0, %v13683_v4  ;;  %v6111_v60 = vsel %vm8747_vm2, 1.0, %v13683_v4  ;;  %6635 = vmatprep.subr.bf16.mxu0 %v7213_v19  ;;  %v8822_v47 = vadd.f32 %v6181_v32, %v1630_v21  ;;  %6548 = vmatpush3.bf16.msra.mxu1 %v7214_v11  ;;  %vm8854_vm11 = vmand %vm1535_vm8, %vm1556_vm6 }
 0x224   : > { %7052 = vset.pattern.permute.xlu0 %v13696_v48  ;;  %13697 = vst [vmem:[#allocation31_spill] sm:$0xff] %v8781_v37  ;;  %v1629_v54 = vadd.f32 %v6156_v13, %v1508_v41  ;;  %vm1439_vm9 = vcmp.gt.f32.partialorder %v8613_v12, %v8143_v61  ;;  %v3540_v13 = vmul.bf16 1027030327, %v3444_v1  ;;  %v6180_v20 = vsel %vm1749_vm4, 1.0, %v13683_v4  ;;  %v8847_v1 = vpop.f32.mrf.mxu1 }
 0x225   : > { %v8796_v22 = vpop.permute.xlu1 %1666  ;;  %787 = vperm.xlu0 %7052, %v8639_v27   ;;  %13699 = vst [vmem:[#allocation33_spill] sm:$0xff] %v8822_v47  ;;  %v1319_v41 = vadd.f32 %v6111_v60, %v1198_v16  ;;  %v3638_v21 = vadd.bf16 %v3542_v46, %v8593_v34  ;;  %v3351_v19 = vmul.bf16 %v8781_v37, %v8781_v37  ;;  %v6135_v47 = vsel %vm1439_vm9, 1.0, %v13683_v4 }
 0x226   : > { %7032 = vset.pattern.permute.xlu1 %v13696_v48  ;;  %v2840_v16 = vadd.f32 %v8514_v57, %v8357_v36  ;;  %v1821_v60 = vadd.f32 %v6180_v20, %v1629_v54  ;;  %v8861_v32 = vmul.bf16 %v3349_v17, %v8753_v3  ;;  %v2691_v57 = vadd.f32 %v8595_v44, %v8326_v15  ;;  %v8874_v17 = vpop.f32.mrf.mxu0  ;;  %v7307_v46 = vpop.eup %7306 }
 0x227   : > { %752 = vperm.xlu1 %7032, %v8285_v52   ;;  %6636 = vmatpush3.bf16.msra.mxu0 %v7215_v29  ;;  %v2844_v54 = vadd.f32 %v8637_v33, %v8357_v36  ;;  %v1511_v20 = vadd.f32 %v6135_v47, %v1319_v41  ;;  %v6204_v44 = vsel %vm8837_vm10, 1.0, %v13683_v4  ;;  %v8883_v12 = vadd.bf16 %v3540_v13, %v8654_v30  ;;  %v8900_v13 = vpop.f32.mrf.mxu1 }
 0x228   : > { %v8826_v7 = vpop.permute.xlu0 %1670  ;;  %13705 = vst [vmem:[#allocation35_spill] sm:$0xff] %v8861_v32  ;;  %v8887_v29 = vadd.f32 %v8531_v51, %v8455_v45  ;;  %v6159_v33 = vsel %vm8854_vm11, 1.0, %v13683_v4  ;;  %vm1537_vm2 = vcmp.eq.f32.partialorder %v8690_v59, %v8152_v56  ;;  %v3734_v41 = vmul.bf16 1061961548, %v3638_v21  ;;  %v8918_v34 = vpop.f32.mrf.mxu0 }
 0x229   : > { %13700 = vst [vmem:[#allocation34_spill] sm:$0xff] %v8826_v7  ;;  %7054 = vset.pattern.permute.xlu0 %v13669_v39  ;;  %13706 = vst [vmem:[#allocation36_spill] sm:$0xff] %v8883_v12  ;;  %v8898_v6 = vadd.f32 %v8570_v0, %v8458_v23  ;;  %v1942_v5 = vadd.f32 %v6204_v44, %v1821_v60  ;;  %v8907_v50 = vpack.c.bf16 %v2691_v57, %v2687_v62  ;;  %v13730_v57 = vld [vmem:[#allocation4_spill] sm:$0xff] }
 0x22a   : > { %v703_v11 = vpop.permute.xlu1 %702  ;;  %1417 = vperm.xlu0 %7054, %v8639_v27   ;;  %vm1441_vm3 = vcmp.gt.f32.partialorder %v8690_v59, %v8152_v56  ;;  %v8914_v30 = vmul.bf16 %v3351_v19, %v8781_v37  ;;  %vm8925_vm4 = vmand %vm1537_vm2, %vm1556_vm6  ;;  %v1632_v60 = vadd.f32 %v6159_v33, %v1511_v20  ;;  %vm1752_vm7 = vcmp.gt.f32.partialorder %v8796_v22, %v8143_v61 }
 0x22b   : > { %vm812_vm13 = vcmp.gt.f32.partialorder %v703_v11, %v8171_v10  ;;  %vm908_vm14 = vcmp.eq.f32.partialorder %v703_v11, %v8171_v10  ;;  %7034 = vset.pattern.permute.xlu1 %v13669_v39  ;;  %13707 = vst [vmem:[#allocation37_spill] sm:$0xff] %v8907_v50  ;;  %v8916_v11 = vpack.c.bf16 %v2844_v54, %v2840_v16  ;;  %7312 = vtanh.bf16 %v3734_v41  ;;  %v8944_v54 = vpop.f32.mrf.mxu1 }
 0x22c   : > { %vm933_vm15 = vmand %vm908_vm14, %vm930_vm1  ;;  %1389 = vperm.xlu1 %7034, %v8285_v52   ;;  %v6038_v51 = vsel %vm812_vm13, 1.0, %v13683_v4  ;;  %13708 = vst [vmem:[#allocation38_spill] sm:$0xff] %v8914_v30  ;;  %vm1848_vm10 = vcmp.eq.f32.partialorder %v8796_v22, %v8143_v61  ;;  %v7309_v20 = vpop.eup %7308  ;;  %v8950_v44 = vsel %vm1441_vm3, 1.0, %v13683_v4  ;;  %vm1966_vm13 = vcmp.lt.f32.partialorder %v1942_v5, 2.0 }
 0x22d   : > { %v8894_v47 = vpop.permute.xlu0 %1369  ;;  %v6062_v58 = vsel %vm933_vm15, 1.0, %v13683_v4  ;;  %13709 = vst [vmem:[#allocation39_spill] sm:$0xff] %v8916_v11  ;;  %vm1223_vm14 = vcmp.eq.f32.partialorder %v8760_v31, %v8158_v8  ;;  %v6183_v41 = vsel %vm1752_vm7, 1.0, %v13683_v4  ;;  %v3358_v0 = vmul.bf16 %v8916_v11, %v8916_v11  ;;  %vm8979_vm15 = vmand %vm1848_vm10, %vm1869_vm12 }
 0x22e   : > { %7057 = vset.pattern.permute.xlu0 %v13677_v42  ;;  %v1005_v19 = vadd.f32 %v6062_v58, %v6038_v51  ;;  %v3916_v51 = vadd.bf16 1065369472, %v7307_v46  ;;  %v3356_v58 = vmul.bf16 %v8907_v50, %v8907_v50  ;;  %v8967_v46 = vpop.f32.mrf.mxu0  ;;  %v8972_v52 = vsel %vm8925_vm4, 1.0, %v13683_v4  ;;  %vm9003_vm4 = vmand %vm1223_vm14, %vm1243_vm5 }
 0x22f   : > { %v1037_v21 = vpop.permute.xlu1 %1036  ;;  %1100 = vperm.xlu0 %7057, %v8627_v53   ;;  %v1824_v12 = vadd.f32 %v6183_v41, %v1632_v60  ;;  %vm1127_vm2 = vcmp.gt.f32.partialorder %v8760_v31, %v8158_v8  ;;  %v8994_v22 = vsel %vm1966_vm13, %v8127_v43, 0.0  ;;  %v3918_v60 = vadd.bf16 1065369472, %v7309_v20  ;;  %v8996_v41 = vpop.f32.mrf.mxu1 }
 0x230   : > { %vm1125_vm8 = vcmp.gt.f32.partialorder %v1037_v21, %v8171_v10  ;;  %vm1221_vm9 = vcmp.eq.f32.partialorder %v1037_v21, %v8171_v10  ;;  %7037 = vset.pattern.permute.xlu1 %v13677_v42  ;;  %v8956_v21 = vpop.eup %7310  ;;  %13717 = vst [vmem:[#allocation41_spill] sm:$0xff] %v8994_v22  ;;  %v3452_v5 = vmul.bf16 %v3356_v58, %v8907_v50  ;;  %v9016_v32 = vmul.bf16 1056980736, %v3916_v51 }
 0x231   : > { %v6086_v16 = vsel %vm1125_vm8, 1.0, %v13683_v4  ;;  %vm8939_vm11 = vmand %vm1221_vm9, %vm1243_vm5  ;;  %1088 = vperm.xlu1 %7037, %v8305_v63   ;;  %13714 = vst [vmem:[#allocation40_spill] sm:$0xff] %v8956_v21  ;;  %v2693_v43 = vadd.f32 %v8675_v14, %v8455_v45  ;;  %v2846_v20 = vadd.f32 %v8705_v18, %v8458_v23  ;;  %v6207_v3 = vsel %vm8979_vm15, 1.0, %v13683_v4 }
 0x232   : > { %v8952_v33 = vpop.permute.xlu0 %1052  ;;  %v1197_v59 = vadd.f32 %v6086_v16, %v1005_v19  ;;  %v6110_v16 = vsel %vm8939_vm11, 1.0, %v13683_v4  ;;  %13721 = vst [vmem:[#allocation43_spill] sm:$0xff] %v9016_v32  ;;  %v1945_v18 = vadd.f32 %v6207_v3, %v1824_v12  ;;  %v2850_v58 = vadd.f32 %v8774_v26, %v8357_v36  ;;  %v9058_v12 = vpop.f32.mrf.mxu1 }
 0x233   : > { %7059 = vset.pattern.permute.xlu0 %v13687_v24  ;;  %v2854_v51 = vadd.f32 %v8874_v17, %v8357_v36  ;;  %v9054_v31 = vsel %vm13569_vm0, %v8994_v22, 0.0  ;;  %v9056_v17 = vmul.bf16 1056980736, %v3918_v60  ;;  %vm1753_vm9 = vcmp.gt.f32.partialorder %v8826_v7, %v8158_v8  ;;  %v13731_v60 = vld [vmem:[#allocation17_spill] sm:$0xff] }
 0x234   : > { %v1350_v37 = vpop.permute.xlu1 %1349  ;;  %1726 = vperm.xlu0 %7059, %v8627_v53   ;;  %v1318_v62 = vadd.f32 %v6110_v16, %v1197_v59  ;;  %v3454_v53 = vmul.bf16 %v3358_v0, %v8916_v11  ;;  %v9036_v0 = vsel %vm1127_vm2, 1.0, %v13683_v4  ;;  %v9041_v59 = vsel %vm9003_vm4, 1.0, %v13683_v4  ;;  %13726 = vst [vmem:[#allocation46_spill] sm:$0xff] %v9054_v31  ;;  %v9097_v3 = vpop.f32.mrf.mxu1 }
 0x235   : > { %vm1438_vm3 = vcmp.gt.f32.partialorder %v1350_v37, %v8171_v10  ;;  %7039 = vset.pattern.permute.xlu1 %v13687_v24  ;;  %vm1534_vm7 = vcmp.eq.f32.partialorder %v1350_v37, %v8171_v10  ;;  %13722 = vst [vmem:[#allocation44_spill] sm:$0xff] %v9036_v0  ;;  %13723 = vst [vmem:[#allocation45_spill] sm:$0xff] %v9041_v59  ;;  %v3548_v37 = vmul.bf16 1027030327, %v3452_v5  ;;  %vm1969_vm11 = vcmp.lt.f32.partialorder %v1945_v18, 2.0 }
 0x236   : > { %1714 = vperm.xlu1 %7039, %v8305_v63   ;;  %v9022_v63 = vpop.f32.mrf.mxu0  ;;  %v6134_v14 = vsel %vm1438_vm3, 1.0, %v13683_v4  ;;  %vm9047_vm8 = vmand %vm1534_vm7, %vm1556_vm6  ;;  %13727 = vst [vmem:[#allocation47_spill] sm:$0xff] %v9056_v17  ;;  %v9064_v19 = vpack.c.bf16 %v2693_v43, %v8887_v29  ;;  %v9067_v16 = vpack.c.bf16 %v2846_v20, %v8898_v6  ;;  %vm1539_vm10 = vcmp.eq.f32.partialorder %v8894_v47, %v13730_v57  ;;  %v13750_v20 = vld [vmem:[#allocation28_spill] sm:$0xff] }
 0x237   : > { %v9014_v30 = vpop.permute.xlu0 %1678  ;;  %v1510_v22 = vadd.f32 %v6134_v14, %v1318_v62  ;;  %v3550_v31 = vmul.bf16 1027030327, %v3454_v53  ;;  %v2697_v59 = vadd.f32 %v8739_v40, %v8326_v15  ;;  %v6158_v29 = vsel %vm9047_vm8, 1.0, %v13683_v4  ;;  %vm9117_vm2 = vmand %vm1539_vm10, %vm1556_vm6 }
 0x238   : > { %13720 = vst [vmem:[#allocation42_spill] sm:$0xff] %v9014_v30  ;;  %7060 = vset.pattern.permute.xlu0 %v13696_v48  ;;  %13728 = vst [vmem:[#allocation48_spill] sm:$0xff] %v9064_v19  ;;  %v9074_v0 = vpop.f32.mrf.mxu0  ;;  %v2701_v6 = vadd.f32 %v8847_v1, %v8326_v15  ;;  %v9083_v43 = vpack.c.bf16 %v2854_v51, %v2850_v58  ;;  %v9089_v53 = vsel %vm1753_vm9, 1.0, %v13683_v4 }
 0x239   : > { %v1663_v26 = vpop.permute.xlu1 %1662  ;;  %797 = vperm.xlu0 %7060, %v8720_v9   ;;  %13729 = vst [vmem:[#allocation49_spill] sm:$0xff] %v9067_v16  ;;  %13733 = vst [vmem:[#allocation50_spill] sm:$0xff] %v9089_v53  ;;  %v9102_v58 = vadd.bf16 %v3548_v37, %v8907_v50  ;;  %v3357_v51 = vmul.bf16 %v9064_v19, %v9064_v19  ;;  %v3359_v53 = vmul.bf16 %v9067_v16, %v9067_v16  ;;  %v9108_v62 = vpop.eup %7312 }
 0x23a   : > { %7040 = vset.pattern.permute.xlu1 %v13696_v48  ;;  %13732 = vst [vmem:[#allocation4_spill] sm:$0xff] %v9083_v43  ;;  %vm1751_vm13 = vcmp.gt.f32.partialorder %v1663_v26, %v8171_v10  ;;  %vm1847_vm14 = vcmp.eq.f32.partialorder %v1663_v26, %v8171_v10  ;;  %13737 = vst [vmem:[#allocation52_spill] sm:$0xff] %v9108_v62  ;;  %vm1443_vm15 = vcmp.gt.f32.partialorder %v8894_v47, %v13730_v57 }
 0x23b   : > { %762 = vperm.xlu1 %7040, %v13731_v60   ;;  %13736 = vst [vmem:[#allocation51_spill] sm:$0xff] %v9102_v58  ;;  %v1631_v37 = vadd.f32 %v6158_v29, %v1510_v22  ;;  %v9124_v50 = vsel %vm1969_vm11, %v8143_v61, 0.0  ;;  %v9127_v7 = vadd.bf16 %v3550_v31, %v8916_v11  ;;  %v9129_v58 = vpop.f32.mrf.mxu0  ;;  %v6182_v62 = vsel %vm1751_vm13, 1.0, %v13683_v4  ;;  %vm9144_vm4 = vmand %vm1847_vm14, %vm1869_vm12 }
 0x23c   : > { %v9079_v5 = vpop.permute.xlu0 %737  ;;  %13740 = vst [vmem:[#allocation53_spill] sm:$0xff] %v9124_v50  ;;  %v9136_v22 = vpack.c.bf16 %v2701_v6, %v2697_v59  ;;  %v3366_v18 = vmul.bf16 %v9083_v43, %v9083_v43  ;;  %v2699_v29 = vadd.f32 %v8799_v28, %v8455_v45  ;;  %v2852_v59 = vadd.f32 %v8820_v49, %v8458_v23 }
 0x23d   : > { %7062 = vset.pattern.permute.xlu0 %v13669_v39  ;;  %v2703_v6 = vadd.f32 %v8900_v13, %v8455_v45  ;;  %v2856_v11 = vadd.f32 %v8918_v34, %v8458_v23  ;;  %v9164_v26 = vsel %vm1443_vm15, 1.0, %v13683_v4  ;;  %v9169_v28 = vsel %vm9117_vm2, 1.0, %v13683_v4 }
 0x23e   : > { %v718_v1 = vpop.permute.xlu1 %717  ;;  %1425 = vperm.xlu0 %7062, %v8720_v9   ;;  %13741 = vst [vmem:[#allocation54_spill] sm:$0xff] %v9136_v22  ;;  %13744 = vst [vmem:[#allocation55_spill] sm:$0xff] %v9164_v26  ;;  %v9173_v49 = vmul.bf16 %v3357_v51, %v9064_v19  ;;  %v9176_v34 = vmul.bf16 %v3359_v53, %v9067_v16  ;;  %v1823_v13 = vadd.f32 %v6182_v62, %v1631_v37  ;;  %v9193_v62 = vpop.f32.mrf.mxu0  ;;  %v13752_v37 = vld [vmem:[#allocation5_spill] sm:$0xff] }
 0x23f   : > { %7042 = vset.pattern.permute.xlu1 %v13669_v39  ;;  %vm911_vm3 = vcmp.eq.f32.partialorder %v718_v1, %v8152_v56  ;;  %13745 = vst [vmem:[#allocation56_spill] sm:$0xff] %v9169_v28  ;;  %vm815_vm7 = vcmp.gt.f32.partialorder %v718_v1, %v8152_v56  ;;  %v9190_v51 = vsel %vm13569_vm0, %v9124_v50, 0.0  ;;  %v3742_v53 = vmul.bf16 1061961548, %v9127_v7  ;;  %v13753_v50 = vld [vmem:[#allocation21_spill] sm:$0xff] }
 0x240   : > { %1397 = vperm.xlu1 %7042, %v13731_v60   ;;  %v9158_v60 = vpop.f32.mrf.mxu1  ;;  %13746 = vst [vmem:[#allocation57_spill] sm:$0xff] %v9173_v49  ;;  %13747 = vst [vmem:[#allocation58_spill] sm:$0xff] %v9176_v34  ;;  %vm1129_vm9 = vcmp.gt.f32.partialorder %v8952_v33, %v13752_v37  ;;  %v6206_v16 = vsel %vm9144_vm4, 1.0, %v13683_v4  ;;  %v3364_v19 = vmul.bf16 %v9136_v22, %v9136_v22  ;;  %v6041_v61 = vsel %vm815_vm7, 1.0, %v13683_v4 }
 0x241   : > { %v9148_v31 = vpop.permute.xlu0 %1377  ;;  %vm9183_vm8 = vmand %vm911_vm3, %vm930_vm1  ;;  %13751 = vst [vmem:[#allocation59_spill] sm:$0xff] %v9190_v51  ;;  %v3462_v17 = vmul.bf16 %v3366_v18, %v9083_v43  ;;  %v9206_v7 = vpack.c.bf16 %v2703_v6, %v2699_v29  ;;  %v9208_v51 = vpack.c.bf16 %v2856_v11, %v2852_v59  ;;  %v2707_v40 = vadd.f32 %v8944_v54, %v8326_v15  ;;  %v13756_v29 = vld [vmem:[#allocation6_spill] sm:$0xff]  ;;  %v9232_v6 = vpop.f32.mrf.mxu0 }
 0x242   : > { %7065 = vset.pattern.permute.xlu0 %v13677_v42  ;;  %v9212_v32 = vpop.f32.mrf.mxu1  ;;  %v6065_v18 = vsel %vm9183_vm8, 1.0, %v13683_v4  ;;  %v2860_v11 = vadd.f32 %v8967_v46, %v8357_v36  ;;  %vm915_vm13 = vcmp.eq.f32.partialorder %v9079_v5, %v13756_v29  ;;  %v1944_v54 = vadd.f32 %v6206_v16, %v1823_v13 }
 0x243   : > { %v1049_v14 = vpop.permute.xlu1 %1048  ;;  %1108 = vperm.xlu0 %7065, %v13750_v20   ;;  %13754 = vst [vmem:[#allocation5_spill] sm:$0xff] %v9206_v7  ;;  %13755 = vst [vmem:[#allocation60_spill] sm:$0xff] %v9208_v51  ;;  %v2711_v1 = vadd.f32 %v9058_v12, %v8326_v15  ;;  %v2864_v59 = vadd.f32 %v9074_v0, %v8357_v36  ;;  %v3460_v16 = vmul.bf16 %v3364_v19, %v9136_v22  ;;  %v9284_v49 = vpop.f32.mrf.mxu0 }
 0x244   : > { %7045 = vset.pattern.permute.xlu1 %v13677_v42  ;;  %vm1128_vm10 = vcmp.gt.f32.partialorder %v1049_v14, %v8152_v56  ;;  %vm1224_vm11 = vcmp.eq.f32.partialorder %v1049_v14, %v8152_v56  ;;  %v3558_v13 = vmul.bf16 1027030327, %v3462_v17  ;;  %v1008_v26 = vadd.f32 %v6065_v18, %v6041_v61  ;;  %v9256_v17 = vpop.f32.mrf.mxu1  ;;  %vm9273_vm3 = vmand %vm915_vm13, %vm930_vm1 }
 0x245   : > { %1096 = vperm.xlu1 %7045, %v13753_v50   ;;  %v6089_v47 = vsel %vm1128_vm10, 1.0, %v13683_v4  ;;  %vm9246_vm14 = vmand %vm1224_vm11, %vm1243_vm5  ;;  %v3367_v19 = vmul.bf16 %v9208_v51, %v9208_v51  ;;  %v9262_v14 = vsel %vm1129_vm9, 1.0, %v13683_v4  ;;  %vm1225_vm15 = vcmp.eq.f32.partialorder %v8952_v33, %v13752_v37 }
 0x246   : > { %v9221_v28 = vpop.permute.xlu0 %1060  ;;  %13759 = vst [vmem:[#allocation6_spill] sm:$0xff] %v9262_v14  ;;  %vm819_vm2 = vcmp.gt.f32.partialorder %v9079_v5, %v13756_v29  ;;  %7314 = vtanh.bf16 %v3742_v53  ;;  %v1200_v18 = vadd.f32 %v6089_v47, %v1008_v26  ;;  %vm1968_vm4 = vcmp.lt.f32.partialorder %v1944_v54, 2.0  ;;  %vm9298_vm8 = vmand %vm1225_vm15, %vm1243_vm5 }
 0x247   : > { %7067 = vset.pattern.permute.xlu0 %v13687_v24  ;;  %v9280_v46 = vpack.c.bf16 %v2711_v1, %v2707_v40  ;;  %v9282_v34 = vpack.c.bf16 %v2864_v59, %v2860_v11  ;;  %vm1755_vm7 = vcmp.gt.f32.partialorder %v9014_v30, %v13752_v37  ;;  %v6113_v14 = vsel %vm9246_vm14, 1.0, %v13683_v4  ;;  %v13781_v40 = vld [vmem:[#allocation22_spill] sm:$0xff] }
 0x248   : > { %v9237_v9 = vpop.permute.xlu1 %1674  ;;  %1734 = vperm.xlu0 %7067, %v13750_v20   ;;  %v3365_v20 = vmul.bf16 %v9206_v7, %v9206_v7  ;;  %v3556_v53 = vmul.bf16 1027030327, %v3460_v16  ;;  %v3654_v26 = vadd.bf16 %v3558_v13, %v9083_v43  ;;  %v6045_v11 = vsel %vm819_vm2, 1.0, %v13683_v4  ;;  %v9318_v16 = vpop.f32.mrf.mxu1 }
 0x249   : > { %7047 = vset.pattern.permute.xlu1 %v13687_v24  ;;  %13763 = vst [vmem:[#allocation62_spill] sm:$0xff] %v9280_v46  ;;  %13764 = vst [vmem:[#allocation63_spill] sm:$0xff] %v9282_v34  ;;  %v6069_v1 = vsel %vm9273_vm3, 1.0, %v13683_v4  ;;  %v9316_v33 = vmul.bf16 %v3367_v19, %v9208_v51  ;;  %vm1541_vm9 = vcmp.eq.f32.partialorder %v9148_v31, %v13756_v29  ;;  %v9325_v5 = vsel %vm1968_vm4, %v8171_v10, 0.0  ;;  %v13770_v19 = vld [vmem:[#allocation23_spill] sm:$0xff]  ;;  %v9338_v10 = vpop.f32.mrf.mxu0 }
 0x24a   : > { %1722 = vperm.xlu1 %7047, %v13753_v50   ;;  %v9313_v47 = vmul.bf16 %v3365_v20, %v9206_v7  ;;  %13769 = vst [vmem:[#allocation66_spill] sm:$0xff] %v9325_v5  ;;  %v2709_v13 = vadd.f32 %v8996_v41, %v8455_v45  ;;  %v2713_v20 = vadd.f32 %v9097_v3, %v8455_v45  ;;  %v9343_v41 = vsel %vm9298_vm8, 1.0, %v13683_v4  ;;  %vm9363_vm11 = vmand %vm1541_vm9, %vm1556_vm6 }
 0x24b   : > { %v9278_v12 = vpop.permute.xlu0 %1686  ;;  %13768 = vst [vmem:[#allocation65_spill] sm:$0xff] %v9316_v33  ;;  %vm1445_vm10 = vcmp.gt.f32.partialorder %v9148_v31, %v13756_v29  ;;  %v1321_v0 = vadd.f32 %v6113_v14, %v1200_v18  ;;  %v3372_v61 = vmul.bf16 %v9280_v46, %v9280_v46  ;;  %v3374_v54 = vmul.bf16 %v9282_v34, %v9282_v34  ;;  %v9397_v7 = vpop.f32.mrf.mxu0 }
 0x24c   : > { %13762 = vst [vmem:[#allocation61_spill] sm:$0xff] %v9278_v12  ;;  %7068 = vset.pattern.permute.xlu0 %v13696_v48  ;;  %13767 = vst [vmem:[#allocation64_spill] sm:$0xff] %v9313_v47  ;;  %v9349_v3 = vsel %vm1755_vm7, 1.0, %v13683_v4  ;;  %v9354_v18 = vadd.bf16 %v3556_v53, %v9136_v22  ;;  %v3750_v43 = vmul.bf16 1061961548, %v3654_v26  ;;  %v9356_v51 = vadd.f32 %v6069_v1, %v6045_v11  ;;  %v9373_v11 = vpop.f32.mrf.mxu1 }
 0x24d   : > { %v9309_v59 = vpop.permute.xlu1 %712  ;;  %807 = vperm.xlu0 %7068, %v8956_v21   ;;  %13771 = vst [vmem:[#allocation67_spill] sm:$0xff] %v9343_v41  ;;  %13772 = vst [vmem:[#allocation68_spill] sm:$0xff] %v9349_v3  ;;  %v2862_v53 = vadd.f32 %v9022_v63, %v8458_v23  ;;  %v2866_v26 = vadd.f32 %v9129_v58, %v8458_v23  ;;  %v9379_v1 = vsel %vm1445_vm10, 1.0, %v13683_v4  ;;  %v9386_v3 = vsel %vm13569_vm0, %v9325_v5, 0.0  ;;  %v9443_v30 = vpop.f32.mrf.mxu0 }
 0x24e   : > { %7048 = vset.pattern.permute.xlu1 %v13696_v48  ;;  %13773 = vst [vmem:[#allocation69_spill] sm:$0xff] %v9354_v18  ;;  %13776 = vst [vmem:[#allocation70_spill] sm:$0xff] %v9386_v3  ;;  %v9389_v18 = vpack.c.bf16 %v2713_v20, %v2709_v13  ;;  %v1513_v58 = vadd.f32 %v8950_v44, %v1321_v0  ;;  %vm910_vm13 = vcmp.eq.f32.partialorder %v9309_v59, %v8158_v8  ;;  %v13779_v0 = vld [vmem:[#allocation7_spill] sm:$0xff] }
 0x24f   : > { %772 = vperm.xlu1 %7048, %v13770_v19   ;;  %v3468_v31 = vmul.bf16 %v3372_v61, %v9280_v46  ;;  %v3470_v47 = vmul.bf16 %v3374_v54, %v9282_v34  ;;  %v9402_v5 = vsel %vm9363_vm11, 1.0, %v13683_v4  ;;  %7316 = vtanh.bf16 %v3750_v43  ;;  %vm9434_vm4 = vmand %vm910_vm13, %vm930_vm1 }
 0x250   : > { %v9351_v14 = vpop.permute.xlu0 %747  ;;  %13777 = vst [vmem:[#allocation71_spill] sm:$0xff] %v9389_v18  ;;  %v9407_v44 = vadd.f32 %v9158_v60, %v8326_v15  ;;  %v13778_v13 = vmul.bf16 1027030327, %v8766_v55  ;;  %vm1131_vm14 = vcmp.gt.f32.partialorder %v9221_v28, %v13779_v0  ;;  %vm1227_vm15 = vcmp.eq.f32.partialorder %v9221_v28, %v13779_v0  ;;  %v9423_v60 = vpop.f32.mrf.mxu1 }
 0x251   : > { %7070 = vset.pattern.permute.xlu0 %v13669_v39  ;;  %v9418_v54 = vpack.c.bf16 %v2866_v26, %v2862_v53  ;;  %v13782_v43 = vmul.bf16 1027030327, %v8772_v35  ;;  %vm1754_vm2 = vcmp.gt.f32.partialorder %v9237_v9, %v8152_v56  ;;  %vm814_vm3 = vcmp.gt.f32.partialorder %v9309_v59, %v8158_v8  ;;  %vm9462_vm9 = vmand %vm1227_vm15, %vm1243_vm5 }
 0x252   : > { %v9381_v22 = vpop.permute.xlu1 %1357  ;;  %1433 = vperm.xlu0 %7070, %v8956_v21   ;;  %v3629_v20 = vadd.bf16 %v13778_v13, %v8550_v25  ;;  %v3373_v35 = vmul.bf16 %v9389_v18, %v9389_v18  ;;  %v1634_v26 = vadd.f32 %v8972_v52, %v1513_v58  ;;  %v3566_v33 = vmul.bf16 1027030327, %v3470_v47  ;;  %v9478_v28 = vpop.f32.mrf.mxu1 }
 0x253   : > { %7050 = vset.pattern.permute.xlu1 %v13669_v39  ;;  %13780 = vst [vmem:[#allocation7_spill] sm:$0xff] %v9418_v54  ;;  %v3631_v63 = vadd.bf16 %v13782_v43, %v13781_v40  ;;  %v3564_v43 = vmul.bf16 1027030327, %v3468_v31  ;;  %v9451_v3 = vsel %vm1131_vm14, 1.0, %v13683_v4  ;;  %vm1850_vm7 = vcmp.eq.f32.partialorder %v9237_v9, %v8152_v56 }
 0x254   : > { %1405 = vperm.xlu1 %7050, %v13770_v19   ;;  %v3725_v53 = vmul.bf16 1061961548, %v3629_v20  ;;  %v9445_v50 = vpop.eup %7314  ;;  %13786 = vst [vmem:[#allocation72_spill] sm:$0xff] %v9451_v3  ;;  %v6185_v47 = vsel %vm1754_vm2, 1.0, %v13683_v4  ;;  %v6064_v58 = vsel %vm9434_vm4, 1.0, %v13683_v4  ;;  %vm1757_vm10 = vcmp.gt.f32.partialorder %v9278_v12, %v13779_v0  ;;  %vm9500_vm14 = vmand %vm1850_vm7, %vm1869_vm12 }
 0x255   : > { %v9416_v61 = vpop.permute.xlu0 %1385  ;;  %v3727_v19 = vmul.bf16 1061961548, %v3631_v63  ;;  %13785 = vst [vmem:[#allocation22_spill] sm:$0xff] %v9445_v50  ;;  %v6040_v63 = vsel %vm814_vm3, 1.0, %v13683_v4  ;;  %v3375_v20 = vmul.bf16 %v9418_v54, %v9418_v54  ;;  %v1826_v55 = vadd.f32 %v6185_v47, %v1634_v26  ;;  %v13794_v47 = vld [vmem:[#allocation8_spill] sm:$0xff] }
 0x256   : > { %7073 = vset.pattern.permute.xlu0 %v13677_v42  ;;  %7318 = vtanh.bf16 %v3725_v53  ;;  %v3660_v50 = vadd.bf16 %v3564_v43, %v9280_v46  ;;  %v3662_v3 = vadd.bf16 %v3566_v33, %v9282_v34  ;;  %v9508_v21 = vmul.bf16 %v3373_v35, %v9389_v18 }
 0x257   : > { %v728_v13 = vpop.permute.xlu1 %727  ;;  %1116 = vperm.xlu0 %7073, %v8786_v2   ;;  %7320 = vtanh.bf16 %v3727_v19  ;;  %v2870_v19 = vadd.f32 %v9193_v62, %v8357_v36  ;;  %v9510_v62 = vpop.f32.mrf.mxu0  ;;  %v1007_v26 = vadd.f32 %v6064_v58, %v6040_v63  ;;  %vm917_vm15 = vcmp.eq.f32.partialorder %v9351_v14, %v13794_v47 }
 0x258   : > { %vm913_vm8 = vcmp.eq.f32.partialorder %v728_v13, %v13730_v57  ;;  %7053 = vset.pattern.permute.xlu1 %v13677_v42  ;;  %vm817_vm11 = vcmp.gt.f32.partialorder %v728_v13, %v13730_v57  ;;  %13793 = vst [vmem:[#allocation73_spill] sm:$0xff] %v9508_v21  ;;  %v2721_v41 = vadd.f32 %v9256_v17, %v8326_v15  ;;  %v9528_v63 = vpop.f32.mrf.mxu1  ;;  %v9539_v17 = vsel %vm1757_vm10, 1.0, %v13683_v4  ;;  %vm9555_vm7 = vmand %vm917_vm15, %vm930_vm1 }
 0x259   : > { %1104 = vperm.xlu1 %7053, %v8639_v27   ;;  %vm9485_vm13 = vmand %vm913_vm8, %vm930_vm1  ;;  %v2874_v43 = vadd.f32 %v9284_v49, %v8357_v36  ;;  %v6043_v33 = vsel %vm817_vm11, 1.0, %v13683_v4  ;;  %v9533_v49 = vsel %vm9462_vm9, 1.0, %v13683_v4  ;;  %13796 = vst [vmem:[#allocation74_spill] sm:$0xff] %v9539_v17  ;;  %v6209_v13 = vsel %vm9500_vm14, 1.0, %v13683_v4 }
 0x25a   : > { %v9489_v59 = vpop.permute.xlu0 %1068  ;;  %v6067_v35 = vsel %vm9485_vm13, 1.0, %v13683_v4  ;;  %13795 = vst [vmem:[#allocation8_spill] sm:$0xff] %v9533_v49  ;;  %v9546_v58 = vmul.bf16 %v3375_v20, %v9418_v54  ;;  %vm821_vm4 = vcmp.gt.f32.partialorder %v9351_v14, %v13794_v47  ;;  %v1947_v53 = vadd.f32 %v6209_v13, %v1826_v55  ;;  %v9562_v20 = vpop.f32.mrf.mxu0  ;;  %v13801_v54 = vld [vmem:[#allocation44_spill] sm:$0xff]  ;;  %v13810_v13 = vld [vmem:[#allocation45_spill] sm:$0xff] }
 0x25b   : > { %7075 = vset.pattern.permute.xlu0 %v13687_v24  ;;  %v3756_v46 = vmul.bf16 1061961548, %v3660_v50  ;;  %v1199_v18 = vadd.f32 %v13801_v54, %v1007_v26  ;;  %v1010_v17 = vadd.f32 %v6067_v35, %v6043_v33  ;;  %v9575_v49 = vpack.c.bf16 %v2721_v41, %v9407_v44 }
 0x25c   : > { %v1057_v9 = vpop.permute.xlu1 %1056  ;;  %1742 = vperm.xlu0 %7075, %v8786_v2   ;;  %13797 = vst [vmem:[#allocation75_spill] sm:$0xff] %v9546_v58  ;;  %vm1536_vm9 = vcmp.eq.f32.partialorder %v9381_v22, %v8158_v8  ;;  %v3758_v54 = vmul.bf16 1061961548, %v3662_v3  ;;  %v2719_v55 = vadd.f32 %v9212_v32, %v8455_v45  ;;  %v9584_v26 = vpack.c.bf16 %v2874_v43, %v2870_v19  ;;  %v13808_v19 = vld [vmem:[#allocation25_spill] sm:$0xff]  ;;  %v9605_v43 = vpop.f32.mrf.mxu0 }
 0x25d   : > { %vm1130_vm2 = vcmp.gt.f32.partialorder %v1057_v9, %v13730_v57  ;;  %vm1226_vm3 = vcmp.eq.f32.partialorder %v1057_v9, %v13730_v57  ;;  %7055 = vset.pattern.permute.xlu1 %v13687_v24  ;;  %13804 = vst [vmem:[#allocation44_spill] sm:$0xff] %v9575_v49  ;;  %v9586_v9 = vpop.f32.mrf.mxu1  ;;  %v9588_v33 = vpop.eup %7316  ;;  %v6047_v41 = vsel %vm821_vm4, 1.0, %v13683_v4  ;;  %v6071_v44 = vsel %vm9555_vm7, 1.0, %v13683_v4  ;;  %13809 = vst [vmem:[#allocation80_spill] sm:$0xff] %v9605_v43 }
 0x25e   : > { %1730 = vperm.xlu1 %7055, %v8639_v27   ;;  %v6091_v31 = vsel %vm1130_vm2, 1.0, %v13683_v4  ;;  %vm9569_vm8 = vmand %vm1226_vm3, %vm1243_vm5  ;;  %13805 = vst [vmem:[#allocation77_spill] sm:$0xff] %v9584_v26  ;;  %vm1971_vm10 = vcmp.lt.f32.partialorder %v1947_v53, 2.0  ;;  %7322 = vtanh.bf16 %v3756_v46  ;;  %v2723_v14 = vadd.f32 %v9318_v16, %v8455_v45  ;;  %v9665_v53 = vpop.f32.mrf.mxu0 }
 0x25f   : > { %v9560_v34 = vpop.permute.xlu0 %1694  ;;  %13806 = vst [vmem:[#allocation78_spill] sm:$0xff] %v9586_v9  ;;  %13807 = vst [vmem:[#allocation79_spill] sm:$0xff] %v9588_v33  ;;  %v1202_v35 = vadd.f32 %v6091_v31, %v1010_v17  ;;  %v6115_v3 = vsel %vm9569_vm8, 1.0, %v13683_v4  ;;  %v1320_v52 = vadd.f32 %v13810_v13, %v1199_v18  ;;  %vm1440_vm11 = vcmp.gt.f32.partialorder %v9381_v22, %v8158_v8  ;;  %v9631_v13 = vpop.f32.mrf.mxu1 }
 0x260   : > { %13800 = vst [vmem:[#allocation76_spill] sm:$0xff] %v9560_v34  ;;  %7076 = vset.pattern.permute.xlu0 %v13696_v48  ;;  %vm9615_vm13 = vmand %vm1536_vm9, %vm1556_vm6  ;;  %vm1543_vm14 = vcmp.eq.f32.partialorder %v9416_v61, %v13794_v47  ;;  %v3380_v16 = vmul.bf16 %v9575_v49, %v9575_v49  ;;  %v9625_v18 = vadd.f32 %v6071_v44, %v6047_v41  ;;  %7324 = vtanh.bf16 %v3758_v54  ;;  %v13815_v54 = vld [vmem:[#allocation30_spill] sm:$0xff]  ;;  %v13816_v44 = vld [vmem:[#allocation35_spill] sm:$0xff] }
 0x261   : > { %v9580_v50 = vpop.permute.xlu1 %1682  ;;  %v2872_v17 = vadd.f32 %v9232_v6, %v8458_v23  ;;  %v3382_v31 = vmul.bf16 %v9584_v26, %v9584_v26  ;;  %13813 = vst [vmem:[#allocation45_spill] sm:$0xff] %v9631_v13  ;;  %vm1447_vm15 = vcmp.gt.f32.partialorder %v9416_v61, %v13794_v47  ;;  %v1323_v27 = vadd.f32 %v6115_v3, %v1202_v35  ;;  %vm9656_vm2 = vmand %vm1543_vm14, %vm1556_vm6 }
 0x262   : > { %7056 = vset.pattern.permute.xlu1 %v13696_v48  ;;  %v9639_v41 = vsel %vm1971_vm10, %v8152_v56, 0.0  ;;  %v13817_v21 = vmul.bf16 1027030327, %v13816_v44  ;;  %v6136_v13 = vsel %vm1440_vm11, 1.0, %v13683_v4  ;;  %v6160_v35 = vsel %vm9615_vm13, 1.0, %v13683_v4  ;;  %13821 = vst [vmem:[#allocation35_spill] sm:$0xff] %v9665_v53 }
 0x263   : > { %782 = vperm.xlu1 %7056, %v13808_v19   ;;  %13814 = vst [vmem:[#allocation81_spill] sm:$0xff] %v9639_v41  ;;  %v2876_v22 = vadd.f32 %v9338_v10, %v8458_v23  ;;  %v1512_v3 = vadd.f32 %v6136_v13, %v1320_v52  ;;  %v3476_v8 = vmul.bf16 %v3380_v16, %v9575_v49  ;;  %v9673_v43 = vsel %vm1447_vm15, 1.0, %v13683_v4  ;;  %v9682_v13 = vpop.f32.mrf.mxu1  ;;  %v13827_v53 = vld [vmem:[#allocation38_spill] sm:$0xff] }
 0x264   : > { %v9621_v46 = vpop.permute.xlu0 %757  ;;  %v7319_v32 = vpop.eup %7318  ;;  %v3637_v6 = vadd.bf16 %v13817_v21, %v13815_v54  ;;  %v9661_v21 = vpack.c.bf16 %v2723_v14, %v2719_v55  ;;  %13822 = vst [vmem:[#allocation82_spill] sm:$0xff] %v9673_v43  ;;  %v9679_v10 = vsel %vm13569_vm0, %v9639_v41, 0.0  ;;  %v3478_v14 = vmul.bf16 %v3382_v31, %v9584_v26  ;;  %13823 = vst [vmem:[#allocation83_spill] sm:$0xff] %v9682_v13 }
 0x265   : > { %v7321_v33 = vpop.eup %7320  ;;  %v3917_v12 = vadd.bf16 1065369472, %v7319_v32  ;;  %v13825_v32 = vld [vmem:[#allocation55_spill] sm:$0xff]  ;;  %v13828_v9 = vmul.bf16 1027030327, %v13827_v53  ;;  %v9699_v13 = vpop.f32.mrf.mxu0  ;;  %v9701_v56 = vadd.f32 %v6160_v35, %v1512_v3  ;;  %v13834_v3 = vld [vmem:[#allocation56_spill] sm:$0xff]  ;;  %vm1756_vm8 = vcmp.gt.f32.partialorder %v9580_v50, %v13730_v57 }
 0x266   : > { %v9635_v58 = vpop.permute.xlu1 %722  ;;  %13820 = vst [vmem:[#allocation30_spill] sm:$0xff] %v9661_v21  ;;  %v3919_v44 = vadd.bf16 1065369472, %v7321_v33  ;;  %v3733_v52 = vmul.bf16 1061961548, %v3637_v6  ;;  %v9687_v33 = vsel %vm9656_vm2, 1.0, %v13683_v4  ;;  %v1515_v61 = vadd.f32 %v13825_v32, %v1323_v27  ;;  %v9713_v53 = vpop.f32.mrf.mxu1 }
 0x267   : > { %7058 = vset.pattern.permute.xlu1 %v13669_v39  ;;  %13824 = vst [vmem:[#allocation84_spill] sm:$0xff] %v9687_v33  ;;  %v4013_v16 = vmul.bf16 1056980736, %v3917_v12  ;;  %v3381_v31 = vmul.bf16 %v9661_v21, %v9661_v21  ;;  %v9697_v6 = vpack.c.bf16 %v2876_v22, %v2872_v17  ;;  %v13831_v33 = vld [vmem:[#allocation9_spill] sm:$0xff]  ;;  %v3572_v27 = vmul.bf16 1027030327, %v3476_v8 }
 0x268   : > { %1413 = vperm.xlu1 %7058, %v13808_v19   ;;  %v13826_v19 = vld [vmem:[#allocation31_spill] sm:$0xff]  ;;  %v4015_v41 = vmul.bf16 1056980736, %v3919_v44  ;;  %7326 = vtanh.bf16 %v3733_v52  ;;  %vm1133_vm3 = vcmp.gt.f32.partialorder %v9489_v59, %v13831_v33  ;;  %vm1229_vm4 = vcmp.eq.f32.partialorder %v9489_v59, %v13831_v33  ;;  %13833 = vst [vmem:[#allocation38_spill] sm:$0xff] %v9713_v53  ;;  %v13840_v32 = vld [vmem:[#allocation10_spill] sm:$0xff] }
 0x269   : > { %v9675_v55 = vpop.permute.xlu0 %1393  ;;  %v3639_v2 = vadd.bf16 %v13828_v9, %v13826_v19  ;;  %13829 = vst [vmem:[#allocation55_spill] sm:$0xff] %v9697_v6  ;;  %13830 = vst [vmem:[#allocation31_spill] sm:$0xff] %v9701_v56  ;;  %vm912_vm7 = vcmp.eq.f32.partialorder %v9635_v58, %v13752_v37  ;;  %v13832_v9 = vld [vmem:[#allocation29_spill] sm:$0xff]  ;;  %v4109_v17 = vmul.bf16 %v4013_v16, %v8550_v25  ;;  %v3574_v35 = vmul.bf16 1027030327, %v3478_v14  ;;  %v13838_v14 = vld [vmem:[#allocation36_spill] sm:$0xff] }
 0x26a   : > { %v4111_v22 = vmul.bf16 %v4015_v41, %v13781_v40  ;;  %v1636_v12 = vadd.f32 %v13834_v3, %v1515_v61  ;;  %vm1852_vm9 = vcmp.eq.f32.partialorder %v9580_v50, %v13730_v57  ;;  %vm9724_vm10 = vmand %vm1229_vm4, %vm1243_vm5  ;;  %vm1759_vm11 = vcmp.gt.f32.partialorder %v9560_v34, %v13831_v33  ;;  %v13846_v3 = vld [vmem:[#allocation47_spill] sm:$0xff] }
 0x26b   : > { %v9693_v43 = vpop.permute.xlu1 %1365  ;;  %v3735_v44 = vmul.bf16 1061961548, %v3639_v2  ;;  %4369 = vmatprep.mubr.bf16.mxu1 %v4109_v17  ;;  %v9731_v40 = vmul.bf16 %v3381_v31, %v9661_v21  ;;  %v3383_v41 = vmul.bf16 %v9697_v6, %v9697_v6  ;;  %v3732_v52 = vmul.bf16 1061961548, %v13838_v14  ;;  %v9736_v2 = vpop.f32.mrf.mxu0  ;;  %vm9747_vm15 = vmand %vm912_vm7, %vm930_vm1  ;;  %v13843_v31 = vld [vmem:[#allocation43_spill] sm:$0xff]  ;;  %v13844_v17 = vld [vmem:[#allocation18_spill] sm:$0xff] }
 0x26c   : > { %7061 = vset.pattern.permute.xlu1 %v13677_v42  ;;  %4799 = vmatprep.mubr.bf16.mxu0 %v4111_v22  ;;  %13839 = vst [vmem:[#allocation56_spill] sm:$0xff] %v9736_v2  ;;  %vm919_vm13 = vcmp.eq.f32.partialorder %v9621_v46, %v13840_v32  ;;  %vm816_vm14 = vcmp.gt.f32.partialorder %v9635_v58, %v13752_v37  ;;  %v13847_v14 = vld [vmem:[#allocation19_spill] sm:$0xff]  ;;  %v9758_v56 = vpop.eup %7322  ;;  %v6187_v53 = vsel %vm1756_vm8, 1.0, %v13683_v4  ;;  %vm9769_vm2 = vmand %vm1852_vm9, %vm1869_vm12  ;;  %v9818_v58 = vsel %vm9724_vm10, 1.0, %v13683_v4 }
 0x26d   : > { %1112 = vperm.xlu1 %7061, %v13832_v9   ;;  %13837 = vst [vmem:[#allocation9_spill] sm:$0xff] %v9731_v40  ;;  %v13845_v22 = vmul.bf16 %v13843_v31, %v13844_v17  ;;  %v13848_v21 = vmul.bf16 %v13846_v3, %v13847_v14  ;;  %v3668_v2 = vadd.bf16 %v3572_v27, %v9575_v49  ;;  %7328 = vtanh.bf16 %v3735_v44  ;;  %vm9792_vm0 = vmand %vm919_vm13, %vm930_vm1  ;;  %v9807_v3 = vpop.f32.mrf.mxu0  ;;  %v13859_v31 = vld [vmem:[#allocation28_spill] sm:$0xff]  ;;  %v13873_v40 = vld [vmem:[#allocation11_spill] sm:$0xff] }
 0x26e   : > { %v9720_v8 = vpop.permute.xlu0 %1076  ;;  %13849 = vst [vmem:[#allocation36_spill] sm:$0xff] %v9758_v56  ;;  %7330 = vtanh.bf16 %v3732_v52  ;;  %v1828_v27 = vadd.f32 %v6187_v53, %v1636_v12  ;;  %vm823_vm8 = vcmp.gt.f32.partialorder %v9621_v46, %v13840_v32  ;;  %v3670_v50 = vadd.bf16 %v3574_v35, %v9584_v26  ;;  %v9785_v17 = vpop.eup %7324  ;;  %13855 = vst [vmem:[#allocation43_spill] sm:$0xff] %v9807_v3 }
 0x26f   : > { %4370 = vmatmul.mubr.bf16.vlgmr.msra.gmra.mxu1 %v13845_v22  ;;  %4800 = vmatmul.mubr.bf16.vlgmr.msra.gmra.mxu0 %v13848_v21  ;;  %v9776_v21 = vpop.f32.mrf.mxu1  ;;  %13852 = vst [vmem:[#allocation10_spill] sm:$0xff] %v9785_v17  ;;  %v6042_v12 = vsel %vm816_vm14, 1.0, %v13683_v4  ;;  %v6066_v35 = vsel %vm9747_vm15, 1.0, %v13683_v4  ;;  %v9813_v14 = vsel %vm1133_vm3, 1.0, %v13683_v4  ;;  %v9821_v61 = vmul.bf16 %v3383_v41, %v9697_v6  ;;  %v9849_v46 = vpop.f32.mrf.mxu0 }
 0x270   : > { %v1065_v16 = vpop.permute.xlu1 %1064  ;;  %v6211_v25 = vsel %vm9769_vm2, 1.0, %v13683_v4  ;;  %v3764_v49 = vmul.bf16 1061961548, %v3668_v2  ;;  %v6073_v41 = vsel %vm9792_vm0, 1.0, %v13683_v4  ;;  %v1009_v6 = vadd.f32 %v6066_v35, %v6042_v12  ;;  %13860 = vst [vmem:[#allocation85_spill] sm:$0xff] %v9849_v46  ;;  %v13893_v46 = vld [vmem:[#allocation12_spill] sm:$0xff] }
 0x271   : > { %vm1132_vm4 = vcmp.gt.f32.partialorder %v1065_v16, %v13756_v29  ;;  %vm1228_vm7 = vcmp.eq.f32.partialorder %v1065_v16, %v13756_v29  ;;  %7063 = vset.pattern.permute.xlu1 %v13687_v24  ;;  %13856 = vst [vmem:[#allocation18_spill] sm:$0xff] %v9821_v61  ;;  %v9834_v17 = vpop.f32.mrf.mxu1  ;;  %vm1545_vm3 = vcmp.eq.f32.partialorder %v9675_v55, %v13840_v32 }
 0x272   : > { %v6093_v44 = vsel %vm1132_vm4, 1.0, %v13683_v4  ;;  %vm1253_vm9 = vmand %vm1228_vm7, %vm1243_vm5  ;;  %1738 = vperm.xlu1 %7063, %v13832_v9   ;;  %13858 = vst [vmem:[#allocation19_spill] sm:$0xff] %v9834_v17  ;;  %v2880_v12 = vadd.f32 %v9397_v7, %v8357_v36  ;;  %vm1449_vm0 = vcmp.gt.f32.partialorder %v9675_v55, %v13840_v32  ;;  %7332 = vtanh.bf16 %v3764_v49  ;;  %v13861_v7 = vld [vmem:[#allocation6_spill] sm:$0xff]  ;;  %v13870_v55 = vld [vmem:[#allocation67_spill] sm:$0xff] }
 0x273   : > { %v1204_v52 = vadd.f32 %v6093_v44, %v9356_v51  ;;  %v6117_v16 = vsel %vm1253_vm9, 1.0, %v13683_v4  ;;  %v9805_v22 = vpop.permute.xlu0 %1702  ;;  %v2727_v51 = vadd.f32 %v9373_v11, %v8326_v15  ;;  %v9829_v44 = vsel %vm1759_vm11, 1.0, %v13683_v4  ;;  %vm9878_vm10 = vmand %vm1545_vm3, %vm1556_vm6  ;;  %v13887_v17 = vld [vmem:[#allocation70_spill] sm:$0xff] }
 0x274   : > { %13857 = vst [vmem:[#allocation47_spill] sm:$0xff] %v9829_v44  ;;  %v6049_v11 = vsel %vm823_vm8, 1.0, %v13683_v4  ;;  %v1201_v53 = vadd.f32 %v13861_v7, %v1009_v6  ;;  %vm1538_vm13 = vcmp.eq.f32.partialorder %v9693_v43, %v13752_v37  ;;  %v9891_v7 = vpop.f32.mrf.mxu0  ;;  %v2884_v56 = vadd.f32 %v9510_v62, %v8357_v36 }
 0x275   : > { %v1325_v59 = vadd.f32 %v6117_v16, %v1204_v52  ;;  %v1691_v26 = vpop.permute.xlu1 %1690  ;;  %v1949_v52 = vadd.f32 %v6211_v25, %v1828_v27  ;;  %v3766_v16 = vmul.bf16 1061961548, %v3670_v50  ;;  %v9858_v27 = vadd.f32 %v9423_v60, %v8455_v45  ;;  %v9870_v25 = vpop.f32.mrf.mxu1  ;;  %13866 = vst [vmem:[#allocation6_spill] sm:$0xff] %v9891_v7  ;;  %vm9926_vm4 = vmand %vm1538_vm13, %vm1556_vm6  ;;  %v13884_v60 = vld [vmem:[#allocation24_spill] sm:$0xff] }
 0x276   : > { %7064 = vset.pattern.permute.xlu1 %v13696_v48  ;;  %v7327_v35 = vpop.eup %7326  ;;  %v9862_v50 = vadd.f32 %v6073_v41, %v6049_v11  ;;  %v13864_v11 = vld [vmem:[#allocation52_spill] sm:$0xff]  ;;  %vm1758_vm14 = vcmp.gt.f32.partialorder %v1691_v26, %v13756_v29  ;;  %v13865_v41 = vld [vmem:[#allocation46_spill] sm:$0xff]  ;;  %vm1854_vm15 = vcmp.eq.f32.partialorder %v1691_v26, %v13756_v29  ;;  %vm1442_vm2 = vcmp.gt.f32.partialorder %v9693_v43, %v13752_v37 }
 0x277   : > { %v1517_v2 = vadd.f32 %v9379_v1, %v1325_v59  ;;  %792 = vperm.xlu1 %7064, %v13859_v31   ;;  %v2731_v1 = vadd.f32 %v9478_v28, %v8326_v15  ;;  %v9868_v59 = vadd.f32 %v9443_v30, %v8458_v23  ;;  %vm1973_vm11 = vcmp.lt.f32.partialorder %v1949_v52, 2.0  ;;  %v9918_v62 = vpop.f32.mrf.mxu1  ;;  %vm9940_vm8 = vmand %vm1854_vm15, %vm1869_vm12  ;;  %v13879_v43 = vld [vmem:[#allocation40_spill] sm:$0xff] }
 0x278   : > { %v9851_v44 = vpop.permute.xlu0 %767  ;;  %v3925_v49 = vadd.bf16 1065369472, %v7327_v35  ;;  %v3926_v30 = vadd.bf16 1065369472, %v13864_v11  ;;  %7334 = vtanh.bf16 %v3766_v16  ;;  %13869 = vst [vmem:[#allocation86_spill] sm:$0xff] %v9918_v62  ;;  %v6189_v52 = vsel %vm1758_vm14, 1.0, %v13683_v4 }
 0x279   : > { %v1638_v6 = vadd.f32 %v9402_v5, %v1517_v2  ;;  %v9895_v11 = vpack.c.bf16 %v2731_v1, %v2727_v51  ;;  %v9903_v5 = vsel %vm1449_vm0, 1.0, %v13683_v4  ;;  %v9908_v2 = vsel %vm9878_vm10, 1.0, %v13683_v4 }
 0x27a   : > { %v9882_v28 = vpop.permute.xlu1 %732  ;;  %v4021_v35 = vmul.bf16 1056980736, %v3925_v49  ;;  %v9916_v51 = vsel %vm1973_vm11, %v13730_v57, 0.0  ;;  %v1322_v49 = vadd.f32 %v13870_v55, %v1201_v53  ;;  %vm1231_vm7 = vcmp.eq.f32.partialorder %v9720_v8, %v13873_v40 }
 0x27b   : > { %7066 = vset.pattern.permute.xlu1 %v13669_v39  ;;  %2015 = vadd.xlane.f32.xlu0 %v13865_v41  ;;  %13867 = vst [vmem:[#allocation52_spill] sm:$0xff] %v9895_v11  ;;  %13868 = vst [vmem:[#allocation46_spill] sm:$0xff] %v9916_v51  ;;  %v7329_v1 = vpop.eup %7328  ;;  %v4022_v41 = vmul.bf16 1056980736, %v3926_v30  ;;  %v1830_v53 = vadd.f32 %v6189_v52, %v1638_v6  ;;  %vm914_vm9 = vcmp.eq.f32.partialorder %v9882_v28, %v13779_v0  ;;  %vm13883_vm11 = vcmask 31744  }
 0x27c   : > { %1421 = vperm.xlu1 %7066, %v13859_v31   ;;  %v4117_v57 = vmul.bf16 %v4021_v35, %v13815_v54  ;;  %v7331_v61 = vpop.eup %7330  ;;  %v13876_v54 = vld [vmem:[#allocation59_spill] sm:$0xff]  ;;  %v3927_v30 = vadd.bf16 1065369472, %v7329_v1  ;;  %v9949_v35 = vpop.f32.mrf.mxu0  ;;  %v6138_v6 = vsel %vm1442_vm2, 1.0, %v13683_v4  ;;  %v3388_v26 = vmul.bf16 %v9895_v11, %v9895_v11  ;;  %vm9979_vm10 = vmand %vm914_vm9, %vm930_vm1 }
 0x27d   : > { %v9912_v16 = vpop.permute.xlu0 %1401  ;;  %13877 = vst [vmem:[#allocation67_spill] sm:$0xff] %v9949_v35  ;;  %v9958_v52 = vpack.c.bf16 %v2884_v56, %v2880_v12  ;;  %v2733_v62 = vadd.f32 %v9528_v63, %v8455_v45  ;;  %v9965_v1 = vsel %vm9926_vm4, 1.0, %v13683_v4  ;;  %vm818_vm3 = vcmp.gt.f32.partialorder %v9882_v28, %v13779_v0  ;;  %v9970_v35 = vpop.f32.mrf.mxu1  ;;  %vm9998_vm13 = vmand %vm1231_vm7, %vm1243_vm5 }
 0x27e   : > { %4377 = vmatprep.mubr.bf16.mxu1 %v4117_v57  ;;  %v3924_v57 = vadd.bf16 1065369472, %v7331_v61  ;;  %13880 = vst [vmem:[#allocation59_spill] sm:$0xff] %v9970_v35  ;;  %vm1135_vm0 = vcmp.gt.f32.partialorder %v9720_v8, %v13873_v40  ;;  %v2035_v12 = vsel %vm13883_vm11, %v9916_v51, 0.0  ;;  %v6213_v61 = vsel %vm9940_vm8, 1.0, %v13683_v4  ;;  %v10004_v7 = vpop.f32.mrf.mxu0 }
 0x27f   : > { %v9946_v31 = vpop.permute.xlu1 %1373  ;;  %2024 = vadd.xlane.f32.xlu0 %v13876_v54  ;;  %13878 = vst [vmem:[#allocation11_spill] sm:$0xff] %v9958_v52  ;;  %v4023_v54 = vmul.bf16 1056980736, %v3927_v30  ;;  %v4118_v30 = vmul.bf16 %v4022_v41, %v13884_v60  ;;  %v9991_v35 = vadd.f32 %v6138_v6, %v1322_v49  ;;  %v1951_v51 = vadd.f32 %v6213_v61, %v1830_v53  ;;  %v10023_v53 = vpop.f32.mrf.mxu1 }
 0x280   : > { %7069 = vset.pattern.permute.xlu1 %v13677_v42  ;;  %v4020_v55 = vmul.bf16 1056980736, %v3924_v57  ;;  %13888 = vst [vmem:[#allocation24_spill] sm:$0xff] %v10004_v7  ;;  %v6044_v49 = vsel %vm818_vm3, 1.0, %v13683_v4  ;;  %v3484_v6 = vmul.bf16 %v3388_v26, %v9895_v11  ;;  %v3390_v60 = vmul.bf16 %v9958_v52, %v9958_v52  ;;  %v10044_v8 = vpop.eup %7332 }
 0x281   : > { %1120 = vperm.xlu1 %7069, %v13879_v43   ;;  %v4119_v34 = vmul.bf16 %v4023_v54, %v13826_v19  ;;  %v10014_v3 = vpack.c.bf16 %v2733_v62, %v9858_v27  ;;  %v6068_v19 = vsel %vm9979_vm10, 1.0, %v13683_v4  ;;  %v10029_v27 = vsel %vm1135_vm0, 1.0, %v13683_v4  ;;  %13892 = vst [vmem:[#allocation87_spill] sm:$0xff] %v10044_v8 }
 0x282   : > { %v9983_v56 = vpop.permute.xlu0 %1084  ;;  %v10034_v62 = vsel %vm9998_vm13, 1.0, %v13683_v4  ;;  %vm1761_vm4 = vcmp.gt.f32.partialorder %v9805_v22, %v13873_v40  ;;  %vm825_vm7 = vcmp.gt.f32.partialorder %v9851_v44, %v13893_v46  ;;  %vm1975_vm8 = vcmp.lt.f32.partialorder %v1951_v51, 2.0  ;;  %v13910_v51 = vld [vmem:[#allocation72_spill] sm:$0xff] }
 0x283   : > { %2021 = vadd.xlane.f32.xlu0 %v13887_v17  ;;  %13889 = vst [vmem:[#allocation70_spill] sm:$0xff] %v10014_v3  ;;  %4807 = vmatprep.mubr.bf16.mxu0 %v4119_v34  ;;  %v13890_v17 = vld [vmem:[#allocation27_spill] sm:$0xff]  ;;  %v10042_v34 = vadd.f32 %v9562_v20, %v8458_v23  ;;  %v10055_v20 = vpop.f32.mrf.mxu0  ;;  %v1011_v61 = vadd.f32 %v6068_v19, %v6044_v49  ;;  %v10070_v19 = vpop.f32.mrf.mxu1 }
 0x284   : > { %v1073_v41 = vpop.permute.xlu1 %1072  ;;  %v4116_v28 = vmul.bf16 %v4020_v55, %v13890_v17  ;;  %13891 = vst [vmem:[#allocation27_spill] sm:$0xff] %v10023_v53  ;;  %4808 = vmatmul.mubr.bf16.gmra.mxu0 %v4118_v30  ;;  %13894 = vst [vmem:[#allocation12_spill] sm:$0xff] %v10055_v20  ;;  %v3580_v30 = vmul.bf16 1027030327, %v3484_v6  ;;  %v3486_v55 = vmul.bf16 %v3390_v60, %v9958_v52  ;;  %v13900_v20 = vld [vmem:[#allocation58_spill] sm:$0xff]  ;;  %v6051_v60 = vsel %vm825_vm7, 1.0, %v13683_v4 }
 0x285   : > { %vm1134_vm14 = vcmp.gt.f32.partialorder %v1073_v41, %v13794_v47  ;;  %vm1230_vm15 = vcmp.eq.f32.partialorder %v1073_v41, %v13794_v47  ;;  %7071 = vset.pattern.permute.xlu1 %v13687_v24  ;;  %v3389_v41 = vmul.bf16 %v10014_v3, %v10014_v3  ;;  %vm921_vm9 = vcmp.eq.f32.partialorder %v9851_v44, %v13893_v46  ;;  %v13897_v24 = vld [vmem:[#allocation57_spill] sm:$0xff]  ;;  %v10086_v7 = vpop.f32.mrf.mxu0 }
 0x286   : > { %v6095_v26 = vsel %vm1134_vm14, 1.0, %v13683_v4  ;;  %vm1255_vm2 = vmand %vm1230_vm15, %vm1243_vm5  ;;  %1746 = vperm.xlu1 %7071, %v13879_v43   ;;  %4378 = vmatmul.mubr.bf16.gmra.mxu1 %v4116_v28  ;;  %v10060_v17 = vpop.eup %7334  ;;  %v13898_v8 = vmul.bf16 1027030327, %v13897_v24  ;;  %v13899_v43 = vld [vmem:[#allocation49_spill] sm:$0xff]  ;;  %v13901_v49 = vmul.bf16 1027030327, %v13900_v20  ;;  %vm1451_vm13 = vcmp.gt.f32.partialorder %v9912_v16, %v13893_v46 }
 0x287   : > { %v1206_v54 = vadd.f32 %v6095_v26, %v9625_v18  ;;  %v6119_v57 = vsel %vm1255_vm2, 1.0, %v13683_v4  ;;  %2030 = vadd.xlane.f32.xlu0 %v9679_v10  ;;  %v10053_v63 = vpop.permute.xlu0 %1710  ;;  %13895 = vst [vmem:[#allocation88_spill] sm:$0xff] %v10060_v17  ;;  %v13896_v26 = vld [vmem:[#allocation48_spill] sm:$0xff]  ;;  %v13904_v24 = vld [vmem:[#allocation51_spill] sm:$0xff]  ;;  %13907 = vst [vmem:[#allocation49_spill] sm:$0xff] %v10086_v7  ;;  %vm1547_vm15 = vcmp.eq.f32.partialorder %v9912_v16, %v13893_v46  ;;  %vm13918_vm2 = vcmask 31744  }
 0x288   : > { %v3645_v28 = vadd.bf16 %v13898_v8, %v13896_v26  ;;  %v3647_v6 = vadd.bf16 %v13901_v49, %v13899_v43  ;;  %13902 = vst [vmem:[#allocation48_spill] sm:$0xff] %v10070_v19  ;;  %v3740_v8 = vmul.bf16 1061961548, %v13904_v24  ;;  %v13906_v49 = vld [vmem:[#allocation32_spill] sm:$0xff]  ;;  %vm10093_vm10 = vmand %vm921_vm9, %vm930_vm1  ;;  %vm1444_vm7 = vcmp.gt.f32.partialorder %v9946_v31, %v13779_v0 }
 0x289   : > { %v1327_v18 = vadd.f32 %v6119_v57, %v1206_v54  ;;  %v1699_v10 = vpop.permute.xlu1 %1698  ;;  %v10080_v54 = vsel %vm1975_vm8, %v13756_v29, 0.0  ;;  %v13905_v57 = vld [vmem:[#allocation82_spill] sm:$0xff]  ;;  %vm1540_vm8 = vcmp.eq.f32.partialorder %v9946_v31, %v13779_v0 }
 0x28a   : > { %vm1856_vm3 = vcmp.eq.f32.partialorder %v1699_v10, %v13794_v47  ;;  %7072 = vset.pattern.permute.xlu1 %v13696_v48  ;;  %13903 = vst [vmem:[#allocation57_spill] sm:$0xff] %v10080_v54  ;;  %vm1760_vm0 = vcmp.gt.f32.partialorder %v1699_v10, %v13794_v47  ;;  %v3741_v17 = vmul.bf16 1061961548, %v3645_v28  ;;  %v3743_v53 = vmul.bf16 1061961548, %v3647_v6  ;;  %v13911_v28 = vld [vmem:[#allocation2_spill] sm:$0xff]  ;;  %v10134_v10 = vpop.f32.mrf.mxu0 }
 0x28b   : > { %v1519_v20 = vadd.f32 %v13905_v57, %v1327_v18  ;;  %802 = vperm.xlu1 %7072, %v13906_v49   ;;  %2036 = vadd.xlane.f32.xlu0 %v2035_v12  ;;  %v1203_v18 = vadd.f32 %v13910_v51, %v1011_v61  ;;  %v3676_v57 = vadd.bf16 %v3580_v30, %v9895_v11  ;;  %v3582_v12 = vmul.bf16 1027030327, %v3486_v55  ;;  %v13912_v6 = vld [vmem:[#allocation20_spill] sm:$0xff]  ;;  %vm10110_vm14 = vmand %vm1856_vm3, %vm1869_vm12  ;;  %v10117_v55 = vpop.f32.mrf.mxu1 }
 0x28c   : > { %v10098_v24 = vpop.permute.xlu0 %777  ;;  %7336 = vtanh.bf16 %v3740_v8  ;;  %vm1846_vm11 = vcmp.eq.f32.partialorder %v13912_v6, %v13911_v28  ;;  %v13913_v48 = vld [vmem:[#allocation84_spill] sm:$0xff]  ;;  %v10115_v30 = vmul.bf16 %v3389_v41, %v10014_v3  ;;  %13917 = vst [vmem:[#allocation51_spill] sm:$0xff] %v10117_v55  ;;  %v6075_v41 = vsel %vm10093_vm10, 1.0, %v13683_v4  ;;  %13919 = vst [vmem:[#allocation82_spill] sm:$0xff] %v10134_v10  ;;  %v13954_v10 = vld [vmem:[#allocation33_spill] sm:$0xff] }
 0x28d   : > { %v1640_v44 = vadd.f32 %v13913_v48, %v1519_v20  ;;  %7338 = vtanh.bf16 %v3741_v17  ;;  %v6191_v48 = vsel %vm1760_vm0, 1.0, %v13683_v4  ;;  %v2041_v20 = vsel %vm13918_vm2, %v10080_v54, 0.0  ;;  %v13920_v51 = vld [vmem:[#allocation8_spill] sm:$0xff]  ;;  %v13921_v54 = vld [vmem:[#allocation17_spill] sm:$0xff]  ;;  %vm10149_vm3 = vmand %vm1547_vm15, %vm1556_vm6 }
 0x28e   : > { %13916 = vst [vmem:[#allocation58_spill] sm:$0xff] %v10115_v30  ;;  %v743_v8 = vpop.permute.xlu1 %742  ;;  %7340 = vtanh.bf16 %v3743_v53  ;;  %v1324_v11 = vadd.f32 %v13920_v51, %v1203_v18  ;;  %vm1233_vm9 = vcmp.eq.f32.partialorder %v9983_v56, %v13921_v54  ;;  %v6215_v53 = vsel %vm10110_vm14, 1.0, %v13683_v4  ;;  %vm10179_vm10 = vmand %vm1540_vm8, %vm1556_vm6 }
 0x28f   : > { %v1832_v17 = vadd.f32 %v6191_v48, %v1640_v44  ;;  %7074 = vset.pattern.permute.xlu1 %v13669_v39  ;;  %2042 = vadd.xlane.f32.xlu0 %v2041_v20  ;;  %v3678_v29 = vadd.bf16 %v3582_v12, %v9958_v52  ;;  %vm916_vm0 = vcmp.eq.f32.partialorder %v743_v8, %v13831_v33  ;;  %v3772_v20 = vmul.bf16 1061961548, %v3676_v57  ;;  %v10160_v12 = vpop.f32.mrf.mxu1  ;;  %vm10264_vm8 = vmand %vm1846_vm11, %vm1869_vm12 }
 0x290   : > { %1429 = vperm.xlu1 %7074, %v13906_v49   ;;  %v10158_v61 = vpack.c.bf16 %v10042_v34, %v9868_v59  ;;  %13925 = vst [vmem:[#allocation2_spill] sm:$0xff] %v10160_v12  ;;  %v10164_v51 = vadd.f32 %v9965_v1, %v9991_v35  ;;  %v10170_v39 = vsel %vm1761_vm4, 1.0, %v13683_v4  ;;  %v10172_v49 = vadd.f32 %v6075_v41, %v6051_v60  ;;  %v13929_v35 = vld [vmem:[#allocation78_spill] sm:$0xff]  ;;  %vm10200_vm4 = vmand %vm1233_vm9, %vm1243_vm5 }
 0x291   : > { %v10154_v18 = vpop.permute.xlu0 %1409  ;;  %v1953_v48 = vadd.f32 %v6215_v53, %v1832_v17  ;;  %13926 = vst [vmem:[#allocation20_spill] sm:$0xff] %v10170_v39  ;;  %v2737_v1 = vadd.f32 %v13929_v35, %v8326_v15  ;;  %v10189_v34 = vsel %vm1451_vm13, 1.0, %v13683_v4  ;;  %v6140_v60 = vsel %vm1444_vm7, 1.0, %v13683_v4  ;;  %v10207_v17 = vpop.f32.mrf.mxu0  ;;  %vm10216_vm2 = vmand %vm916_vm0, %vm930_vm1 }
 0x292   : > { %13924 = vst [vmem:[#allocation72_spill] sm:$0xff] %v10158_v61  ;;  %13932 = vst [vmem:[#allocation84_spill] sm:$0xff] %v10207_v17  ;;  %v1516_v53 = vadd.f32 %v6140_v60, %v1324_v11  ;;  %vm1137_vm13 = vcmp.gt.f32.partialorder %v9983_v56, %v13921_v54  ;;  %vm820_vm15 = vcmp.gt.f32.partialorder %v743_v8, %v13831_v33  ;;  %v3774_v35 = vmul.bf16 1061961548, %v3678_v29  ;;  %v13936_v56 = vld [vmem:[#allocation22_spill] sm:$0xff]  ;;  %v10227_v16 = vpop.f32.mrf.mxu1 }
 0x293   : > { %v10204_v41 = vpop.permute.xlu1 %1381  ;;  %vm1977_vm14 = vcmp.lt.f32.partialorder %v1953_v48, 2.0  ;;  %7342 = vtanh.bf16 %v3772_v20  ;;  %v3391_v11 = vmul.bf16 %v10158_v61, %v10158_v61  ;;  %v3934_v60 = vadd.bf16 1065369472, %v13936_v56  ;;  %13937 = vst [vmem:[#allocation17_spill] sm:$0xff] %v10227_v16  ;;  %v10257_v3 = vpop.f32.mrf.mxu0  ;;  %v13946_v16 = vld [vmem:[#allocation80_spill] sm:$0xff] }
 0x294   : > { %7077 = vset.pattern.permute.xlu1 %v13677_v42  ;;  %v10222_v48 = vsel %vm1977_vm14, %v13794_v47, 0.0  ;;  %v10232_v52 = vsel %vm10149_vm3, 1.0, %v13683_v4  ;;  %v6164_v29 = vsel %vm10179_vm10, 1.0, %v13683_v4  ;;  %vm13938_vm7 = vcmask 31744   ;;  %v13939_v42 = vld [vmem:[#allocation83_spill] sm:$0xff]  ;;  %v10281_v17 = vpop.f32.mrf.mxu1 }
 0x295   : > { %13935 = vst [vmem:[#allocation8_spill] sm:$0xff] %v10222_v48  ;;  %v2047_v47 = vsel %vm13938_vm7, %v10222_v48, 0.0  ;;  %v2741_v30 = vadd.f32 %v13939_v42, %v8326_v15  ;;  %v10244_v56 = vsel %vm1137_vm13, 1.0, %v13683_v4  ;;  %v10249_v44 = vsel %vm10200_vm4, 1.0, %v13683_v4  ;;  %13942 = vst [vmem:[#allocation83_spill] sm:$0xff] %v10257_v3 }
 0x296   : > { %v10239_v20 = vpop.permute.xlu0 %1092  ;;  %13940 = vst [vmem:[#allocation78_spill] sm:$0xff] %v10244_v56  ;;  %13941 = vst [vmem:[#allocation22_spill] sm:$0xff] %v10249_v44  ;;  %v6046_v59 = vsel %vm820_vm15, 1.0, %v13683_v4  ;;  %v6070_v48 = vsel %vm10216_vm2, 1.0, %v13683_v4  ;;  %2048 = vadd.xlane.f32.xlu0 %v2047_v47  ;;  %v10268_v57 = vadd.f32 %v6164_v29, %v1516_v53  ;;  %7344 = vtanh.bf16 %v3774_v35  ;;  %v13956_v44 = vld [vmem:[#allocation39_spill] sm:$0xff]  ;;  %v10310_v19 = vpop.f32.mrf.mxu1  ;;  %v13958_v56 = vld [vmem:[#allocation34_spill] sm:$0xff] }
 0x297   : > { %v2890_v31 = vadd.f32 %v13946_v16, %v8357_v36  ;;  %v2894_v47 = vadd.f32 %v9699_v13, %v8357_v36  ;;  %v10277_v6 = vmul.bf16 %v3391_v11, %v10158_v61  ;;  %v10279_v3 = vmul.bf16 1056980736, %v3934_v60  ;;  %13948 = vst [vmem:[#allocation90_spill] sm:$0xff] %v10281_v17  ;;  %v13949_v13 = vld [vmem:[#allocation45_spill] sm:$0xff]  ;;  %v10299_v61 = vpop.f32.mrf.mxu0 }
 0x298   : > { %13945 = vst [vmem:[#allocation89_spill] sm:$0xff] %v10268_v57  ;;  %v1081_v8 = vpop.permute.xlu1 %1080  ;;  %v1013_v29 = vadd.f32 %v6070_v48, %v6046_v59  ;;  %v10288_v16 = vadd.f32 %v13949_v13, %v8455_v45  ;;  %v10290_v12 = vpack.c.bf16 %v2741_v30, %v2737_v1  ;;  %vm1763_vm0 = vcmp.gt.f32.partialorder %v10053_v63, %v13921_v54  ;;  %v13952_v13 = vld [vmem:[#allocation21_spill] sm:$0xff] }
 0x299   : > { %vm1136_vm9 = vcmp.gt.f32.partialorder %v1081_v8, %v13840_v32  ;;  %vm1232_vm3 = vcmp.eq.f32.partialorder %v1081_v8, %v13840_v32  ;;  %13947 = vst [vmem:[#allocation80_spill] sm:$0xff] %v10277_v6  ;;  %v6205_v59 = vsel %vm10264_vm8, 1.0, %v13683_v4  ;;  %13951 = vst [vmem:[#allocation91_spill] sm:$0xff] %v10299_v61  ;;  %vm923_vm10 = vcmp.eq.f32.partialorder %v10098_v24, %v13952_v13  ;;  %v13957_v61 = vld [vmem:[#allocation3_spill] sm:$0xff] }
 0x29a   : > { %v7337_v53 = vpop.eup %7336  ;;  %v6097_v35 = vsel %vm1136_vm9, 1.0, %v13683_v4  ;;  %vm1257_vm11 = vmand %vm1232_vm3, %vm1243_vm5  ;;  %13950 = vst [vmem:[#allocation45_spill] sm:$0xff] %v10290_v12  ;;  %v1943_v55 = vadd.f32 %v6205_v59, %v13954_v10  ;;  %v10306_v39 = vpack.c.bf16 %v2894_v47, %v2890_v31  ;;  %v4126_v42 = vmul.bf16 %v10279_v3, %v13956_v44  ;;  %v13959_v47 = vld [vmem:[#allocation37_spill] sm:$0xff]  ;;  %v10321_v44 = vpop.f32.mrf.mxu0 }
 0x29b   : > { %v7339_v8 = vpop.eup %7338  ;;  %v1208_v11 = vadd.f32 %v6097_v35, %v9862_v50  ;;  %v6121_v60 = vsel %vm1257_vm11, 1.0, %v13683_v4  ;;  %v3932_v48 = vadd.bf16 1065369472, %v7337_v53  ;;  %v10303_v30 = vpop.permute.xlu0 %1718  ;;  %vm1849_vm4 = vcmp.eq.f32.partialorder %v13958_v56, %v13957_v61  ;;  %13960 = vst [vmem:[#allocation39_spill] sm:$0xff] %v10321_v44  ;;  %vm10349_vm3 = vmand %vm923_vm10, %vm930_vm1 }
 0x29c   : > { %v7341_v17 = vpop.eup %7340  ;;  %13953 = vst [vmem:[#allocation21_spill] sm:$0xff] %v10303_v30  ;;  %v3933_v1 = vadd.bf16 1065369472, %v7339_v8  ;;  %13955 = vst [vmem:[#allocation33_spill] sm:$0xff] %v10306_v39  ;;  %v1205_v57 = vadd.f32 %v9813_v14, %v1013_v29  ;;  %v3396_v10 = vmul.bf16 %v10290_v12, %v10290_v12  ;;  %vm1549_vm15 = vcmp.eq.f32.partialorder %v10154_v18, %v13952_v13 }
 0x29d   : > { %v1329_v50 = vadd.f32 %v6121_v60, %v1208_v11  ;;  %v1707_v35 = vpop.permute.xlu1 %1706  ;;  %v3935_v53 = vadd.bf16 1065369472, %v7341_v17  ;;  %v4028_v7 = vmul.bf16 1056980736, %v3932_v48  ;;  %vm1967_vm2 = vcmp.lt.f32.partialorder %v1943_v55, 2.0  ;;  %v10342_v11 = vpop.f32.mrf.mxu1  ;;  %vm10371_vm10 = vmand %vm1549_vm15, %vm1556_vm6 }
 0x29e   : > { %vm1858_vm14 = vcmp.eq.f32.partialorder %v1707_v35, %v13840_v32  ;;  %v4029_v8 = vmul.bf16 1056980736, %v3933_v1  ;;  %vm1762_vm13 = vcmp.gt.f32.partialorder %v1707_v35, %v13840_v32  ;;  %v3398_v29 = vmul.bf16 %v10306_v39, %v10306_v39  ;;  %13963 = vst [vmem:[#allocation3_spill] sm:$0xff] %v10342_v11  ;;  %v7219_v1 = vld [vmem:[%s13454_s5 + $0x1b8] sm:$0xff]  }
 0x29f   : > { %v1521_v31 = vadd.f32 %v9903_v5, %v1329_v50  ;;  %v4031_v17 = vmul.bf16 1056980736, %v3935_v53  ;;  %v4124_v3 = vmul.bf16 %v4028_v7, %v13959_v47  ;;  %vm827_vm7 = vcmp.gt.f32.partialorder %v10098_v24, %v13952_v13  ;;  %vm10337_vm9 = vmand %vm1858_vm14, %vm1869_vm12  ;;  %v13972_v47 = vld [vmem:[#allocation42_spill] sm:$0xff]  ;;  %v7216_v7 = vld [vmem:[%s13454_s5 + $0x178] sm:$0xff]  }
 0x2a0   : > { %v4125_v14 = vmul.bf16 %v4029_v8, %v13896_v26  ;;  %vm1542_vm8 = vcmp.eq.f32.partialorder %v10204_v41, %v13831_v33  ;;  %vm1446_vm11 = vcmp.gt.f32.partialorder %v10204_v41, %v13831_v33  ;;  %v10359_v48 = vpop.permute.xlu0 %787  ;;  %v10377_v35 = vsel %vm1967_vm2, %v13911_v28, 0.0  ;;  %v13970_v8 = vld [vmem:[#allocation38_spill] sm:$0xff]  ;;  %v7221_v41 = vld [vmem:[%s13454_s5 + $0x1f0] sm:$0xff]   ;;  %6709 = vmatprep.subr.bf16.mxu1 %v7216_v7 }
 0x2a1   : > { %v1642_v5 = vadd.f32 %v9908_v2, %v1521_v31  ;;  %v4127_v26 = vmul.bf16 %v4031_v17, %v13899_v43  ;;  %v1326_v2 = vadd.f32 %v9818_v58, %v1205_v57  ;;  %v6193_v43 = vsel %vm1762_vm13, 1.0, %v13683_v4  ;;  %v10364_v50 = vpop.eup %7342  ;;  %13969 = vst [vmem:[#allocation37_spill] sm:$0xff] %v10377_v35  ;;  %v10382_v17 = vpop.f32.mrf.mxu0  ;;  %vm10395_vm13 = vmand %vm1542_vm8, %vm1556_vm6  ;;  %v7223_v58 = vld [vmem:[%s13454_s5 + $0x1b0] sm:$0xff]   ;;  %v13987_v7 = vld [vmem:[#allocation50_spill] sm:$0xff] }
 0x2a2   : > { %v10361_v59 = vpop.permute.xlu1 %752  ;;  %4385 = vmatprep.mubr.bf16.mxu1 %v4125_v14  ;;  %13966 = vst [vmem:[#allocation34_spill] sm:$0xff] %v10364_v50  ;;  %v3492_v53 = vmul.bf16 %v3396_v10, %v10290_v12  ;;  %v2743_v31 = vadd.f32 %v13970_v8, %v8455_v45  ;;  %13971 = vst [vmem:[#allocation38_spill] sm:$0xff] %v10382_v17  ;;  %vm1851_vm14 = vcmp.eq.f32.partialorder %v13972_v47, %v13752_v37  ;;  %v13975_v10 = vld [vmem:[#allocation35_spill] sm:$0xff]  ;;  %vm13978_vm8 = vcmask 31744  }
 0x2a3   : > { %v1834_v57 = vadd.f32 %v6193_v43, %v1642_v5  ;;  %4815 = vmatprep.mubr.bf16.mxu0 %v4127_v26  ;;  %4386 = vmatmul.mubr.bf16.gmra.mxu1 %v4124_v3  ;;  %v6053_v14 = vsel %vm827_vm7, 1.0, %v13683_v4  ;;  %v6217_v55 = vsel %vm10337_vm9, 1.0, %v13683_v4  ;;  %v10404_v3 = vadd.f32 %v13975_v10, %v8458_v23  ;;  %v13976_v26 = vld [vmem:[#allocation23_spill] sm:$0xff]  ;;  %v10443_v10 = vpop.f32.mrf.mxu1 }
 0x2a4   : > { %4816 = vmatmul.mubr.bf16.gmra.mxu0 %v4126_v42  ;;  %v3494_v24 = vmul.bf16 %v3398_v29, %v10306_v39  ;;  %v6077_v5 = vsel %vm10349_vm3, 1.0, %v13683_v4  ;;  %vm1453_vm15 = vcmp.gt.f32.partialorder %v10154_v18, %v13952_v13  ;;  %vm1235_vm2 = vcmp.eq.f32.partialorder %v10239_v20, %v13976_v26  ;;  %v10420_v42 = vld [vmem:[%s13454_s5 + $0x1f8] sm:$0xff]   ;;  %v10425_v60 = vpop.eup %7344  ;;  %13979 = vst [vmem:[#allocation35_spill] sm:$0xff] %v10443_v10  ;;  %v10459_v10 = vpop.f32.mrf.mxu0  ;;  %v7222_v18 = vld [vmem:[%s13454_s5 + $0x130] sm:$0xff]   ;;  %vm10497_vm3 = vmand %vm1849_vm4, %vm1869_vm12 }
 0x2a5   : > { %v1955_v43 = vadd.f32 %v6217_v55, %v1834_v57  ;;  %v7218_v29 = vld [vmem:[%s13454_s5 + $0x138] sm:$0xff]   ;;  %13977 = vst [vmem:[#allocation42_spill] sm:$0xff] %v10425_v60  ;;  %v10431_v57 = vsel %vm1763_vm0, 1.0, %v13683_v4  ;;  %v6142_v8 = vsel %vm1446_vm11, 1.0, %v13683_v4  ;;  %vm1139_vm7 = vcmp.gt.f32.partialorder %v10239_v20, %v13976_v26  ;;  %v7220_v60 = vld [vmem:[%s13454_s5 + $0x170] sm:$0xff]   ;;  %13980 = vst [vmem:[#allocation23_spill] sm:$0xff] %v10459_v10  ;;  %6797 = vmatprep.subr.bf16.mxu0 %v10420_v42 }
 0x2a6   : > { %v10441_v55 = vsel %vm13978_vm8, %v10377_v35, 0.0  ;;  %v1518_v50 = vadd.f32 %v6142_v8, %v1326_v2  ;;  %v3588_v35 = vmul.bf16 1027030327, %v3492_v53  ;;  %v10457_v11 = vpack.c.bf16 %v2743_v31, %v10288_v16  ;;  %vm10480_vm9 = vmand %vm1235_vm2, %vm1243_vm5  ;;  %v10484_v53 = vpop.permute.xlu0 %1417  ;;  %6710 = vmatpush3.bf16.msra.mxu1 %v7218_v29  ;;  %6798 = vmatpush3.bf16.msra.mxu0 %v7219_v1  ;;  %v10524_v8 = vpop.f32.mrf.mxu1 }
 0x2a7   : > { %v10454_v17 = vpop.permute.xlu1 %1389  ;;  %vm1979_vm0 = vcmp.lt.f32.partialorder %v1955_v43, 2.0  ;;  %v10462_v6 = vadd.f32 %v6077_v5, %v6053_v14  ;;  %v10468_v44 = vsel %vm1453_vm15, 1.0, %v13683_v4  ;;  %v10473_v2 = vsel %vm10371_vm10, 1.0, %v13683_v4  ;;  %v13986_v5 = vld [vmem:[#allocation31_spill] sm:$0xff]  ;;  %6711 = vmatprep.subr.bf16.mxu1 %v7220_v60  ;;  %6799 = vmatprep.subr.bf16.mxu0 %v7221_v41  ;;  %vm13988_vm10 = vmmov %vm13978_vm8  ;;  %v13996_v41 = vld [vmem:[#allocation64_spill] sm:$0xff] }
 0x2a8   : > { %v3590_v31 = vmul.bf16 1027030327, %v3494_v24  ;;  %v6166_v1 = vsel %vm10395_vm13, 1.0, %v13683_v4  ;;  %vm1765_vm11 = vcmp.gt.f32.partialorder %v10303_v30, %v13976_v26  ;;  %v10508_v24 = vsel %vm1979_vm0, %v13840_v32, 0.0  ;;  %v13989_v32 = vld [vmem:[#allocation56_spill] sm:$0xff]  ;;  %13990 = vst [vmem:[#allocation31_spill] sm:$0xff] %v10524_v8 }
 0x2a9   : > { %13985 = vst [vmem:[#allocation92_spill] sm:$0xff] %v10508_v24  ;;  %v1825_v29 = vadd.f32 %v13987_v7, %v13986_v5  ;;  %v10516_v56 = vsel %vm1139_vm7, 1.0, %v13683_v4  ;;  %vm918_vm4 = vcmp.eq.f32.partialorder %v10361_v59, %v13873_v40  ;;  %v2053_v28 = vsel %vm13988_vm10, %v10508_v24, 0.0  ;;  %v10538_v7 = vpop.f32.mrf.mxu0 }
 0x2aa   : > { %v2896_v43 = vadd.f32 %v13989_v32, %v8458_v23  ;;  %v10526_v5 = vadd.f32 %v6166_v1, %v1518_v50  ;;  %v10531_v60 = vsel %vm10480_vm9, 1.0, %v13683_v4  ;;  %2054 = vadd.xlane.f32.xlu0 %v2053_v28  ;;  %v10534_v20 = vadd.bf16 %v3588_v35, %v10290_v12  ;;  %13991 = vst [vmem:[#allocation50_spill] sm:$0xff] %v10538_v7  ;;  %vm10559_vm15 = vmand %vm918_vm4, %vm930_vm1  ;;  %v13995_v32 = vld [vmem:[#allocation5_spill] sm:$0xff]  ;;  %v13999_v12 = vld [vmem:[#allocation60_spill] sm:$0xff] }
 0x2ab   : > { %v10544_v50 = vsel %vm1765_vm11, 1.0, %v13683_v4  ;;  %vm822_vm13 = vcmp.gt.f32.partialorder %v10361_v59, %v13873_v40  ;;  %v10549_v1 = vadd.bf16 %v3590_v31, %v10306_v39  ;;  %v6208_v35 = vsel %vm10497_vm3, 1.0, %v13683_v4  ;;  %6712 = vmatpush3.bf16.msra.mxu1 %v7222_v18  ;;  %6800 = vmatpush3.bf16.msra.mxu0 %v7223_v58  ;;  %v13998_v18 = vld [vmem:[#allocation26_spill] sm:$0xff]  ;;  %v10570_v58 = vpop.permute.xlu0 %1100  ;;  %vm10586_vm9 = vmand %vm1851_vm14, %vm1869_vm12  ;;  %v7224_v59 = vld [vmem:[%s13454_s5 + $0x168] sm:$0xff]  }
 0x2ac   : > { %13992 = vst [vmem:[#allocation56_spill] sm:$0xff] %v10544_v50  ;;  %v1089_v16 = vpop.permute.xlu1 %1088  ;;  %v1946_v31 = vadd.f32 %v6208_v35, %v1825_v29  ;;  %v13997_v14 = vmul.bf16 1027030327, %v13996_v41  ;;  %vm925_vm8 = vcmp.eq.f32.partialorder %v10359_v48, %v13998_v18  ;;  %v14000_v50 = vld [vmem:[#allocation65_spill] sm:$0xff]  ;;  %v10579_v35 = vpop.f32.mrf.mxu1  ;;  %v6072_v47 = vsel %vm10559_vm15, 1.0, %v13683_v4  ;;  %6713 = vmatprep.subr.bf16.mxu1 %v7224_v59 }
 0x2ad   : > { %vm1138_vm2 = vcmp.gt.f32.partialorder %v1089_v16, %v13893_v46  ;;  %vm1234_vm7 = vcmp.eq.f32.partialorder %v1089_v16, %v13893_v46  ;;  %v14001_v10 = vmul.bf16 1027030327, %v14000_v50  ;;  %v14002_v16 = vld [vmem:[#allocation69_spill] sm:$0xff]  ;;  %14003 = vst [vmem:[#allocation5_spill] sm:$0xff] %v10579_v35  ;;  %v10596_v35 = vpop.f32.mrf.mxu0  ;;  %v10602_v7 = vpack.c.bf16 %v2896_v43, %v10404_v3  ;;  %v7228_v3 = vld [vmem:[%s13454_s5 + $0x160] sm:$0xff]   ;;  %v14008_v43 = vld [vmem:[#allocation68_spill] sm:$0xff] }
 0x2ae   : > { %v3653_v24 = vadd.bf16 %v13997_v14, %v13995_v32  ;;  %v6099_v39 = vsel %vm1138_vm2, 1.0, %v13683_v4  ;;  %vm1259_vm0 = vmand %vm1234_vm7, %vm1243_vm5  ;;  %v3748_v29 = vmul.bf16 1061961548, %v14002_v16  ;;  %v6048_v14 = vsel %vm822_vm13, 1.0, %v13683_v4  ;;  %14006 = vst [vmem:[#allocation64_spill] sm:$0xff] %v10596_v35 }
 0x2af   : > { %v3655_v30 = vadd.bf16 %v14001_v10, %v13999_v12  ;;  %v1210_v10 = vadd.f32 %v6099_v39, %v10172_v49  ;;  %v6123_v50 = vsel %vm1259_vm0, 1.0, %v13683_v4  ;;  %14007 = vst [vmem:[#allocation26_spill] sm:$0xff] %v10602_v7  ;;  %v7225_v39 = vld [vmem:[%s13454_s5 + $0x1e8] sm:$0xff]   ;;  %v3780_v35 = vmul.bf16 1061961548, %v10534_v20  ;;  %v10625_v20 = vpop.f32.mrf.mxu1  ;;  %vm10635_vm4 = vmand %vm925_vm8, %vm930_vm1  ;;  %v10644_v59 = vpop.f32.mrf.mxu0 }
 0x2b0   : > { %v3749_v16 = vmul.bf16 1061961548, %v3653_v24  ;;  %7346 = vtanh.bf16 %v3748_v29  ;;  %v7226_v49 = vld [vmem:[%s13454_s5 + $0x128] sm:$0xff]   ;;  %vm1970_vm14 = vcmp.lt.f32.partialorder %v1946_v31, 2.0  ;;  %vm829_vm3 = vcmp.gt.f32.partialorder %v10359_v48, %v13998_v18  ;;  %6801 = vmatprep.subr.bf16.mxu0 %v7225_v39  ;;  %14011 = vst [vmem:[#allocation60_spill] sm:$0xff] %v10644_v59  ;;  %v7230_v39 = vld [vmem:[%s13454_s5 + $0x120] sm:$0xff]  }
 0x2b1   : > { %v3751_v8 = vmul.bf16 1061961548, %v3655_v30  ;;  %v1331_v24 = vadd.f32 %v6123_v50, %v1210_v10  ;;  %v1715_v28 = vpop.permute.xlu1 %1714  ;;  %v7227_v30 = vld [vmem:[%s13454_s5 + $0x1a8] sm:$0xff]   ;;  %v1827_v29 = vadd.f32 %v14008_v43, %v10164_v51  ;;  %v7229_v10 = vld [vmem:[%s13454_s5 + $0x1e0] sm:$0xff]   ;;  %6714 = vmatpush3.bf16.msra.mxu1 %v7226_v49  ;;  %v3399_v41 = vmul.bf16 %v10602_v7, %v10602_v7  ;;  %v10698_v50 = vpop.f32.mrf.mxu0  ;;  %v14060_v59 = vld [vmem:[#allocation89_spill] sm:$0xff] }
 0x2b2   : > { %7348 = vtanh.bf16 %v3749_v16  ;;  %vm1860_vm11 = vcmp.eq.f32.partialorder %v1715_v28, %v13893_v46  ;;  %vm1764_vm10 = vcmp.gt.f32.partialorder %v1715_v28, %v13893_v46  ;;  %v6210_v16 = vsel %vm10586_vm9, 1.0, %v13683_v4  ;;  %6802 = vmatpush3.bf16.msra.mxu0 %v7227_v30  ;;  %6715 = vmatprep.subr.bf16.mxu1 %v7228_v3  ;;  %v10691_v3 = vpop.f32.mrf.mxu1  ;;  %14019 = vst [vmem:[#allocation93_spill] sm:$0xff] %v10698_v50 }
 0x2b3   : > { %7350 = vtanh.bf16 %v3751_v8  ;;  %v1015_v8 = vadd.f32 %v6072_v47, %v6048_v14  ;;  %v1523_v51 = vadd.f32 %v10189_v34, %v1331_v24  ;;  %v7231_v14 = vld [vmem:[%s13454_s5 + $0x1a0] sm:$0xff]   ;;  %v10652_v47 = vpop.permute.xlu0 %1726  ;;  %v3782_v34 = vmul.bf16 1061961548, %v10549_v1  ;;  %vm10673_vm15 = vmand %vm1860_vm11, %vm1869_vm12  ;;  %6803 = vmatprep.subr.bf16.mxu0 %v7229_v10  ;;  %14017 = vst [vmem:[#allocation68_spill] sm:$0xff] %v10691_v3 }
 0x2b4   : > { %14012 = vst [vmem:[#allocation65_spill] sm:$0xff] %v10652_v47  ;;  %2018 = vadd.xlane.f32.xlu1 %v10441_v55  ;;  %v10660_v49 = vsel %vm1970_vm14, %v13957_v61, 0.0  ;;  %v1948_v24 = vadd.f32 %v6210_v16, %v1827_v29  ;;  %v6055_v30 = vsel %vm829_vm3, 1.0, %v13683_v4  ;;  %vm1551_vm13 = vcmp.eq.f32.partialorder %v10484_v53, %v13998_v18  ;;  %v10747_v1 = vpop.f32.mrf.mxu1 }
 0x2b5   : > { %14013 = vst [vmem:[#allocation69_spill] sm:$0xff] %v10660_v49  ;;  %v1644_v55 = vadd.f32 %v10232_v52, %v1523_v51  ;;  %v14016_v61 = vmul.bf16 %v10457_v11, %v10457_v11  ;;  %v6079_v48 = vsel %vm10635_vm4, 1.0, %v13683_v4  ;;  %vm1455_vm2 = vcmp.gt.f32.partialorder %v10484_v53, %v13998_v18  ;;  %6716 = vmatpush3.bf16.msra.mxu1 %v7230_v39  ;;  %v14020_v51 = vld [vmem:[#allocation61_spill] sm:$0xff]  ;;  %vm10707_vm14 = vmand %vm1551_vm13, %vm1556_vm6 }
 0x2b6   : > { %v6195_v52 = vsel %vm1764_vm10, 1.0, %v13683_v4  ;;  %vm1972_vm7 = vcmp.lt.f32.partialorder %v1948_v24, 2.0  ;;  %v1207_v43 = vadd.f32 %v10029_v27, %v1015_v8  ;;  %vm1544_vm8 = vcmp.eq.f32.partialorder %v10454_v17, %v13873_v40  ;;  %6804 = vmatpush3.bf16.msra.mxu0 %v7231_v14  ;;  %v10724_v14 = vpop.permute.xlu1 %762 }
 0x2b7   : > { %v10681_v31 = vmul.bf16 %v14016_v61, %v10457_v11  ;;  %v1836_v29 = vadd.f32 %v6195_v52, %v1644_v55  ;;  %vm14018_vm0 = vcmask 31744   ;;  %vm1853_vm9 = vcmp.eq.f32.partialorder %v14020_v51, %v13779_v0  ;;  %vm10737_vm11 = vmand %vm1544_vm8, %vm1556_vm6  ;;  %v10741_v24 = vpop.permute.xlu0 %797  ;;  %v14028_v55 = vld [vmem:[#allocation79_spill] sm:$0xff] }
 0x2b8   : > { %v2026_v10 = vsel %vm14018_vm0, %v10660_v49, 0.0  ;;  %7352 = vtanh.bf16 %v3780_v35  ;;  %v10712_v28 = vmul.bf16 %v3399_v41, %v10602_v7  ;;  %v10715_v8 = vsel %vm1972_vm7, %v13752_v37, 0.0  ;;  %14029 = vst [vmem:[#allocation79_spill] sm:$0xff] %v10747_v1  ;;  %vm14031_vm4 = vmmov %vm14018_vm0 }
 0x2b9   : > { %2027 = vadd.xlane.f32.xlu1 %v2026_v10  ;;  %14024 = vst [vmem:[#allocation94_spill] sm:$0xff] %v10715_v8  ;;  %v6219_v16 = vsel %vm10673_vm15, 1.0, %v13683_v4  ;;  %v10720_v39 = vadd.f32 %v6079_v48, %v6055_v30  ;;  %vm1448_vm3 = vcmp.gt.f32.partialorder %v10454_v17, %v13873_v40  ;;  %7354 = vtanh.bf16 %v3782_v34  ;;  %v14033_v10 = vld [vmem:[#allocation25_spill] sm:$0xff]  ;;  %v14034_v17 = vld [vmem:[#allocation43_spill] sm:$0xff]  ;;  %vm14037_vm7 = vmmov %vm14018_vm0  ;;  %v10788_v34 = vpop.f32.mrf.mxu1 }
 0x2ba   : > { %14023 = vst [vmem:[#allocation61_spill] sm:$0xff] %v10712_v28  ;;  %v1957_v35 = vadd.f32 %v6219_v16, %v1836_v29  ;;  %v10730_v41 = vsel %vm1455_vm2, 1.0, %v13683_v4  ;;  %v2747_v30 = vadd.f32 %v9776_v21, %v8326_v15  ;;  %v3942_v53 = vadd.bf16 1065369472, %v14028_v55  ;;  %v10757_v29 = vpop.f32.mrf.mxu0  ;;  %14038 = vst [vmem:[#allocation43_spill] sm:$0xff] %v10788_v34  ;;  %v14061_v28 = vld [vmem:[#allocation74_spill] sm:$0xff] }
 0x2bb   : > { %14025 = vst [vmem:[#allocation95_spill] sm:$0xff] %v10730_v41  ;;  %v10752_v61 = vsel %vm10707_vm14, 1.0, %v13683_v4  ;;  %v1328_v48 = vadd.f32 %v10034_v62, %v1207_v43  ;;  %v2032_v52 = vsel %vm14031_vm4, %v10715_v8, 0.0  ;;  %14032 = vst [vmem:[#allocation97_spill] sm:$0xff] %v10757_v29  ;;  %v6144_v21 = vsel %vm1448_vm3, 1.0, %v13683_v4  ;;  %v10809_v34 = vpop.permute.xlu1 %1397  ;;  %v10839_v1 = vpop.f32.mrf.mxu1 }
 0x2bc   : > { %14030 = vst [vmem:[#allocation96_spill] sm:$0xff] %v10752_v61  ;;  %vm1981_vm10 = vcmp.lt.f32.partialorder %v1957_v35, 2.0  ;;  %vm1141_vm13 = vcmp.gt.f32.partialorder %v10570_v58, %v14033_v10  ;;  %v2751_v62 = vadd.f32 %v9870_v25, %v8326_v15  ;;  %v10771_v43 = vsel %vm10737_vm11, 1.0, %v13683_v4  ;;  %v14036_v25 = vld [vmem:[#allocation6_spill] sm:$0xff]  ;;  %v10811_v3 = vpop.f32.mrf.mxu0  ;;  %v7235_v61 = vld [vmem:[%s13454_s5 + $0x198] sm:$0xff]   ;;  %14046 = vst [vmem:[#allocation98_spill] sm:$0xff] %v10839_v1 }
 0x2bd   : > { %2033 = vadd.xlane.f32.xlu1 %v2032_v52  ;;  %vm927_vm15 = vcmp.eq.f32.partialorder %v10741_v24, %v13832_v9  ;;  %v2900_v16 = vadd.f32 %v14034_v17, %v8357_v36  ;;  %v10778_v35 = vsel %vm1981_vm10, %v13893_v46, 0.0  ;;  %vm920_vm2 = vcmp.eq.f32.partialorder %v10724_v14, %v13921_v54  ;;  %v7232_v17 = vld [vmem:[%s13454_s5 + $0x158] sm:$0xff]   ;;  %v7239_v1 = vld [vmem:[%s13454_s5 + $0x190] sm:$0xff]  }
 0x2be   : > { %14035 = vst [vmem:[#allocation25_spill] sm:$0xff] %v10778_v35  ;;  %v7347_v55 = vpop.eup %7346  ;;  %v10782_v52 = vmul.bf16 1056980736, %v3942_v53  ;;  %v2904_v37 = vadd.f32 %v14036_v25, %v8357_v36  ;;  %v2059_v27 = vsel %vm14037_vm7, %v10778_v35, 0.0  ;;  %v7233_v46 = vld [vmem:[%s13454_s5 + $0x1d8] sm:$0xff]   ;;  %v14039_v25 = vld [vmem:[#allocation76_spill] sm:$0xff]  ;;  %v1520_v49 = vadd.f32 %v6144_v21, %v1328_v48  ;;  %vm10829_vm3 = vmand %vm927_vm15, %vm930_vm1  ;;  %6717 = vmatprep.subr.bf16.mxu1 %v7232_v17  ;;  %v10856_v17 = vpop.f32.mrf.mxu0 }
 0x2bf   : > { %v7234_v53 = vld [vmem:[%s13454_s5 + $0x118] sm:$0xff]   ;;  %vm1855_vm8 = vcmp.eq.f32.partialorder %v14039_v25, %v13831_v33  ;;  %v10805_v35 = vsel %vm1141_vm13, 1.0, %v13683_v4  ;;  %vm1237_vm0 = vcmp.eq.f32.partialorder %v10570_v58, %v14033_v10  ;;  %v3940_v50 = vadd.bf16 1065369472, %v7347_v55  ;;  %2060 = vadd.xlane.f32.xlu0 %v2059_v27  ;;  %14041 = vst [vmem:[#allocation76_spill] sm:$0xff] %v10811_v3  ;;  %v7236_v48 = vld [vmem:[%s13454_s5 + $0x150] sm:$0xff]   ;;  %6805 = vmatprep.subr.bf16.mxu0 %v7233_v46  ;;  %vm10848_vm4 = vmand %vm920_vm2, %vm930_vm1 }
 0x2c0   : > { %v7349_v8 = vpop.eup %7348  ;;  %14040 = vst [vmem:[#allocation6_spill] sm:$0xff] %v10805_v35  ;;  %v7237_v21 = vld [vmem:[%s13454_s5 + $0x1d0] sm:$0xff]   ;;  %vm831_vm14 = vcmp.gt.f32.partialorder %v10741_v24, %v13832_v9  ;;  %v14044_v55 = vld [vmem:[#allocation19_spill] sm:$0xff]  ;;  %v10837_v29 = vpack.c.bf16 %v2751_v62, %v2747_v30  ;;  %vm824_vm11 = vcmp.gt.f32.partialorder %v10724_v14, %v13921_v54  ;;  %6718 = vmatpush3.bf16.msra.mxu1 %v7234_v53  ;;  %vm10869_vm10 = vmand %vm1237_vm0, %vm1243_vm5  ;;  %v6074_v24 = vsel %vm10848_vm4, 1.0, %v13683_v4 }
 0x2c1   : > { %v7351_v35 = vpop.eup %7350  ;;  %v10835_v3 = vadd.f32 %v14044_v55, %v8455_v45  ;;  %v3941_v41 = vadd.bf16 1065369472, %v7349_v8  ;;  %v14049_v8 = vld [vmem:[#allocation85_spill] sm:$0xff]  ;;  %v4036_v55 = vmul.bf16 1056980736, %v3940_v50  ;;  %6806 = vmatpush3.bf16.msra.mxu0 %v7235_v61  ;;  %v7238_v46 = vld [vmem:[%s13454_s5 + $0x110] sm:$0xff]   ;;  %vm1767_vm13 = vcmp.gt.f32.partialorder %v10652_v47, %v14033_v10  ;;  %6719 = vmatprep.subr.bf16.mxu1 %v7236_v48  ;;  %vm10884_vm15 = vmand %vm1853_vm9, %vm1869_vm12 }
 0x2c2   : > { %14045 = vst [vmem:[#allocation19_spill] sm:$0xff] %v10837_v29  ;;  %v10854_v30 = vadd.f32 %v14049_v8, %v8458_v23  ;;  %v3943_v62 = vadd.bf16 1065369472, %v7351_v35  ;;  %14050 = vst [vmem:[#allocation85_spill] sm:$0xff] %v10856_v17  ;;  %v14053_v61 = vld [vmem:[#allocation4_spill] sm:$0xff]  ;;  %v10877_v8 = vpack.c.bf16 %v2904_v37, %v2900_v16  ;;  %6807 = vmatprep.subr.bf16.mxu0 %v7237_v21  ;;  %v6081_v16 = vsel %vm10829_vm3, 1.0, %v13683_v4  ;;  %v1097_v17 = vpop.permute.xlu1 %1096 }
 0x2c3   : > { %v4037_v50 = vmul.bf16 1056980736, %v3941_v41  ;;  %v4134_v53 = vmul.bf16 %v10782_v52, %v14053_v61  ;;  %v6057_v41 = vsel %vm831_vm14, 1.0, %v13683_v4  ;;  %v10895_v52 = vpop.permute.xlu0 %1425  ;;  %v14057_v48 = vld [vmem:[#allocation54_spill] sm:$0xff]  ;;  %vm1857_vm9 = vcmp.eq.f32.partialorder %v9805_v22, %v13873_v40 }
 0x2c4   : > { %14054 = vst [vmem:[#allocation4_spill] sm:$0xff] %v10877_v8  ;;  %v4039_v37 = vmul.bf16 1056980736, %v3943_v62  ;;  %v4132_v21 = vmul.bf16 %v4036_v55, %v14057_v48  ;;  %v6050_v51 = vsel %vm824_vm11, 1.0, %v13683_v4  ;;  %v3404_v61 = vmul.bf16 %v10837_v29, %v10837_v29  ;;  %v10910_v62 = vpop.f32.mrf.mxu1  ;;  %6720 = vmatpush3.bf16.msra.mxu1 %v7238_v46  ;;  %vm10981_vm11 = vmand %vm1855_vm8, %vm1869_vm12  ;;  %v7244_v25 = vld [vmem:[%s13454_s5 + $0x140] sm:$0xff]  }
 0x2c5   : > { %v4133_v27 = vmul.bf16 %v4037_v50, %v13995_v32  ;;  %14058 = vst [vmem:[#allocation54_spill] sm:$0xff] %v10910_v62  ;;  %v10913_v55 = vadd.f32 %v10771_v43, %v1520_v49  ;;  %v10918_v48 = vsel %vm10869_vm10, 1.0, %v13683_v4  ;;  %v1829_v7 = vadd.f32 %v14061_v28, %v14060_v59  ;;  %v10923_v32 = vpop.f32.mrf.mxu0  ;;  %6808 = vmatpush3.bf16.msra.mxu0 %v7239_v1  ;;  %v14063_v43 = vld [vmem:[#allocation86_spill] sm:$0xff]  ;;  %v14066_v59 = vld [vmem:[#allocation71_spill] sm:$0xff] }
 0x2c6   : > { %14059 = vst [vmem:[#allocation99_spill] sm:$0xff] %v10918_v48  ;;  %v4135_v14 = vmul.bf16 %v4039_v37, %v13999_v12  ;;  %14062 = vst [vmem:[#allocation89_spill] sm:$0xff] %v10923_v32  ;;  %v10925_v50 = vpop.eup %7352  ;;  %vm1457_vm2 = vcmp.gt.f32.partialorder %v10895_v52, %v13832_v9  ;;  %v3406_v49 = vmul.bf16 %v10877_v8, %v10877_v8  ;;  %v6212_v28 = vsel %vm10884_vm15, 1.0, %v13683_v4  ;;  %v10953_v47 = vpop.f32.mrf.mxu1 }
 0x2c7   : > { %4393 = vmatprep.mubr.bf16.mxu1 %v4133_v27  ;;  %v2753_v12 = vadd.f32 %v14063_v43, %v8455_v45  ;;  %v10936_v35 = vpop.eup %7354  ;;  %v10942_v1 = vsel %vm1767_vm13, 1.0, %v13683_v4  ;;  %v10944_v46 = vadd.f32 %v6081_v16, %v6057_v41  ;;  %v1017_v37 = vadd.f32 %v6074_v24, %v6050_v51  ;;  %v14067_v43 = vld [vmem:[#allocation73_spill] sm:$0xff]  ;;  %14069 = vst [vmem:[#allocation71_spill] sm:$0xff] %v10953_v47  ;;  %v10965_v51 = vpop.f32.mrf.mxu0  ;;  %v7240_v24 = vld [vmem:[%s13454_s5 + $0x148] sm:$0xff]   ;;  %vm11050_vm15 = vmand %vm1857_vm9, %vm1869_vm12 }
 0x2c8   : > { %14064 = vst [vmem:[#allocation74_spill] sm:$0xff] %v10942_v1  ;;  %4823 = vmatprep.mubr.bf16.mxu0 %v4135_v14  ;;  %4394 = vmatmul.mubr.bf16.gmra.mxu1 %v4132_v21  ;;  %v1950_v27 = vadd.f32 %v6212_v28, %v1829_v7  ;;  %vm1553_vm7 = vcmp.eq.f32.partialorder %v10895_v52, %v13832_v9  ;;  %v14068_v32 = vmul.bf16 1027030327, %v14067_v43  ;;  %v10959_v41 = vsel %vm1457_vm2, 1.0, %v13683_v4  ;;  %v14071_v7 = vld [vmem:[#allocation7_spill] sm:$0xff]  ;;  %v14078_v1 = vld [vmem:[#allocation78_spill] sm:$0xff] }
 0x2c9   : > { %14065 = vst [vmem:[#allocation86_spill] sm:$0xff] %v10944_v46  ;;  %4824 = vmatmul.mubr.bf16.gmra.mxu0 %v4134_v53  ;;  %v3500_v58 = vmul.bf16 %v3404_v61, %v10837_v29  ;;  %vm1140_vm0 = vcmp.gt.f32.partialorder %v1097_v17, %v13952_v13  ;;  %14070 = vst [vmem:[#allocation73_spill] sm:$0xff] %v10959_v41  ;;  %vm1236_vm14 = vcmp.eq.f32.partialorder %v1097_v17, %v13952_v13  ;;  %v14072_v53 = vld [vmem:[#allocation75_spill] sm:$0xff]  ;;  %vm14079_vm8 = vcmask 31744   ;;  %v7246_v17 = vld [vmem:[%s13454_s5 + $0x100] sm:$0xff]  }
 0x2ca   : > { %v3661_v62 = vadd.bf16 %v14068_v32, %v14066_v59  ;;  %vm1974_vm3 = vcmp.lt.f32.partialorder %v1950_v27, 2.0  ;;  %v14073_v16 = vmul.bf16 1027030327, %v14072_v53  ;;  %14074 = vst [vmem:[#allocation7_spill] sm:$0xff] %v10965_v51  ;;  %v7241_v61 = vld [vmem:[%s13454_s5 + $0x1c8] sm:$0xff]   ;;  %v10986_v28 = vmul.bf16 %v3406_v49, %v10877_v8  ;;  %6721 = vmatprep.subr.bf16.mxu1 %v7240_v24  ;;  %vm11012_vm10 = vmand %vm1236_vm14, %vm1243_vm5  ;;  %v1109_v24 = vpop.permute.xlu0 %1108 }
 0x2cb   : > { %v7242_v14 = vld [vmem:[%s13454_s5 + $0x108] sm:$0xff]   ;;  %v10989_v27 = vpack.c.bf16 %v2753_v12, %v10835_v3  ;;  %v10992_v43 = vsel %vm1974_vm3, %v13779_v0, 0.0  ;;  %v1209_v51 = vadd.f32 %v14078_v1, %v1017_v37  ;;  %v6101_v49 = vsel %vm1140_vm0, 1.0, %v13683_v4  ;;  %6809 = vmatprep.subr.bf16.mxu0 %v7241_v61  ;;  %vm11070_vm9 = vmand %vm1553_vm7, %vm1556_vm6 }
 0x2cc   : > { %v3663_v21 = vadd.bf16 %v14073_v16, %v14071_v7  ;;  %14077 = vst [vmem:[#allocation75_spill] sm:$0xff] %v10992_v43  ;;  %v3757_v53 = vmul.bf16 1061961548, %v3661_v62  ;;  %v7243_v16 = vld [vmem:[%s13454_s5 + $0x188] sm:$0xff]   ;;  %v2038_v3 = vsel %vm14079_vm8, %v10992_v43, 0.0  ;;  %vm1450_vm4 = vcmp.gt.f32.partialorder %v10809_v34, %v13921_v54  ;;  %6722 = vmatpush3.bf16.msra.mxu1 %v7242_v14  ;;  %v11033_v14 = vpop.f32.mrf.mxu0  ;;  %vm14101_vm3 = vmmov %vm14079_vm8 }
 0x2cd   : > { %v3596_v62 = vmul.bf16 1027030327, %v3500_v58  ;;  %2039 = vadd.xlane.f32.xlu1 %v2038_v3  ;;  %v14082_v1 = vld [vmem:[#allocation47_spill] sm:$0xff]  ;;  %v7245_v58 = vld [vmem:[%s13454_s5 + $0x1c0] sm:$0xff]   ;;  %vm1546_vm13 = vcmp.eq.f32.partialorder %v10809_v34, %v13921_v54  ;;  %6810 = vmatpush3.bf16.msra.mxu0 %v7243_v16  ;;  %vm1859_vm7 = vcmp.eq.f32.partialorder %v10053_v63, %v13921_v54 }
 0x2ce   : > { %v3759_v0 = vmul.bf16 1061961548, %v3663_v21  ;;  %7356 = vtanh.bf16 %v3757_v53  ;;  %v1831_v37 = vadd.f32 %v14082_v1, %v10526_v5  ;;  %v11018_v21 = vpop.f32.mrf.mxu1  ;;  %v14084_v61 = vld [vmem:[#allocation67_spill] sm:$0xff]  ;;  %v6214_v5 = vsel %vm10981_vm11, 1.0, %v13683_v4  ;;  %14085 = vst [vmem:[#allocation47_spill] sm:$0xff] %v11033_v14  ;;  %6723 = vmatprep.subr.bf16.mxu1 %v7244_v25  ;;  %v7247_v3 = vld [vmem:[%s13454_s5 + $0x180] sm:$0xff]   ;;  %6811 = vmatprep.subr.bf16.mxu0 %v7245_v58  ;;  %vm11096_vm14 = vmand %vm1546_vm13, %vm1556_vm6 }
 0x2cf   : > { %14083 = vst [vmem:[#allocation78_spill] sm:$0xff] %v11018_v21  ;;  %v2906_v53 = vadd.f32 %v14084_v61, %v8458_v23  ;;  %v1212_v1 = vadd.f32 %v6101_v49, %v10462_v6  ;;  %v14086_v43 = vld [vmem:[#allocation59_spill] sm:$0xff]  ;;  %v14091_v6 = vld [vmem:[#allocation22_spill] sm:$0xff]  ;;  %v3598_v25 = vmul.bf16 1027030327, %v10986_v28  ;;  %v6125_v49 = vsel %vm11012_vm10, 1.0, %v13683_v4  ;;  %vm14114_vm10 = vmmov %vm14101_vm3 }
 0x2d0   : > { %7358 = vtanh.bf16 %v3759_v0  ;;  %v2757_v21 = vadd.f32 %v14086_v43, %v8326_v15  ;;  %v1952_v41 = vadd.f32 %v6214_v5, %v1831_v37  ;;  %v14087_v0 = vld [vmem:[#allocation48_spill] sm:$0xff]  ;;  %v11043_v47 = vpop.f32.mrf.mxu1  ;;  %v1330_v16 = vadd.f32 %v14091_v6, %v1209_v51  ;;  %v11063_v37 = vpop.f32.mrf.mxu0  ;;  %6724 = vmatpush3.bf16.msra.mxu1 %v7246_v17  ;;  %v14098_v6 = vld [vmem:[#allocation49_spill] sm:$0xff] }
 0x2d1   : > { %v2761_v61 = vadd.f32 %v14087_v0, %v8326_v15  ;;  %14088 = vst [vmem:[#allocation67_spill] sm:$0xff] %v11043_v47  ;;  %v6146_v43 = vsel %vm1450_vm4, 1.0, %v13683_v4  ;;  %14092 = vst [vmem:[#allocation59_spill] sm:$0xff] %v11063_v37  ;;  %v3692_v51 = vadd.bf16 %v3596_v62, %v10837_v29  ;;  %v14095_v58 = vld [vmem:[#allocation28_spill] sm:$0xff]  ;;  %v3405_v28 = vmul.bf16 %v10989_v27, %v10989_v27 }
 0x2d2   : > { %vm1239_vm2 = vcmp.eq.f32.partialorder %v1109_v24, %v14095_v58  ;;  %vm1976_vm0 = vcmp.lt.f32.partialorder %v1952_v41, 2.0  ;;  %v11079_v12 = vpack.c.bf16 %v2906_v53, %v10854_v30  ;;  %v14096_v5 = vld [vmem:[#allocation24_spill] sm:$0xff]  ;;  %v2914_v47 = vadd.f32 %v14098_v6, %v8357_v36  ;;  %6812 = vmatpush3.bf16.msra.mxu0 %v7247_v3  ;;  %6953 = vmatprep.subr.bf16.mxu1 %v10420_v42  ;;  %v11106_v53 = vpop.f32.mrf.mxu1 }
 0x2d3   : > { %v2910_v0 = vadd.f32 %v14096_v5, %v8357_v36  ;;  %v11084_v52 = vsel %vm1976_vm0, %v13831_v33, 0.0  ;;  %v1333_v33 = vadd.f32 %v6125_v49, %v1212_v1  ;;  %v11102_v62 = vpack.c.bf16 %v2761_v61, %v2757_v21  ;;  %v14102_v42 = vld [vmem:[#allocation20_spill] sm:$0xff]  ;;  %14103 = vst [vmem:[#allocation22_spill] sm:$0xff] %v11106_v53  ;;  %v11117_v21 = vpop.f32.mrf.mxu0  ;;  %vm1264_vm8 = vmand %vm1239_vm2, %vm1243_vm5 }
 0x2d4   : > { %14097 = vst [vmem:[#allocation48_spill] sm:$0xff] %v11084_v52  ;;  %v2044_v41 = vsel %vm14101_vm3, %v11084_v52, 0.0  ;;  %v1833_v17 = vadd.f32 %v14102_v42, %v10913_v55  ;;  %v11111_v3 = vsel %vm11070_vm9, 1.0, %v13683_v4  ;;  %v1522_v34 = vadd.f32 %v6146_v43, %v1330_v16  ;;  %v14105_v5 = vld [vmem:[#allocation36_spill] sm:$0xff]  ;;  %14106 = vst [vmem:[#allocation24_spill] sm:$0xff] %v11117_v21  ;;  %v14107_v55 = vld [vmem:[#allocation10_spill] sm:$0xff] }
 0x2d5   : > { %14104 = vst [vmem:[#allocation28_spill] sm:$0xff] %v11111_v3  ;;  %v3948_v6 = vadd.bf16 1065369472, %v14105_v5  ;;  %2045 = vadd.xlane.f32.xlu1 %v2044_v41  ;;  %v6216_v1 = vsel %vm11050_vm15, 1.0, %v13683_v4  ;;  %v11120_v61 = vadd.bf16 %v3598_v25, %v10877_v8  ;;  %vm1143_vm11 = vcmp.gt.f32.partialorder %v1109_v24, %v14095_v58  ;;  %v14116_v53 = vld [vmem:[#allocation12_spill] sm:$0xff]  ;;  %vm11197_vm2 = vmand %vm1859_vm7, %vm1869_vm12 }
 0x2d6   : > { %v3950_v49 = vadd.bf16 1065369472, %v14107_v55  ;;  %v1954_v22 = vadd.f32 %v6216_v1, %v1833_v17  ;;  %v6170_v16 = vsel %vm11096_vm14, 1.0, %v13683_v4  ;;  %v3788_v43 = vmul.bf16 1061961548, %v3692_v51  ;;  %v11141_v17 = vpop.permute.xlu1 %1722  ;;  %v11143_v51 = vpop.f32.mrf.mxu1 }
 0x2d7   : > { %v11132_v32 = vmul.bf16 %v3405_v28, %v10989_v27  ;;  %v11134_v25 = vpack.c.bf16 %v2914_v47, %v2910_v0  ;;  %v3407_v41 = vmul.bf16 %v11079_v12, %v11079_v12  ;;  %v1525_v42 = vadd.f32 %v10468_v44, %v1333_v33  ;;  %14108 = vst [vmem:[#allocation49_spill] sm:$0xff] %v11143_v51  ;;  %v11151_v0 = vpop.f32.mrf.mxu0  ;;  %v11157_v1 = vpop.permute.xlu0 %1734 }
 0x2d8   : > { %v3412_v30 = vmul.bf16 %v11102_v62, %v11102_v62  ;;  %vm1978_vm4 = vcmp.lt.f32.partialorder %v1954_v22, 2.0  ;;  %v1643_v24 = vadd.f32 %v6170_v16, %v1522_v34  ;;  %v11146_v5 = vsel %vm1143_vm11, 1.0, %v13683_v4  ;;  %14111 = vst [vmem:[#allocation10_spill] sm:$0xff] %v11151_v0  ;;  %14113 = vst [vmem:[#allocation101_spill] sm:$0xff] %v11157_v1  ;;  %v14122_v0 = vld [vmem:[#allocation30_spill] sm:$0xff] }
 0x2d9   : > { %14109 = vst [vmem:[#allocation20_spill] sm:$0xff] %v11146_v5  ;;  %v4044_v28 = vmul.bf16 1056980736, %v3948_v6  ;;  %v11149_v47 = vsel %vm1978_vm4, %v13873_v40, 0.0  ;;  %v3790_v44 = vmul.bf16 1061961548, %v11120_v61  ;;  %7360 = vtanh.bf16 %v3788_v43 }
 0x2da   : > { %14110 = vst [vmem:[#allocation36_spill] sm:$0xff] %v11149_v47  ;;  %v11155_v33 = vsel %vm1264_vm8, 1.0, %v13683_v4  ;;  %v4046_v55 = vmul.bf16 1056980736, %v3950_v49  ;;  %v2050_v34 = vsel %vm14114_vm10, %v11149_v47, 0.0  ;;  %v14115_v6 = vld [vmem:[#allocation27_spill] sm:$0xff]  ;;  %v3414_v16 = vmul.bf16 %v11134_v25, %v11134_v25  ;;  %v11173_v47 = vpop.f32.mrf.mxu1 }
 0x2db   : > { %14112 = vst [vmem:[#allocation100_spill] sm:$0xff] %v11155_v33  ;;  %v2759_v40 = vadd.f32 %v14115_v6, %v8455_v45  ;;  %2051 = vadd.xlane.f32.xlu1 %v2050_v34  ;;  %v11167_v52 = vmul.bf16 %v3407_v41, %v11079_v12  ;;  %v2912_v49 = vadd.f32 %v14116_v53, %v8458_v23  ;;  %14117 = vst [vmem:[#allocation27_spill] sm:$0xff] %v11173_v47  ;;  %v14118_v6 = vld [vmem:[#allocation62_spill] sm:$0xff]  ;;  %v11182_v53 = vpop.f32.mrf.mxu0  ;;  %v14123_v33 = vld [vmem:[#allocation9_spill] sm:$0xff]  ;;  %v808_v29 = vpop.permute.xlu0 %807 }
 0x2dc   : > { %v7357_v61 = vpop.eup %7356  ;;  %v3508_v51 = vmul.bf16 %v3412_v30, %v11102_v62  ;;  %v1646_v43 = vadd.f32 %v10473_v2, %v1525_v42  ;;  %vm1769_vm13 = vcmp.gt.f32.partialorder %v11157_v1, %v14095_v58  ;;  %v4140_v34 = vmul.bf16 %v4044_v28, %v14118_v6  ;;  %14119 = vst [vmem:[#allocation12_spill] sm:$0xff] %v11182_v53  ;;  %v14120_v30 = vld [vmem:[#allocation63_spill] sm:$0xff]  ;;  %v11190_v28 = vpop.f32.mrf.mxu1 }
 0x2dd   : > { %v3949_v21 = vadd.bf16 1065369472, %v7357_v61  ;;  %vm1766_vm15 = vcmp.gt.f32.partialorder %v11141_v17, %v13952_v13  ;;  %vm1862_vm9 = vcmp.eq.f32.partialorder %v11141_v17, %v13952_v13  ;;  %v4142_v2 = vmul.bf16 %v4046_v55, %v14120_v30  ;;  %v14121_v42 = vld [vmem:[#allocation51_spill] sm:$0xff]  ;;  %v773_v61 = vpop.permute.xlu1 %772  ;;  %14125 = vst [vmem:[#allocation62_spill] sm:$0xff] %v11190_v28  ;;  %v14128_v30 = vld [vmem:[#allocation82_spill] sm:$0xff]  ;;  %v11207_v28 = vpop.f32.mrf.mxu0 }
 0x2de   : > { %v7359_v22 = vpop.eup %7358  ;;  %v2763_v47 = vadd.f32 %v14121_v42, %v8455_v45  ;;  %v14124_v37 = vmul.bf16 1027030327, %v14123_v33  ;;  %v2916_v42 = vadd.f32 %v14128_v30, %v8458_v23  ;;  %v14129_v53 = vld [vmem:[#allocation55_spill] sm:$0xff]  ;;  %v14130_v33 = vld [vmem:[#allocation18_spill] sm:$0xff]  ;;  %14132 = vst [vmem:[#allocation63_spill] sm:$0xff] %v11207_v28  ;;  %v1835_v46 = vadd.f32 %v10431_v57, %v1643_v24  ;;  %vm11262_vm10 = vmand %vm1862_vm9, %vm1869_vm12 }
 0x2df   : > { %v3951_v41 = vadd.bf16 1065369472, %v7359_v22  ;;  %v4045_v55 = vmul.bf16 1056980736, %v3949_v21  ;;  %v3510_v22 = vmul.bf16 %v3414_v16, %v11134_v25  ;;  %v3604_v8 = vmul.bf16 1027030327, %v3508_v51 }
 0x2e0   : > { %v3669_v14 = vadd.bf16 %v14124_v37, %v14122_v0  ;;  %v14131_v37 = vmul.bf16 1027030327, %v14130_v33  ;;  %v14133_v21 = vld [vmem:[#allocation2_spill] sm:$0xff]  ;;  %vm922_vm0 = vcmp.eq.f32.partialorder %v773_v61, %v13976_v26  ;;  %v11220_v33 = vpop.f32.mrf.mxu1  ;;  %v6197_v57 = vsel %vm1766_vm15, 1.0, %v13683_v4 }
 0x2e1   : > { %v4047_v3 = vmul.bf16 1056980736, %v3951_v41  ;;  %v4141_v48 = vmul.bf16 %v4045_v55, %v14066_v59  ;;  %v2767_v16 = vadd.f32 %v14133_v21, %v8326_v15  ;;  %v6218_v41 = vsel %vm11197_vm2, 1.0, %v13683_v4  ;;  %v14134_v51 = vld [vmem:[#allocation90_spill] sm:$0xff]  ;;  %14135 = vst [vmem:[#allocation51_spill] sm:$0xff] %v11220_v33  ;;  %v14136_v59 = vld [vmem:[#allocation40_spill] sm:$0xff]  ;;  %vm947_vm3 = vmand %vm922_vm0, %vm930_vm1 }
 0x2e2   : > { %v3671_v5 = vadd.bf16 %v14131_v37, %v14129_v53  ;;  %v3765_v63 = vmul.bf16 1061961548, %v3669_v14  ;;  %v2771_v14 = vadd.f32 %v14134_v51, %v8326_v15  ;;  %vm929_vm7 = vcmp.eq.f32.partialorder %v808_v29, %v14136_v59 }
 0x2e3   : > { %v4143_v9 = vmul.bf16 %v4047_v3, %v14071_v7  ;;  %4401 = vmatprep.mubr.bf16.mxu1 %v4141_v48  ;;  %v1956_v7 = vadd.f32 %v6218_v41, %v1835_v46  ;;  %v11227_v3 = vpop.f32.mrf.mxu0  ;;  %v1838_v24 = vadd.f32 %v6197_v57, %v1646_v43  ;;  %vm826_vm14 = vcmp.gt.f32.partialorder %v773_v61, %v13976_v26  ;;  %vm11246_vm4 = vmand %vm929_vm7, %vm930_vm1 }
 0x2e4   : > { %v3767_v30 = vmul.bf16 1061961548, %v3671_v5  ;;  %7362 = vtanh.bf16 %v3765_v63  ;;  %14137 = vst [vmem:[#allocation30_spill] sm:$0xff] %v11227_v3  ;;  %4402 = vmatmul.mubr.bf16.gmra.mxu1 %v4140_v34  ;;  %v11229_v5 = vpack.c.bf16 %v2763_v47, %v2759_v40  ;;  %v11236_v48 = vpack.c.bf16 %v2916_v42, %v2912_v49  ;;  %v14141_v40 = vld [vmem:[#allocation84_spill] sm:$0xff]  ;;  %v11255_v34 = vpop.f32.mrf.mxu1  ;;  %v14150_v63 = vld [vmem:[#allocation87_spill] sm:$0xff] }
 0x2e5   : > { %4831 = vmatprep.mubr.bf16.mxu0 %v4143_v9  ;;  %vm833_vm11 = vcmp.gt.f32.partialorder %v808_v29, %v14136_v59  ;;  %vm1980_vm8 = vcmp.lt.f32.partialorder %v1956_v7, 2.0  ;;  %v11239_v46 = vpack.c.bf16 %v2771_v14, %v2767_v16  ;;  %v3700_v9 = vadd.bf16 %v3604_v8, %v11102_v62  ;;  %14143 = vst [vmem:[#allocation55_spill] sm:$0xff] %v11255_v34  ;;  %v14156_v8 = vld [vmem:[#allocation88_spill] sm:$0xff] }
 0x2e6   : > { %7364 = vtanh.bf16 %v3767_v30  ;;  %4832 = vmatmul.mubr.bf16.gmra.mxu0 %v4142_v2  ;;  %v2920_v49 = vadd.f32 %v14141_v40, %v8357_v36  ;;  %v11253_v43 = vsel %vm1980_vm8, %v13921_v54, 0.0  ;;  %v6052_v2 = vsel %vm826_vm14, 1.0, %v13683_v4  ;;  %v14147_v54 = vld [vmem:[#allocation91_spill] sm:$0xff] }
 0x2e7   : > { %7366 = vtanh.bf16 %v3790_v44  ;;  %14138 = vst [vmem:[#allocation9_spill] sm:$0xff] %v11239_v46  ;;  %v3606_v44 = vmul.bf16 1027030327, %v3510_v22  ;;  %14142 = vst [vmem:[#allocation82_spill] sm:$0xff] %v11253_v43  ;;  %v6076_v61 = vsel %vm947_vm3, 1.0, %v13683_v4  ;;  %vm14146_vm15 = vcmask 31744   ;;  %v11272_v22 = vpop.f32.mrf.mxu0  ;;  %v11285_v16 = vpop.eup %7360 }
 0x2e8   : > { %v2056_v6 = vsel %vm14146_vm15, %v11253_v43, 0.0  ;;  %v2924_v55 = vadd.f32 %v14147_v54, %v8357_v36  ;;  %14148 = vst [vmem:[#allocation18_spill] sm:$0xff] %v11272_v22  ;;  %v11279_v17 = vsel %vm1769_vm13, 1.0, %v13683_v4  ;;  %v6059_v37 = vsel %vm833_vm11, 1.0, %v13683_v4  ;;  %v14152_v54 = vld [vmem:[#allocation17_spill] sm:$0xff]  ;;  %vm14162_vm9 = vmmov %vm14146_vm15  ;;  %v14169_v22 = vld [vmem:[#allocation80_spill] sm:$0xff] }
 0x2e9   : > { %14149 = vst [vmem:[#allocation2_spill] sm:$0xff] %v11279_v17  ;;  %v3956_v21 = vadd.bf16 1065369472, %v14150_v63  ;;  %2057 = vadd.xlane.f32.xlu1 %v2056_v6  ;;  %v3413_v30 = vmul.bf16 %v11229_v5, %v11229_v5  ;;  %v3415_v41 = vmul.bf16 %v11236_v48, %v11236_v48  ;;  %v6083_v51 = vsel %vm11246_vm4, 1.0, %v13683_v4  ;;  %v11302_v6 = vpop.f32.mrf.mxu1 }
 0x2ea   : > { %v3420_v14 = vmul.bf16 %v11239_v46, %v11239_v46  ;;  %v3796_v29 = vmul.bf16 1061961548, %v3700_v9  ;;  %v11297_v57 = vadd.bf16 %v3606_v44, %v11134_v25  ;;  %v1019_v7 = vadd.f32 %v6076_v61, %v6052_v2  ;;  %14151 = vst [vmem:[#allocation90_spill] sm:$0xff] %v11302_v6  ;;  %v11310_v9 = vpop.f32.mrf.mxu0  ;;  %v14155_v44 = vld [vmem:[#allocation83_spill] sm:$0xff] }
 0x2eb   : > { %v6221_v40 = vsel %vm11262_vm10, 1.0, %v13683_v4  ;;  %v2769_v63 = vadd.f32 %v14152_v54, %v8455_v45  ;;  %v11306_v42 = vpack.c.bf16 %v2924_v55, %v2920_v49  ;;  %v2773_v47 = vadd.f32 %v10310_v19, %v8455_v45  ;;  %14154 = vst [vmem:[#allocation91_spill] sm:$0xff] %v11310_v9  ;;  %v14157_v6 = vld [vmem:[#allocation39_spill] sm:$0xff]  ;;  %v11319_v34 = vpop.f32.mrf.mxu1  ;;  %v1406_v55 = vpop.permute.xlu1 %1405 }
 0x2ec   : > { %v1959_v43 = vadd.f32 %v6221_v40, %v1838_v24  ;;  %v2922_v2 = vadd.f32 %v14155_v44, %v8458_v23  ;;  %v11314_v61 = vmul.bf16 1056980736, %v3956_v21  ;;  %v3958_v33 = vadd.bf16 1065369472, %v14156_v8  ;;  %14158 = vst [vmem:[#allocation87_spill] sm:$0xff] %v11319_v34  ;;  %v11328_v40 = vpop.f32.mrf.mxu0  ;;  %v1434_v44 = vpop.permute.xlu0 %1433  ;;  %v14163_v34 = vld [vmem:[#allocation44_spill] sm:$0xff] }
 0x2ed   : > { %14153 = vst [vmem:[#allocation84_spill] sm:$0xff] %v11306_v42  ;;  %v2926_v3 = vadd.f32 %v14157_v6, %v8458_v23  ;;  %v11322_v49 = vmul.bf16 %v3413_v30, %v11229_v5  ;;  %v11325_v19 = vmul.bf16 %v3415_v41, %v11236_v48  ;;  %v3516_v24 = vmul.bf16 %v3420_v14, %v11239_v46 }
 0x2ee   : > { %vm1983_vm13 = vcmp.lt.f32.partialorder %v1959_v43, 2.0  ;;  %14159 = vst [vmem:[#allocation17_spill] sm:$0xff] %v11328_v40  ;;  %v3798_v21 = vmul.bf16 1061961548, %v11297_v57  ;;  %v11331_v54 = vadd.f32 %v6083_v51, %v6059_v37  ;;  %v1211_v6 = vadd.f32 %v10516_v56, %v1019_v7  ;;  %v14164_v56 = vld [vmem:[#allocation70_spill] sm:$0xff]  ;;  %v11350_v40 = vpop.f32.mrf.mxu1 }
 0x2ef   : > { %v11335_v8 = vsel %vm1983_vm13, %v13952_v13, 0.0  ;;  %7368 = vtanh.bf16 %v3796_v29  ;;  %v3422_v30 = vmul.bf16 %v11306_v42, %v11306_v42  ;;  %v11339_v41 = vpack.c.bf16 %v2773_v47, %v2769_v63  ;;  %v14165_v13 = vld [vmem:[#allocation58_spill] sm:$0xff]  ;;  %14167 = vst [vmem:[#allocation39_spill] sm:$0xff] %v11350_v40  ;;  %v14189_v40 = vld [vmem:[#allocation35_spill] sm:$0xff] }
 0x2f0   : > { %14160 = vst [vmem:[#allocation83_spill] sm:$0xff] %v11331_v54  ;;  %14161 = vst [vmem:[#allocation88_spill] sm:$0xff] %v11335_v8  ;;  %v2065_v43 = vsel %vm14162_vm9, %v11335_v8, 0.0  ;;  %v4148_v37 = vmul.bf16 %v11314_v61, %v14163_v34  ;;  %v4054_v51 = vmul.bf16 1056980736, %v3958_v33  ;;  %v11345_v57 = vpack.c.bf16 %v2926_v3, %v2922_v2  ;;  %v14168_v8 = vld [vmem:[#allocation72_spill] sm:$0xff]  ;;  %v11356_v34 = vpop.f32.mrf.mxu0 }
 0x2f1   : > { %2066 = vadd.xlane.f32.xlu0 %v2065_v43  ;;  %v14166_v7 = vmul.bf16 1027030327, %v14165_v13  ;;  %v3612_v47 = vmul.bf16 1027030327, %v3516_v24  ;;  %vm1555_vm2 = vcmp.eq.f32.partialorder %v1434_v44, %v14136_v59  ;;  %v14170_v28 = vmul.bf16 1027030327, %v14169_v22 }
 0x2f2   : > { %v7363_v14 = vpop.eup %7362  ;;  %14171 = vst [vmem:[#allocation44_spill] sm:$0xff] %v11356_v34  ;;  %v1332_v2 = vadd.f32 %v10531_v60, %v1211_v6  ;;  %vm1452_vm0 = vcmp.gt.f32.partialorder %v1406_v55, %v13976_v26  ;;  %v3421_v24 = vmul.bf16 %v11339_v41, %v11339_v41  ;;  %vm1548_vm7 = vcmp.eq.f32.partialorder %v1406_v55, %v13976_v26  ;;  %v14173_v6 = vld [vmem:[#allocation77_spill] sm:$0xff]  ;;  %vm11381_vm3 = vmand %vm1555_vm2, %vm1556_vm6 }
 0x2f3   : > { %v3677_v29 = vadd.bf16 %v14166_v7, %v14164_v56  ;;  %v3957_v63 = vadd.bf16 1065369472, %v7363_v14  ;;  %v3679_v17 = vadd.bf16 %v14170_v28, %v14168_v8  ;;  %v3518_v14 = vmul.bf16 %v3422_v30, %v11306_v42  ;;  %v1105_v7 = vpop.permute.xlu1 %1104  ;;  %vm1573_vm8 = vmand %vm1548_vm7, %vm1556_vm6 }
 0x2f4   : > { %v7365_v9 = vpop.eup %7364  ;;  %v3423_v28 = vmul.bf16 %v11345_v57, %v11345_v57  ;;  %v3708_v30 = vadd.bf16 %v3612_v47, %v11239_v46  ;;  %vm1459_vm14 = vcmp.gt.f32.partialorder %v1434_v44, %v14136_v59  ;;  %vm1142_vm11 = vcmp.gt.f32.partialorder %v1105_v7, %v13998_v18  ;;  %v14182_v44 = vld [vmem:[#allocation38_spill] sm:$0xff] }
 0x2f5   : > { %v11358_v33 = vpop.eup %7366  ;;  %v3959_v3 = vadd.bf16 1065369472, %v7365_v9  ;;  %v3773_v61 = vmul.bf16 1061961548, %v3677_v29  ;;  %v4053_v43 = vmul.bf16 1056980736, %v3957_v63  ;;  %v11368_v9 = vpop.f32.mrf.mxu1  ;;  %v4150_v29 = vmul.bf16 %v4054_v51, %v14173_v6 }
 0x2f6   : > { %v3775_v13 = vmul.bf16 1061961548, %v3679_v17  ;;  %14172 = vst [vmem:[#allocation70_spill] sm:$0xff] %v11368_v9  ;;  %v11373_v63 = vpop.f32.mrf.mxu0  ;;  %v3614_v51 = vmul.bf16 1027030327, %v3518_v14  ;;  %vm1238_vm4 = vcmp.eq.f32.partialorder %v1105_v7, %v13998_v18  ;;  %v11400_v14 = vmul.bf16 %v3423_v28, %v11345_v57  ;;  %v14181_v28 = vld [vmem:[#allocation3_spill] sm:$0xff] }
 0x2f7   : > { %v4055_v22 = vmul.bf16 1056980736, %v3959_v3  ;;  %7370 = vtanh.bf16 %v3773_v61  ;;  %v4149_v60 = vmul.bf16 %v4053_v43, %v14122_v0  ;;  %14174 = vst [vmem:[#allocation58_spill] sm:$0xff] %v11373_v63  ;;  %v6148_v0 = vsel %vm1452_vm0, 1.0, %v13683_v4  ;;  %vm11428_vm10 = vmand %vm1238_vm4, %vm1243_vm5  ;;  %v14200_v63 = vld [vmem:[#allocation13_spill] sm:$0xff] }
 0x2f8   : > { %7372 = vtanh.bf16 %v3775_v13  ;;  %v1524_v47 = vadd.f32 %v6148_v0, %v1332_v2  ;;  %v3804_v2 = vmul.bf16 1061961548, %v3708_v30  ;;  %v11407_v55 = vsel %vm1459_vm14, 1.0, %v13683_v4  ;;  %v11417_v13 = vpop.f32.mrf.mxu0  ;;  %v14185_v30 = vld [vmem:[#allocation31_spill] sm:$0xff] }
 0x2f9   : > { %v4151_v17 = vmul.bf16 %v4055_v22, %v14129_v53  ;;  %4409 = vmatprep.mubr.bf16.mxu1 %v4149_v60  ;;  %v11390_v53 = vmul.bf16 %v3421_v24, %v11339_v41  ;;  %7374 = vtanh.bf16 %v3798_v21  ;;  %v11402_v24 = vpop.f32.mrf.mxu1  ;;  %14178 = vst [vmem:[#allocation80_spill] sm:$0xff] %v11407_v55  ;;  %v11412_v21 = vsel %vm11381_vm3, 1.0, %v13683_v4  ;;  %14180 = vst [vmem:[#allocation102_spill] sm:$0xff] %v11417_v13  ;;  %v14190_v13 = vld [vmem:[#allocation34_spill] sm:$0xff] }
 0x2fa   : > { %4410 = vmatmul.mubr.bf16.gmra.mxu1 %v4148_v37  ;;  %14177 = vst [vmem:[#allocation72_spill] sm:$0xff] %v11402_v24  ;;  %14179 = vst [vmem:[#allocation77_spill] sm:$0xff] %v11412_v21  ;;  %v6103_v37 = vsel %vm1142_vm11, 1.0, %v13683_v4  ;;  %v6172_v22 = vsel %vm1573_vm8, 1.0, %v13683_v4  ;;  %v2777_v60 = vadd.f32 %v14181_v28, %v8326_v15  ;;  %v2930_v6 = vadd.f32 %v14182_v44, %v8357_v36  ;;  %v14187_v44 = vld [vmem:[#allocation50_spill] sm:$0xff]  ;;  %v11442_v24 = vpop.f32.mrf.mxu0  ;;  %v14197_v28 = vld [vmem:[#allocation64_spill] sm:$0xff] }
 0x2fb   : > { %4839 = vmatprep.mubr.bf16.mxu0 %v4151_v17  ;;  %v2781_v17 = vadd.f32 %v14185_v30, %v8326_v15  ;;  %v11434_v3 = vpop.f32.mrf.mxu1  ;;  %v3710_v0 = vadd.bf16 %v3614_v51, %v11306_v42  ;;  %v11438_v43 = vadd.f32 %v6172_v22, %v1524_v47  ;;  %v2934_v61 = vadd.f32 %v14187_v44, %v8357_v36  ;;  %v14192_v47 = vld [vmem:[#allocation21_spill] sm:$0xff]  ;;  %v14193_v36 = vld [vmem:[#allocation23_spill] sm:$0xff]  ;;  %v14194_v44 = vld [vmem:[#allocation42_spill] sm:$0xff] }
 0x2fc   : > { %4840 = vmatmul.mubr.bf16.gmra.mxu0 %v4150_v29  ;;  %14186 = vst [vmem:[#allocation3_spill] sm:$0xff] %v11434_v3  ;;  %14188 = vst [vmem:[#allocation38_spill] sm:$0xff] %v11442_v24  ;;  %v2779_v9 = vadd.f32 %v14189_v40, %v8455_v45  ;;  %v3964_v15 = vadd.bf16 1065369472, %v14190_v13  ;;  %v1214_v30 = vadd.f32 %v6103_v37, %v10720_v39  ;;  %7376 = vtanh.bf16 %v3804_v2  ;;  %v14196_v39 = vld [vmem:[#allocation5_spill] sm:$0xff]  ;;  %v11467_v24 = vpop.permute.xlu1 %1730  ;;  %v14206_v42 = vld [vmem:[#allocation60_spill] sm:$0xff] }
 0x2fd   : > { %v11449_v3 = vpop.f32.mrf.mxu1  ;;  %v11451_v51 = vpop.eup %7368  ;;  %vm1861_vm15 = vcmp.eq.f32.partialorder %v14192_v47, %v13976_v26  ;;  %v2932_v22 = vadd.f32 %v14193_v36, %v8458_v23  ;;  %v3966_v7 = vadd.bf16 1065369472, %v14194_v44  ;;  %v6127_v40 = vsel %vm11428_vm10, 1.0, %v13683_v4  ;;  %v14224_v47 = vld [vmem:[#allocation14_spill] sm:$0xff] }
 0x2fe   : > { %14191 = vst [vmem:[#allocation31_spill] sm:$0xff] %v11449_v3  ;;  %v11461_v13 = vpack.c.bf16 %v2781_v17, %v2777_v60  ;;  %v2783_v37 = vadd.f32 %v14196_v39, %v8455_v45  ;;  %v2936_v3 = vadd.f32 %v14197_v28, %v8458_v23  ;;  %v14198_v2 = vmul.bf16 1027030327, %v10681_v31  ;;  %v14201_v60 = vld [vmem:[#allocation26_spill] sm:$0xff]  ;;  %v14202_v17 = vld [vmem:[#allocation61_spill] sm:$0xff]  ;;  %v11479_v45 = vpop.f32.mrf.mxu0  ;;  %v14205_v28 = vld [vmem:[#allocation15_spill] sm:$0xff] }
 0x2ff   : > { %v3806_v34 = vmul.bf16 1061961548, %v3710_v0  ;;  %v11472_v44 = vpack.c.bf16 %v2934_v61, %v2930_v6  ;;  %v2973_v29 = vadd.f32 %v10625_v20, %v14200_v63  ;;  %v14203_v21 = vmul.bf16 1027030327, %v14202_v17  ;;  %14204 = vst [vmem:[#allocation34_spill] sm:$0xff] %v11479_v45  ;;  %v11483_v31 = vpop.f32.mrf.mxu1  ;;  %v14208_v6 = vld [vmem:[#allocation79_spill] sm:$0xff]  ;;  %vm11528_vm9 = vmand %vm1861_vm15, %vm1869_vm12 }
 0x300   : > { %14195 = vst [vmem:[#allocation50_spill] sm:$0xff] %v11461_v13  ;;  %v3685_v36 = vadd.bf16 %v14198_v2, %v10457_v11  ;;  %v4060_v39 = vmul.bf16 1056980736, %v3964_v15  ;;  %v1335_v23 = vadd.f32 %v6127_v40, %v1214_v30  ;;  %v3126_v46 = vadd.f32 %v14206_v42, %v14205_v28  ;;  %14207 = vst [vmem:[#allocation21_spill] sm:$0xff] %v11483_v31  ;;  %v14209_v20 = vld [vmem:[#allocation97_spill] sm:$0xff] }
 0x301   : > { %14199 = vst [vmem:[#allocation35_spill] sm:$0xff] %v11472_v44  ;;  %v3687_v55 = vadd.bf16 %v14203_v21, %v14201_v60  ;;  %v4062_v0 = vmul.bf16 1056980736, %v3966_v7  ;;  %v2977_v2 = vadd.f32 %v14208_v6, %v14200_v63  ;;  %v3130_v1 = vadd.f32 %v14209_v20, %v14205_v28  ;;  %v14214_v20 = vld [vmem:[#allocation95_spill] sm:$0xff] }
 0x302   : > { %v3781_v54 = vmul.bf16 1061961548, %v3685_v36  ;;  %v3428_v21 = vmul.bf16 %v11461_v13, %v11461_v13  ;;  %v11491_v15 = vpack.c.bf16 %v2783_v37, %v2779_v9  ;;  %v11493_v30 = vpack.c.bf16 %v2936_v3, %v2932_v22  ;;  %v11499_v36 = vpop.f32.mrf.mxu0  ;;  %v783_v9 = vpop.permute.xlu1 %782  ;;  %v14216_v22 = vld [vmem:[#allocation52_spill] sm:$0xff] }
 0x303   : > { %v3783_v61 = vmul.bf16 1061961548, %v3687_v55  ;;  %v3430_v55 = vmul.bf16 %v11472_v44, %v11472_v44  ;;  %v11497_v7 = vpack.c.bf16 %v2977_v2, %v2973_v29  ;;  %14213 = vst [vmem:[#allocation64_spill] sm:$0xff] %v11499_v36  ;;  %v1527_v31 = vadd.f32 %v14214_v20, %v1335_v23  ;;  %v11504_v3 = vpop.f32.mrf.mxu1 }
 0x304   : > { %14210 = vst [vmem:[#allocation23_spill] sm:$0xff] %v11491_v15  ;;  %14211 = vst [vmem:[#allocation42_spill] sm:$0xff] %v11493_v30  ;;  %7378 = vtanh.bf16 %v3781_v54  ;;  %v11502_v45 = vpack.c.bf16 %v3130_v1, %v3126_v46  ;;  %v4156_v37 = vmul.bf16 %v4060_v39, %v14216_v22  ;;  %v3429_v1 = vmul.bf16 %v11491_v15, %v11491_v15  ;;  %v14225_v22 = vld [vmem:[#allocation68_spill] sm:$0xff] }
 0x305   : > { %v7371_v17 = vpop.eup %7370  ;;  %7380 = vtanh.bf16 %v3783_v61  ;;  %14212 = vst [vmem:[#allocation5_spill] sm:$0xff] %v11497_v7  ;;  %14215 = vst [vmem:[#allocation13_spill] sm:$0xff] %v11504_v3  ;;  %v3344_v29 = vmul.bf16 %v11497_v7, %v11497_v7  ;;  %v3972_v46 = vadd.bf16 1065369472, %v10925_v50  ;;  %v3431_v39 = vmul.bf16 %v11493_v30, %v11493_v30 }
 0x306   : > { %v7373_v42 = vpop.eup %7372  ;;  %v3965_v40 = vadd.bf16 1065369472, %v7371_v17  ;;  %7382 = vtanh.bf16 %v3806_v34  ;;  %v14217_v17 = vld [vmem:[#allocation11_spill] sm:$0xff]  ;;  %v3524_v34 = vmul.bf16 %v3428_v21, %v11461_v13  ;;  %vm924_vm13 = vcmp.eq.f32.partialorder %v783_v9, %v14033_v10  ;;  %v11579_v3 = vpop.permute.xlu1 %1413 }
 0x307   : > { %v3967_v6 = vadd.bf16 1065369472, %v7373_v42  ;;  %v4158_v59 = vmul.bf16 %v4062_v0, %v14217_v17  ;;  %v11510_v61 = vpop.eup %7374  ;;  %v3526_v42 = vmul.bf16 %v3430_v55, %v11472_v44  ;;  %v11521_v0 = vpop.f32.mrf.mxu0  ;;  %v3346_v55 = vmul.bf16 %v11502_v45, %v11502_v45  ;;  %vm11556_vm14 = vmand %vm924_vm13, %vm930_vm1 }
 0x308   : > { %v4061_v54 = vmul.bf16 1056980736, %v3965_v40  ;;  %14218 = vst [vmem:[#allocation26_spill] sm:$0xff] %v11521_v0  ;;  %vm1768_vm2 = vcmp.gt.f32.partialorder %v11467_v24, %v13998_v18  ;;  %vm1864_vm0 = vcmp.eq.f32.partialorder %v11467_v24, %v13998_v18  ;;  %vm828_vm7 = vcmp.gt.f32.partialorder %v783_v9, %v14033_v10 }
 0x309   : > { %v4063_v2 = vmul.bf16 1056980736, %v3967_v6  ;;  %v14222_v6 = vld [vmem:[#allocation56_spill] sm:$0xff]  ;;  %v11549_v17 = vpop.f32.mrf.mxu0  ;;  %v6078_v21 = vsel %vm11556_vm14, 1.0, %v13683_v4  ;;  %vm11605_vm11 = vmand %vm1864_vm0, %vm1869_vm12  ;;  %vm14239_vm4 = vcmask 31744  }
 0x30a   : > { %v4157_v23 = vmul.bf16 %v4061_v54, %v14164_v56  ;;  %v14221_v56 = vld [vmem:[#allocation96_spill] sm:$0xff]  ;;  %v1837_v20 = vadd.f32 %v14222_v6, %v11438_v43  ;;  %v11538_v54 = vpop.f32.mrf.mxu1  ;;  %14226 = vst [vmem:[#allocation15_spill] sm:$0xff] %v11549_v17  ;;  %v3620_v43 = vmul.bf16 1027030327, %v3524_v34  ;;  %v3622_v34 = vmul.bf16 1027030327, %v3526_v42  ;;  %v11583_v42 = vpop.permute.xlu0 %1116 }
 0x30b   : > { %v4159_v50 = vmul.bf16 %v4063_v2, %v14168_v8  ;;  %v1648_v40 = vadd.f32 %v14221_v56, %v1527_v31  ;;  %14223 = vst [vmem:[#allocation61_spill] sm:$0xff] %v11538_v54  ;;  %v11546_v8 = vadd.f32 %v14225_v22, %v14224_v47  ;;  %v3440_v31 = vmul.bf16 %v3344_v29, %v11497_v7  ;;  %v11591_v17 = vpop.f32.mrf.mxu0 }
 0x30c   : > { %4417 = vmatprep.mubr.bf16.mxu1 %v4157_v23  ;;  %v14229_v23 = vmul.bf16 1027030327, %v11132_v32  ;;  %v14230_v29 = vmul.bf16 1027030327, %v11167_v52  ;;  %v11569_v6 = vmul.bf16 %v3429_v1, %v11491_v15  ;;  %v11572_v22 = vmul.bf16 %v3431_v39, %v11493_v30  ;;  %14232 = vst [vmem:[#allocation79_spill] sm:$0xff] %v11591_v17 }
 0x30d   : > { %4847 = vmatprep.mubr.bf16.mxu0 %v4159_v50  ;;  %4418 = vmatmul.mubr.bf16.gmra.mxu1 %v4156_v37  ;;  %v11566_v37 = vpop.eup %7376  ;;  %v6220_v54 = vsel %vm11528_vm9, 1.0, %v13683_v4  ;;  %v3974_v32 = vadd.bf16 1065369472, %v10936_v35  ;;  %v3536_v1 = vmul.bf16 1027030327, %v3440_v31  ;;  %v6054_v39 = vsel %vm828_vm7, 1.0, %v13683_v4 }
 0x30e   : > { %v3693_v56 = vadd.bf16 %v14229_v23, %v10989_v27  ;;  %v3695_v50 = vadd.bf16 %v14230_v29, %v11079_v12  ;;  %4848 = vmatmul.mubr.bf16.gmra.mxu0 %v4158_v59  ;;  %v3442_v23 = vmul.bf16 %v3346_v55, %v11502_v45  ;;  %v1958_v52 = vadd.f32 %v6220_v54, %v1837_v20  ;;  %v11581_v59 = vpop.f32.mrf.mxu1  ;;  %v14235_v31 = vld [vmem:[#allocation16_spill] sm:$0xff] }
 0x30f   : > { %14231 = vst [vmem:[#allocation60_spill] sm:$0xff] %v11581_v59  ;;  %v11594_v55 = vadd.bf16 %v3620_v43, %v11461_v13  ;;  %v6199_v20 = vsel %vm1768_vm2, 1.0, %v13683_v4  ;;  %v14236_v43 = vld [vmem:[#allocation93_spill] sm:$0xff]  ;;  %v11621_v36 = vadd.bf16 %v3622_v34, %v11472_v44  ;;  %v1113_v34 = vpop.permute.xlu1 %1112  ;;  %vm14250_vm2 = vmmov %vm14239_vm4  ;;  %vm1454_vm7 = vcmp.gt.f32.partialorder %v11579_v3, %v14033_v10 }
 0x310   : > { %v3789_v29 = vmul.bf16 1061961548, %v3693_v56  ;;  %v3791_v35 = vmul.bf16 1061961548, %v3695_v50  ;;  %vm1982_vm3 = vcmp.lt.f32.partialorder %v1958_v52, 2.0  ;;  %v1840_v54 = vadd.f32 %v6199_v20, %v1648_v40  ;;  %v14238_v52 = vld [vmem:[#allocation32_spill] sm:$0xff]  ;;  %v11618_v59 = vpop.f32.mrf.mxu1 }
 0x311   : > { %v3128_v2 = vadd.f32 %v14236_v43, %v14235_v31  ;;  %v4068_v56 = vmul.bf16 1056980736, %v3972_v46  ;;  %v11612_v50 = vsel %vm1982_vm3, %v13976_v26, 0.0  ;;  %vm1241_vm8 = vcmp.eq.f32.partialorder %v11583_v42, %v14238_v52  ;;  %14240 = vst [vmem:[#allocation95_spill] sm:$0xff] %v11618_v59  ;;  %v11624_v43 = vpop.f32.mrf.mxu0  ;;  %v14246_v44 = vld [vmem:[#allocation33_spill] sm:$0xff] }
 0x312   : > { %7384 = vtanh.bf16 %v3789_v29  ;;  %14237 = vst [vmem:[#allocation97_spill] sm:$0xff] %v11612_v50  ;;  %v7379_v17 = vpop.eup %7378  ;;  %v4070_v40 = vmul.bf16 1056980736, %v3974_v32  ;;  %v3538_v29 = vmul.bf16 1027030327, %v3442_v23  ;;  %v1021_v20 = vadd.f32 %v6078_v21, %v6054_v39  ;;  %14241 = vst [vmem:[#allocation52_spill] sm:$0xff] %v11624_v43 }
 0x313   : > { %v2062_v24 = vsel %vm14239_vm4, %v11612_v50, 0.0  ;;  %v7381_v0 = vpop.eup %7380  ;;  %v3973_v46 = vadd.bf16 1065369472, %v7379_v17  ;;  %v3632_v26 = vadd.bf16 %v3536_v1, %v11497_v7  ;;  %7386 = vtanh.bf16 %v3791_v35  ;;  %v14243_v39 = vld [vmem:[#allocation43_spill] sm:$0xff]  ;;  %v14244_v35 = vld [vmem:[#allocation45_spill] sm:$0xff]  ;;  %v14245_v50 = vld [vmem:[#allocation76_spill] sm:$0xff] }
 0x314   : > { %2063 = vadd.xlane.f32.xlu1 %v2062_v24  ;;  %v11626_v13 = vpop.eup %7382  ;;  %vm1145_vm10 = vcmp.gt.f32.partialorder %v11583_v42, %v14238_v52  ;;  %v3812_v32 = vmul.bf16 1061961548, %v11594_v55  ;;  %v3975_v23 = vadd.bf16 1065369472, %v7381_v0  ;;  %v2979_v21 = vadd.f32 %v14243_v39, %v14224_v47  ;;  %v14247_v55 = vld [vmem:[#allocation6_spill] sm:$0xff]  ;;  %v11642_v39 = vpop.f32.mrf.mxu1 }
 0x315   : > { %14242 = vst [vmem:[#allocation11_spill] sm:$0xff] %v11626_v13  ;;  %v6223_v17 = vsel %vm11605_vm11, 1.0, %v13683_v4  ;;  %v4069_v1 = vmul.bf16 1056980736, %v3973_v46  ;;  %v4164_v24 = vmul.bf16 %v4068_v56, %v14244_v35  ;;  %v3132_v59 = vadd.f32 %v14245_v50, %v14235_v31  ;;  %v14248_v46 = vld [vmem:[#allocation29_spill] sm:$0xff]  ;;  %v11646_v56 = vpop.f32.mrf.mxu0  ;;  %vm11699_vm11 = vmand %vm1241_vm8, %vm1243_vm5 }
 0x316   : > { %v1961_v43 = vadd.f32 %v6223_v17, %v1840_v54  ;;  %v4071_v7 = vmul.bf16 1056980736, %v3975_v23  ;;  %v4166_v13 = vmul.bf16 %v4070_v40, %v14246_v44  ;;  %v3634_v0 = vadd.bf16 %v3538_v29, %v11502_v45  ;;  %v11685_v23 = vpop.permute.xlu1 %1738 }
 0x317   : > { %v1213_v30 = vadd.f32 %v14247_v55, %v1021_v20  ;;  %v4165_v9 = vmul.bf16 %v4069_v1, %v10457_v11  ;;  %v3728_v15 = vmul.bf16 1061961548, %v3632_v26  ;;  %vm1144_vm13 = vcmp.gt.f32.partialorder %v1113_v34, %v14248_v46 }
 0x318   : > { %vm1985_vm15 = vcmp.lt.f32.partialorder %v1961_v43, 2.0  ;;  %v4167_v50 = vmul.bf16 %v4071_v7, %v14201_v60  ;;  %v11650_v54 = vpack.c.bf16 %v2979_v21, %v11546_v8  ;;  %vm1240_vm9 = vcmp.eq.f32.partialorder %v1113_v34, %v14248_v46  ;;  %v14253_v8 = vld [vmem:[#allocation99_spill] sm:$0xff]  ;;  %v11687_v21 = vpop.f32.mrf.mxu0  ;;  %v14259_v34 = vld [vmem:[#allocation86_spill] sm:$0xff] }
 0x319   : > { %v11653_v44 = vsel %vm1985_vm15, %v13998_v18, 0.0  ;;  %4425 = vmatprep.mubr.bf16.mxu1 %v4165_v9  ;;  %v11656_v40 = vpack.c.bf16 %v3132_v59, %v3128_v2  ;;  %v14251_v29 = vmul.bf16 1027030327, %v11322_v49  ;;  %v14252_v60 = vmul.bf16 1027030327, %v11325_v19  ;;  %v11671_v2 = vpop.f32.mrf.mxu1  ;;  %v14254_v49 = vld [vmem:[#allocation65_spill] sm:$0xff]  ;;  %vm11681_vm14 = vmand %vm1240_vm9, %vm1243_vm5 }
 0x31a   : > { %14249 = vst [vmem:[#allocation96_spill] sm:$0xff] %v11653_v44  ;;  %v2071_v11 = vsel %vm14250_vm2, %v11653_v44, 0.0  ;;  %4855 = vmatprep.mubr.bf16.mxu0 %v4167_v50  ;;  %4426 = vmatmul.mubr.bf16.gmra.mxu1 %v4164_v24  ;;  %v3730_v18 = vmul.bf16 1061961548, %v3634_v0  ;;  %v1334_v26 = vadd.f32 %v14253_v8, %v1213_v30  ;;  %v3980_v43 = vadd.bf16 1065369472, %v11285_v16 }
 0x31b   : > { %v3701_v20 = vadd.bf16 %v14251_v29, %v11229_v5  ;;  %v3703_v7 = vadd.bf16 %v14252_v60, %v11236_v48  ;;  %v6105_v59 = vsel %vm1144_vm13, 1.0, %v13683_v4  ;;  %vm1863_vm0 = vcmp.eq.f32.partialorder %v14254_v49, %v14033_v10  ;;  %4856 = vmatmul.mubr.bf16.gmra.mxu0 %v4166_v13  ;;  %2072 = vadd.xlane.f32.xlu0 %v2071_v11  ;;  %v11714_v9 = vpop.f32.mrf.mxu1  ;;  %v11727_v29 = vpop.f32.mrf.mxu0  ;;  %v14278_v49 = vld [vmem:[#allocation28_spill] sm:$0xff] }
 0x31c   : > { %7388 = vtanh.bf16 %v3728_v15  ;;  %v3814_v13 = vmul.bf16 1061961548, %v11621_v36  ;;  %v3345_v15 = vmul.bf16 %v11650_v54, %v11650_v54  ;;  %vm1550_vm3 = vcmp.eq.f32.partialorder %v11579_v3, %v14033_v10  ;;  %14260 = vst [vmem:[#allocation56_spill] sm:$0xff] %v11714_v9  ;;  %14261 = vst [vmem:[#allocation14_spill] sm:$0xff] %v11727_v29 }
 0x31d   : > { %v3797_v19 = vmul.bf16 1061961548, %v3701_v20  ;;  %v3799_v30 = vmul.bf16 1061961548, %v3703_v7  ;;  %7390 = vtanh.bf16 %v3812_v32  ;;  %v3347_v32 = vmul.bf16 %v11656_v40, %v11656_v40  ;;  %vm1575_vm8 = vmand %vm1550_vm3, %vm1556_vm6  ;;  %v11744_v17 = vpop.f32.mrf.mxu1 }
 0x31e   : > { %v3982_v36 = vadd.bf16 1065369472, %v11358_v33  ;;  %v1216_v1 = vadd.f32 %v6105_v59, %v14259_v34  ;;  %v6150_v24 = vsel %vm1454_vm7, 1.0, %v13683_v4  ;;  %v4076_v0 = vmul.bf16 1056980736, %v3980_v43  ;;  %v793_v43 = vpop.permute.xlu1 %792 }
 0x31f   : > { %7392 = vtanh.bf16 %v3797_v19  ;;  %v6129_v55 = vsel %vm11681_vm14, 1.0, %v13683_v4  ;;  %v11720_v33 = vsel %vm1145_vm10, 1.0, %v13683_v4  ;;  %v1526_v11 = vadd.f32 %v6150_v24, %v1334_v26  ;;  %vm11766_vm10 = vmand %vm1863_vm0, %vm1869_vm12 }
 0x320   : > { %v7385_v35 = vpop.eup %7384  ;;  %7394 = vtanh.bf16 %v3799_v30  ;;  %v11732_v20 = vsel %vm11699_vm11, 1.0, %v13683_v4  ;;  %v4078_v26 = vmul.bf16 1056980736, %v3982_v36  ;;  %v1337_v3 = vadd.f32 %v6129_v55, %v1216_v1  ;;  %v14262_v30 = vld [vmem:[#allocation19_spill] sm:$0xff]  ;;  %v11751_v55 = vpop.f32.mrf.mxu0 }
 0x321   : > { %7396 = vtanh.bf16 %v3730_v18  ;;  %v3981_v50 = vadd.bf16 1065369472, %v7385_v35  ;;  %v7387_v7 = vpop.eup %7386  ;;  %v11737_v18 = vmul.bf16 %v3345_v15, %v11650_v54  ;;  %v11740_v59 = vmul.bf16 %v3347_v32, %v11656_v40  ;;  %v14263_v15 = vld [vmem:[#allocation98_spill] sm:$0xff]  ;;  %v14264_v36 = vld [vmem:[#allocation71_spill] sm:$0xff] }
 0x322   : > { %7398 = vtanh.bf16 %v3814_v13  ;;  %v3983_v16 = vadd.bf16 1065369472, %v7387_v7  ;;  %v6174_v19 = vsel %vm1575_vm8, 1.0, %v13683_v4  ;;  %v4172_v13 = vmul.bf16 %v4076_v0, %v14262_v30  ;;  %v14267_v30 = vld [vmem:[#allocation85_spill] sm:$0xff] }
 0x323   : > { %v4077_v8 = vmul.bf16 1056980736, %v3981_v50  ;;  %v1647_v35 = vadd.f32 %v6174_v19, %v1526_v11  ;;  %v2983_v24 = vadd.f32 %v14263_v15, %v14200_v63  ;;  %v2987_v1 = vadd.f32 %v14264_v36, %v14200_v63  ;;  %v11777_v36 = vpop.f32.mrf.mxu1 }
 0x324   : > { %v4079_v32 = vmul.bf16 1056980736, %v3983_v16  ;;  %v3988_v50 = vadd.bf16 1065369472, %v11451_v51  ;;  %v3990_v7 = vadd.bf16 1065369472, %v11510_v61  ;;  %vm926_vm4 = vcmp.eq.f32.partialorder %v793_v43, %v14095_v58 }
 0x325   : > { %v4173_v34 = vmul.bf16 %v4077_v8, %v10989_v27  ;;  %v14265_v27 = vld [vmem:[#allocation4_spill] sm:$0xff]  ;;  %v14266_v8 = vld [vmem:[#allocation73_spill] sm:$0xff]  ;;  %v3136_v15 = vadd.f32 %v14267_v30, %v14205_v28  ;;  %v14270_v16 = vld [vmem:[#allocation7_spill] sm:$0xff]  ;;  %vm830_vm15 = vcmp.gt.f32.partialorder %v793_v43, %v14095_v58  ;;  %14272 = vst [vmem:[#allocation68_spill] sm:$0xff] %v11777_v36  ;;  %vm1770_vm13 = vcmp.gt.f32.partialorder %v11685_v23, %v14248_v46 }
 0x326   : > { %v4174_v11 = vmul.bf16 %v4078_v26, %v14265_v27  ;;  %v1529_v19 = vadd.f32 %v14266_v8, %v1337_v3  ;;  %v4175_v61 = vmul.bf16 %v4079_v32, %v11079_v12  ;;  %v3140_v26 = vadd.f32 %v14270_v16, %v14205_v28  ;;  %vm11788_vm9 = vmand %vm926_vm4, %vm930_vm1  ;;  %v11795_v32 = vpop.f32.mrf.mxu0  ;;  %v14280_v12 = vld [vmem:[#allocation54_spill] sm:$0xff] }
 0x327   : > { %4433 = vmatprep.mubr.bf16.mxu1 %v4173_v34  ;;  %v14271_v3 = vmul.bf16 1027030327, %v11390_v53  ;;  %v11782_v27 = vpack.c.bf16 %v2987_v1, %v2983_v24  ;;  %v14275_v53 = vmul.bf16 1027030327, %v11400_v14  ;;  %14276 = vst [vmem:[#allocation16_spill] sm:$0xff] %v11795_v32  ;;  %v14277_v1 = vld [vmem:[#allocation74_spill] sm:$0xff]  ;;  %vm1866_vm2 = vcmp.eq.f32.partialorder %v11685_v23, %v14248_v46 }
 0x328   : > { %4434 = vmatmul.mubr.bf16.gmra.mxu1 %v4172_v13  ;;  %4863 = vmatprep.mubr.bf16.mxu0 %v4175_v61  ;;  %v4084_v8 = vmul.bf16 1056980736, %v3988_v50  ;;  %v11797_v30 = vmul.bf16 1056980736, %v3990_v7  ;;  %v1839_v16 = vadd.f32 %v14277_v1, %v1647_v35  ;;  %v1650_v0 = vadd.f32 %v14278_v49, %v1529_v19  ;;  %v11824_v51 = vpop.f32.mrf.mxu0  ;;  %vm11840_vm7 = vmand %vm1866_vm2, %vm1869_vm12 }
 0x329   : > { %v3709_v34 = vadd.bf16 %v14271_v3, %v11339_v41  ;;  %v3711_v13 = vadd.bf16 %v14275_v53, %v11345_v57  ;;  %4864 = vmatmul.mubr.bf16.gmra.mxu0 %v4174_v11  ;;  %v6056_v60 = vsel %vm830_vm15, 1.0, %v13683_v4  ;;  %v6222_v14 = vsel %vm11766_vm10, 1.0, %v13683_v4  ;;  %v11814_v11 = vpop.f32.mrf.mxu1 }
 0x32a   : > { %v7389_v3 = vpop.eup %7388  ;;  %v11809_v50 = vpack.c.bf16 %v3140_v26, %v3136_v15  ;;  %v6080_v35 = vsel %vm11788_vm9, 1.0, %v13683_v4  ;;  %v1960_v7 = vadd.f32 %v6222_v14, %v1839_v16  ;;  %14279 = vst [vmem:[#allocation93_spill] sm:$0xff] %v11814_v11  ;;  %v6201_v43 = vsel %vm1770_vm13, 1.0, %v13683_v4 }
 0x32b   : > { %v3805_v24 = vmul.bf16 1061961548, %v3709_v34  ;;  %v3807_v42 = vmul.bf16 1061961548, %v3711_v13  ;;  %v11807_v61 = vpop.eup %7390  ;;  %v3352_v15 = vmul.bf16 %v11782_v27, %v11782_v27  ;;  %v3920_v34 = vadd.bf16 1065369472, %v7389_v3  ;;  %v11828_v13 = vpop.permute.xlu1 %1421 }
 0x32c   : > { %v2985_v53 = vadd.f32 %v14280_v12, %v14224_v47  ;;  %vm1984_vm0 = vcmp.lt.f32.partialorder %v1960_v7, 2.0  ;;  %v1842_v16 = vadd.f32 %v6201_v43, %v1650_v0  ;;  %v1023_v14 = vadd.f32 %v6080_v35, %v6056_v60  ;;  %v14284_v60 = vld [vmem:[#allocation78_spill] sm:$0xff]  ;;  %v11850_v35 = vpop.f32.mrf.mxu1 }
 0x32d   : > { %7400 = vtanh.bf16 %v3805_v24  ;;  %v7393_v19 = vpop.eup %7392  ;;  %v11831_v44 = vsel %vm1984_vm0, %v14033_v10, 0.0  ;;  %v3354_v7 = vmul.bf16 %v11809_v50, %v11809_v50  ;;  %v2989_v0 = vadd.f32 %v14284_v60, %v14224_v47  ;;  %14286 = vst [vmem:[#allocation43_spill] sm:$0xff] %v11850_v35 }
 0x32e   : > { %7402 = vtanh.bf16 %v3807_v42  ;;  %v7395_v26 = vpop.eup %7394  ;;  %v3989_v49 = vadd.bf16 1065369472, %v7393_v19  ;;  %14281 = vst [vmem:[#allocation32_spill] sm:$0xff] %v11831_v44  ;;  %vm14285_vm14 = vcmask 31744   ;;  %v4180_v43 = vmul.bf16 %v4084_v8, %v11102_v62  ;;  %v14289_v8 = vld [vmem:[#allocation20_spill] sm:$0xff] }
 0x32f   : > { %v7397_v24 = vpop.eup %7396  ;;  %v3991_v1 = vadd.bf16 1065369472, %v7395_v26  ;;  %v2068_v10 = vsel %vm14285_vm14, %v11831_v44, 0.0  ;;  %v3448_v23 = vmul.bf16 %v3352_v15, %v11782_v27  ;;  %v3996_v26 = vadd.bf16 1065369472, %v11566_v37  ;;  %v14288_v44 = vld [vmem:[#allocation89_spill] sm:$0xff]  ;;  %vm14303_vm15 = vmmov %vm14285_vm14 }
 0x330   : > { %v11833_v36 = vpop.eup %7398  ;;  %v4085_v42 = vmul.bf16 1056980736, %v3989_v49  ;;  %2069 = vadd.xlane.f32.xlu1 %v2068_v10  ;;  %v11855_v49 = vpop.f32.mrf.mxu0  ;;  %v3922_v12 = vadd.bf16 1065369472, %v7397_v24  ;;  %v4182_v60 = vmul.bf16 %v11797_v30, %v11134_v25  ;;  %v3138_v32 = vadd.f32 %v14288_v44, %v14235_v31  ;;  %v14290_v30 = vld [vmem:[#allocation23_spill] sm:$0xff] }
 0x331   : > { %v4087_v19 = vmul.bf16 1056980736, %v3991_v1  ;;  %14287 = vst [vmem:[#allocation45_spill] sm:$0xff] %v11855_v49  ;;  %v11862_v35 = vmul.bf16 1056980736, %v3920_v34  ;;  %v1215_v15 = vadd.f32 %v14289_v8, %v1023_v14  ;;  %v6225_v37 = vsel %vm11840_vm7, 1.0, %v13683_v4  ;;  %v1121_v1 = vpop.permute.xlu1 %1120 }
 0x332   : > { %v4181_v9 = vmul.bf16 %v4085_v42, %v11229_v5  ;;  %v11870_v24 = vmul.bf16 %v3354_v7, %v11809_v50  ;;  %v11872_v5 = vpack.c.bf16 %v2989_v0, %v2985_v53  ;;  %v1963_v25 = vadd.f32 %v6225_v37, %v1842_v16  ;;  %v11877_v42 = vpop.f32.mrf.mxu1  ;;  %v14293_v14 = vld [vmem:[#allocation47_spill] sm:$0xff]  ;;  %v14294_v7 = vld [vmem:[#allocation42_spill] sm:$0xff]  ;;  %v11886_v16 = vpop.f32.mrf.mxu0 }
 0x333   : > { %v4183_v62 = vmul.bf16 %v4087_v19, %v11236_v48  ;;  %v14291_v44 = vmul.bf16 1027030327, %v11569_v6  ;;  %14292 = vst [vmem:[#allocation76_spill] sm:$0xff] %v11877_v42  ;;  %v3544_v48 = vmul.bf16 1027030327, %v3448_v23  ;;  %v3142_v3 = vadd.f32 %v14293_v14, %v14235_v31  ;;  %14296 = vst [vmem:[#allocation33_spill] sm:$0xff] %v11886_v16 }
 0x334   : > { %4441 = vmatprep.mubr.bf16.mxu1 %v4181_v9  ;;  %v11881_v9 = vmul.bf16 1056980736, %v3996_v26  ;;  %v14295_v53 = vmul.bf16 1027030327, %v11572_v22  ;;  %v14297_v6 = vld [vmem:[#allocation11_spill] sm:$0xff]  ;;  %vm1987_vm3 = vcmp.lt.f32.partialorder %v1963_v25, 2.0  ;;  %vm1456_vm4 = vcmp.gt.f32.partialorder %v11828_v13, %v14095_v58  ;;  %v11910_v14 = vpop.f32.mrf.mxu0 }
 0x335   : > { %v3717_v34 = vadd.bf16 %v14291_v44, %v14290_v30  ;;  %4871 = vmatprep.mubr.bf16.mxu0 %v4183_v62  ;;  %4442 = vmatmul.mubr.bf16.gmra.mxu1 %v4180_v43  ;;  %v3998_v10 = vadd.bf16 1065369472, %v14297_v6  ;;  %v14298_v19 = vld [vmem:[#allocation59_spill] sm:$0xff]  ;;  %v14299_v23 = vld [vmem:[#allocation100_spill] sm:$0xff]  ;;  %v11893_v37 = vsel %vm1987_vm3, %v14248_v46, 0.0  ;;  %v14302_v22 = vld [vmem:[#allocation101_spill] sm:$0xff]  ;;  %vm1552_vm10 = vcmp.eq.f32.partialorder %v11828_v13, %v14095_v58 }
 0x336   : > { %v3719_v0 = vadd.bf16 %v14295_v53, %v14294_v7  ;;  %4872 = vmatmul.mubr.bf16.gmra.mxu0 %v4182_v60  ;;  %v3146_v8 = vadd.f32 %v14298_v19, %v14205_v28  ;;  %v1336_v62 = vadd.f32 %v14299_v23, %v1215_v15  ;;  %14300 = vst [vmem:[#allocation6_spill] sm:$0xff] %v11893_v37  ;;  %v14301_v44 = vld [vmem:[#allocation40_spill] sm:$0xff]  ;;  %v2077_v60 = vsel %vm14303_vm15, %v11893_v37, 0.0  ;;  %v11904_v15 = vpop.f32.mrf.mxu1  ;;  %v14305_v46 = vld [vmem:[#allocation10_spill] sm:$0xff]  ;;  %vm1577_vm2 = vmand %vm1552_vm10, %vm1556_vm6  ;;  %v11944_v42 = vpop.f32.mrf.mxu0 }
 0x337   : > { %v3813_v43 = vmul.bf16 1061961548, %v3717_v34  ;;  %vm1146_vm11 = vcmp.gt.f32.partialorder %v1121_v1, %v14301_v44  ;;  %vm1865_vm8 = vcmp.eq.f32.partialorder %v14302_v22, %v14095_v58  ;;  %14304 = vst [vmem:[#allocation29_spill] sm:$0xff] %v11904_v15  ;;  %2078 = vadd.xlane.f32.xlu0 %v2077_v60  ;;  %v3150_v25 = vadd.f32 %v14305_v46, %v14205_v28  ;;  %v11919_v60 = vpop.permute.xlu1 %1746  ;;  %v14309_v16 = vld [vmem:[#allocation84_spill] sm:$0xff] }
 0x338   : > { %v3815_v26 = vmul.bf16 1061961548, %v3719_v0  ;;  %v6107_v34 = vsel %vm1146_vm11, 1.0, %v13683_v4  ;;  %vm1242_vm13 = vcmp.eq.f32.partialorder %v1121_v1, %v14301_v44  ;;  %14306 = vst [vmem:[#allocation99_spill] sm:$0xff] %v11910_v14  ;;  %v11912_v0 = vmul.bf16 1056980736, %v3922_v12  ;;  %v11937_v37 = vpop.f32.mrf.mxu1 }
 0x339   : > { %7404 = vtanh.bf16 %v3813_v43  ;;  %v3353_v6 = vmul.bf16 %v11872_v5, %v11872_v5  ;;  %v4094_v19 = vmul.bf16 1056980736, %v3998_v10  ;;  %v14307_v43 = vld [vmem:[#allocation83_spill] sm:$0xff]  ;;  %vm1267_vm9 = vmand %vm1242_vm13, %vm1243_vm5  ;;  %v3546_v46 = vmul.bf16 1027030327, %v11870_v24  ;;  %v14308_v14 = vld [vmem:[#allocation9_spill] sm:$0xff] }
 0x33a   : > { %7406 = vtanh.bf16 %v3815_v26  ;;  %v1218_v23 = vadd.f32 %v6107_v34, %v14307_v43  ;;  %v6152_v12 = vsel %vm1456_vm4, 1.0, %v13683_v4  ;;  %v6131_v10 = vsel %vm1267_vm9, 1.0, %v13683_v4  ;;  %vm11982_vm5 = vmand %vm1865_vm8, %vm1869_vm12 }
 0x33b   : > { %v7401_v53 = vpop.eup %7400  ;;  %v11933_v34 = vadd.bf16 %v3544_v48, %v11782_v27  ;;  %v11935_v43 = vpack.c.bf16 %v3142_v3, %v3138_v32  ;;  %v4188_v49 = vmul.bf16 %v11881_v9, %v14308_v14  ;;  %v11941_v29 = vpack.c.bf16 %v3150_v25, %v3146_v8  ;;  %vm14330_vm4 = vmmov %vm14303_vm15 }
 0x33c   : > { %v7403_v26 = vpop.eup %7402  ;;  %v3997_v1 = vadd.bf16 1065369472, %v7401_v53  ;;  %v1528_v53 = vadd.f32 %v6152_v12, %v1336_v62  ;;  %v4004_v13 = vadd.bf16 1065369472, %v11807_v61  ;;  %v4190_v48 = vmul.bf16 %v4094_v19, %v14309_v16  ;;  %v11969_v12 = vpop.f32.mrf.mxu0 }
 0x33d   : > { %v3999_v24 = vadd.bf16 1065369472, %v7403_v26  ;;  %v6176_v32 = vsel %vm1577_vm2, 1.0, %v13683_v4  ;;  %v1339_v3 = vadd.f32 %v6131_v10, %v1218_v23  ;;  %v4006_v26 = vadd.bf16 1065369472, %v11833_v36  ;;  %14312 = vst [vmem:[#allocation65_spill] sm:$0xff] %v11969_v12 }
 0x33e   : > { %v4093_v15 = vmul.bf16 1056980736, %v3997_v1  ;;  %v14310_v1 = vmul.bf16 1027030327, %v11737_v18  ;;  %v14311_v8 = vmul.bf16 1027030327, %v11740_v59  ;;  %v11957_v25 = vadd.bf16 %v3546_v46, %v11809_v50 }
 0x33f   : > { %v4095_v11 = vmul.bf16 1056980736, %v3999_v24  ;;  %v11960_v16 = vmul.bf16 %v3353_v6, %v11872_v5  ;;  %v1649_v19 = vadd.f32 %v6176_v32, %v1528_v53  ;;  %v3362_v18 = vmul.bf16 %v11941_v29, %v11941_v29  ;;  %v14314_v10 = vld [vmem:[#allocation80_spill] sm:$0xff]  ;;  %v14317_v32 = vld [vmem:[#allocation67_spill] sm:$0xff] }
 0x340   : > { %v4189_v62 = vmul.bf16 %v4093_v15, %v11339_v41  ;;  %v3633_v9 = vadd.bf16 %v14310_v1, %v11650_v54  ;;  %v3635_v61 = vadd.bf16 %v14311_v8, %v11656_v40  ;;  %v803_v41 = vpop.permute.xlu1 %802  ;;  %v11963_v15 = vpop.f32.mrf.mxu1  ;;  %v11967_v36 = vmul.bf16 1056980736, %v4004_v13  ;;  %v14320_v8 = vld [vmem:[#allocation2_spill] sm:$0xff]  ;;  %v14324_v46 = vld [vmem:[#allocation35_spill] sm:$0xff] }
 0x341   : > { %v4191_v14 = vmul.bf16 %v4095_v11, %v11345_v57  ;;  %v3355_v6 = vmul.bf16 %v11935_v43, %v11935_v43  ;;  %v14313_v57 = vld [vmem:[#allocation24_spill] sm:$0xff]  ;;  %v1531_v24 = vadd.f32 %v14314_v10, %v1339_v3  ;;  %v11986_v13 = vmul.bf16 1056980736, %v4006_v26  ;;  %v14318_v3 = vld [vmem:[#allocation49_spill] sm:$0xff]  ;;  %v14319_v26 = vld [vmem:[#allocation50_spill] sm:$0xff] }
 0x342   : > { %4449 = vmatprep.mubr.bf16.mxu1 %v4189_v62  ;;  %v3729_v59 = vmul.bf16 1061961548, %v3633_v9  ;;  %v3731_v23 = vmul.bf16 1061961548, %v3635_v61  ;;  %v3148_v11 = vadd.f32 %v14313_v57, %v14235_v31  ;;  %vm832_vm0 = vcmp.gt.f32.partialorder %v803_v41, %v14238_v52  ;;  %v11995_v22 = vpop.f32.mrf.mxu1  ;;  %v14323_v57 = vld [vmem:[#allocation77_spill] sm:$0xff] }
 0x343   : > { %4879 = vmatprep.mubr.bf16.mxu0 %v4191_v14  ;;  %4450 = vmatmul.mubr.bf16.gmra.mxu1 %v4188_v49  ;;  %v2993_v49 = vadd.f32 %v14317_v32, %v14200_v63  ;;  %v2997_v62 = vadd.f32 %v14318_v3, %v14200_v63  ;;  %v6058_v1 = vsel %vm832_vm0, 1.0, %v13683_v4  ;;  %vm928_vm7 = vcmp.eq.f32.partialorder %v803_v41, %v14238_v52  ;;  %v12005_v14 = vpop.f32.mrf.mxu0  ;;  %v14322_v41 = vld [vmem:[#allocation12_spill] sm:$0xff] }
 0x344   : > { %4880 = vmatmul.mubr.bf16.gmra.mxu0 %v4190_v48  ;;  %7408 = vtanh.bf16 %v3729_v59  ;;  %v3458_v48 = vmul.bf16 %v3362_v18, %v11941_v29  ;;  %v4196_v9 = vmul.bf16 %v11967_v36, %v14319_v26  ;;  %vm1772_vm14 = vcmp.gt.f32.partialorder %v11919_v60, %v14301_v44  ;;  %vm953_vm3 = vmand %vm928_vm7, %vm930_vm1  ;;  %14321 = vst [vmem:[#allocation86_spill] sm:$0xff] %v12005_v14  ;;  %v12024_v53 = vpop.f32.mrf.mxu1 }
 0x345   : > { %7410 = vtanh.bf16 %v3731_v23  ;;  %v1841_v61 = vadd.f32 %v14320_v8, %v1649_v19  ;;  %v3152_v23 = vadd.f32 %v14322_v41, %v14235_v31  ;;  %v1652_v10 = vadd.f32 %v14323_v57, %v1531_v24  ;;  %vm14355_vm7 = vmmov %vm14330_vm4 }
 0x346   : > { %v6082_v18 = vsel %vm953_vm3, 1.0, %v13683_v4  ;;  %v6224_v36 = vsel %vm11982_vm5, 1.0, %v13683_v4  ;;  %vm1868_vm1 = vcmp.eq.f32.partialorder %v11919_v60, %v14301_v44  ;;  %v4198_v12 = vmul.bf16 %v11986_v13, %v14324_v46  ;;  %vm14337_vm5 = vmmov %vm14330_vm4 }
 0x347   : > { %v7405_v59 = vpop.eup %7404  ;;  %v1025_v19 = vadd.f32 %v6082_v18, %v6058_v1  ;;  %v1962_v26 = vadd.f32 %v6224_v36, %v1841_v61  ;;  %v6203_v24 = vsel %vm1772_vm14, 1.0, %v13683_v4  ;;  %v12022_v41 = vpack.c.bf16 %v2997_v62, %v2993_v49  ;;  %v14326_v1 = vld [vmem:[#allocation18_spill] sm:$0xff]  ;;  %v12030_v18 = vpop.f32.mrf.mxu0  ;;  %vm12037_vm8 = vmand %vm1868_vm1, %vm1869_vm12 }
 0x348   : > { %v7407_v32 = vpop.eup %7406  ;;  %v4005_v3 = vadd.bf16 1065369472, %v7405_v59  ;;  %v14325_v59 = vld [vmem:[#allocation63_spill] sm:$0xff]  ;;  %v3160_v61 = vadd.f32 %v14326_v1, %v14205_v28  ;;  %v3554_v46 = vmul.bf16 1027030327, %v3458_v48  ;;  %v1844_v36 = vadd.f32 %v6203_v24, %v1652_v10 }
 0x349   : > { %v4007_v8 = vadd.bf16 1065369472, %v7407_v32  ;;  %v3156_v14 = vadd.f32 %v14325_v59, %v14205_v28  ;;  %vm1986_vm11 = vcmp.lt.f32.partialorder %v1962_v26, 2.0  ;;  %v12044_v32 = vpop.permute.xlu0 %1742  ;;  %v12047_v26 = vpack.c.bf16 %v3152_v23, %v3148_v11  ;;  %v12059_v11 = vpop.f32.mrf.mxu1 }
 0x34a   : > { %v4101_v57 = vmul.bf16 1056980736, %v4005_v3  ;;  %v12042_v62 = vsel %vm1986_vm11, %v14095_v58, 0.0  ;;  %v1217_v48 = vadd.f32 %v11720_v33, %v1025_v19  ;;  %v3360_v59 = vmul.bf16 %v12022_v41, %v12022_v41  ;;  %v12068_v1 = vpop.f32.mrf.mxu0 }
 0x34b   : > { %v4103_v13 = vmul.bf16 1056980736, %v4007_v8  ;;  %14329 = vst [vmem:[#allocation19_spill] sm:$0xff] %v12042_v62  ;;  %v2074_v10 = vsel %vm14330_vm4, %v12042_v62, 0.0  ;;  %v14331_v8 = vld [vmem:[#allocation5_spill] sm:$0xff]  ;;  %v3451_v23 = vmul.bf16 %v3355_v6, %v11935_v43  ;;  %v12063_v19 = vpack.c.bf16 %v3160_v61, %v3156_v14  ;;  %14332 = vst [vmem:[#allocation98_spill] sm:$0xff] %v12068_v1 }
 0x34c   : > { %v4197_v3 = vmul.bf16 %v4101_v57, %v14290_v30  ;;  %2075 = vadd.xlane.f32.xlu1 %v2074_v10  ;;  %v1430_v30 = vpop.permute.xlu1 %1429  ;;  %v3738_v33 = vmul.bf16 1061961548, %v11957_v25  ;;  %v6227_v57 = vsel %vm12037_vm8, 1.0, %v13683_v4  ;;  %vm1867_vm10 = vcmp.eq.f32.partialorder %v12044_v32, %v14238_v52  ;;  %v14334_v61 = vld [vmem:[#allocation22_spill] sm:$0xff] }
 0x34d   : > { %v4199_v58 = vmul.bf16 %v4103_v13, %v14294_v7  ;;  %v14333_v7 = vmul.bf16 1061961548, %v11933_v34  ;;  %v3545_v13 = vmul.bf16 1027030327, %v11960_v16  ;;  %v12076_v25 = vadd.bf16 %v3554_v46, %v11941_v29  ;;  %v14335_v46 = vld [vmem:[#allocation27_spill] sm:$0xff] }
 0x34e   : > { %4457 = vmatprep.mubr.bf16.mxu1 %v4197_v3  ;;  %v1965_v6 = vadd.f32 %v6227_v57, %v1844_v36  ;;  %vm1771_vm15 = vcmp.gt.f32.partialorder %v12044_v32, %v14238_v52  ;;  %v3363_v14 = vmul.bf16 %v12047_v26, %v12047_v26  ;;  %v2995_v49 = vadd.f32 %v14334_v61, %v14224_v47  ;;  %v12090_v36 = vpop.f32.mrf.mxu1  ;;  %v7549_v32 = vld [vmem:[%s13454_s5 + $0x1f0] sm:$0xff]  }
 0x34f   : > { %7412 = vtanh.bf16 %v14333_v7  ;;  %4887 = vmatprep.mubr.bf16.mxu0 %v4199_v58  ;;  %4458 = vmatmul.mubr.bf16.gmra.mxu1 %v4196_v9  ;;  %v1338_v34 = vadd.f32 %v11732_v20, %v1217_v48  ;;  %vm1458_vm13 = vcmp.gt.f32.partialorder %v1430_v30, %v14238_v52  ;;  %v3456_v16 = vmul.bf16 %v3360_v59, %v12022_v41  ;;  %v12097_v48 = vpop.f32.mrf.mxu0 }
 0x350   : > { %4888 = vmatmul.mubr.bf16.gmra.mxu0 %v4198_v12  ;;  %v2999_v9 = vadd.f32 %v14335_v46, %v14224_v47  ;;  %vm1554_vm9 = vcmp.eq.f32.partialorder %v1430_v30, %v14238_v52  ;;  %vm1989_vm2 = vcmp.lt.f32.partialorder %v1965_v6, 2.0  ;;  %7414 = vtanh.bf16 %v3738_v33  ;;  %v14339_v46 = vld [vmem:[#allocation55_spill] sm:$0xff] }
 0x351   : > { %v3547_v3 = vmul.bf16 1027030327, %v3451_v23  ;;  %v3370_v10 = vmul.bf16 %v12063_v19, %v12063_v19  ;;  %v12095_v20 = vsel %vm1989_vm2, %v14301_v44, 0.0  ;;  %v3746_v59 = vmul.bf16 1061961548, %v12076_v25  ;;  %vm1579_vm0 = vmand %vm1554_vm9, %vm1556_vm6  ;;  %v14338_v44 = vld [vmem:[#allocation62_spill] sm:$0xff] }
 0x352   : > { %v7409_v12 = vpop.eup %7408  ;;  %14336 = vst [vmem:[#allocation71_spill] sm:$0xff] %v12095_v20  ;;  %v6154_v7 = vsel %vm1458_vm13, 1.0, %v13683_v4  ;;  %v2083_v6 = vsel %vm14337_vm5, %v12095_v20, 0.0  ;;  %v3003_v23 = vadd.f32 %v14338_v44, %v14200_v63  ;;  %v3007_v25 = vadd.f32 %v14339_v46, %v14200_v63  ;;  %v12120_v44 = vpop.f32.mrf.mxu0  ;;  %vm12140_vm6 = vmand %vm1867_vm10, %vm1869_vm12 }
 0x353   : > { %v7411_v58 = vpop.eup %7410  ;;  %v3921_v57 = vadd.bf16 1065369472, %v7409_v12  ;;  %v1530_v33 = vadd.f32 %v6154_v7, %v1338_v34  ;;  %2084 = vadd.xlane.f32.xlu0 %v2083_v6  ;;  %v3459_v12 = vmul.bf16 %v3363_v14, %v12047_v26  ;;  %v3552_v60 = vmul.bf16 1027030327, %v3456_v16  ;;  %v14340_v7 = vld [vmem:[#allocation30_spill] sm:$0xff]  ;;  %14341 = vst [vmem:[#allocation4_spill] sm:$0xff] %v12120_v44 }
 0x354   : > { %v3923_v61 = vadd.bf16 1065369472, %v7411_v58  ;;  %v12112_v62 = vpack.c.bf16 %v2999_v9, %v2995_v49  ;;  %v12114_v58 = vpop.f32.mrf.mxu1  ;;  %v3158_v30 = vadd.f32 %v14340_v7, %v14235_v31  ;;  %v3466_v6 = vmul.bf16 %v3370_v10, %v12063_v19  ;;  %v14342_v16 = vld [vmem:[#allocation91_spill] sm:$0xff] }
 0x355   : > { %v4017_v24 = vmul.bf16 1056980736, %v3921_v57  ;;  %v3641_v20 = vadd.bf16 %v3545_v13, %v11872_v5  ;;  %v6178_v14 = vsel %vm1579_vm0, 1.0, %v13683_v4  ;;  %v3162_v49 = vadd.f32 %v14342_v16, %v14235_v31 }
 0x356   : > { %v4019_v34 = vmul.bf16 1056980736, %v3923_v61  ;;  %v3643_v9 = vadd.bf16 %v3547_v3, %v11935_v43  ;;  %v1651_v61 = vadd.f32 %v6178_v14, %v1530_v33  ;;  %v12128_v1 = vpack.c.bf16 %v3007_v25, %v3003_v23  ;;  %v12147_v33 = vpop.f32.mrf.mxu0 }
 0x357   : > { %v4113_v46 = vmul.bf16 %v4017_v24, %v11650_v54  ;;  %v3737_v7 = vmul.bf16 1061961548, %v3641_v20  ;;  %v3648_v13 = vadd.bf16 %v3552_v60, %v12022_v41  ;;  %v3361_v10 = vmul.bf16 %v12112_v62, %v12112_v62  ;;  %v12133_v24 = vpop.f32.mrf.mxu1  ;;  %14346 = vst [vmem:[#allocation73_spill] sm:$0xff] %v12147_v33 }
 0x358   : > { %v4115_v57 = vmul.bf16 %v4019_v34, %v11656_v40  ;;  %v3739_v54 = vmul.bf16 1061961548, %v3643_v9  ;;  %v3555_v3 = vmul.bf16 1027030327, %v3459_v12  ;;  %v14345_v60 = vmul.bf16 %v11862_v35, %v14331_v8  ;;  %v7548_v35 = vld [vmem:[%s13454_s5 + $0x1b8] sm:$0xff]   ;;  %v12176_v9 = vpop.f32.mrf.mxu0  ;;  %v7550_v40 = vld [vmem:[%s13454_s5 + $0x1b0] sm:$0xff]  }
 0x359   : > { %5205 = vmatprep.mubr.bf16.mxu1 %v4113_v46  ;;  %v3562_v20 = vmul.bf16 1027030327, %v3466_v6  ;;  %7416 = vtanh.bf16 %v3737_v7  ;;  %v6202_v38 = vsel %vm1771_vm15, 1.0, %v13683_v4  ;;  %v14347_v23 = vmul.bf16 %v11912_v0, %v11502_v45  ;;  %v12170_v6 = vpop.f32.mrf.mxu1  ;;  %v14349_v46 = vld [vmem:[#allocation51_spill] sm:$0xff]  ;;  %14350 = vst [vmem:[#allocation7_spill] sm:$0xff] %v12176_v9 }
 0x35a   : > { %5611 = vmatprep.mubr.bf16.mxu0 %v4115_v57  ;;  %5206 = vmatmul.mubr.bf16.vlgmr.msra.gmra.mxu1 %v14345_v60  ;;  %v12156_v25 = vpack.c.bf16 %v3162_v49, %v3158_v30  ;;  %7418 = vtanh.bf16 %v3739_v54  ;;  %v3368_v8 = vmul.bf16 %v12128_v1, %v12128_v1  ;;  %v1843_v12 = vadd.f32 %v6202_v38, %v1651_v61  ;;  %v14351_v61 = vld [vmem:[#allocation90_spill] sm:$0xff]  ;;  %v7551_v38 = vld [vmem:[%s13454_s5 + $0x1e8] sm:$0xff]  }
 0x35b   : > { %5612 = vmatmul.mubr.bf16.vlgmr.msra.gmra.mxu0 %v14347_v23  ;;  %6961 = vmatpush3.bf16.msra.mxu1 %v7548_v35  ;;  %7420 = vtanh.bf16 %v3746_v59  ;;  %v3744_v0 = vmul.bf16 1061961548, %v3648_v13  ;;  %v3457_v34 = vmul.bf16 %v3361_v10, %v12112_v62  ;;  %v6226_v30 = vsel %vm12140_vm6, 1.0, %v13683_v4  ;;  %14348 = vst [vmem:[#allocation85_spill] sm:$0xff] %v12170_v6  ;;  %v14352_v4 = vld [vmem:[#allocation17_spill] sm:$0xff]  ;;  %v14353_v10 = vld [vmem:[#allocation58_spill] sm:$0xff] }
 0x35c   : > { %6954 = vmatprep.subr.bf16.mxu1 %v7549_v32  ;;  %v3658_v59 = vadd.bf16 %v3562_v20, %v12063_v19  ;;  %v3005_v14 = vadd.f32 %v14349_v46, %v14224_v47  ;;  %v1964_v16 = vadd.f32 %v6226_v30, %v1843_v12  ;;  %v3651_v49 = vadd.bf16 %v3555_v3, %v12047_v26  ;;  %v12196_v12 = vpop.f32.mrf.mxu1 }
 0x35d   : > { %v7413_v45 = vpop.eup %7412  ;;  %v3371_v57 = vmul.bf16 %v12156_v25, %v12156_v25  ;;  %v3009_v7 = vadd.f32 %v14351_v61, %v14224_v47  ;;  %v3166_v13 = vadd.f32 %v14352_v4, %v14205_v28  ;;  %v3170_v54 = vadd.f32 %v14353_v10, %v14205_v28 }
 0x35e   : > { %v7415_v3 = vpop.eup %7414  ;;  %v3464_v60 = vmul.bf16 %v3368_v8, %v12128_v1  ;;  %vm1988_vm12 = vcmp.lt.f32.partialorder %v1964_v16, 2.0  ;;  %v3747_v20 = vmul.bf16 1061961548, %v3651_v49  ;;  %7422 = vtanh.bf16 %v3744_v0  ;;  %v12200_v8 = vpop.f32.mrf.mxu0 }
 0x35f   : > { %6962 = vmatpush3.bf16.msra.mxu1 %v7550_v40  ;;  %v3553_v23 = vmul.bf16 1027030327, %v3457_v34  ;;  %v12194_v35 = vsel %vm1988_vm12, %v14238_v52, 0.0  ;;  %v3754_v32 = vmul.bf16 1061961548, %v3658_v59  ;;  %14356 = vst [vmem:[#allocation28_spill] sm:$0xff] %v12200_v8  ;;  %v3467_v46 = vmul.bf16 %v3371_v57, %v12156_v25 }
 0x360   : > { %6955 = vmatprep.subr.bf16.mxu1 %v7551_v38  ;;  %14354 = vst [vmem:[#allocation74_spill] sm:$0xff] %v12194_v35  ;;  %v2080_v30 = vsel %vm14355_vm7, %v12194_v35, 0.0  ;;  %7424 = vtanh.bf16 %v3747_v20  ;;  %v12203_v16 = vpack.c.bf16 %v3009_v7, %v3005_v14  ;;  %v12205_v49 = vpack.c.bf16 %v3170_v54, %v3166_v13  ;;  %v7552_v52 = vld [vmem:[%s13454_s5 + $0x1a8] sm:$0xff]   ;;  %v7553_v59 = vld [vmem:[%s13454_s5 + $0x1e0] sm:$0xff]   ;;  %v12214_v14 = vpop.f32.mrf.mxu1  ;;  %v12216_v7 = vpop.f32.mrf.mxu0 }
 0x361   : > { %2081 = vadd.xlane.f32.xlu1 %v2080_v30  ;;  %v3560_v0 = vmul.bf16 1027030327, %v3464_v60  ;;  %v3928_v34 = vadd.bf16 1065369472, %v7413_v45  ;;  %v3930_v61 = vadd.bf16 1065369472, %v7415_v3  ;;  %v3649_v57 = vadd.bf16 %v3553_v23, %v12112_v62 }
 0x362   : > { %14357 = vst [vmem:[#allocation54_spill] sm:$0xff] %v12214_v14  ;;  %7426 = vtanh.bf16 %v3754_v32  ;;  %14358 = vst [vmem:[#allocation78_spill] sm:$0xff] %v12216_v7  ;;  %v3563_v4 = vmul.bf16 1027030327, %v3467_v46  ;;  %v3369_v13 = vmul.bf16 %v12203_v16, %v12203_v16  ;;  %v3378_v45 = vmul.bf16 %v12205_v49, %v12205_v49  ;;  %v7554_v54 = vld [vmem:[%s13454_s5 + $0x1a0] sm:$0xff]   ;;  %v14359_v60 = vld [vmem:[#allocation44_spill] sm:$0xff] }
 0x363   : > { %6963 = vmatpush3.bf16.msra.mxu1 %v7552_v52  ;;  %v3745_v10 = vmul.bf16 1061961548, %v3649_v57  ;;  %v3656_v3 = vadd.bf16 %v3560_v0, %v12128_v1  ;;  %v3168_v20 = vadd.f32 %v14359_v60, %v14235_v31  ;;  %v4024_v38 = vmul.bf16 1056980736, %v3928_v34  ;;  %v14360_v23 = vld [vmem:[#allocation102_spill] sm:$0xff]  ;;  %v7555_v30 = vld [vmem:[%s13454_s5 + $0x1d8] sm:$0xff]   ;;  %v12233_v57 = vpop.f32.mrf.mxu1 }
 0x364   : > { %6956 = vmatprep.subr.bf16.mxu1 %v7553_v59  ;;  %v3172_v32 = vadd.f32 %v14360_v23, %v14235_v31  ;;  %v4026_v59 = vmul.bf16 1056980736, %v3930_v61  ;;  %v14361_v35 = vld [vmem:[#allocation87_spill] sm:$0xff]  ;;  %v14362_v34 = vld [vmem:[#allocation70_spill] sm:$0xff]  ;;  %v12239_v23 = vpop.f32.mrf.mxu0  ;;  %v3465_v9 = vmul.bf16 %v3369_v13, %v12203_v16  ;;  %v3659_v61 = vadd.bf16 %v3563_v4, %v12156_v25  ;;  %v7557_v13 = vld [vmem:[%s13454_s5 + $0x1d0] sm:$0xff]  }
 0x365   : > { %7428 = vtanh.bf16 %v3745_v10  ;;  %v3013_v60 = vadd.f32 %v14361_v35, %v14200_v63  ;;  %v3017_v7 = vadd.f32 %v14362_v34, %v14200_v63  ;;  %14363 = vst [vmem:[#allocation89_spill] sm:$0xff] %v12239_v23  ;;  %v7556_v10 = vld [vmem:[%s13454_s5 + $0x198] sm:$0xff]   ;;  %v4120_v35 = vmul.bf16 %v4024_v38, %v11782_v27  ;;  %v12255_v23 = vpop.f32.mrf.mxu1 }
 0x366   : > { %v12248_v44 = vpack.c.bf16 %v3172_v32, %v3168_v20  ;;  %v4122_v4 = vmul.bf16 %v4026_v59, %v11809_v50  ;;  %v3755_v34 = vmul.bf16 1061961548, %v3659_v61  ;;  %14364 = vst [vmem:[#allocation20_spill] sm:$0xff] %v12255_v23  ;;  %v12260_v27 = vpop.f32.mrf.mxu0  ;;  %v3561_v38 = vmul.bf16 1027030327, %v3465_v9  ;;  %v14366_v9 = vld [vmem:[#allocation38_spill] sm:$0xff] }
 0x367   : > { %6964 = vmatpush3.bf16.msra.mxu1 %v7554_v54  ;;  %v7417_v40 = vpop.eup %7416  ;;  %14365 = vst [vmem:[#allocation23_spill] sm:$0xff] %v12260_v27  ;;  %v3176_v59 = vadd.f32 %v14366_v9, %v14205_v28  ;;  %v7559_v61 = vld [vmem:[%s13454_s5 + $0x1c8] sm:$0xff]  }
 0x368   : > { %6957 = vmatprep.subr.bf16.mxu1 %v7555_v30  ;;  %v7419_v46 = vpop.eup %7418  ;;  %v3929_v52 = vadd.bf16 1065369472, %v7417_v40  ;;  %v3474_v30 = vmul.bf16 %v3378_v45, %v12205_v49  ;;  %v3752_v40 = vmul.bf16 1061961548, %v3656_v3  ;;  %7430 = vtanh.bf16 %v3755_v34 }
 0x369   : > { %v7421_v54 = vpop.eup %7420  ;;  %v3931_v0 = vadd.bf16 1065369472, %v7419_v46 }
 0x36a   : > { %v4025_v8 = vmul.bf16 1056980736, %v3929_v52  ;;  %v3938_v52 = vadd.bf16 1065369472, %v7421_v54  ;;  %v3570_v32 = vmul.bf16 1027030327, %v3474_v30  ;;  %7432 = vtanh.bf16 %v3752_v40  ;;  %v12271_v30 = vpop.f32.mrf.mxu1  ;;  %v12278_v40 = vpop.f32.mrf.mxu0 }
 0x36b   : > { %6965 = vmatpush3.bf16.msra.mxu1 %v7556_v10  ;;  %v4027_v46 = vmul.bf16 1056980736, %v3931_v0  ;;  %v12258_v0 = vpack.c.bf16 %v3017_v7, %v3013_v60  ;;  %v14367_v54 = vld [vmem:[#allocation64_spill] sm:$0xff]  ;;  %14368 = vst [vmem:[#allocation47_spill] sm:$0xff] %v12271_v30  ;;  %14369 = vst [vmem:[#allocation42_spill] sm:$0xff] %v12278_v40 }
 0x36c   : > { %6958 = vmatprep.subr.bf16.mxu1 %v7557_v13  ;;  %v4121_v45 = vmul.bf16 %v4025_v8, %v11872_v5  ;;  %v7423_v20 = vpop.eup %7422  ;;  %v7558_v5 = vld [vmem:[%s13454_s5 + $0x190] sm:$0xff]   ;;  %v4034_v7 = vmul.bf16 1056980736, %v3938_v52  ;;  %v3180_v60 = vadd.f32 %v14367_v54, %v14205_v28 }
 0x36d   : > { %v4123_v3 = vmul.bf16 %v4027_v46, %v11935_v43  ;;  %v3379_v43 = vmul.bf16 %v12248_v44, %v12248_v44  ;;  %v3376_v10 = vmul.bf16 %v12258_v0, %v12258_v0  ;;  %v3666_v46 = vadd.bf16 %v3570_v32, %v12205_v49 }
 0x36e   : > { %5213 = vmatprep.mubr.bf16.mxu1 %v4121_v45  ;;  %v7425_v50 = vpop.eup %7424  ;;  %v3936_v13 = vadd.bf16 1065369472, %v7423_v20  ;;  %v3657_v45 = vadd.bf16 %v3561_v38, %v12203_v16  ;;  %v7561_v20 = vld [vmem:[%s13454_s5 + $0x1c0] sm:$0xff]   ;;  %v4130_v32 = vmul.bf16 %v4034_v7, %v11941_v29 }
 0x36f   : > { %6966 = vmatpush3.bf16.msra.mxu1 %v7558_v5  ;;  %5619 = vmatprep.mubr.bf16.mxu0 %v4123_v3  ;;  %v3939_v8 = vadd.bf16 1065369472, %v7425_v50  ;;  %v3475_v34 = vmul.bf16 %v3379_v43, %v12248_v44  ;;  %v14370_v3 = vld [vmem:[#allocation39_spill] sm:$0xff]  ;;  %v14371_v50 = vld [vmem:[#allocation72_spill] sm:$0xff]  ;;  %v12299_v43 = vpop.f32.mrf.mxu0  ;;  %v14374_v29 = vld [vmem:[#allocation34_spill] sm:$0xff] }
 0x370   : > { %5214 = vmatmul.mubr.bf16.gmra.mxu1 %v4120_v35  ;;  %5620 = vmatmul.mubr.bf16.gmra.mxu0 %v4122_v4  ;;  %v7560_v4 = vld [vmem:[%s13454_s5 + $0x188] sm:$0xff]   ;;  %v7427_v52 = vpop.eup %7426  ;;  %v3015_v5 = vadd.f32 %v14370_v3, %v14224_v47  ;;  %v3019_v9 = vadd.f32 %v14371_v50, %v14224_v47  ;;  %v3753_v54 = vmul.bf16 1061961548, %v3657_v45  ;;  %14373 = vst [vmem:[#allocation59_spill] sm:$0xff] %v12299_v43  ;;  %v3762_v3 = vmul.bf16 1061961548, %v3666_v46  ;;  %v12309_v45 = vpop.xlane.xlu0 %2015 }
 0x371   : > { %6959 = vmatprep.subr.bf16.mxu1 %v7559_v61  ;;  %v4035_v35 = vmul.bf16 1056980736, %v3939_v8  ;;  %v12295_v8 = vpack.c.bf16 %v3180_v60, %v3176_v59  ;;  %v12297_v61 = vpop.f32.mrf.mxu1  ;;  %v3472_v50 = vmul.bf16 %v3376_v10, %v12258_v0  ;;  %v4032_v40 = vmul.bf16 1056980736, %v3936_v13  ;;  %v14375_v59 = vld [vmem:[#allocation26_spill] sm:$0xff] }
 0x372   : > { %14372 = vst [vmem:[#allocation11_spill] sm:$0xff] %v12297_v61  ;;  %7434 = vtanh.bf16 %v3753_v54  ;;  %v3178_v7 = vadd.f32 %v14374_v29, %v14235_v31  ;;  %v3182_v60 = vadd.f32 %v14375_v59, %v14235_v31  ;;  %v3571_v46 = vmul.bf16 1027030327, %v3475_v34 }
 0x373   : > { %6967 = vmatpush3.bf16.msra.mxu1 %v7560_v4  ;;  %v4131_v38 = vmul.bf16 %v4035_v35, %v12047_v26  ;;  %v7429_v4 = vpop.eup %7428  ;;  %v7562_v26 = vld [vmem:[%s13454_s5 + $0x180] sm:$0xff]   ;;  %v3386_v10 = vmul.bf16 %v12295_v8, %v12295_v8  ;;  %v3946_v13 = vadd.bf16 1065369472, %v7427_v52  ;;  %7436 = vtanh.bf16 %v3762_v3  ;;  %v14379_v3 = vld [vmem:[#allocation3_spill] sm:$0xff] }
 0x374   : > { %6960 = vmatprep.subr.bf16.mxu1 %v7561_v20  ;;  %v3937_v35 = vadd.bf16 1065369472, %v7429_v4  ;;  %v12311_v20 = vpack.c.bf16 %v3019_v9, %v3015_v5  ;;  %v3568_v29 = vmul.bf16 1027030327, %v3472_v50  ;;  %v4128_v59 = vmul.bf16 %v4032_v40, %v12022_v41  ;;  %v14380_v40 = vld [vmem:[#allocation21_spill] sm:$0xff] }
 0x375   : > { %5627 = vmatprep.mubr.bf16.mxu0 %v4131_v38  ;;  %v12315_v38 = vpop.f32.mrf.mxu1  ;;  %v12320_v4 = vpack.c.bf16 %v3182_v60, %v3178_v7  ;;  %v3482_v9 = vmul.bf16 %v3386_v10, %v12295_v8  ;;  %v4042_v52 = vmul.bf16 1056980736, %v3946_v13  ;;  %v3667_v43 = vadd.bf16 %v3571_v46, %v12248_v44  ;;  %v12335_v60 = vpop.xlane.xlu0 %2024 }
 0x376   : > { %14376 = vst [vmem:[#allocation100_spill] sm:$0xff] %v12315_v38  ;;  %v4033_v54 = vmul.bf16 1056980736, %v3937_v35  ;;  %v3377_v5 = vmul.bf16 %v12311_v20, %v12311_v20  ;;  %v3023_v41 = vadd.f32 %v14379_v3, %v14200_v63  ;;  %v3027_v50 = vadd.f32 %v14380_v40, %v14200_v63 }
 0x377   : > { %6968 = vmatpush3.bf16.msra.mxu1 %v7562_v26  ;;  %v12317_v26 = vpop.f32.mrf.mxu0  ;;  %v12327_v35 = vpop.f32.mrf.mxu1  ;;  %v3664_v10 = vadd.bf16 %v3568_v29, %v12258_v0  ;;  %v3763_v13 = vmul.bf16 1061961548, %v3667_v43  ;;  %v3387_v46 = vmul.bf16 %v12320_v4, %v12320_v4  ;;  %v3578_v3 = vmul.bf16 1027030327, %v3482_v9 }
 0x378   : > { %5628 = vmatmul.mubr.bf16.gmra.mxu0 %v4130_v32  ;;  %14377 = vst [vmem:[#allocation40_spill] sm:$0xff] %v12317_v26  ;;  %v4129_v34 = vmul.bf16 %v4033_v54, %v12112_v62  ;;  %v7431_v32 = vpop.eup %7430  ;;  %14378 = vst [vmem:[#allocation101_spill] sm:$0xff] %v12327_v35  ;;  %v3473_v35 = vmul.bf16 %v3377_v5, %v12311_v20  ;;  %v4138_v38 = vmul.bf16 %v4042_v52, %v12063_v19 }
 0x379   : > { %v7433_v26 = vpop.eup %7432  ;;  %v3947_v62 = vadd.bf16 1065369472, %v7431_v32  ;;  %v12333_v7 = vpop.f32.mrf.mxu0  ;;  %7438 = vtanh.bf16 %v3763_v13  ;;  %v3760_v43 = vmul.bf16 1061961548, %v3664_v10  ;;  %v3674_v19 = vadd.bf16 %v3578_v3, %v12295_v8  ;;  %v14387_v10 = vld [vmem:[#allocation15_spill] sm:$0xff]  ;;  %v14388_v13 = vld [vmem:[#allocation52_spill] sm:$0xff] }
 0x37a   : > { %5221 = vmatprep.mubr.bf16.mxu1 %v4129_v34  ;;  %14381 = vst [vmem:[#allocation10_spill] sm:$0xff] %v12333_v7  ;;  %v2019_v34 = vpop.xlane.xlu1 %2018  ;;  %v3944_v40 = vadd.bf16 1065369472, %v7433_v26  ;;  %v12342_v32 = vpop.f32.mrf.mxu1  ;;  %v12344_v7 = vpack.c.bf16 %v3027_v50, %v3023_v41  ;;  %v3569_v9 = vmul.bf16 1027030327, %v3473_v35 }
 0x37b   : > { %5222 = vmatmul.mubr.bf16.gmra.mxu1 %v4128_v59  ;;  %v4043_v54 = vmul.bf16 1056980736, %v3947_v62  ;;  %14382 = vst [vmem:[#allocation83_spill] sm:$0xff] %v12342_v32  ;;  %v12347_v29 = vpop.f32.mrf.mxu0  ;;  %7440 = vrcp.f32 %v2019_v34  ;;  %v3483_v59 = vmul.bf16 %v3387_v46, %v12320_v4  ;;  %v12350_v5 = vpop.xlane.xlu0 %2021  ;;  %v3190_v46 = vadd.f32 %v14388_v13, %v14205_v28  ;;  %v14390_v32 = vld [vmem:[#allocation13_spill] sm:$0xff] }
 0x37c   : > { %14383 = vst [vmem:[#allocation9_spill] sm:$0xff] %v12344_v7  ;;  %14384 = vst [vmem:[#allocation84_spill] sm:$0xff] %v12347_v29  ;;  %v4040_v26 = vmul.bf16 1056980736, %v3944_v40  ;;  %v12353_v52 = vpop.f32.mrf.mxu1  ;;  %7442 = vtanh.bf16 %v3760_v43  ;;  %v3770_v40 = vmul.bf16 1061961548, %v3674_v19  ;;  %v3029_v29 = vadd.f32 %v14390_v32, %v14224_v47 }
 0x37d   : > { %v4139_v61 = vmul.bf16 %v4043_v54, %v12156_v25  ;;  %14385 = vst [vmem:[#allocation24_spill] sm:$0xff] %v12353_v52  ;;  %v3384_v25 = vmul.bf16 %v12344_v7, %v12344_v7  ;;  %v12357_v50 = vpop.f32.mrf.mxu0  ;;  %v3579_v35 = vmul.bf16 1027030327, %v3483_v59  ;;  %v14389_v54 = vld [vmem:[#allocation31_spill] sm:$0xff]  ;;  %v3665_v43 = vadd.bf16 %v3569_v9, %v12311_v20  ;;  %v14392_v13 = vld [vmem:[#allocation61_spill] sm:$0xff] }
 0x37e   : > { %14386 = vst [vmem:[#allocation80_spill] sm:$0xff] %v12357_v50  ;;  %v12369_v52 = vpop.f32.mrf.mxu1  ;;  %v3033_v59 = vadd.f32 %v14392_v13, %v14200_v63  ;;  %v14393_v50 = vld [vmem:[#allocation95_spill] sm:$0xff]  ;;  %7444 = vrcp.f32 %v12309_v45  ;;  %v14396_v13 = vld [vmem:[#allocation60_spill] sm:$0xff] }
 0x37f   : > { %5635 = vmatprep.mubr.bf16.mxu0 %v4139_v61  ;;  %v3186_v61 = vadd.f32 %v14387_v10, %v14205_v28  ;;  %14391 = vst [vmem:[#allocation67_spill] sm:$0xff] %v12369_v52  ;;  %v3480_v10 = vmul.bf16 %v3384_v25, %v12344_v7  ;;  %v12377_v19 = vpop.f32.mrf.mxu0  ;;  %v2031_v27 = vpop.xlane.xlu0 %2030  ;;  %7446 = vtanh.bf16 %v3770_v40 }
 0x380   : > { %v7435_v62 = vpop.eup %7434  ;;  %5636 = vmatmul.mubr.bf16.gmra.mxu0 %v4138_v38  ;;  %v3025_v38 = vadd.f32 %v14389_v54, %v14224_v47  ;;  %v3037_v54 = vadd.f32 %v14393_v50, %v14200_v63  ;;  %14394 = vst [vmem:[#allocation49_spill] sm:$0xff] %v12377_v19  ;;  %v3035_v50 = vadd.f32 %v14396_v13, %v14224_v47  ;;  %v14421_v19 = vmov 1  }
 0x381   : > { %v3945_v41 = vadd.bf16 1065369472, %v7435_v62  ;;  %v7437_v3 = vpop.eup %7436  ;;  %v4136_v62 = vmul.bf16 %v4040_v26, %v12128_v1  ;;  %v12379_v32 = vpack.c.bf16 %v3190_v46, %v3186_v61  ;;  %v3761_v1 = vmul.bf16 1061961548, %v3665_v43  ;;  %v12393_v45 = vpop.f32.mrf.mxu0  ;;  %v14400_v46 = vld [vmem:[#allocation79_spill] sm:$0xff] }
 0x382   : > { %v3954_v9 = vadd.bf16 1065369472, %v7437_v3  ;;  %v3675_v26 = vadd.bf16 %v3579_v35, %v12320_v4  ;;  %v12383_v25 = vpack.c.bf16 %v3029_v29, %v3025_v38  ;;  %v12389_v52 = vpack.c.bf16 %v3037_v54, %v3033_v59  ;;  %14399 = vst [vmem:[#allocation77_spill] sm:$0xff] %v12393_v45  ;;  %v14403_v45 = vld [vmem:[#allocation37_spill] sm:$0xff] }
 0x383   : > { %v4041_v34 = vmul.bf16 1056980736, %v3945_v41  ;;  %14395 = vst [vmem:[#allocation50_spill] sm:$0xff] %v12379_v32  ;;  %v3039_v61 = vadd.f32 %v11642_v39, %v14224_v47  ;;  %7448 = vtanh.bf16 %v3761_v1  ;;  %v3188_v35 = vadd.f32 %v14400_v46, %v14235_v31  ;;  %v2037_v43 = vpop.xlane.xlu0 %2036  ;;  %v12411_v13 = vpop.f32.mrf.mxu0 }
 0x384   : > { %14398 = vst [vmem:[#allocation12_spill] sm:$0xff] %v12389_v52  ;;  %v3394_v29 = vmul.bf16 %v12379_v32, %v12379_v32  ;;  %v3192_v38 = vadd.f32 %v11646_v56, %v14235_v31  ;;  %7450 = vrcp.f32 %v12335_v60  ;;  %v3385_v39 = vmul.bf16 %v12383_v25, %v12383_v25  ;;  %14402 = vst [vmem:[#allocation63_spill] sm:$0xff] %v12411_v13 }
 0x385   : > { %v4137_v41 = vmul.bf16 %v4041_v34, %v12203_v16  ;;  %v12387_v16 = vpop.f32.mrf.mxu1  ;;  %v3576_v34 = vmul.bf16 1027030327, %v3480_v10  ;;  %v12409_v1 = vpack.c.bf16 %v3039_v61, %v3035_v50  ;;  %v3771_v56 = vmul.bf16 1061961548, %v3675_v26 }
 0x386   : > { %14397 = vst [vmem:[#allocation2_spill] sm:$0xff] %v12387_v16  ;;  %v12414_v60 = vpack.c.bf16 %v3192_v38, %v3188_v35  ;;  %v3196_v26 = vadd.f32 %v11687_v21, %v14205_v28  ;;  %v14405_v35 = vld [vmem:[#allocation33_spill] sm:$0xff]  ;;  %v14411_v13 = vmov 3  }
 0x387   : > { %5229 = vmatprep.mubr.bf16.mxu1 %v4137_v41  ;;  %v7439_v3 = vpop.eup %7438  ;;  %v12404_v59 = vpop.f32.mrf.mxu1  ;;  %v3672_v54 = vadd.bf16 %v3576_v34, %v12344_v7  ;;  %v3392_v41 = vmul.bf16 %v12389_v52, %v12389_v52  ;;  %v3047_v34 = vadd.f32 %v11744_v17, %v14200_v63  ;;  %7452 = vtanh.bf16 %v3771_v56  ;;  %v14408_v56 = vld [vmem:[#allocation93_spill] sm:$0xff] }
 0x388   : > { %5230 = vmatmul.mubr.bf16.gmra.mxu1 %v4136_v62  ;;  %v7441_v40 = vpop.eup %7440  ;;  %v4050_v62 = vmul.bf16 1056980736, %v3954_v9  ;;  %v3955_v10 = vadd.bf16 1065369472, %v7439_v3  ;;  %14401 = vst [vmem:[#allocation35_spill] sm:$0xff] %v12404_v59  ;;  %v3490_v9 = vmul.bf16 %v3394_v29, %v12379_v32  ;;  %v3043_v3 = vadd.f32 %v11671_v2, %v14200_v63  ;;  %v12438_v29 = vpop.f32.mrf.mxu0 }
 0x389   : > { %v2111_v16 = vmul.f32 %v7441_v40, %v14403_v45  ;;  %7454 = vrcp.f32 %v12350_v5  ;;  %v3200_v45 = vadd.f32 %v11751_v55, %v14205_v28  ;;  %v12428_v2 = vpop.f32.mrf.mxu1  ;;  %v12431_v17 = vmul.bf16 %v3385_v39, %v12383_v25  ;;  %14406 = vst [vmem:[#allocation5_spill] sm:$0xff] %v12438_v29 }
 0x38a   : > { %v4051_v46 = vmul.bf16 1056980736, %v3955_v10  ;;  %v4146_v59 = vmul.bf16 %v4050_v62, %v12205_v49  ;;  %v7443_v50 = vpop.eup %7442  ;;  %14404 = vst [vmem:[#allocation18_spill] sm:$0xff] %v12428_v2  ;;  %v3488_v49 = vmul.bf16 %v3392_v41, %v12389_v52  ;;  %v3206_v5 = vadd.f32 %v11824_v51, %v14205_v28 }
 0x38b   : > { %4473 = vperm.xlu0 %7076, %v2111_v16   ;;  %4901 = vperm.xlu1 %7077, %v2111_v16   ;;  %v3210_v21 = vadd.f32 %v14405_v35, %v14205_v28  ;;  %v3768_v38 = vmul.bf16 1061961548, %v3672_v54  ;;  %v3586_v55 = vmul.bf16 1027030327, %v3490_v9  ;;  %v3393_v40 = vmul.bf16 %v12409_v1, %v12409_v1  ;;  %v7445_v10 = vpop.eup %7444  ;;  %v14409_v9 = vld [vmem:[#allocation76_spill] sm:$0xff] }
 0x38c   : > { %v4147_v61 = vmul.bf16 %v4051_v46, %v12248_v44  ;;  %v2043_v44 = vpop.xlane.xlu0 %2042  ;;  %v3395_v62 = vmul.bf16 %v12414_v60, %v12414_v60  ;;  %7456 = vrcp.f32 %v2031_v27  ;;  %v12444_v39 = vpack.c.bf16 %v3047_v34, %v3043_v3  ;;  %v14418_v27 = vld [vmem:[#allocation41_spill] sm:$0xff] }
 0x38d   : > { %v3952_v51 = vadd.bf16 1065369472, %v7443_v50  ;;  %7458 = vrcp.f32 %v2037_v43  ;;  %v12446_v41 = vpack.c.bf16 %v3200_v45, %v3196_v26  ;;  %v3053_v54 = vadd.f32 %v14408_v56, %v14200_v63  ;;  %v12459_v43 = vpop.f32.mrf.mxu0  ;;  %v7447_v34 = vpop.eup %7446  ;;  %v14415_v56 = vld [vmem:[#allocation14_spill] sm:$0xff] }
 0x38e   : > { %5643 = vmatprep.mubr.bf16.mxu0 %v4147_v61  ;;  %14407 = vst [vmem:[#allocation22_spill] sm:$0xff] %v12444_v39  ;;  %v3057_v46 = vadd.f32 %v14409_v9, %v14200_v63  ;;  %v14410_v35 = vmov 2   ;;  %v12454_v61 = vpop.f32.mrf.mxu1  ;;  %7460 = vrcp.f32 %v2043_v44  ;;  %v12457_v3 = vpack.c.bf16 %v3210_v21, %v3206_v5  ;;  %14414 = vst [vmem:[#allocation55_spill] sm:$0xff] %v12459_v43  ;;  %v14420_v43 = vld [vmem:[#allocation56_spill] sm:$0xff] }
 0x38f   : > { %5644 = vmatmul.mubr.bf16.gmra.mxu0 %v4146_v59  ;;  %7078 = vset.pattern.permute.xlu0 %v14410_v35  ;;  %14412 = vst [vmem:[#allocation27_spill] sm:$0xff] %v12454_v61  ;;  %v3584_v59 = vmul.bf16 1027030327, %v3488_v49  ;;  %7462 = vtanh.bf16 %v3768_v38  ;;  %v3682_v50 = vadd.bf16 %v3586_v55, %v12379_v32  ;;  %v12463_v26 = vmul.bf16 %v3393_v40, %v12409_v1 }
 0x390   : > { %7079 = vset.pattern.permute.xlu1 %v14411_v13  ;;  %14413 = vst [vmem:[#allocation62_spill] sm:$0xff] %v12457_v3  ;;  %5307 = vperm.xlu0 %7078, %v2111_v16   ;;  %v12466_v45 = vmul.bf16 %v3395_v62, %v12414_v60  ;;  %v3198_v49 = vadd.f32 %v14415_v56, %v14235_v31  ;;  %v4048_v9 = vmul.bf16 1056980736, %v3952_v51  ;;  %v12479_v61 = vpop.f32.mrf.mxu1 }
 0x391   : > { %5713 = vperm.xlu1 %7079, %v2111_v16   ;;  %v7449_v44 = vpop.eup %7448  ;;  %v3400_v5 = vmul.bf16 %v12444_v39, %v12444_v39  ;;  %v14416_v16 = vld [vmem:[#allocation16_spill] sm:$0xff]  ;;  %v3402_v38 = vmul.bf16 %v12446_v41, %v12446_v41  ;;  %v12476_v55 = vpack.c.bf16 %v3057_v46, %v3053_v54  ;;  %v2110_v62 = vmul.f32 %v7445_v10, %v14418_v27  ;;  %v12490_v46 = vpop.f32.mrf.mxu0  ;;  %v14424_v27 = vld [vmem:[#allocation45_spill] sm:$0xff] }
 0x392   : > { %v3202_v21 = vadd.f32 %v14416_v16, %v14235_v31  ;;  %v3953_v40 = vadd.bf16 1065369472, %v7449_v44  ;;  %14419 = vst [vmem:[#allocation91_spill] sm:$0xff] %v12479_v61  ;;  %v12481_v2 = vpop.eup %7450  ;;  %v3680_v56 = vadd.bf16 %v3584_v59, %v12389_v52  ;;  %v3045_v29 = vadd.f32 %v14420_v43, %v14224_v47  ;;  %14423 = vst [vmem:[#allocation51_spill] sm:$0xff] %v12490_v46  ;;  %v14425_v59 = vld [vmem:[#allocation99_spill] sm:$0xff]  ;;  %v12507_v46 = vpop.f32.mrf.mxu1 }
 0x393   : > { %14417 = vst [vmem:[#allocation30_spill] sm:$0xff] %v12476_v55  ;;  %v3410_v51 = vmul.bf16 %v12457_v3, %v12457_v3  ;;  %v3962_v16 = vadd.bf16 1065369472, %v7447_v34  ;;  %v14422_v54 = vmov 0   ;;  %v3778_v10 = vmul.bf16 1061961548, %v3682_v50  ;;  %v12516_v50 = vpop.f32.mrf.mxu0 }
 0x394   : > { %7081 = vset.pattern.permute.xlu0 %v14421_v19  ;;  %v3208_v44 = vadd.f32 %v14424_v27, %v14235_v31  ;;  %v4049_v30 = vmul.bf16 1056980736, %v3953_v40  ;;  %v3212_v23 = vadd.f32 %v14425_v59, %v14235_v31  ;;  %v3496_v43 = vmul.bf16 %v3400_v5, %v12444_v39  ;;  %v14426_v34 = vld [vmem:[#allocation68_spill] sm:$0xff]  ;;  %v2028_v27 = vpop.xlane.xlu1 %2027  ;;  %14428 = vst [vmem:[#allocation17_spill] sm:$0xff] %v12507_v46 }
 0x395   : > { %7080 = vset.pattern.permute.xlu1 %v14422_v54  ;;  %4897 = vperm.xlu0 %7081, %v2110_v62   ;;  %v3049_v52 = vadd.f32 %v14426_v34, %v14224_v47  ;;  %v12499_v33 = vpack.c.bf16 %v3202_v21, %v3198_v49  ;;  %v4144_v32 = vmul.bf16 %v4048_v9, %v12258_v0  ;;  %v7453_v5 = vpop.eup %7452  ;;  %v14429_v49 = vld [vmem:[#allocation43_spill] sm:$0xff]  ;;  %v14430_v9 = vld [vmem:[#allocation29_spill] sm:$0xff]  ;;  %v3776_v14 = vmul.bf16 1061961548, %v3680_v56 }
 0x396   : > { %4468 = vperm.xlu1 %7080, %v2110_v62   ;;  %v3498_v7 = vmul.bf16 %v3402_v38, %v12446_v41  ;;  %v3408_v40 = vmul.bf16 %v12476_v55, %v12476_v55  ;;  %v4145_v59 = vmul.bf16 %v4049_v30, %v12311_v20  ;;  %v12509_v61 = vpop.eup %7454  ;;  %v3055_v21 = vadd.f32 %v14429_v49, %v14224_v47 }
 0x397   : > { %14427 = vst [vmem:[#allocation90_spill] sm:$0xff] %v12499_v33  ;;  %v3506_v0 = vmul.bf16 %v3410_v51, %v12457_v3  ;;  %v3059_v34 = vadd.f32 %v14430_v9, %v14224_v47  ;;  %v4058_v38 = vmul.bf16 1056980736, %v3962_v16  ;;  %v3587_v6 = vmul.bf16 1027030327, %v12466_v45 }
 0x398   : > { %5237 = vmatprep.mubr.bf16.mxu1 %v4145_v59  ;;  %v12519_v30 = vpack.c.bf16 %v3212_v23, %v3208_v44  ;;  %v3963_v20 = vadd.bf16 1065369472, %v7453_v5  ;;  %7464 = vtanh.bf16 %v3778_v10  ;;  %v3592_v46 = vmul.bf16 1027030327, %v3496_v43 }
 0x399   : > { %7083 = vset.pattern.permute.xlu0 %v14411_v13  ;;  %v12522_v49 = vpack.c.bf16 %v3049_v52, %v3045_v29  ;;  %v3403_v51 = vmul.bf16 %v12499_v33, %v12499_v33  ;;  %5238 = vmatmul.mubr.bf16.gmra.mxu1 %v4144_v32  ;;  %v12527_v16 = vpop.eup %7456  ;;  %v3594_v56 = vmul.bf16 1027030327, %v3498_v7  ;;  %v3504_v45 = vmul.bf16 %v3408_v40, %v12476_v55  ;;  %v12533_v52 = vpop.f32.mrf.mxu1 }
 0x39a   : > { %14431 = vst [vmem:[#allocation58_spill] sm:$0xff] %v12519_v30  ;;  %7082 = vset.pattern.permute.xlu1 %v14410_v35  ;;  %v4059_v23 = vmul.bf16 1056980736, %v3963_v20  ;;  %v14433_v44 = vmul.bf16 1027030327, %v12431_v17  ;;  %5709 = vperm.xlu0 %7083, %v2110_v62   ;;  %v12535_v29 = vpop.eup %7458  ;;  %v12537_v32 = vpack.c.bf16 %v3059_v34, %v3055_v21  ;;  %v3063_v43 = vadd.f32 %v11937_v37, %v14200_v63  ;;  %v12542_v40 = vpop.f32.mrf.mxu0 }
 0x39b   : > { %14432 = vst [vmem:[#allocation44_spill] sm:$0xff] %v12522_v49  ;;  %5303 = vperm.xlu1 %7082, %v2110_v62   ;;  %v3602_v10 = vmul.bf16 1027030327, %v3506_v0  ;;  %v4154_v7 = vmul.bf16 %v4058_v38, %v12295_v8  ;;  %v12544_v5 = vpop.eup %7460  ;;  %v2034_v17 = vpop.xlane.xlu1 %2033  ;;  %v3411_v62 = vmul.bf16 %v12519_v30, %v12519_v30  ;;  %v3067_v0 = vadd.f32 %v11995_v22, %v14200_v63 }
 0x39c   : > { %v3673_v59 = vadd.bf16 %v14433_v44, %v12383_v25  ;;  %14434 = vst [vmem:[#allocation102_spill] sm:$0xff] %v12544_v5  ;;  %v4155_v9 = vmul.bf16 %v4059_v23, %v12320_v4  ;;  %7466 = vtanh.bf16 %v3776_v14  ;;  %v3683_v34 = vadd.bf16 %v3587_v6, %v12414_v60  ;;  %v12563_v6 = vpop.f32.mrf.mxu1 }
 0x39d   : > { %v3401_v37 = vmul.bf16 %v12522_v49, %v12522_v49  ;;  %v3499_v8 = vmul.bf16 %v3403_v51, %v12499_v33  ;;  %v12555_v38 = vpop.eup %7462  ;;  %v3688_v20 = vadd.bf16 %v3592_v46, %v12444_v39  ;;  %7468 = vrcp.f32 %v2028_v27  ;;  %v12569_v46 = vpop.f32.mrf.mxu0 }
 0x39e   : > { %v3769_v21 = vmul.bf16 1061961548, %v3673_v59  ;;  %v3065_v4 = vadd.f32 %v11963_v15, %v14224_v47  ;;  %5651 = vmatprep.mubr.bf16.mxu0 %v4155_v9  ;;  %v3069_v22 = vadd.f32 %v12024_v53, %v14224_v47  ;;  %7085 = vset.pattern.permute.xlu0 %v14421_v19  ;;  %v3690_v14 = vadd.bf16 %v3594_v56, %v12446_v41  ;;  %v14435_v59 = vld [vmem:[#allocation53_spill] sm:$0xff] }
 0x39f   : > { %7470 = vrcp.f32 %v2034_v17  ;;  %v3600_v51 = vmul.bf16 1027030327, %v3504_v45  ;;  %v3409_v23 = vmul.bf16 %v12537_v32, %v12537_v32  ;;  %5652 = vmatmul.mubr.bf16.gmra.mxu0 %v4154_v7  ;;  %7084 = vset.pattern.permute.xlu1 %v14422_v54  ;;  %v3698_v15 = vadd.bf16 %v3602_v10, %v12457_v3 }
 0x3a0   : > { %v3507_v53 = vmul.bf16 %v3411_v62, %v12519_v30  ;;  %v12573_v27 = vpack.c.bf16 %v3067_v0, %v3063_v43  ;;  %7472 = vtanh.bf16 %v3769_v21  ;;  %v3075_v56 = vadd.f32 %v12090_v36, %v14224_v47 }
 0x3a1   : > { %v3079_v45 = vadd.f32 %v12133_v24, %v14224_v47  ;;  %v3779_v44 = vmul.bf16 1061961548, %v3683_v34  ;;  %v2113_v7 = vmul.f32 %v12481_v2, %v14435_v59  ;;  %v3784_v17 = vmul.bf16 1061961548, %v3688_v20 }
 0x3a2   : > { %v12582_v9 = vmul.bf16 %v3401_v37, %v12522_v49  ;;  %v3595_v10 = vmul.bf16 1027030327, %v3499_v8  ;;  %v12584_v3 = vpack.c.bf16 %v3069_v22, %v3065_v4  ;;  %v3786_v62 = vmul.bf16 1061961548, %v3690_v14  ;;  %v14437_v14 = vld [vmem:[#allocation65_spill] sm:$0xff] }
 0x3a3   : > { %v12589_v0 = vadd.bf16 %v3600_v51, %v12476_v55  ;;  %v3216_v36 = vadd.f32 %v11944_v42, %v14205_v28  ;;  %7474 = vtanh.bf16 %v3779_v44  ;;  %4909 = vperm.xlu0 %7085, %v2113_v7   ;;  %4483 = vperm.xlu1 %7084, %v2113_v7   ;;  %v12596_v2 = vmul.bf16 %v3409_v23, %v12537_v32  ;;  %v14436_v42 = vld [vmem:[#allocation86_spill] sm:$0xff] }
 0x3a4   : > { %v12586_v43 = vpop.f32.mrf.mxu1  ;;  %v3416_v21 = vmul.bf16 %v12573_v27, %v12573_v27  ;;  %v3073_v34 = vadd.f32 %v12059_v11, %v14200_v63  ;;  %v3077_v37 = vadd.f32 %v12114_v58, %v14200_v63  ;;  %v3794_v8 = vmul.bf16 1061961548, %v3698_v15 }
 0x3a5   : > { %v3603_v20 = vmul.bf16 1027030327, %v3507_v53  ;;  %v3220_v4 = vadd.f32 %v14436_v42, %v14205_v28  ;;  %v12606_v22 = vpack.c.bf16 %v3079_v45, %v3075_v56  ;;  %7476 = vtanh.bf16 %v3784_v17 }
 0x3a6   : > { %v12593_v24 = vpop.f32.mrf.mxu0  ;;  %v3218_v51 = vadd.f32 %v14437_v14, %v14235_v31  ;;  %v3417_v23 = vmul.bf16 %v12584_v3, %v12584_v3  ;;  %v3222_v11 = vadd.f32 %v12030_v18, %v14235_v31  ;;  %v12614_v44 = vpop.f32.mrf.mxu1  ;;  %7478 = vtanh.bf16 %v3786_v62 }
 0x3a7   : > { %v7465_v58 = vpop.eup %7464  ;;  %v3593_v15 = vmul.bf16 1027030327, %v12582_v9  ;;  %v3691_v53 = vadd.bf16 %v3595_v10, %v12499_v33  ;;  %7087 = vset.pattern.permute.xlu0 %v14411_v13  ;;  %7086 = vset.pattern.permute.xlu1 %v14410_v35  ;;  %v3512_v18 = vmul.bf16 %v3416_v21, %v12573_v27  ;;  %v12625_v17 = vpack.c.bf16 %v3077_v37, %v3073_v34 }
 0x3a8   : > { %v12620_v56 = vpop.f32.mrf.mxu0  ;;  %5721 = vperm.xlu0 %7087, %v2113_v7   ;;  %5315 = vperm.xlu1 %7086, %v2113_v7   ;;  %7480 = vtanh.bf16 %v3794_v8  ;;  %v12628_v9 = vadd.bf16 %v3603_v20, %v12519_v30  ;;  %v12630_v10 = vpack.c.bf16 %v3220_v4, %v3216_v36  ;;  %v3425_v62 = vmul.bf16 %v12606_v22, %v12606_v22  ;;  %v12643_v37 = vpop.f32.mrf.mxu1 }
 0x3a9   : > { %v12635_v42 = vmul.bf16 %v3417_v23, %v12584_v3  ;;  %v12637_v14 = vpack.c.bf16 %v3222_v11, %v3218_v51  ;;  %v3960_v21 = vadd.bf16 1065369472, %v12555_v38  ;;  %v14438_v34 = vmul.bf16 1027030327, %v12463_v26  ;;  %v14439_v23 = vld [vmem:[#allocation66_spill] sm:$0xff]  ;;  %v14440_v38 = vld [vmem:[#allocation81_spill] sm:$0xff] }
 0x3aa   : > { %v12645_v8 = vpop.eup %7466  ;;  %v3085_v20 = vadd.f32 %v12196_v12, %v14224_v47  ;;  %v3089_v4 = vadd.f32 %v12233_v57, %v14224_v47  ;;  %v12653_v51 = vmul.f32 %v12509_v61, %v14439_v23  ;;  %v12657_v11 = vmul.f32 %v12527_v16, %v14440_v38  ;;  %v12659_v26 = vpop.f32.mrf.mxu0  ;;  %v14442_v23 = vld [vmem:[#allocation85_spill] sm:$0xff] }
 0x3ab   : > { %v3681_v7 = vadd.bf16 %v14438_v34, %v12409_v1  ;;  %v7469_v36 = vpop.eup %7468  ;;  %v3608_v45 = vmul.bf16 1027030327, %v3512_v18  ;;  %v3424_v59 = vmul.bf16 %v12625_v17, %v12625_v17  ;;  %v3970_v12 = vadd.bf16 1065369472, %v7465_v58 }
 0x3ac   : > { %v12661_v34 = vpop.eup %7470  ;;  %7093 = vset.pattern.permute.xlu0 %v14421_v19  ;;  %7088 = vset.pattern.permute.xlu1 %v14422_v54  ;;  %v12669_v57 = vadd.f32 %v12097_v48, %v14235_v31  ;;  %v12672_v61 = vmul.bf16 %v3425_v62, %v12606_v22  ;;  %v3689_v16 = vadd.bf16 %v3593_v15, %v12522_v49  ;;  %v3787_v18 = vmul.bf16 1061961548, %v3691_v53  ;;  %v6577_v48 = vpop.f32.mrf.mxu1 }
 0x3ad   : > { %14441 = vst [vmem:[#allocation87_spill] sm:$0xff] %v12661_v34  ;;  %v3777_v47 = vmul.bf16 1061961548, %v3681_v7  ;;  %4478 = vperm.xlu1 %7088, %v12653_v51   ;;  %4917 = vperm.xlu0 %7093, %v12657_v11   ;;  %v3083_v38 = vadd.f32 %v14442_v23, %v14200_v63  ;;  %v4056_v55 = vmul.bf16 1056980736, %v3960_v21  ;;  %v14443_v7 = vld [vmem:[#allocation54_spill] sm:$0xff]  ;;  %v12681_v62 = vpack.c.bf16 %v3089_v4, %v3085_v20  ;;  %v6665_v34 = vpop.f32.mrf.mxu0 }
 0x3ae   : > { %v7473_v58 = vpop.eup %7472  ;;  %v3087_v30 = vadd.f32 %v14443_v7, %v14200_v63  ;;  %v3785_v39 = vmul.bf16 1061961548, %v3689_v16  ;;  %v12684_v33 = vadd.bf16 %v3608_v45, %v12573_v27  ;;  %v3609_v15 = vmul.bf16 1027030327, %v12635_v42  ;;  %v14444_v63 = vld [vmem:[#allocation91_spill] sm:$0xff]  ;;  %v14445_v20 = vld [vmem:[#allocation17_spill] sm:$0xff] }
 0x3af   : > { %7482 = vtanh.bf16 %v3777_v47  ;;  %v3961_v5 = vadd.bf16 1065369472, %v7473_v58  ;;  %v12688_v53 = vmul.bf16 %v3424_v59, %v12625_v17  ;;  %v4066_v21 = vmul.bf16 1056980736, %v3970_v12  ;;  %v14446_v47 = vld [vmem:[#allocation51_spill] sm:$0xff]  ;;  %v14447_v59 = vld [vmem:[#allocation9_spill] sm:$0xff] }
 0x3b0   : > { %7484 = vtanh.bf16 %v3787_v18  ;;  %v12694_v4 = vadd.f32 %v14445_v20, %v14444_v63  ;;  %v12698_v45 = vadd.f32 %v12516_v50, %v14446_v47  ;;  %v3617_v42 = vmul.bf16 1027030327, %v12672_v61  ;;  %v14450_v47 = vld [vmem:[#allocation69_spill] sm:$0xff] }
 0x3b1   : > { %v7475_v23 = vpop.eup %7474  ;;  %v4057_v49 = vmul.bf16 1056980736, %v3961_v5  ;;  %7089 = vset.pattern.permute.xlu1 %v14421_v19  ;;  %7095 = vset.pattern.permute.xlu0 %v14411_v13  ;;  %7486 = vtanh.bf16 %v3785_v39  ;;  %v4152_v16 = vmul.bf16 %v4056_v55, %v14447_v59  ;;  %v12702_v12 = vpack.c.bf16 %v3087_v30, %v3083_v38 }
 0x3b2   : > { %v3971_v5 = vadd.bf16 1065369472, %v7475_v23  ;;  %4905 = vperm.xlu1 %7089, %v12653_v51   ;;  %5729 = vperm.xlu0 %7095, %v12657_v11   ;;  %v3433_v58 = vmul.bf16 %v12681_v62, %v12681_v62  ;;  %v14448_v50 = vmul.bf16 1027030327, %v12596_v2  ;;  %v12714_v55 = vadd.f32 %v12563_v6, %v12533_v52  ;;  %v14449_v23 = vld [vmem:[#allocation50_spill] sm:$0xff] }
 0x3b3   : > { %v4153_v18 = vmul.bf16 %v4057_v49, %v12383_v25  ;;  %v12716_v61 = vpop.eup %7476  ;;  %v4162_v63 = vmul.bf16 %v4066_v21, %v14449_v23  ;;  %v12721_v25 = vadd.f32 %v12569_v46, %v12542_v40  ;;  %v12725_v49 = vadd.f32 %v12614_v44, %v12586_v43 }
 0x3b4   : > { %v3697_v7 = vadd.bf16 %v14448_v50, %v12537_v32  ;;  %v4067_v38 = vmul.bf16 1056980736, %v3971_v5  ;;  %v7479_v20 = vpop.eup %7478  ;;  %v12728_v52 = vmul.f32 %v7469_v36, %v14450_v47  ;;  %v12732_v59 = vadd.f32 %v12620_v56, %v12593_v24 }
 0x3b5   : > { %5245 = vmatprep.mubr.bf16.mxu1 %v4153_v18  ;;  %v3705_v21 = vadd.bf16 %v3609_v15, %v12584_v3  ;;  %v14451_v40 = vmul.bf16 1061961548, %v12589_v0  ;;  %v12740_v43 = vadd.f32 %v6577_v48, %v12643_v37  ;;  %v12743_v44 = vadd.f32 %v6665_v34, %v12659_v26  ;;  %v14452_v26 = vld [vmem:[#allocation73_spill] sm:$0xff] }
 0x3b6   : > { %v3793_v6 = vmul.bf16 1061961548, %v3697_v7  ;;  %5246 = vmatmul.mubr.bf16.gmra.mxu1 %v4152_v16  ;;  %v4163_v46 = vmul.bf16 %v4067_v38, %v12414_v60  ;;  %7090 = vset.pattern.permute.xlu1 %v14410_v35  ;;  %v12745_v24 = vpop.eup %7480  ;;  %v3529_v56 = vmul.bf16 %v3433_v58, %v12681_v62  ;;  %v3795_v60 = vmul.bf16 1061961548, %v12628_v9 }
 0x3b7   : > { %7488 = vtanh.bf16 %v14451_v40  ;;  %7098 = vset.pattern.permute.xlu0 %v14410_v35  ;;  %5311 = vperm.xlu1 %7090, %v12653_v51   ;;  %v3801_v0 = vmul.bf16 1061961548, %v3705_v21  ;;  %v3419_v37 = vmul.bf16 %v12637_v14, %v12637_v14  ;;  %v3232_v34 = vadd.f32 %v14452_v26, %v14235_v31 }
 0x3b8   : > { %7490 = vtanh.bf16 %v3793_v6  ;;  %5659 = vmatprep.mubr.bf16.mxu0 %v4163_v46  ;;  %v3968_v48 = vadd.bf16 1065369472, %v12645_v8  ;;  %5319 = vperm.xlu0 %7098, %v12728_v52   ;;  %v3800_v18 = vmul.bf16 1061961548, %v12684_v33  ;;  %v3978_v58 = vadd.bf16 1065369472, %v7479_v20 }
 0x3b9   : > { %5660 = vmatmul.mubr.bf16.gmra.mxu0 %v4162_v63  ;;  %v3713_v9 = vadd.bf16 %v3617_v42, %v12606_v22  ;;  %v3616_v38 = vmul.bf16 1027030327, %v12688_v53  ;;  %v3432_v23 = vmul.bf16 %v12702_v12, %v12702_v12  ;;  %7492 = vtanh.bf16 %v3801_v0  ;;  %v14453_v33 = vld [vmem:[#allocation46_spill] sm:$0xff]  ;;  %v14455_v0 = vld [vmem:[#allocation4_spill] sm:$0xff] }
 0x3ba   : > { %v6579_v39 = vpop.f32.mrf.mxu1  ;;  %v12771_v63 = vmul.f32 %v12535_v29, %v14453_v33  ;;  %7494 = vtanh.bf16 %v3795_v60  ;;  %v3418_v53 = vmul.bf16 %v12630_v10, %v12630_v10  ;;  %v4064_v6 = vmul.bf16 1056980736, %v3968_v48 }
 0x3bb   : > { %7091 = vset.pattern.permute.xlu1 %v14411_v13  ;;  %v3809_v21 = vmul.bf16 1061961548, %v3713_v9  ;;  %v3515_v29 = vmul.bf16 %v3419_v37, %v12637_v14  ;;  %v12783_v40 = vpack.c.bf16 %v3232_v34, %v12669_v57  ;;  %7496 = vtanh.bf16 %v3800_v18  ;;  %v14456_v34 = vld [vmem:[#allocation12_spill] sm:$0xff]  ;;  %v2040_v18 = vpop.xlane.xlu1 %2039 }
 0x3bc   : > { %v6667_v30 = vpop.f32.mrf.mxu0  ;;  %v6580_v2 = vpop.f32.mrf.mxu1  ;;  %7101 = vset.pattern.permute.xlu0 %v14421_v19  ;;  %5717 = vperm.xlu1 %7091, %v12653_v51   ;;  %v3230_v60 = vadd.f32 %v14455_v0, %v14205_v28  ;;  %v3528_v51 = vmul.bf16 %v3432_v23, %v12702_v12  ;;  %v3976_v57 = vadd.bf16 1065369472, %v12716_v61  ;;  %v4160_v9 = vmul.bf16 %v4064_v6, %v14456_v34  ;;  %v14457_v61 = vld [vmem:[#allocation28_spill] sm:$0xff] }
 0x3bd   : > { %v12757_v16 = vadd.f32 %v6580_v2, %v6579_v39  ;;  %v3625_v39 = vmul.bf16 1027030327, %v3529_v56  ;;  %v7483_v42 = vpop.eup %7482  ;;  %v14454_v2 = vld [vmem:[#allocation98_spill] sm:$0xff]  ;;  %4925 = vperm.xlu0 %7101, %v12771_v63   ;;  %v3712_v56 = vadd.bf16 %v3616_v38, %v12625_v17  ;;  %7498 = vtanh.bf16 %v3809_v21 }
 0x3be   : > { %v6668_v5 = vpop.f32.mrf.mxu0  ;;  %v6582_v36 = vpop.f32.mrf.mxu1  ;;  %v3226_v20 = vadd.f32 %v14454_v2, %v14205_v28  ;;  %v3969_v46 = vadd.bf16 1065369472, %v7483_v42  ;;  %v3611_v38 = vmul.bf16 1027030327, %v3515_v29  ;;  %v14458_v42 = vld [vmem:[#allocation89_spill] sm:$0xff]  ;;  %v14459_v21 = vld [vmem:[#allocation90_spill] sm:$0xff]  ;;  %7500 = vrcp.f32 %v2040_v18 }
 0x3bf   : > { %v12760_v50 = vadd.f32 %v6668_v5, %v6667_v30  ;;  %v7485_v5 = vpop.eup %7484  ;;  %v3721_v48 = vadd.bf16 %v3625_v39, %v12681_v62  ;;  %v3238_v39 = vadd.f32 %v14457_v61, %v14235_v31  ;;  %v3242_v2 = vadd.f32 %v14458_v42, %v14235_v31 }
 0x3c0   : > { %v6670_v15 = vpop.f32.mrf.mxu0  ;;  %v6583_v7 = vpop.f32.mrf.mxu1  ;;  %v4065_v37 = vmul.bf16 1056980736, %v3969_v46  ;;  %7092 = vset.pattern.permute.xlu1 %v14422_v54  ;;  %v3808_v29 = vmul.bf16 1061961548, %v3712_v56  ;;  %v3624_v46 = vmul.bf16 1027030327, %v3528_v51  ;;  %v3514_v31 = vmul.bf16 %v3418_v53, %v12630_v10 }
 0x3c1   : > { %v12766_v8 = vadd.f32 %v6583_v7, %v6582_v36  ;;  %v4074_v36 = vmul.bf16 1056980736, %v3978_v58  ;;  %v7487_v26 = vpop.eup %7486  ;;  %7103 = vset.pattern.permute.xlu0 %v14411_v13  ;;  %4493 = vperm.xlu1 %7092, %v12657_v11   ;;  %v12808_v34 = vpack.c.bf16 %v3230_v60, %v3226_v20  ;;  %v14461_v56 = vld [vmem:[#allocation94_spill] sm:$0xff]  ;;  %v14462_v51 = vld [vmem:[#allocation87_spill] sm:$0xff]  ;;  %v3707_v18 = vadd.bf16 %v3611_v38, %v12637_v14 }
 0x3c2   : > { %v6671_v47 = vpop.f32.mrf.mxu0  ;;  %v3977_v58 = vadd.bf16 1065369472, %v7487_v26  ;;  %v4161_v33 = vmul.bf16 %v4065_v37, %v12409_v1  ;;  %5737 = vperm.xlu0 %7103, %v12771_v63   ;;  %v4072_v1 = vmul.bf16 1056980736, %v3976_v57  ;;  %v3817_v26 = vmul.bf16 1061961548, %v3721_v48 }
 0x3c3   : > { %v12773_v30 = vadd.f32 %v6671_v47, %v6670_v15  ;;  %v3979_v15 = vadd.bf16 1065369472, %v7485_v5  ;;  %v3427_v47 = vmul.bf16 %v12783_v40, %v12783_v40  ;;  %v4170_v23 = vmul.bf16 %v4074_v36, %v12446_v41  ;;  %v14460_v36 = vld [vmem:[#allocation44_spill] sm:$0xff] }
 0x3c4   : > { %v4073_v6 = vmul.bf16 1056980736, %v3977_v58  ;;  %5253 = vmatprep.mubr.bf16.mxu1 %v4161_v33  ;;  %v12813_v58 = vmul.f32 %v14462_v51, %v14461_v56  ;;  %v3986_v57 = vadd.bf16 1065369472, %v12745_v24  ;;  %v12818_v33 = vpack.c.bf16 %v3242_v2, %v3238_v39 }
 0x3c5   : > { %v4075_v7 = vmul.bf16 1056980736, %v3979_v15  ;;  %v7489_v41 = vpop.eup %7488  ;;  %5254 = vmatmul.mubr.bf16.gmra.mxu1 %v4160_v9  ;;  %7094 = vset.pattern.permute.xlu1 %v14410_v35  ;;  %v3523_v48 = vmul.bf16 %v3427_v47, %v12783_v40  ;;  %7502 = vtanh.bf16 %v3808_v29  ;;  %v3720_v60 = vadd.bf16 %v3624_v46, %v12702_v12 }
 0x3c6   : > { %v4169_v0 = vmul.bf16 %v4073_v6, %v14460_v36  ;;  %v7491_v37 = vpop.eup %7490  ;;  %7106 = vset.pattern.permute.xlu0 %v14410_v35  ;;  %5323 = vperm.xlu1 %7094, %v12657_v11   ;;  %v3984_v42 = vadd.bf16 1065369472, %v7489_v41  ;;  %7504 = vtanh.bf16 %v3817_v26  ;;  %v4082_v46 = vmul.bf16 1056980736, %v3986_v57  ;;  %v14464_v26 = vld [vmem:[#allocation57_spill] sm:$0xff] }
 0x3c7   : > { %v4171_v5 = vmul.bf16 %v4075_v7, %v14459_v21  ;;  %v2049_v7 = vpop.xlane.xlu0 %2048  ;;  %v3985_v53 = vadd.bf16 1065369472, %v7491_v37  ;;  %5327 = vperm.xlu0 %7106, %v12813_v58   ;;  %v7493_v47 = vpop.eup %7492  ;;  %v3426_v11 = vmul.bf16 %v12808_v34, %v12808_v34  ;;  %v3619_v36 = vmul.bf16 1027030327, %v3523_v48 }
 0x3c8   : > { %5261 = vmatprep.mubr.bf16.mxu1 %v4169_v0  ;;  %v7495_v21 = vpop.eup %7494  ;;  %7506 = vrcp.f32 %v2049_v7  ;;  %v3993_v29 = vadd.bf16 1065369472, %v7493_v47  ;;  %v3816_v56 = vmul.bf16 1061961548, %v3720_v60  ;;  %v3435_v41 = vmul.bf16 %v12818_v33, %v12818_v33  ;;  %v14466_v60 = vld [vmem:[#allocation7_spill] sm:$0xff] }
 0x3c9   : > { %5667 = vmatprep.mubr.bf16.mxu0 %v4171_v5  ;;  %v4081_v39 = vmul.bf16 1056980736, %v3985_v53  ;;  %v3610_v5 = vmul.bf16 1027030327, %v3514_v31  ;;  %v14465_v31 = vld [vmem:[#allocation102_spill] sm:$0xff]  ;;  %v7497_v7 = vpop.eup %7496 }
 0x3ca   : > { %5668 = vmatmul.mubr.bf16.gmra.mxu0 %v4170_v23  ;;  %v14463_v23 = vld [vmem:[#allocation22_spill] sm:$0xff]  ;;  %7096 = vset.pattern.permute.xlu1 %v14422_v54  ;;  %v12838_v51 = vmul.f32 %v14465_v31, %v14464_v26  ;;  %7508 = vtanh.bf16 %v3816_v56  ;;  %v3531_v26 = vmul.bf16 %v3435_v41, %v12818_v33 }
 0x3cb   : > { %v4168_v61 = vmul.bf16 %v4072_v1, %v14463_v23  ;;  %v4177_v0 = vmul.bf16 %v4081_v39, %v12537_v32  ;;  %7109 = vset.pattern.permute.xlu0 %v14421_v19  ;;  %v4080_v32 = vmul.bf16 1056980736, %v3984_v42  ;;  %4488 = vperm.xlu1 %7096, %v12728_v52   ;;  %v3236_v23 = vadd.f32 %v14466_v60, %v14205_v28  ;;  %v14469_v42 = vld [vmem:[#allocation58_spill] sm:$0xff] }
 0x3cc   : > { %v4089_v39 = vmul.bf16 1056980736, %v3993_v29  ;;  %4933 = vperm.xlu0 %7109, %v12838_v51   ;;  %v14470_v31 = vld [vmem:[#allocation30_spill] sm:$0xff] }
 0x3cd   : > { %v6585_v15 = vpop.f32.mrf.mxu1  ;;  %5262 = vmatmul.mubr.bf16.gmra.mxu1 %v4168_v61  ;;  %v7499_v61 = vpop.eup %7498 }
 0x3ce   : > { %v6673_v9 = vpop.f32.mrf.mxu0  ;;  %5269 = vmatprep.mubr.bf16.mxu1 %v4177_v0  ;;  %v3992_v0 = vadd.bf16 1065369472, %v7497_v7  ;;  %v7501_v29 = vpop.eup %7500 }
 0x3cf   : > { %v6586_v20 = vpop.f32.mrf.mxu1  ;;  %7097 = vset.pattern.permute.xlu1 %v14421_v19 }
 0x3d0   : > { %v12825_v24 = vadd.f32 %v6586_v20, %v6585_v15  ;;  %v6674_v38 = vpop.f32.mrf.mxu0  ;;  %v3987_v15 = vadd.bf16 1065369472, %v7495_v21  ;;  %v3803_v20 = vmul.bf16 1061961548, %v3707_v18  ;;  %v3715_v18 = vadd.bf16 %v3619_v36, %v12783_v40  ;;  %7111 = vset.pattern.permute.xlu0 %v14411_v13  ;;  %4913 = vperm.xlu1 %7097, %v12728_v52  }
 0x3d1   : > { %v12827_v2 = vadd.f32 %v6674_v38, %v6673_v9  ;;  %v6588_v6 = vpop.f32.mrf.mxu1  ;;  %v14467_v38 = vld [vmem:[#allocation78_spill] sm:$0xff]  ;;  %5745 = vperm.xlu0 %7111, %v12838_v51  }
 0x3d2   : > { %v6676_v1 = vpop.f32.mrf.mxu0  ;;  %v4083_v48 = vmul.bf16 1056980736, %v3987_v15  ;;  %v3240_v47 = vadd.f32 %v14467_v38, %v14205_v28  ;;  %v4176_v28 = vmul.bf16 %v4080_v32, %v14470_v31  ;;  %7510 = vtanh.bf16 %v3803_v20 }
 0x3d3   : > { %v6589_v37 = vpop.f32.mrf.mxu1  ;;  %v3627_v32 = vmul.bf16 1027030327, %v3531_v26  ;;  %v3811_v60 = vmul.bf16 1061961548, %v3715_v18 }
 0x3d4   : > { %v12840_v57 = vadd.f32 %v6589_v37, %v6588_v6  ;;  %v6677_v9 = vpop.f32.mrf.mxu0  ;;  %v14468_v6 = vld [vmem:[#allocation62_spill] sm:$0xff]  ;;  %v4179_v15 = vmul.bf16 %v4083_v48, %v14469_v42  ;;  %v3706_v37 = vadd.bf16 %v3610_v5, %v12630_v10  ;;  %v4185_v5 = vmul.bf16 %v4089_v39, %v12584_v3  ;;  %7099 = vset.pattern.permute.xlu1 %v14411_v13 }
 0x3d5   : > { %v12843_v53 = vadd.f32 %v6677_v9, %v6676_v1  ;;  %v4178_v21 = vmul.bf16 %v4082_v46, %v14468_v6  ;;  %v3522_v1 = vmul.bf16 %v3426_v11, %v12808_v34  ;;  %v2046_v46 = vpop.xlane.xlu1 %2045  ;;  %v12858_v9 = vpack.c.bf16 %v3240_v47, %v3236_v23  ;;  %5270 = vmatmul.mubr.bf16.gmra.mxu1 %v4176_v28  ;;  %v7503_v23 = vpop.eup %7502  ;;  %v14471_v47 = vld [vmem:[#allocation75_spill] sm:$0xff] }
 0x3d6   : > { %5675 = vmatprep.mubr.bf16.mxu0 %v4179_v15  ;;  %v4001_v11 = vadd.bf16 1065369472, %v7499_v61  ;;  %v3802_v56 = vmul.bf16 1061961548, %v3706_v37  ;;  %7512 = vrcp.f32 %v2046_v46  ;;  %v4088_v48 = vmul.bf16 1056980736, %v3992_v0  ;;  %5277 = vmatprep.mubr.bf16.mxu1 %v4185_v5  ;;  %v7505_v61 = vpop.eup %7504 }
 0x3d7   : > { %5676 = vmatmul.mubr.bf16.gmra.mxu0 %v4178_v21  ;;  %v3618_v41 = vmul.bf16 1027030327, %v3522_v1  ;;  %v3434_v3 = vmul.bf16 %v12858_v9, %v12858_v9  ;;  %v12867_v39 = vmul.f32 %v7501_v29, %v14471_v47  ;;  %v7507_v42 = vpop.eup %7506  ;;  %7114 = vset.pattern.permute.xlu0 %v14410_v35  ;;  %v3723_v26 = vadd.bf16 %v3627_v32, %v12818_v33 }
 0x3d8   : > { %v4097_v38 = vmul.bf16 1056980736, %v4001_v11  ;;  %7514 = vtanh.bf16 %v3802_v56  ;;  %5725 = vperm.xlu1 %7099, %v12728_v52   ;;  %v4184_v31 = vmul.bf16 %v4088_v48, %v12573_v27  ;;  %v4000_v28 = vadd.bf16 1065369472, %v7503_v23  ;;  %v2055_v52 = vpop.xlane.xlu0 %2054  ;;  %v14473_v27 = vld [vmem:[#allocation8_spill] sm:$0xff]  ;;  %v7509_v48 = vpop.eup %7508 }
 0x3d9   : > { %v3714_v1 = vadd.bf16 %v3618_v41, %v12808_v34  ;;  %5335 = vperm.xlu0 %7114, %v12867_v39   ;;  %7516 = vtanh.bf16 %v3811_v60  ;;  %v3530_v29 = vmul.bf16 %v3434_v3, %v12858_v9  ;;  %v4009_v5 = vadd.bf16 1065369472, %v7505_v61 }
 0x3da   : > { %v6591_v36 = vpop.f32.mrf.mxu1  ;;  %v4193_v46 = vmul.bf16 %v4097_v38, %v12606_v22  ;;  %v4096_v32 = vmul.bf16 1056980736, %v4000_v28  ;;  %v3819_v22 = vmul.bf16 1061961548, %v3723_v26  ;;  %7518 = vrcp.f32 %v2055_v52 }
 0x3db   : > { %v6679_v7 = vpop.f32.mrf.mxu0  ;;  %v3810_v41 = vmul.bf16 1061961548, %v3714_v1  ;;  %v4105_v60 = vmul.bf16 1056980736, %v4009_v5  ;;  %v4008_v47 = vadd.bf16 1065369472, %v7509_v48  ;;  %v2052_v5 = vpop.xlane.xlu1 %2051 }
 0x3dc   : > { %v6592_v20 = vpop.f32.mrf.mxu1  ;;  %7100 = vset.pattern.permute.xlu1 %v14422_v54  ;;  %v4192_v38 = vmul.bf16 %v4096_v32, %v12625_v17 }
 0x3dd   : > { %v12869_v6 = vadd.f32 %v6592_v20, %v6591_v36  ;;  %v6680_v21 = vpop.f32.mrf.mxu0  ;;  %7117 = vset.pattern.permute.xlu0 %v14421_v19  ;;  %5278 = vmatmul.mubr.bf16.gmra.mxu1 %v4184_v31  ;;  %v3626_v20 = vmul.bf16 1027030327, %v3530_v29  ;;  %7520 = vtanh.bf16 %v3810_v41  ;;  %v4104_v28 = vmul.bf16 1056980736, %v4008_v47 }
 0x3de   : > { %v12873_v15 = vadd.f32 %v6680_v21, %v6679_v7  ;;  %v6594_v37 = vpop.f32.mrf.mxu1  ;;  %v12889_v7 = vmul.f32 %v7507_v42, %v14473_v27  ;;  %4503 = vperm.xlu1 %7100, %v12771_v63   ;;  %5285 = vmatprep.mubr.bf16.mxu1 %v4193_v46  ;;  %7522 = vtanh.bf16 %v3819_v22 }
 0x3df   : > { %v6682_v18 = vpop.f32.mrf.mxu0  ;;  %v3722_v42 = vadd.bf16 %v3626_v20, %v12858_v9  ;;  %7524 = vrcp.f32 %v2052_v5  ;;  %v4200_v20 = vmul.bf16 %v4104_v28, %v12702_v12 }
 0x3e0   : > { %14472 = vst [vmem:[#allocation70_spill] sm:$0xff] %v12873_v15  ;;  %v6595_v0 = vpop.f32.mrf.mxu1  ;;  %4941 = vperm.xlu0 %7117, %v12889_v7   ;;  %v7511_v23 = vpop.eup %7510 }
 0x3e1   : > { %v12882_v11 = vadd.f32 %v6595_v0, %v6594_v37  ;;  %v6683_v36 = vpop.f32.mrf.mxu0  ;;  %v4201_v37 = vmul.bf16 %v4105_v60, %v12681_v62  ;;  %v3995_v1 = vadd.bf16 1065369472, %v7511_v23  ;;  %v3818_v62 = vmul.bf16 1061961548, %v3722_v42 }
 0x3e2   : > { %v12884_v56 = vadd.f32 %v6683_v36, %v6682_v18  ;;  %7102 = vset.pattern.permute.xlu1 %v14410_v35 }
 0x3e3   : > { %v7513_v61 = vpop.eup %7512  ;;  %5331 = vperm.xlu1 %7102, %v12771_v63   ;;  %v4091_v36 = vmul.bf16 1056980736, %v3995_v1  ;;  %v14476_v63 = vld [vmem:[#allocation48_spill] sm:$0xff]  ;;  %7526 = vtanh.bf16 %v3818_v62 }
 0x3e4   : > { %7119 = vset.pattern.permute.xlu0 %v14411_v13  ;;  %v12906_v52 = vmul.f32 %v7513_v61, %v14476_v63  ;;  %v2058_v63 = vpop.xlane.xlu1 %2057 }
 0x3e5   : > { %5753 = vperm.xlu0 %7119, %v12889_v7   ;;  %5286 = vmatmul.mubr.bf16.gmra.mxu1 %v4192_v38  ;;  %v4187_v23 = vmul.bf16 %v4091_v36, %v12637_v14 }
 0x3e6   : > { %v7515_v46 = vpop.eup %7514  ;;  %5293 = vmatprep.mubr.bf16.mxu1 %v4201_v37 }
 0x3e7   : > { %7104 = vset.pattern.permute.xlu1 %v14422_v54  ;;  %v7517_v32 = vpop.eup %7516  ;;  %v3994_v48 = vadd.bf16 1065369472, %v7515_v46  ;;  %v2061_v46 = vpop.xlane.xlu0 %2060 }
 0x3e8   : > { %v6597_v3 = vpop.f32.mrf.mxu1  ;;  %4498 = vperm.xlu1 %7104, %v12813_v58   ;;  %v7519_v38 = vpop.eup %7518  ;;  %7528 = vrcp.f32 %v2061_v46 }
 0x3e9   : > { %v6685_v18 = vpop.f32.mrf.mxu0  ;;  %7120 = vset.pattern.permute.xlu0 %v14422_v54  ;;  %7530 = vrcp.f32 %v2058_v63 }
 0x3ea   : > { %v6598_v21 = vpop.f32.mrf.mxu1  ;;  %4518 = vperm.xlu0 %7120, %v12906_v52  }
 0x3eb   : > { %v12899_v26 = vadd.f32 %v6598_v21, %v6597_v3  ;;  %v6686_v31 = vpop.f32.mrf.mxu0  ;;  %v4003_v3 = vadd.bf16 1065369472, %v7517_v32  ;;  %v4090_v21 = vmul.bf16 1056980736, %v3994_v48  ;;  %v7521_v12 = vpop.eup %7520 }
 0x3ec   : > { %v6600_v17 = vpop.f32.mrf.mxu1  ;;  %v12902_v0 = vadd.f32 %v6686_v31, %v6685_v18  ;;  %7105 = vset.pattern.permute.xlu1 %v14421_v19  ;;  %v7523_v1 = vpop.eup %7522  ;;  %v4002_v36 = vadd.bf16 1065369472, %v7521_v12 }
 0x3ed   : > { %14474 = vst [vmem:[#allocation38_spill] sm:$0xff] %v12899_v26  ;;  %v6688_v41 = vpop.f32.mrf.mxu0  ;;  %4921 = vperm.xlu1 %7105, %v12813_v58   ;;  %5294 = vmatmul.mubr.bf16.gmra.mxu1 %v4200_v20  ;;  %v4099_v37 = vmul.bf16 1056980736, %v4003_v3  ;;  %v4186_v5 = vmul.bf16 %v4090_v21, %v12630_v10  ;;  %v12939_v3 = vpop.xlane.xlu1 %2063 }
 0x3ee   : > { %14475 = vst [vmem:[#allocation64_spill] sm:$0xff] %v12902_v0  ;;  %v6601_v29 = vpop.f32.mrf.mxu1  ;;  %7122 = vset.pattern.permute.xlu0 %v14410_v35  ;;  %5683 = vmatprep.mubr.bf16.mxu1 %v4187_v23  ;;  %v4098_v10 = vmul.bf16 1056980736, %v4002_v36 }
 0x3ef   : > { %v12908_v27 = vadd.f32 %v6601_v29, %v6600_v17  ;;  %v6689_v22 = vpop.f32.mrf.mxu0  ;;  %5343 = vperm.xlu0 %7122, %v12906_v52   ;;  %v14480_v17 = vld [vmem:[#allocation92_spill] sm:$0xff]  ;;  %v4195_v32 = vmul.bf16 %v4099_v37, %v12783_v40 }
 0x3f0   : > { %v12914_v60 = vadd.f32 %v6689_v22, %v6688_v41  ;;  %v12925_v31 = vmul.f32 %v7519_v38, %v14480_v17  ;;  %v4011_v22 = vadd.bf16 1065369472, %v7523_v1  ;;  %v4194_v21 = vmul.bf16 %v4098_v10, %v12808_v34  ;;  %v14484_v37 = vld [vmem:[#allocation36_spill] sm:$0xff] }
 0x3f1   : > { %14477 = vst [vmem:[#allocation39_spill] sm:$0xff] %v12908_v27  ;;  %7107 = vset.pattern.permute.xlu1 %v14411_v13  ;;  %v12945_v12 = vpop.xlane.xlu1 %2069 }
 0x3f2   : > { %14478 = vst [vmem:[#allocation72_spill] sm:$0xff] %v12914_v60  ;;  %5733 = vperm.xlu1 %7107, %v12813_v58   ;;  %v7525_v58 = vpop.eup %7524  ;;  %v4107_v38 = vmul.bf16 1056980736, %v4011_v22  ;;  %v14503_v60 = vld [vmem:[#allocation88_spill] sm:$0xff] }
 0x3f3   : > { %7125 = vset.pattern.permute.xlu0 %v14421_v19  ;;  %v7527_v40 = vpop.eup %7526  ;;  %v12948_v1 = vmul.f32 %v7525_v58, %v14484_v37 }
 0x3f4   : > { %4949 = vperm.xlu0 %7125, %v12925_v31   ;;  %v4010_v46 = vadd.bf16 1065369472, %v7527_v40 }
 0x3f5   : > { %v6603_v47 = vpop.f32.mrf.mxu1  ;;  %5684 = vmatmul.mubr.bf16.vlgmr.msra.gmra.mxu1 %v4186_v5 }
 0x3f6   : > { %v6691_v61 = vpop.f32.mrf.mxu0  ;;  %7108 = vset.pattern.permute.xlu1 %v14422_v54  ;;  %5691 = vmatprep.mubr.bf16.mxu1 %v4195_v32 }
 0x3f7   : > { %v6604_v42 = vpop.f32.mrf.mxu1  ;;  %4513 = vperm.xlu1 %7108, %v12838_v51  }
 0x3f8   : > { %v12921_v14 = vadd.f32 %v6604_v42, %v6603_v47  ;;  %v6692_v18 = vpop.f32.mrf.mxu0  ;;  %7127 = vset.pattern.permute.xlu0 %v14411_v13  ;;  %v2067_v47 = vpop.xlane.xlu0 %2066 }
 0x3f9   : > { %v12927_v28 = vadd.f32 %v6692_v18, %v6691_v61  ;;  %v6606_v29 = vpop.f32.mrf.mxu1  ;;  %5761 = vperm.xlu0 %7127, %v12925_v31   ;;  %v4203_v18 = vmul.bf16 %v4107_v38, %v12818_v33  ;;  %v12961_v33 = vpop.xlane.xlu1 %2075  ;;  %7532 = vrcp.f32 %v2067_v47 }
 0x3fa   : > { %14479 = vst [vmem:[#allocation34_spill] sm:$0xff] %v12921_v14  ;;  %v6694_v62 = vpop.f32.mrf.mxu0  ;;  %7534 = vrcp.f32 %v12939_v3 }
 0x3fb   : > { %14481 = vst [vmem:[#allocation26_spill] sm:$0xff] %v12927_v28  ;;  %v6607_v41 = vpop.f32.mrf.mxu1  ;;  %7110 = vset.pattern.permute.xlu1 %v14410_v35 }
 0x3fc   : > { %v12934_v48 = vadd.f32 %v6607_v41, %v6606_v29  ;;  %v6695_v20 = vpop.f32.mrf.mxu0  ;;  %v12951_v17 = vpop.xlane.xlu0 %2072  ;;  %5339 = vperm.xlu1 %7110, %v12838_v51  }
 0x3fd   : > { %v12936_v23 = vadd.f32 %v6695_v20, %v6694_v62  ;;  %7128 = vset.pattern.permute.xlu0 %v14422_v54  ;;  %5692 = vmatmul.mubr.bf16.gmra.mxu1 %v4194_v21  ;;  %v4106_v20 = vmul.bf16 1056980736, %v4010_v46  ;;  %v7529_v51 = vpop.eup %7528  ;;  %v12973_v63 = vpop.xlane.xlu1 %2081  ;;  %7536 = vrcp.f32 %v12951_v17  ;;  %v14504_v17 = vld [vmem:[#allocation97_spill] sm:$0xff] }
 0x3fe   : > { %14482 = vst [vmem:[#allocation3_spill] sm:$0xff] %v12934_v48  ;;  %4528 = vperm.xlu0 %7128, %v12948_v1   ;;  %5699 = vmatprep.mubr.bf16.mxu1 %v4203_v18  ;;  %7538 = vrcp.f32 %v12945_v12 }
 0x3ff   : > { %14483 = vst [vmem:[#allocation21_spill] sm:$0xff] %v12936_v23  ;;  %v4202_v21 = vmul.bf16 %v4106_v20, %v12858_v9 }
 0x400   : > { %v12963_v32 = vpop.xlane.xlu0 %2078  ;;  %7112 = vset.pattern.permute.xlu1 %v14422_v54 }
 0x401   : > { %4508 = vperm.xlu1 %7112, %v12867_v39   ;;  %7540 = vrcp.f32 %v12963_v32 }
 0x402   : > { %7130 = vset.pattern.permute.xlu0 %v14410_v35  ;;  %7542 = vrcp.f32 %v12961_v33 }
 0x403   : > { %v6609_v61 = vpop.f32.mrf.mxu1  ;;  %5351 = vperm.xlu0 %7130, %v12948_v1  }
 0x404   : > { %v6697_v42 = vpop.f32.mrf.mxu0  ;;  %v12975_v40 = vpop.xlane.xlu0 %2084 }
 0x405   : > { %v6610_v29 = vpop.f32.mrf.mxu1  ;;  %7113 = vset.pattern.permute.xlu1 %v14421_v19  ;;  %5700 = vmatmul.mubr.bf16.gmra.mxu1 %v4202_v21  ;;  %7544 = vrcp.f32 %v12975_v40 }
 0x406   : > { %v12955_v5 = vadd.f32 %v6610_v29, %v6609_v61  ;;  %v6698_v34 = vpop.f32.mrf.mxu0  ;;  %v14489_v61 = vld [vmem:[#allocation25_spill] sm:$0xff]  ;;  %4929 = vperm.xlu1 %7113, %v12867_v39   ;;  %v4902_v29 = vpop.permute.xlu1 %4901  ;;  %7546 = vrcp.f32 %v12973_v63 }
 0x407   : > { %v12959_v62 = vadd.f32 %v6698_v34, %v6697_v42  ;;  %v6612_v36 = vpop.f32.mrf.mxu1  ;;  %v12979_v42 = vmul.f32 %v7529_v51, %v14489_v61  ;;  %7133 = vset.pattern.permute.xlu0 %v14421_v19  ;;  %v14492_v51 = vld [vmem:[#allocation20_spill] sm:$0xff]  ;;  %v14493_v61 = vld [vmem:[#allocation47_spill] sm:$0xff] }
 0x408   : > { %14485 = vst [vmem:[#allocation15_spill] sm:$0xff] %v12955_v5  ;;  %v6700_v41 = vpop.f32.mrf.mxu0  ;;  %v4474_v34 = vpop.permute.xlu0 %4473  ;;  %v14494_v5 = vld [vmem:[#allocation23_spill] sm:$0xff] }
 0x409   : > { %14486 = vst [vmem:[#allocation52_spill] sm:$0xff] %v12959_v62  ;;  %v6613_v22 = vpop.f32.mrf.mxu1  ;;  %4957 = vperm.xlu0 %7133, %v12979_v42   ;;  %v6551_v62 = vadd.f32 %v14493_v61, %v14492_v51  ;;  %v14498_v51 = vld [vmem:[#allocation11_spill] sm:$0xff]  ;;  %v14499_v61 = vld [vmem:[#allocation100_spill] sm:$0xff] }
 0x40a   : > { %v12965_v10 = vadd.f32 %v6613_v22, %v6612_v36  ;;  %v6701_v58 = vpop.f32.mrf.mxu0  ;;  %7115 = vset.pattern.permute.xlu1 %v14411_v13 }
 0x40b   : > { %v12969_v38 = vadd.f32 %v6701_v58, %v6700_v41  ;;  %v7531_v58 = vpop.eup %7530  ;;  %5741 = vperm.xlu1 %7115, %v12867_v39   ;;  %v13011_v39 = vld [vmem:[%s13455_s6 + $0x1] ss:$0 sm:$0xff] }
 0x40c   : > { %14487 = vst [vmem:[#allocation31_spill] sm:$0xff] %v12965_v10  ;;  %v14495_v10 = vld [vmem:[#allocation42_spill] sm:$0xff]  ;;  %v5714_v47 = vpop.permute.xlu1 %5713  ;;  %v7533_v3 = vpop.eup %7532 }
 0x40d   : > { %14488 = vst [vmem:[#allocation13_spill] sm:$0xff] %v12969_v38  ;;  %7135 = vset.pattern.permute.xlu0 %v14411_v13  ;;  %v6639_v38 = vadd.f32 %v14495_v10, %v14494_v5  ;;  %v6554_v5 = vadd.f32 %v14499_v61, %v14498_v51  ;;  %v14500_v10 = vld [vmem:[#allocation59_spill] sm:$0xff] }
 0x40e   : > { %5769 = vperm.xlu0 %7135, %v12979_v42  }
 0x40f   : > { %v6615_v37 = vpop.f32.mrf.mxu1  ;;  %7116 = vset.pattern.permute.xlu1 %v14422_v54 }
 0x410   : > { %v6703_v18 = vpop.f32.mrf.mxu0  ;;  %4523 = vperm.xlu1 %7116, %v12889_v7  }
 0x411   : > { %v6616_v46 = vpop.f32.mrf.mxu1  ;;  %v4469_v61 = vpop.permute.xlu1 %4468 }
 0x412   : > { %v12985_v36 = vadd.f32 %v6616_v46, %v6615_v37  ;;  %v6704_v9 = vpop.f32.mrf.mxu0  ;;  %v5308_v46 = vpop.permute.xlu0 %5307  ;;  %7136 = vset.pattern.permute.xlu0 %v14422_v54 }
 0x413   : > { %v12987_v41 = vadd.f32 %v6704_v9, %v6703_v18  ;;  %v6618_v22 = vpop.f32.mrf.mxu1 }
 0x414   : > { %14490 = vst [vmem:[#allocation61_spill] sm:$0xff] %v12985_v36  ;;  %v6706_v20 = vpop.f32.mrf.mxu0  ;;  %v14502_v36 = vld [vmem:[#allocation82_spill] sm:$0xff]  ;;  %7118 = vset.pattern.permute.xlu1 %v14410_v35 }
 0x415   : > { %14491 = vst [vmem:[#allocation95_spill] sm:$0xff] %v12987_v41  ;;  %v6619_v21 = vpop.f32.mrf.mxu1  ;;  %v13004_v41 = vld [vmem:[%s13455_s6] ss:$0 sm:$0xff]  ;;  %5347 = vperm.xlu1 %7118, %v12889_v7   ;;  %v13044_v7 = vmul.f32 %v7533_v3, %v14503_v60 }
 0x416   : > { %v12997_v37 = vadd.f32 %v6619_v21, %v6618_v22  ;;  %v6707_v18 = vpop.f32.mrf.mxu0  ;;  %v14501_v22 = vld [vmem:[#allocation40_spill] sm:$0xff]  ;;  %v4898_v28 = vpop.permute.xlu0 %4897 }
 0x417   : > { %v12999_v9 = vadd.f32 %v6707_v18, %v6706_v20  ;;  %v6642_v21 = vadd.f32 %v14501_v22, %v14500_v10  ;;  %v4372_v20 = vadd.f32 %v6551_v62, %v13004_v41  ;;  %v4802_v18 = vadd.f32 %v6639_v38, %v13011_v39  ;;  %v13030_v38 = vld [vmem:[%s13455_s6 + $0x2] ss:$0 sm:$0xff] }
 0x418   : > { %14496 = vst [vmem:[#allocation60_spill] sm:$0xff] %v12997_v37  ;;  %v13016_v37 = vmul.f32 %v7531_v58, %v14502_v36  ;;  %v4375_v62 = vadd.f32 %v6554_v5, %v13004_v41 }
 0x419   : > { %14497 = vst [vmem:[#allocation79_spill] sm:$0xff] %v12999_v9  ;;  %v4805_v36 = vadd.f32 %v6642_v21, %v13011_v39  ;;  %v4586_v14 = vmul.f32 %v4469_v61, %v4372_v20  ;;  %v4992_v48 = vmul.f32 %v4898_v28, %v4802_v18  ;;  %v5304_v18 = vpop.permute.xlu1 %5303  ;;  %7121 = vset.pattern.permute.xlu1 %v14421_v19 }
 0x41a   : > { %v6725_v51 = vpop.f32.mrf.mxu1  ;;  %4538 = vperm.xlu0 %7136, %v13016_v37   ;;  %v4587_v5 = vmul.f32 %v4474_v34, %v4375_v62  ;;  %v5710_v15 = vpop.permute.xlu0 %5709  ;;  %4937 = vperm.xlu1 %7121, %v12906_v52  }
 0x41b   : > { %v6813_v9 = vpop.f32.mrf.mxu0  ;;  %v4993_v28 = vmul.f32 %v4902_v29, %v4805_v36  ;;  %v7535_v62 = vpop.eup %7534 }
 0x41c   : > { %v6726_v58 = vpop.f32.mrf.mxu1 }
 0x41d   : > { %v6727_v10 = vadd.f32 %v6726_v58, %v6725_v51  ;;  %v6814_v22 = vpop.f32.mrf.mxu0  ;;  %v5016_v58 = vadd.f32 %v4992_v48, %v4586_v14 }
 0x41e   : > { %v6815_v23 = vadd.f32 %v6814_v22, %v6813_v9  ;;  %v6728_v0 = vpop.f32.mrf.mxu1  ;;  %7138 = vset.pattern.permute.xlu0 %v14410_v35  ;;  %v13040_v9 = vld [vmem:[%s13455_s6 + $0x3] ss:$0 sm:$0xff]  ;;  %7123 = vset.pattern.permute.xlu1 %v14411_v13 }
 0x41f   : > { %v5208_v21 = vadd.f32 %v6727_v10, %v13030_v38  ;;  %v6816_v26 = vpop.f32.mrf.mxu0  ;;  %5359 = vperm.xlu0 %7138, %v13016_v37   ;;  %5749 = vperm.xlu1 %7123, %v12906_v52  }
 0x420   : > { %v6729_v20 = vpop.f32.mrf.mxu1  ;;  %v5614_v10 = vadd.f32 %v6815_v23, %v13040_v9 }
 0x421   : > { %v6730_v51 = vadd.f32 %v6729_v20, %v6728_v0  ;;  %v6817_v61 = vpop.f32.mrf.mxu0  ;;  %v5398_v22 = vmul.f32 %v5304_v18, %v5208_v21  ;;  %v5017_v0 = vadd.f32 %v4993_v28, %v4587_v5  ;;  %v14505_v28 = vld [vmem:[#allocation80_spill] sm:$0xff]  ;;  %v14506_v5 = vld [vmem:[#allocation49_spill] sm:$0xff] }
 0x422   : > { %v6818_v27 = vadd.f32 %v6817_v61, %v6816_v26  ;;  %v5804_v14 = vmul.f32 %v5710_v15, %v5614_v10  ;;  %v6648_v20 = vadd.f32 %v14506_v5, %v14505_v28  ;;  %v14508_v10 = vld [vmem:[#allocation67_spill] sm:$0xff]  ;;  %v14512_v5 = vld [vmem:[#allocation101_spill] sm:$0xff] }
 0x423   : > { %v5211_v29 = vadd.f32 %v6730_v51, %v13030_v38  ;;  %7141 = vset.pattern.permute.xlu0 %v14421_v19  ;;  %v5422_v34 = vadd.f32 %v5398_v22, %v5016_v58  ;;  %7124 = vset.pattern.permute.xlu1 %v14422_v54  ;;  %v7537_v51 = vpop.eup %7536  ;;  %v14507_v22 = vld [vmem:[#allocation24_spill] sm:$0xff] }
 0x424   : > { %v5617_v36 = vadd.f32 %v6818_v27, %v13040_v9  ;;  %4965 = vperm.xlu0 %7141, %v13044_v7   ;;  %v4484_v27 = vpop.permute.xlu1 %4483  ;;  %4533 = vperm.xlu1 %7124, %v12925_v31   ;;  %v6560_v12 = vadd.f32 %v14508_v10, %v14507_v22 }
 0x425   : > { %v5399_v26 = vmul.f32 %v5308_v46, %v5211_v29  ;;  %v5828_v23 = vadd.f32 %v5804_v14, %v5422_v34  ;;  %v4910_v34 = vpop.permute.xlu0 %4909 }
 0x426   : > { %v5805_v60 = vmul.f32 %v5714_v47, %v5617_v36  ;;  %v13065_v47 = vmul.f32 %v7535_v62, %v14504_v17  ;;  %v14509_v36 = vld [vmem:[#allocation10_spill] sm:$0xff] }
 0x427   : > { %v5423_v48 = vadd.f32 %v5399_v26, %v5017_v0  ;;  %v14510_v0 = vld [vmem:[#allocation84_spill] sm:$0xff] }
 0x428   : > { %7143 = vset.pattern.permute.xlu0 %v14411_v13  ;;  %v5316_v52 = vpop.permute.xlu1 %5315  ;;  %7126 = vset.pattern.permute.xlu1 %v14410_v35  ;;  %v6645_v26 = vadd.f32 %v14510_v0, %v14509_v36 }
 0x429   : > { %v5829_v3 = vadd.f32 %v5805_v60, %v5423_v48  ;;  %5777 = vperm.xlu0 %7143, %v13044_v7   ;;  %5355 = vperm.xlu1 %7126, %v12925_v31   ;;  %v4813_v60 = vadd.f32 %v6648_v20, %v13011_v39  ;;  %v14513_v20 = vld [vmem:[#allocation83_spill] sm:$0xff] }
 0x42a   : > { %v6557_v22 = vadd.f32 %v14513_v20, %v14512_v5 }
 0x42b   : > { %v6425_v15 = vpack.c.bf16 %v5829_v3, %v5828_v23  ;;  %v14511_v23 = vld [vmem:[#allocation96_spill] sm:$0xff]  ;;  %v4995_v10 = vmul.f32 %v4910_v34, %v4813_v60  ;;  %v14515_v60 = vld [vmem:[#allocation55_spill] sm:$0xff] }
 0x42c   : > { %v4479_v58 = vpop.permute.xlu1 %4478  ;;  %v13085_v62 = vmul.f32 %v7537_v51, %v14511_v23  ;;  %v4380_v5 = vadd.f32 %v6557_v22, %v13004_v41  ;;  %v14518_v22 = vld [vmem:[#allocation27_spill] sm:$0xff] }
 0x42d   : > { %6426 = vst [vmem:[%s13062_s21] sm:$0xff] %v6425_v15   ;;  %7144 = vset.pattern.permute.xlu0 %v14422_v54  ;;  %7129 = vset.pattern.permute.xlu1 %v14421_v19  ;;  %v4383_v15 = vadd.f32 %v6560_v12, %v13004_v41 }
 0x42e   : > { %4548 = vperm.xlu0 %7144, %v13065_v47   ;;  %4945 = vperm.xlu1 %7129, %v12948_v1  }
 0x430   : > { %v6731_v46 = vpop.f32.mrf.mxu1  ;;  %v6819_v21 = vpop.f32.mrf.mxu0 }
 0x431   : > { %v4906_v28 = vpop.permute.xlu1 %4905 }
 0x432   : > { %v6732_v18 = vpop.f32.mrf.mxu1  ;;  %7146 = vset.pattern.permute.xlu0 %v14410_v35  ;;  %v6820_v61 = vpop.f32.mrf.mxu0  ;;  %7131 = vset.pattern.permute.xlu1 %v14411_v13 }
 0x433   : > { %5367 = vperm.xlu0 %7146, %v13065_v47   ;;  %v6733_v3 = vadd.f32 %v6732_v18, %v6731_v46  ;;  %v4810_v46 = vadd.f32 %v6645_v26, %v13011_v39  ;;  %v4589_v18 = vmul.f32 %v4484_v27, %v4383_v15  ;;  %v6821_v36 = vadd.f32 %v6820_v61, %v6819_v21 }
 0x434   : > { %v6734_v29 = vpop.f32.mrf.mxu1  ;;  %v6822_v14 = vpop.f32.mrf.mxu0  ;;  %5757 = vperm.xlu1 %7131, %v12948_v1   ;;  %v4588_v61 = vmul.f32 %v4479_v58, %v4380_v5  ;;  %v14517_v1 = vld [vmem:[#allocation18_spill] sm:$0xff] }
 0x435   : > { %v5216_v0 = vadd.f32 %v6733_v3, %v13030_v38  ;;  %v5312_v32 = vpop.permute.xlu1 %5311  ;;  %v5019_v27 = vadd.f32 %v4995_v10, %v4589_v18  ;;  %v5622_v26 = vadd.f32 %v6821_v36, %v13040_v9 }
 0x436   : > { %v6735_v48 = vpop.f32.mrf.mxu1  ;;  %v6823_v17 = vpop.f32.mrf.mxu0 }
 0x437   : > { %v6736_v31 = vadd.f32 %v6735_v48, %v6734_v29  ;;  %7149 = vset.pattern.permute.xlu0 %v14421_v19  ;;  %v5722_v29 = vpop.permute.xlu0 %5721  ;;  %v6824_v12 = vadd.f32 %v6823_v17, %v6822_v14  ;;  %v7539_v48 = vpop.eup %7538  ;;  %v5400_v34 = vmul.f32 %v5312_v32, %v5216_v0  ;;  %v14514_v14 = vld [vmem:[#allocation5_spill] sm:$0xff] }
 0x438   : > { %4973 = vperm.xlu0 %7149, %v13085_v62   ;;  %v6654_v3 = vadd.f32 %v14515_v60, %v14514_v14  ;;  %7132 = vset.pattern.permute.xlu1 %v14422_v54 }
 0x439   : > { %v5219_v51 = vadd.f32 %v6736_v31, %v13030_v38  ;;  %v4994_v31 = vmul.f32 %v4906_v28, %v4810_v46  ;;  %v5625_v21 = vadd.f32 %v6824_v12, %v13040_v9  ;;  %4543 = vperm.xlu1 %7132, %v12979_v42   ;;  %v5718_v58 = vpop.permute.xlu1 %5717 }
 0x43a   : > { %v5806_v10 = vmul.f32 %v5718_v58, %v5622_v26  ;;  %v4821_v36 = vadd.f32 %v6654_v3, %v13011_v39  ;;  %v14519_v26 = vld [vmem:[#allocation6_spill] sm:$0xff] }
 0x43b   : > { %v5401_v23 = vmul.f32 %v5316_v52, %v5219_v51  ;;  %v4918_v15 = vpop.permute.xlu0 %4917  ;;  %v14516_v52 = vld [vmem:[#allocation32_spill] sm:$0xff]  ;;  %v5018_v20 = vadd.f32 %v4994_v31, %v4588_v61  ;;  %v6566_v51 = vadd.f32 %v14518_v22, %v14517_v1  ;;  %v5807_v46 = vmul.f32 %v5722_v29, %v5625_v21  ;;  %v6737_v0 = vpop.f32.mrf.mxu1  ;;  %v14520_v58 = vld [vmem:[#allocation2_spill] sm:$0xff] }
 0x43c   : > { %7151 = vset.pattern.permute.xlu0 %v14411_v13  ;;  %v13108_v17 = vmul.f32 %v7539_v48, %v14516_v52  ;;  %v7541_v31 = vpop.eup %7540  ;;  %v6825_v29 = vpop.f32.mrf.mxu0 }
 0x43d   : > { %5785 = vperm.xlu0 %7151, %v13085_v62   ;;  %v5425_v28 = vadd.f32 %v5401_v23, %v5019_v27  ;;  %v5424_v18 = vadd.f32 %v5400_v34, %v5018_v20  ;;  %7134 = vset.pattern.permute.xlu1 %v14410_v35  ;;  %v4391_v5 = vadd.f32 %v6566_v51, %v13004_v41  ;;  %v4494_v33 = vpop.permute.xlu1 %4493  ;;  %v6738_v61 = vpop.f32.mrf.mxu1 }
 0x43e   : > { %5363 = vperm.xlu1 %7134, %v12979_v42   ;;  %v4997_v27 = vmul.f32 %v4918_v15, %v4821_v36  ;;  %v13127_v14 = vmul.f32 %v7541_v31, %v14519_v26  ;;  %v6826_v60 = vpop.f32.mrf.mxu0  ;;  %v7543_v1 = vpop.eup %7542  ;;  %v14523_v36 = vld [vmem:[#allocation63_spill] sm:$0xff] }
 0x43f   : > { %v5831_v12 = vadd.f32 %v5807_v46, %v5425_v28  ;;  %v5830_v48 = vadd.f32 %v5806_v10, %v5424_v18  ;;  %v13118_v23 = vpop.permute.xlu0 %5729  ;;  %v4591_v21 = vmul.f32 %v4494_v33, %v4391_v5  ;;  %v6740_v3 = vpop.f32.mrf.mxu1  ;;  %v14521_v46 = vld [vmem:[#allocation35_spill] sm:$0xff]  ;;  %v14522_v10 = vld [vmem:[#allocation77_spill] sm:$0xff] }
 0x440   : > { %v6828_v15 = vpop.f32.mrf.mxu0  ;;  %v6563_v18 = vadd.f32 %v14521_v46, %v14520_v58  ;;  %v6651_v40 = vadd.f32 %v14523_v36, %v14522_v10  ;;  %v14524_v31 = vld [vmem:[#allocation19_spill] sm:$0xff] }
 0x441   : > { %7152 = vset.pattern.permute.xlu0 %v14422_v54  ;;  %v6430_v32 = vpack.c.bf16 %v5831_v12, %v5830_v48  ;;  %v5021_v34 = vadd.f32 %v4997_v27, %v4591_v21  ;;  %v5324_v42 = vpop.permute.xlu1 %5323  ;;  %v6741_v28 = vpop.f32.mrf.mxu1  ;;  %v6739_v48 = vadd.f32 %v6738_v61, %v6737_v0 }
 0x442   : > { %4558 = vperm.xlu0 %7152, %v13108_v17   ;;  %7137 = vset.pattern.permute.xlu1 %v14421_v19  ;;  %v6742_v20 = vadd.f32 %v6741_v28, %v6740_v3  ;;  %v6829_v12 = vpop.f32.mrf.mxu0  ;;  %v4388_v63 = vadd.f32 %v6563_v18, %v13004_v41  ;;  %v4818_v0 = vadd.f32 %v6651_v40, %v13011_v39  ;;  %v14525_v40 = vld [vmem:[#allocation71_spill] sm:$0xff] }
 0x443   : > { %6482 = vst [vmem:[%s13062_s21 + $0x8] sm:$0xff] %v6430_v32   ;;  %v5320_v52 = vpop.permute.xlu0 %5319  ;;  %4953 = vperm.xlu1 %7137, %v13016_v37   ;;  %v13145_v32 = vmul.f32 %v7543_v1, %v14524_v31  ;;  %v6830_v33 = vadd.f32 %v6829_v12, %v6828_v15  ;;  %v5224_v27 = vadd.f32 %v6739_v48, %v13030_v38 }
 0x444   : > { %v5227_v5 = vadd.f32 %v6742_v20, %v13030_v38  ;;  %v6831_v48 = vpop.f32.mrf.mxu0 }
 0x445   : > { %v5633_v20 = vadd.f32 %v6830_v33, %v13040_v9  ;;  %v5402_v15 = vmul.f32 %v5320_v52, %v5224_v27  ;;  %v4829_v52 = vadd.f32 %v12721_v25, %v13011_v39 }
 0x446   : > { %7154 = vset.pattern.permute.xlu0 %v14410_v35  ;;  %v4489_v51 = vpop.permute.xlu1 %4488  ;;  %v5403_v61 = vmul.f32 %v5324_v42, %v5227_v5  ;;  %v6832_v27 = vpop.f32.mrf.mxu0 }
 0x447   : > { %5375 = vperm.xlu0 %7154, %v13108_v17   ;;  %7139 = vset.pattern.permute.xlu1 %v14411_v13  ;;  %v4926_v22 = vpop.permute.xlu0 %4925  ;;  %v4590_v3 = vmul.f32 %v4489_v51, %v4388_v63  ;;  %v5809_v51 = vmul.f32 %v13118_v23, %v5633_v20  ;;  %v4399_v23 = vadd.f32 %v12714_v55, %v13004_v41 }
 0x448   : > { %5765 = vperm.xlu1 %7139, %v13016_v37   ;;  %v6827_v37 = vadd.f32 %v6826_v60, %v6825_v29  ;;  %v7545_v60 = vpop.eup %7544  ;;  %v5427_v58 = vadd.f32 %v5403_v61, %v5021_v34  ;;  %v6743_v18 = vpop.f32.mrf.mxu1  ;;  %v4999_v25 = vmul.f32 %v4926_v22, %v4829_v52 }
 0x449   : > { %v13164_v12 = vmul.f32 %v7545_v60, %v14525_v40  ;;  %v6834_v20 = vpop.f32.mrf.mxu0  ;;  %v4826_v40 = vadd.f32 %v12698_v45, %v13011_v39 }
 0x44a   : > { %v5630_v29 = vadd.f32 %v6827_v37, %v13040_v9  ;;  %v5833_v34 = vadd.f32 %v5809_v51, %v5427_v58  ;;  %v6744_v31 = vpop.f32.mrf.mxu1 }
 0x44b   : > { %7157 = vset.pattern.permute.xlu0 %v14421_v19  ;;  %v13154_v21 = vpop.permute.xlu0 %5737  ;;  %v4914_v26 = vpop.permute.xlu1 %4913 }
 0x44c   : > { %4981 = vperm.xlu0 %7157, %v13127_v14   ;;  %7140 = vset.pattern.permute.xlu1 %v14422_v54  ;;  %v4996_v28 = vmul.f32 %v4914_v26, %v4818_v0  ;;  %v14526_v0 = vld [vmem:[#allocation74_spill] sm:$0xff]  ;;  %v6746_v26 = vpop.f32.mrf.mxu1 }
 0x44d   : > { %4553 = vperm.xlu1 %7140, %v13044_v7  }
 0x44e   : > { %v5020_v1 = vadd.f32 %v4996_v28, %v4590_v3 }
 0x44f   : > { %v5328_v10 = vpop.permute.xlu0 %5327 }
 0x450   : > { %7159 = vset.pattern.permute.xlu0 %v14411_v13  ;;  %v5426_v46 = vadd.f32 %v5402_v15, %v5020_v1  ;;  %v6835_v15 = vpop.f32.mrf.mxu0  ;;  %v6745_v1 = vadd.f32 %v6744_v31, %v6743_v18  ;;  %v4396_v18 = vadd.f32 %v12694_v4, %v13004_v41 }
 0x451   : > { %5793 = vperm.xlu0 %7159, %v13127_v14   ;;  %7142 = vset.pattern.permute.xlu1 %v14410_v35 }
 0x452   : > { %5371 = vperm.xlu1 %7142, %v13044_v7   ;;  %v7547_v7 = vpop.eup %7546  ;;  %v5232_v51 = vadd.f32 %v6745_v1, %v13030_v38 }
 0x453   : > { %v5726_v42 = vpop.permute.xlu1 %5725  ;;  %v13175_v61 = vmul.f32 %v7547_v7, %v14526_v0  ;;  %v4934_v3 = vpop.permute.xlu0 %4933 }
 0x454   : > { %v5808_v36 = vmul.f32 %v5726_v42, %v5630_v29  ;;  %v6747_v29 = vpop.f32.mrf.mxu1  ;;  %v6833_v42 = vadd.f32 %v6832_v27, %v6831_v48  ;;  %v5404_v31 = vmul.f32 %v5328_v10, %v5232_v51 }
 0x455   : > { %7160 = vset.pattern.permute.xlu0 %v14422_v54  ;;  %v6748_v22 = vadd.f32 %v6747_v29, %v6746_v26  ;;  %v4837_v26 = vadd.f32 %v12743_v44, %v13011_v39 }
 0x456   : > { %4568 = vperm.xlu0 %7160, %v13145_v32   ;;  %7145 = vset.pattern.permute.xlu1 %v14421_v19  ;;  %v5832_v5 = vadd.f32 %v5808_v36, %v5426_v46  ;;  %v6836_v46 = vadd.f32 %v6835_v15, %v6834_v20 }
 0x457   : > { %4961 = vperm.xlu1 %7145, %v13065_v47   ;;  %v13184_v60 = vpop.permute.xlu0 %5745  ;;  %v5001_v1 = vmul.f32 %v4934_v3, %v4837_v26 }
 0x458   : > { %v6435_v37 = vpack.c.bf16 %v5833_v34, %v5832_v5  ;;  %v5641_v48 = vadd.f32 %v6836_v46, %v13040_v9 }
 0x459   : > { %v4504_v33 = vpop.permute.xlu1 %4503 }
 0x45a   : > { %7162 = vset.pattern.permute.xlu0 %v14410_v35  ;;  %v4593_v63 = vmul.f32 %v4504_v33, %v4399_v23  ;;  %6483 = vst [vmem:[%s13062_s21 + $0x10] sm:$0xff] %v6435_v37   ;;  %v6749_v23 = vpop.f32.mrf.mxu1 }
 0x45b   : > { %5383 = vperm.xlu0 %7162, %v13145_v32   ;;  %7147 = vset.pattern.permute.xlu1 %v14411_v13  ;;  %v13194_v36 = vpop.permute.xlu0 %5335 }
 0x45c   : > { %v5023_v28 = vadd.f32 %v4999_v25, %v4593_v63  ;;  %5773 = vperm.xlu1 %7147, %v13065_v47   ;;  %v5235_v47 = vadd.f32 %v6748_v22, %v13030_v38  ;;  %v5811_v25 = vmul.f32 %v13154_v21, %v5641_v48  ;;  %v6750_v63 = vpop.f32.mrf.mxu1  ;;  %v4407_v22 = vadd.f32 %v12740_v43, %v13004_v41 }
 0x45e   : > { %v5332_v55 = vpop.permute.xlu1 %5331 }
 0x45f   : > { %7165 = vset.pattern.permute.xlu0 %v14421_v19  ;;  %v5405_v52 = vmul.f32 %v5332_v55, %v5235_v47  ;;  %v13204_v4 = vpop.permute.xlu0 %4941  ;;  %v6752_v55 = vpop.f32.mrf.mxu1 }
 0x460   : > { %4989 = vperm.xlu0 %7165, %v13164_v12   ;;  %7148 = vset.pattern.permute.xlu1 %v14422_v54 }
 0x461   : > { %4563 = vperm.xlu1 %7148, %v13085_v62   ;;  %v5429_v33 = vadd.f32 %v5405_v52, %v5023_v28  ;;  %v6837_v28 = vpop.f32.mrf.mxu0  ;;  %v6751_v52 = vadd.f32 %v6750_v63, %v6749_v23  ;;  %v4834_v23 = vadd.f32 %v12732_v59, %v13011_v39 }
 0x463   : > { %v4499_v58 = vpop.permute.xlu1 %4498  ;;  %v5835_v10 = vadd.f32 %v5811_v25, %v5429_v33  ;;  %v13213_v15 = vpop.permute.xlu0 %5753 }
 0x464   : > { %7167 = vset.pattern.permute.xlu0 %v14422_v54  ;;  %v4592_v34 = vmul.f32 %v4499_v58, %v4396_v18  ;;  %v6753_v58 = vpop.f32.mrf.mxu1  ;;  %v6838_v44 = vpop.f32.mrf.mxu0 }
 0x465   : > { %4578 = vperm.xlu0 %7167, %v13175_v61   ;;  %7150 = vset.pattern.permute.xlu1 %v14410_v35  ;;  %v6754_v43 = vadd.f32 %v6753_v58, %v6752_v55 }
 0x466   : > { %5379 = vperm.xlu1 %7150, %v13085_v62   ;;  %v5638_v62 = vadd.f32 %v6833_v42, %v13040_v9  ;;  %v6840_v51 = vpop.f32.mrf.mxu0 }
 0x467   : > { %v13220_v18 = vpop.permute.xlu0 %4518 }
 0x468   : > { %v4922_v7 = vpop.permute.xlu1 %4921 }
 0x469   : > { %7169 = vset.pattern.permute.xlu0 %v14410_v35  ;;  %v4998_v5 = vmul.f32 %v4922_v7, %v4826_v40  ;;  %v6841_v40 = vpop.f32.mrf.mxu0 }
 0x46a   : > { %5391 = vperm.xlu0 %7169, %v13175_v61   ;;  %7153 = vset.pattern.permute.xlu1 %v14421_v19 }
 0x46b   : > { %v5022_v37 = vadd.f32 %v4998_v5, %v4592_v34  ;;  %4969 = vperm.xlu1 %7153, %v13108_v17   ;;  %v5243_v5 = vadd.f32 %v6754_v43, %v13030_v38  ;;  %v13226_v48 = vpop.permute.xlu0 %5343  ;;  %v6843_v55 = vpop.f32.mrf.mxu0 }
 0x46d   : > { %v5734_v27 = vpop.permute.xlu1 %5733  ;;  %v5428_v45 = vadd.f32 %v5404_v31, %v5022_v37  ;;  %v6842_v31 = vadd.f32 %v6841_v40, %v6840_v51  ;;  %v5240_v37 = vadd.f32 %v6751_v52, %v13030_v38 }
 0x46e   : > { %7171 = vset.pattern.permute.xlu0 %v14411_v13  ;;  %v5810_v0 = vmul.f32 %v5734_v27, %v5638_v62  ;;  %v6839_v62 = vadd.f32 %v6838_v44, %v6837_v28 }
 0x46f   : > { %5801 = vperm.xlu0 %7171, %v13164_v12   ;;  %7155 = vset.pattern.permute.xlu1 %v14411_v13 }
 0x470   : > { %v5834_v20 = vadd.f32 %v5810_v0, %v5428_v45  ;;  %5781 = vperm.xlu1 %7155, %v13108_v17   ;;  %v5649_v0 = vadd.f32 %v6842_v31, %v13040_v9  ;;  %v5646_v26 = vadd.f32 %v6839_v62, %v13040_v9 }
 0x472   : > { %v6440_v29 = vpack.c.bf16 %v5835_v10, %v5834_v20  ;;  %v4514_v21 = vpop.permute.xlu1 %4513  ;;  %v5406_v10 = vmul.f32 %v13194_v36, %v5240_v37 }
 0x473   : > { %v4595_v47 = vmul.f32 %v4514_v21, %v4407_v22  ;;  %v5813_v21 = vmul.f32 %v13184_v60, %v5649_v0  ;;  %v4415_v60 = vadd.f32 %v12766_v8, %v13004_v41 }
 0x474   : > { %6484 = vst [vmem:[%s13062_s21 + $0x18] sm:$0xff] %v6440_v29   ;;  %7156 = vset.pattern.permute.xlu1 %v14422_v54 }
 0x475   : > { %4573 = vperm.xlu1 %7156, %v13127_v14   ;;  %v5025_v42 = vadd.f32 %v5001_v1, %v4595_v47  ;;  %v4845_v47 = vadd.f32 %v12773_v30, %v13011_v39 }
 0x476   : > { %v13218_v46 = vpop.f32.mrf.mxu1 }
 0x477   : > { %v5340_v17 = vpop.permute.xlu1 %5339  ;;  %v5003_v52 = vmul.f32 %v13204_v4, %v4845_v47 }
 0x478   : > { %v6756_v3 = vpop.f32.mrf.mxu1  ;;  %v5407_v27 = vmul.f32 %v5340_v17, %v5243_v5 }
 0x479   : > { %7158 = vset.pattern.permute.xlu1 %v14410_v35  ;;  %v6757_v8 = vadd.f32 %v6756_v3, %v13218_v46  ;;  %v4842_v46 = vadd.f32 %v12760_v50, %v13011_v39 }
 0x47a   : > { %5387 = vperm.xlu1 %7158, %v13127_v14   ;;  %v6758_v34 = vpop.f32.mrf.mxu1  ;;  %v4404_v14 = vadd.f32 %v12725_v49, %v13004_v41  ;;  %v13239_v49 = vpop.permute.xlu0 %4949  ;;  %v5431_v28 = vadd.f32 %v5407_v27, %v5025_v42 }
 0x47c   : > { %v4509_v7 = vpop.permute.xlu1 %4508  ;;  %v6759_v33 = vpop.f32.mrf.mxu1  ;;  %v5837_v36 = vadd.f32 %v5813_v21, %v5431_v28 }
 0x47d   : > { %v4594_v25 = vmul.f32 %v4509_v7, %v4404_v14  ;;  %v6760_v30 = vadd.f32 %v6759_v33, %v6758_v34 }
 0x47e   : > { %7161 = vset.pattern.permute.xlu1 %v14421_v19  ;;  %v13252_v17 = vpop.permute.xlu0 %5761 }
 0x47f   : > { %4977 = vperm.xlu1 %7161, %v13145_v32   ;;  %v5251_v4 = vadd.f32 %v6760_v30, %v13030_v38 }
 0x481   : > { %v4930_v45 = vpop.permute.xlu1 %4929 }
 0x482   : > { %v5000_v63 = vmul.f32 %v4930_v45, %v4834_v23  ;;  %v4529_v23 = vpop.permute.xlu0 %4528  ;;  %v5248_v45 = vadd.f32 %v6757_v8, %v13030_v38 }
 0x483   : > { %7163 = vset.pattern.permute.xlu1 %v14411_v13 }
 0x484   : > { %5789 = vperm.xlu1 %7163, %v13145_v32   ;;  %v5024_v20 = vadd.f32 %v5000_v63, %v4594_v25  ;;  %v6844_v32 = vpop.f32.mrf.mxu0 }
 0x485   : > { %v13241_v59 = vpop.f32.mrf.mxu1 }
 0x486   : > { %v5742_v29 = vpop.permute.xlu1 %5741  ;;  %v5430_v22 = vadd.f32 %v5406_v10, %v5024_v20  ;;  %v5352_v10 = vpop.permute.xlu0 %5351  ;;  %v5408_v20 = vmul.f32 %v13226_v48, %v5248_v45  ;;  %v4423_v48 = vadd.f32 %v12840_v57, %v13004_v41 }
 0x487   : > { %v13244_v1 = vpop.f32.mrf.mxu1  ;;  %v5812_v58 = vmul.f32 %v5742_v29, %v5646_v26 }
 0x488   : > { %7164 = vset.pattern.permute.xlu1 %v14422_v54  ;;  %v6846_v54 = vpop.f32.mrf.mxu0 }
 0x489   : > { %4583 = vperm.xlu1 %7164, %v13164_v12   ;;  %v13250_v44 = vpop.f32.mrf.mxu1  ;;  %v5836_v42 = vadd.f32 %v5812_v58, %v5430_v22 }
 0x48a   : > { %v6847_v37 = vpop.f32.mrf.mxu0  ;;  %v4958_v47 = vpop.permute.xlu0 %4957 }
 0x48b   : > { %v6765_v51 = vpop.f32.mrf.mxu1  ;;  %v6445_v43 = vpack.c.bf16 %v5837_v36, %v5836_v42  ;;  %v4524_v40 = vpop.permute.xlu1 %4523  ;;  %v6848_v34 = vadd.f32 %v6847_v37, %v6846_v54  ;;  %v4853_v42 = vadd.f32 %v12843_v53, %v13011_v39  ;;  %v6763_v53 = vadd.f32 %v13244_v1, %v13241_v59 }
 0x48c   : > { %v4597_v7 = vmul.f32 %v4524_v40, %v4415_v60 }
 0x48d   : > { %7166 = vset.pattern.permute.xlu1 %v14410_v35  ;;  %v13258_v5 = vpop.f32.mrf.mxu1  ;;  %6485 = vst [vmem:[%s13062_s21 + $0x20] sm:$0xff] %v6445_v43   ;;  %v6845_v35 = vadd.f32 %v6844_v32, %v6843_v55  ;;  %v5657_v26 = vadd.f32 %v6848_v34, %v13040_v9  ;;  %v6849_v55 = vpop.f32.mrf.mxu0  ;;  %v5005_v54 = vmul.f32 %v13239_v49, %v4853_v42 }
 0x48e   : > { %5395 = vperm.xlu1 %7166, %v13164_v12   ;;  %v5027_v62 = vadd.f32 %v5003_v52, %v4597_v7  ;;  %v4412_v12 = vadd.f32 %v12757_v16, %v13004_v41  ;;  %v6766_v7 = vadd.f32 %v6765_v51, %v13250_v44  ;;  %v13299_v37 = vpop.permute.xlu0 %5769  ;;  %v5256_v44 = vadd.f32 %v6763_v53, %v13030_v38 }
 0x48f   : > { %v13262_v31 = vpop.f32.mrf.mxu1  ;;  %v5654_v16 = vadd.f32 %v6845_v35, %v13040_v9  ;;  %v4420_v35 = vadd.f32 %v12825_v24, %v13004_v41  ;;  %v4850_v34 = vadd.f32 %v12827_v2, %v13011_v39  ;;  %v4428_v53 = vadd.f32 %v12869_v6, %v13004_v41 }
 0x490   : > { %v5348_v14 = vpop.permute.xlu1 %5347 }
 0x491   : > { %v13265_v27 = vpop.f32.mrf.mxu1  ;;  %v5409_v25 = vmul.f32 %v5348_v14, %v5251_v4  ;;  %v5259_v14 = vadd.f32 %v6766_v7, %v13030_v38  ;;  %v4598_v1 = vmul.f32 %v4529_v23, %v4420_v35 }
 0x492   : > { %7168 = vset.pattern.permute.xlu1 %v14421_v19  ;;  %v4596_v19 = vmul.f32 %v13220_v18, %v4412_v12  ;;  %v5815_v18 = vmul.f32 %v13213_v15, %v5657_v26 }
 0x493   : > { %4985 = vperm.xlu1 %7168, %v13175_v61   ;;  %v13270_v33 = vpop.f32.mrf.mxu1  ;;  %v5433_v29 = vadd.f32 %v5409_v25, %v5027_v62 }
 0x495   : > { %v13277_v3 = vpop.f32.mrf.mxu1  ;;  %v4938_v63 = vpop.permute.xlu1 %4937  ;;  %v5839_v36 = vadd.f32 %v5815_v18, %v5433_v29 }
 0x496   : > { %v5002_v0 = vmul.f32 %v4938_v63, %v4842_v46  ;;  %v4539_v12 = vpop.permute.xlu0 %4538 }
 0x497   : > { %7170 = vset.pattern.permute.xlu1 %v14411_v13  ;;  %v13285_v50 = vpop.f32.mrf.mxu1  ;;  %v6850_v13 = vpop.f32.mrf.mxu0 }
 0x498   : > { %5797 = vperm.xlu1 %7170, %v13175_v61   ;;  %v5026_v28 = vadd.f32 %v5002_v0, %v4596_v19  ;;  %v6851_v4 = vadd.f32 %v6850_v13, %v6849_v55  ;;  %v5410_v0 = vmul.f32 %v5352_v10, %v5256_v44  ;;  %v4861_v13 = vadd.f32 %v12884_v56, %v13011_v39 }
 0x499   : > { %v13288_v32 = vpop.f32.mrf.mxu1  ;;  %v6852_v60 = vpop.f32.mrf.mxu0  ;;  %v4431_v10 = vadd.f32 %v12882_v11, %v13004_v41  ;;  %v6769_v56 = vadd.f32 %v13262_v31, %v13258_v5 }
 0x49a   : > { %v5750_v22 = vpop.permute.xlu1 %5749  ;;  %v5432_v21 = vadd.f32 %v5408_v20, %v5026_v28  ;;  %v5662_v19 = vadd.f32 %v6851_v4, %v13040_v9  ;;  %v5360_v29 = vpop.permute.xlu0 %5359  ;;  %v5007_v42 = vmul.f32 %v4958_v47, %v4861_v13  ;;  %v4600_v4 = vmul.f32 %v4539_v12, %v4428_v53 }
 0x49b   : > { %v5814_v58 = vmul.f32 %v5750_v22, %v5654_v16  ;;  %v13295_v15 = vpop.f32.mrf.mxu1  ;;  %v6853_v62 = vpop.f32.mrf.mxu0 }
 0x49c   : > { %v6854_v49 = vadd.f32 %v6853_v62, %v6852_v60 }
 0x49d   : > { %v5838_v61 = vadd.f32 %v5814_v58, %v5432_v21  ;;  %v13303_v8 = vpop.f32.mrf.mxu1  ;;  %v6855_v63 = vpop.f32.mrf.mxu0 }
 0x49e   : > { %v5665_v25 = vadd.f32 %v6854_v49, %v13040_v9 }
 0x49f   : > { %v6450_v43 = vpack.c.bf16 %v5839_v36, %v5838_v61  ;;  %v4534_v40 = vpop.permute.xlu1 %4533  ;;  %v13309_v51 = vpop.f32.mrf.mxu1 }
 0x4a0   : > { %v4599_v52 = vmul.f32 %v4534_v40, %v4423_v48  ;;  %v5817_v28 = vmul.f32 %v13252_v17, %v5665_v25  ;;  %v6856_v2 = vpop.f32.mrf.mxu0  ;;  %v4966_v60 = vpop.permute.xlu0 %4965  ;;  %v6772_v40 = vadd.f32 %v13270_v33, %v13265_v27  ;;  %v14527_v27 = vld [vmem:[#allocation70_spill] sm:$0xff] }
 0x4a1   : > { %6486 = vst [vmem:[%s13062_s21 + $0x28] sm:$0xff] %v6450_v43   ;;  %v13315_v26 = vpop.f32.mrf.mxu1  ;;  %v6857_v7 = vadd.f32 %v6856_v2, %v6855_v63  ;;  %v4858_v33 = vadd.f32 %v14527_v27, %v13011_v39 }
 0x4a2   : > { %v5029_v30 = vadd.f32 %v5005_v54, %v4599_v52  ;;  %v6858_v58 = vpop.f32.mrf.mxu0  ;;  %v5267_v47 = vadd.f32 %v6772_v40, %v13030_v38 }
 0x4a3   : > { %v13318_v23 = vpop.f32.mrf.mxu1 }
 0x4a4   : > { %v5356_v57 = vpop.permute.xlu1 %5355  ;;  %v6859_v54 = vpop.f32.mrf.mxu0 }
 0x4a5   : > { %v5411_v45 = vmul.f32 %v5356_v57, %v5259_v14  ;;  %v13324_v48 = vpop.f32.mrf.mxu1  ;;  %v13333_v62 = vpop.permute.xlu0 %5777  ;;  %v5264_v57 = vadd.f32 %v6769_v56, %v13030_v38  ;;  %v14530_v56 = vld [vmem:[#allocation38_spill] sm:$0xff] }
 0x4a6   : > { %v6861_v49 = vpop.f32.mrf.mxu0 }
 0x4a7   : > { %v5435_v55 = vadd.f32 %v5411_v45, %v5029_v30  ;;  %v13331_v52 = vpop.f32.mrf.mxu1  ;;  %v6860_v30 = vadd.f32 %v6859_v54, %v6858_v58  ;;  %v5412_v45 = vmul.f32 %v5360_v29, %v5264_v57  ;;  %v14529_v29 = vld [vmem:[#allocation39_spill] sm:$0xff] }
 0x4a8   : > { %v6862_v25 = vpop.f32.mrf.mxu0 }
 0x4a9   : > { %v4946_v59 = vpop.permute.xlu1 %4945  ;;  %v5841_v21 = vadd.f32 %v5817_v28, %v5435_v55  ;;  %v13339_v14 = vpop.f32.mrf.mxu1  ;;  %v5673_v44 = vadd.f32 %v6860_v30, %v13040_v9  ;;  %v14528_v28 = vld [vmem:[#allocation72_spill] sm:$0xff]  ;;  %v6863_v30 = vadd.f32 %v6862_v25, %v6861_v49 }
 0x4aa   : > { %v5004_v46 = vmul.f32 %v4946_v59, %v4850_v34  ;;  %v5670_v34 = vadd.f32 %v6857_v7, %v13040_v9  ;;  %v4869_v2 = vadd.f32 %v14528_v28, %v13011_v39 }
 0x4ab   : > { %v13345_v59 = vpop.f32.mrf.mxu1 }
 0x4ac   : > { %v5028_v24 = vadd.f32 %v5004_v46, %v4598_v1  ;;  %v4549_v1 = vpop.permute.xlu0 %4548 }
 0x4ad   : > { %v13348_v12 = vpop.f32.mrf.mxu1 }
 0x4ae   : > { %v5434_v20 = vadd.f32 %v5410_v0, %v5028_v24  ;;  %v5819_v0 = vmul.f32 %v13299_v37, %v5673_v44  ;;  %v5678_v44 = vadd.f32 %v6863_v30, %v13040_v9 }
 0x4af   : > { %v5758_v16 = vpop.permute.xlu1 %5757  ;;  %v13354_v58 = vpop.f32.mrf.mxu1 }
 0x4b0   : > { %v5816_v22 = vmul.f32 %v5758_v16, %v5662_v19 }
 0x4b1   : > { %v13361_v39 = vpop.f32.mrf.mxu1 }
 0x4b2   : > { %v5840_v18 = vadd.f32 %v5816_v22, %v5434_v20  ;;  %v6864_v20 = vpop.f32.mrf.mxu0  ;;  %v4439_v22 = vadd.f32 %v14529_v29, %v13004_v41 }
 0x4b4   : > { %v6455_v36 = vpack.c.bf16 %v5841_v21, %v5840_v18  ;;  %v4544_v61 = vpop.permute.xlu1 %4543  ;;  %v5368_v21 = vpop.permute.xlu0 %5367 }
 0x4b5   : > { %v4601_v17 = vmul.f32 %v4544_v61, %v4431_v10  ;;  %v5009_v10 = vmul.f32 %v4966_v60, %v4869_v2  ;;  %v6778_v61 = vadd.f32 %v13295_v15, %v13288_v32  ;;  %v13367_v60 = vld [vmem:[%s13455_s6] ss:$0 sm:$0xff]  ;;  %v13371_v32 = vpop.f32.mrf.mxu1 }
 0x4b6   : > { %6487 = vst [vmem:[%s13062_s21 + $0x30] sm:$0xff] %v6455_v36  }
 0x4b7   : > { %v5031_v43 = vadd.f32 %v5007_v42, %v4601_v17  ;;  %v6865_v42 = vpop.f32.mrf.mxu0  ;;  %v6775_v17 = vadd.f32 %v13285_v50, %v13277_v3  ;;  %v5275_v54 = vadd.f32 %v6778_v61, %v13030_v38  ;;  %v13377_v3 = vld [vmem:[%s13455_s6 + $0x1] ss:$0 sm:$0xff]  ;;  %v14531_v50 = vld [vmem:[#allocation64_spill] sm:$0xff] }
 0x4b8   : > { %v4974_v41 = vpop.permute.xlu0 %4973  ;;  %v6866_v40 = vadd.f32 %v6865_v42, %v6864_v20  ;;  %v4866_v7 = vadd.f32 %v13377_v3, %v14531_v50  ;;  %v14534_v61 = vld [vmem:[#allocation34_spill] sm:$0xff] }
 0x4b9   : > { %v5364_v11 = vpop.permute.xlu1 %5363  ;;  %v5272_v15 = vadd.f32 %v6775_v17, %v13030_v38  ;;  %v4444_v42 = vadd.f32 %v13367_v60, %v14534_v61 }
 0x4ba   : > { %v5413_v5 = vmul.f32 %v5364_v11, %v5267_v47  ;;  %v4436_v11 = vadd.f32 %v13367_v60, %v14530_v56  ;;  %v13407_v56 = vld [vmem:[%s13455_s6 + $0x3] ss:$0 sm:$0xff] }
 0x4bc   : > { %v5437_v46 = vadd.f32 %v5413_v5, %v5031_v43  ;;  %v4602_v57 = vmul.f32 %v4549_v1, %v4436_v11  ;;  %v5786_v5 = vpop.permute.xlu0 %5785 }
 0x4be   : > { %v4954_v31 = vpop.permute.xlu1 %4953  ;;  %v5843_v55 = vadd.f32 %v5819_v0, %v5437_v46 }
 0x4bf   : > { %v5006_v35 = vmul.f32 %v4954_v31, %v4858_v33  ;;  %v5681_v33 = vadd.f32 %v6866_v40, %v13040_v9  ;;  %v6867_v31 = vpop.f32.mrf.mxu1 }
 0x4c0   : > { %v4559_v25 = vpop.permute.xlu0 %4558 }
 0x4c1   : > { %v5030_v6 = vadd.f32 %v5006_v35, %v4600_v4  ;;  %v5414_v4 = vmul.f32 %v5368_v21, %v5272_v15  ;;  %v6868_v49 = vpop.f32.mrf.mxu1  ;;  %v6781_v21 = vadd.f32 %v13309_v51, %v13303_v8 }
 0x4c3   : > { %v5766_v63 = vpop.permute.xlu1 %5765  ;;  %v5436_v19 = vadd.f32 %v5412_v45, %v5030_v6  ;;  %v5821_v6 = vmul.f32 %v13333_v62, %v5681_v33  ;;  %v6870_v28 = vpop.f32.mrf.mxu1  ;;  %v6784_v62 = vadd.f32 %v13318_v23, %v13315_v26  ;;  %v14535_v26 = vld [vmem:[#allocation26_spill] sm:$0xff] }
 0x4c4   : > { %v5818_v24 = vmul.f32 %v5766_v63, %v5670_v34  ;;  %v4874_v23 = vadd.f32 %v13377_v3, %v14535_v26 }
 0x4c6   : > { %v5842_v16 = vadd.f32 %v5818_v24, %v5436_v19  ;;  %v14532_v19 = vld [vmem:[#allocation21_spill] sm:$0xff]  ;;  %v14533_v24 = vld [vmem:[#allocation3_spill] sm:$0xff] }
 0x4c7   : > { %v4877_v0 = vadd.f32 %v13377_v3, %v14532_v19 }
 0x4c8   : > { %v6460_v18 = vpack.c.bf16 %v5843_v55, %v5842_v16  ;;  %v4554_v13 = vpop.permute.xlu1 %4553  ;;  %v4447_v55 = vadd.f32 %v13367_v60, %v14533_v24 }
 0x4c9   : > { %v4603_v36 = vmul.f32 %v4554_v13, %v4439_v22  ;;  %v5011_v9 = vmul.f32 %v4974_v41, %v4877_v0  ;;  %v5376_v22 = vpop.permute.xlu0 %5375  ;;  %v4604_v41 = vmul.f32 %v4559_v25, %v4444_v42 }
 0x4ca   : > { %6488 = vst [vmem:[%s13062_s21 + $0x38] sm:$0xff] %v6460_v18   ;;  %v6871_v18 = vpop.f32.mrf.mxu1 }
 0x4cb   : > { %v5033_v37 = vadd.f32 %v5009_v10, %v4603_v36  ;;  %v6872_v10 = vadd.f32 %v6871_v18, %v6870_v28  ;;  %v13396_v36 = vld [vmem:[%s13455_s6 + $0x2] ss:$0 sm:$0xff] }
 0x4cc   : > { %v5280_v17 = vadd.f32 %v13396_v36, %v6781_v21  ;;  %v6873_v15 = vpop.f32.mrf.mxu1 }
 0x4cd   : > { %v5372_v43 = vpop.permute.xlu1 %5371  ;;  %v4982_v40 = vpop.permute.xlu0 %4981  ;;  %v5689_v11 = vadd.f32 %v13407_v56, %v6872_v10 }
 0x4ce   : > { %v5415_v47 = vmul.f32 %v5372_v43, %v5275_v54  ;;  %v6869_v43 = vadd.f32 %v6868_v49, %v6867_v31  ;;  %v5416_v50 = vmul.f32 %v5376_v22, %v5280_v17  ;;  %v6874_v31 = vpop.f32.mrf.mxu1 }
 0x4cf   : > { %v6875_v21 = vadd.f32 %v6874_v31, %v6873_v15 }
 0x4d0   : > { %v5439_v38 = vadd.f32 %v5415_v47, %v5033_v37  ;;  %v5283_v37 = vadd.f32 %v13396_v36, %v6784_v62  ;;  %v5686_v47 = vadd.f32 %v13407_v56, %v6869_v43  ;;  %v6876_v25 = vpop.f32.mrf.mxu1  ;;  %v14539_v62 = vld [vmem:[#allocation52_spill] sm:$0xff] }
 0x4d1   : > { %v4882_v22 = vadd.f32 %v13377_v3, %v14539_v62  ;;  %v5694_v17 = vadd.f32 %v13407_v56, %v6875_v21 }
 0x4d2   : > { %v4962_v53 = vpop.permute.xlu1 %4961  ;;  %v5845_v63 = vadd.f32 %v5821_v6, %v5439_v38  ;;  %v6877_v24 = vpop.f32.mrf.mxu1 }
 0x4d3   : > { %v5008_v27 = vmul.f32 %v4962_v53, %v4866_v7 }
 0x4d5   : > { %v5032_v35 = vadd.f32 %v5008_v27, %v4602_v57  ;;  %v5823_v27 = vmul.f32 %v5786_v5, %v5689_v11  ;;  %v6790_v5 = vadd.f32 %v13345_v59, %v13339_v14  ;;  %v14540_v11 = vld [vmem:[#allocation79_spill] sm:$0xff] }
 0x4d6   : > { %v4893_v15 = vadd.f32 %v13377_v3, %v14540_v11 }
 0x4d7   : > { %v5774_v34 = vpop.permute.xlu1 %5773  ;;  %v5438_v45 = vadd.f32 %v5414_v4, %v5032_v35  ;;  %v5794_v4 = vpop.permute.xlu0 %5793  ;;  %v5291_v28 = vadd.f32 %v13396_v36, %v6790_v5 }
 0x4d8   : > { %v5820_v46 = vmul.f32 %v5774_v34, %v5678_v44  ;;  %v14536_v44 = vld [vmem:[#allocation13_spill] sm:$0xff] }
 0x4d9   : > { %v4885_v34 = vadd.f32 %v13377_v3, %v14536_v44  ;;  %v6793_v44 = vadd.f32 %v13354_v58, %v13348_v12 }
 0x4da   : > { %v5844_v1 = vadd.f32 %v5820_v46, %v5438_v45  ;;  %v14537_v45 = vld [vmem:[#allocation31_spill] sm:$0xff] }
 0x4db   : > { %v4455_v6 = vadd.f32 %v13367_v60, %v14537_v45  ;;  %v4569_v19 = vpop.permute.xlu0 %4568 }
 0x4dc   : > { %v6465_v16 = vpack.c.bf16 %v5845_v63, %v5844_v1  ;;  %v4564_v20 = vpop.permute.xlu1 %4563  ;;  %v5013_v63 = vmul.f32 %v4982_v40, %v4885_v34 }
 0x4dd   : > { %v4605_v2 = vmul.f32 %v4564_v20, %v4447_v55  ;;  %v6878_v20 = vadd.f32 %v6877_v24, %v6876_v25  ;;  %v14543_v25 = vld [vmem:[#allocation95_spill] sm:$0xff] }
 0x4de   : > { %6489 = vst [vmem:[%s13062_s21 + $0x40] sm:$0xff] %v6465_v16   ;;  %v6787_v16 = vadd.f32 %v13331_v52, %v13324_v48  ;;  %v6879_v52 = vpop.f32.mrf.mxu1 }
 0x4df   : > { %v5035_v29 = vadd.f32 %v5011_v9, %v4605_v2  ;;  %v14538_v9 = vld [vmem:[#allocation15_spill] sm:$0xff] }
 0x4e0   : > { %v4452_v2 = vadd.f32 %v13367_v60, %v14538_v9  ;;  %v5288_v14 = vadd.f32 %v13396_v36, %v6787_v16 }
 0x4e1   : > { %v5380_v13 = vpop.permute.xlu1 %5379 }
 0x4e2   : > { %v5417_v8 = vmul.f32 %v5380_v13, %v5283_v37  ;;  %v4606_v10 = vmul.f32 %v4569_v19, %v4452_v2  ;;  %v5697_v37 = vadd.f32 %v13407_v56, %v6878_v20 }
 0x4e4   : > { %v5441_v30 = vadd.f32 %v5417_v8, %v5035_v29  ;;  %v5384_v29 = vpop.permute.xlu0 %5383  ;;  %v5825_v8 = vmul.f32 %v5794_v4, %v5697_v37  ;;  %v6796_v4 = vadd.f32 %v13371_v32, %v13361_v39  ;;  %v5296_v39 = vadd.f32 %v13396_v36, %v6793_v44 }
 0x4e5   : > { %v5418_v48 = vmul.f32 %v5384_v29, %v5288_v14 }
 0x4e6   : > { %v4970_v51 = vpop.permute.xlu1 %4969  ;;  %v5847_v35 = vadd.f32 %v5823_v27, %v5441_v30 }
 0x4e7   : > { %v5010_v54 = vmul.f32 %v4970_v51, %v4874_v23 }
 0x4e8   : > { %v4990_v26 = vpop.permute.xlu0 %4989 }
 0x4e9   : > { %v5034_v7 = vadd.f32 %v5010_v54, %v4604_v41  ;;  %v6880_v41 = vpop.f32.mrf.mxu1 }
 0x4eb   : > { %v5782_v53 = vpop.permute.xlu1 %5781  ;;  %v5440_v57 = vadd.f32 %v5416_v50, %v5034_v7  ;;  %v14541_v50 = vld [vmem:[#allocation60_spill] sm:$0xff]  ;;  %v6882_v27 = vpop.f32.mrf.mxu1 }
 0x4ec   : > { %v5822_v33 = vmul.f32 %v5782_v53, %v5686_v47  ;;  %v4463_v7 = vadd.f32 %v13367_v60, %v14541_v50  ;;  %v5015_v53 = vmul.f32 %v4990_v26, %v4893_v15 }
 0x4ee   : > { %v5846_v38 = vadd.f32 %v5822_v33, %v5440_v57  ;;  %v4579_v57 = vpop.permute.xlu0 %4578 }
 0x4f0   : > { %v6470_v46 = vpack.c.bf16 %v5847_v35, %v5846_v38  ;;  %v4574_v49 = vpop.permute.xlu1 %4573  ;;  %v6883_v35 = vpop.f32.mrf.mxu1 }
 0x4f1   : > { %v4607_v1 = vmul.f32 %v4574_v49, %v4455_v6  ;;  %v6884_v45 = vadd.f32 %v6883_v35, %v6882_v27  ;;  %v5299_v6 = vadd.f32 %v13396_v36, %v6796_v4 }
 0x4f2   : > { %6490 = vst [vmem:[%s13062_s21 + $0x48] sm:$0xff] %v6470_v46   ;;  %v5392_v34 = vpop.permute.xlu0 %5391  ;;  %v14542_v46 = vld [vmem:[#allocation61_spill] sm:$0xff] }
 0x4f3   : > { %v5037_v0 = vadd.f32 %v5013_v63, %v4607_v1  ;;  %v4460_v49 = vadd.f32 %v13367_v60, %v14542_v46  ;;  %v4890_v63 = vadd.f32 %v13377_v3, %v14543_v25  ;;  %v6881_v1 = vadd.f32 %v6880_v41, %v6879_v52 }
 0x4f4   : > { %v5705_v12 = vadd.f32 %v13407_v56, %v6884_v45  ;;  %v5420_v58 = vmul.f32 %v5392_v34, %v5296_v39 }
 0x4f5   : > { %v5388_v55 = vpop.permute.xlu1 %5387  ;;  %v4608_v5 = vmul.f32 %v4579_v57, %v4460_v49  ;;  %v5702_v20 = vadd.f32 %v13407_v56, %v6881_v1 }
 0x4f6   : > { %v5419_v18 = vmul.f32 %v5388_v55, %v5291_v28  ;;  %v5802_v24 = vpop.permute.xlu0 %5801 }
 0x4f7   : > { %v5827_v9 = vmul.f32 %v5802_v24, %v5705_v12 }
 0x4f8   : > { %v5443_v42 = vadd.f32 %v5419_v18, %v5037_v0 }
 0x4fa   : > { %v4978_v13 = vpop.permute.xlu1 %4977  ;;  %v5849_v40 = vadd.f32 %v5825_v8, %v5443_v42 }
 0x4fb   : > { %v5012_v59 = vmul.f32 %v4978_v13, %v4882_v22 }
 0x4fd   : > { %v5036_v61 = vadd.f32 %v5012_v59, %v4606_v10 }
 0x4ff   : > { %v5790_v23 = vpop.permute.xlu1 %5789  ;;  %v5442_v43 = vadd.f32 %v5418_v48, %v5036_v61 }
 0x500   : > { %v5824_v51 = vmul.f32 %v5790_v23, %v5694_v17 }
 0x502   : > { %v5848_v54 = vadd.f32 %v5824_v51, %v5442_v43 }
 0x504   : > { %v6475_v30 = vpack.c.bf16 %v5849_v40, %v5848_v54  ;;  %v4584_v47 = vpop.permute.xlu1 %4583 }
 0x505   : > { %v4609_v33 = vmul.f32 %v4584_v47, %v4463_v7 }
 0x506   : > { %6491 = vst [vmem:[%s13062_s21 + $0x50] sm:$0xff] %v6475_v30  }
 0x507   : > { %v5039_v31 = vadd.f32 %v5015_v53, %v4609_v33 }
 0x509   : > { %v5396_v38 = vpop.permute.xlu1 %5395 }
 0x50a   : > { %v5421_v19 = vmul.f32 %v5396_v38, %v5299_v6 }
 0x50c   : > { %v5445_v16 = vadd.f32 %v5421_v19, %v5039_v31 }
 0x50e   : > { %v4986_v0 = vpop.permute.xlu1 %4985  ;;  %v5851_v2 = vadd.f32 %v5827_v9, %v5445_v16 }
 0x50f   : > { %v5014_v32 = vmul.f32 %v4986_v0, %v4890_v63 }
 0x511   : > { %v5038_v55 = vadd.f32 %v5014_v32, %v4608_v5 }
 0x513   : > { %v5798_v60 = vpop.permute.xlu1 %5797  ;;  %v5444_v28 = vadd.f32 %v5420_v58, %v5038_v55 }
 0x514   : > { %v5826_v3 = vmul.f32 %v5798_v60, %v5702_v20 }
 0x516   : > { %v5850_v29 = vadd.f32 %v5826_v3, %v5444_v28 }
 0x518   : > { %v6480_v62 = vpack.c.bf16 %v5851_v2, %v5850_v29 }
 0x51a   : > { %6492 = vst [vmem:[%s13062_s21 + $0x58] sm:$0xff] %v6480_v62  }
 0x51b PF: > { %s17_s24 = sadd.s32 1, %s7573_s24  }
 0x51c   : > { %p14_p4 = scmp.ge.s32.totalorder %s17_s24, 4  }
 0x51e   :  { %16 = sbr.rel (!%p14_p4) target bundleno = 1 (0x1), region = 78 }

</bundles_post_ra>
